<compile_context>
chip_gen: v7x
topology: tpu7x:2x2x1
jax: 0.10.0
libtpu: 0.0.40
codegen_flags: <defaults>
</compile_context>

<pallas_src>
import jax
import jax.numpy as jnp
from jax.experimental import pallas as pl
from jax.experimental.pallas import tpu as pltpu

BN_EPS = 1e-5
# Row tile for the flattened (N*H*W, C) matmuls. 512-1024 is the production sweet spot;
# 256 here so the toy 16x16 level still exercises a multi-tile grid (and the cross-tile
# BN statistics path).
TILE_M_TARGET = 256
# Explicit scoped-VMEM budget: safe default on v5e/v6e/v7x; tiles sized so double-buffered
# bf16 cols + weights + f32 out stay well under it.
VMEM_LIMIT_BYTES = 32 * 1024 * 1024


def _compiler_params(semantics):
    return pltpu.CompilerParams(dimension_semantics=semantics,
                                vmem_limit_bytes=VMEM_LIMIT_BYTES)


def _choose_tile_m(m, target=TILE_M_TARGET):
    """Largest tile <= target that divides m and is a multiple of 8 (else m itself)."""
    if m <= target:
        return m
    t = target - (target % 8)
    while t >= 8:
        if m % t == 0:
            return t
        t -= 8
    return m


def _choose_tile_h(h, w, c, pool, budget=4 << 20):
    """Row tile for the (N, H, W, C) elementwise kernels; stays even when pooling."""
    th = h
    min_th = 2 if pool else 1
    while th > min_th and th % 2 == 0 and th * w * c * 4 > budget:
        th //= 2
    return th


# ----------------------------- Pallas kernels -----------------------------

def _make_conv_stats_kernel(n_in):
    """3x3 conv as K-split im2col matmuls (bf16 in, f32 acc) + per-tile BN partial stats.

    refs: cols_0..cols_{n-1}, w_0..w_{n-1}, out_ref (raw conv, f32), stats_ref (1, 2, C).
    """
    def kernel(*refs):
        cols = refs[:n_in]
        ws = refs[n_in:2 * n_in]
        out_ref, stats_ref = refs[2 * n_in], refs[2 * n_in + 1]
        acc = jnp.dot(cols[0][...], ws[0][...], preferred_element_type=jnp.float32)
        for i in range(1, n_in):
            acc = acc + jnp.dot(cols[i][...], ws[i][...],
                                preferred_element_type=jnp.float32)
        out_ref[...] = acc
        s = jnp.sum(acc, axis=0, keepdims=True)
        ss = jnp.sum(acc * acc, axis=0, keepdims=True)
        stats_ref[...] = jnp.concatenate([s, ss], axis=0)[None, :, :]
    return kernel


def _bn_relu_kernel(y_ref, scale_ref, shift_ref, o_ref):
    """Per-channel affine (folded BN) + ReLU on a (1, TH, W, C) tile."""
    scale = scale_ref[...].reshape(1, 1, 1, -1)
    shift = shift_ref[...].reshape(1, 1, 1, -1)
    a = jnp.maximum(y_ref[...] * scale + shift, 0.0)
    o_ref[...] = a.astype(o_ref.dtype)


def _bn_relu_pool_kernel(y_ref, scale_ref, shift_ref, o_ref, p_ref, z_ref):
    """BN affine + ReLU, writing both the full-res activation (skip) and its 2x2 maxpool."""
    scale = scale_ref[...].reshape(1, 1, 1, -1)
    shift = shift_ref[...].reshape(1, 1, 1, -1)
    a = jnp.maximum(y_ref[...] * scale + shift, 0.0)       # (1, th, W, C) f32
    o_ref[...] = a.astype(o_ref.dtype)
    _, th, w, c = a.shape
    # H-direction max: leading-dim regroup (free) + reduce over the pair axis.
    z_ref[...] = jnp.max(a.reshape(th // 2, 2, w, c), axis=1)
    # W-direction max: strided sublane reads from the VMEM scratch.
    p0 = z_ref[:, pl.ds(0, w // 2, stride=2), :]
    p1 = z_ref[:, pl.ds(1, w // 2, stride=2), :]
    p_ref[...] = jnp.maximum(p0, p1).reshape(1, th // 2, w // 2, c).astype(p_ref.dtype)


def _matmul_bias_kernel(x_ref, w_ref, b_ref, o_ref):
    """ConvTranspose2d(k=2, s=2): per-pixel matmul producing all 4 sub-pixel taps."""
    o_ref[...] = (jnp.dot(x_ref[...], w_ref[...], preferred_element_type=jnp.float32)
                  + b_ref[...])


def _matmul_bias_sigmoid_kernel(x_ref, w_ref, b_ref, o_ref):
    """Final 1x1 conv + sigmoid."""
    y = (jnp.dot(x_ref[...], w_ref[...], preferred_element_type=jnp.float32)
         + b_ref[...])
    o_ref[...] = jax.nn.sigmoid(y)


# ----------------------------- layer wrappers ------------------------------

def _bn_relu_apply(y, scale, shift, pool):
    """Apply folded-BN affine + ReLU (optionally fused 2x2 maxpool) over (N, H, W, C)."""
    N, H, W, C = y.shape
    th = _choose_tile_h(H, W, C, pool)
    grid = (N, H // th)
    act_spec = pl.BlockSpec((1, th, W, C), lambda n, h: (n, h, 0, 0))
    vec_spec = pl.BlockSpec((1, C), lambda n, h: (0, 0))
    scale2 = scale.reshape(1, C).astype(jnp.float32)
    shift2 = shift.reshape(1, C).astype(jnp.float32)

    if not pool:
        return pl.pallas_call(
            _bn_relu_kernel,
            grid=grid,
            in_specs=[act_spec, vec_spec, vec_spec],
            out_specs=act_spec,
            out_shape=jax.ShapeDtypeStruct((N, H, W, C), jnp.bfloat16),
            compiler_params=_compiler_params(("parallel", "parallel")),
        )(y, scale2, shift2)

    pool_spec = pl.BlockSpec((1, th // 2, W // 2, C), lambda n, h: (n, h, 0, 0))
    return pl.pallas_call(
        _bn_relu_pool_kernel,
        grid=grid,
        in_specs=[act_spec, vec_spec, vec_spec],
        out_specs=[act_spec, pool_spec],
        out_shape=[jax.ShapeDtypeStruct((N, H, W, C), jnp.bfloat16),
                   jax.ShapeDtypeStruct((N, H // 2, W // 2, C), jnp.bfloat16)],
        scratch_shapes=[pltpu.VMEM((th // 2, W, C), jnp.float32)],
        compiler_params=_compiler_params(("parallel", "parallel")),
    )(y, scale2, shift2)


def conv3x3_bn_relu(inputs, weights, gamma, beta, pool=False):
    """3x3 conv (stride 1, pad 1, no bias) over channel-concat(inputs) + BN + ReLU.

    inputs:  list of NHWC bf16 activations sharing (N, H, W); the conv acts on their
             channel concatenation, realized as K-split matmuls (no concat in HBM).
    weights: list of (3, 3, Ci, Cout) f32 slices matching `inputs`.
    Returns the NHWC bf16 activation; if pool=True also the 2x2-maxpooled activation.
    """
    N, H, W, _ = inputs[0].shape
    Cout = weights[0].shape[-1]
    M = N * H * W

    cols_list, w_list, k_list = [], [], []
    for x, w in zip(inputs, weights):
        ci = x.shape[-1]
        xp = jnp.pad(x, ((0, 0), (1, 1), (1, 1), (0, 0)))
        # im2col (glue), tap order (dy, dx, ci) matching the weight flatten below.
        cols = jnp.concatenate(
            [xp[:, dy:dy + H, dx:dx + W, :] for dy in range(3) for dx in range(3)],
            axis=-1).reshape(M, 9 * ci)
        cols_list.append(cols.astype(jnp.bfloat16))
        w_list.append(w.reshape(9 * ci, Cout).astype(jnp.bfloat16))
        k_list.append(9 * ci)

    tile_m = _choose_tile_m(M)
    n_tiles = M // tile_m
    n_in = len(inputs)

    flops = 2 * M * sum(k_list) * Cout + 3 * M * Cout
    bytes_accessed = (sum(M * k * 2 for k in k_list)
                      + sum(k * Cout * 2 for k in k_list)
                      + M * Cout * 4 + n_tiles * 2 * Cout * 4)

    raw, partial = pl.pallas_call(
        _make_conv_stats_kernel(n_in),
        grid=(n_tiles,),
        in_specs=([pl.BlockSpec((tile_m, k), lambda i: (i, 0)) for k in k_list]
                  + [pl.BlockSpec((k, Cout), lambda i: (0, 0)) for k in k_list]),
        out_specs=[pl.BlockSpec((tile_m, Cout), lambda i: (i, 0)),
                   pl.BlockSpec((1, 2, Cout), lambda i: (i, 0, 0))],
        out_shape=[jax.ShapeDtypeStruct((M, Cout), jnp.float32),
                   jax.ShapeDtypeStruct((n_tiles, 2, Cout), jnp.float32)],
        compiler_params=_compiler_params(("parallel",)),
        cost_estimate=pl.CostEstimate(flops=flops, transcendentals=0,
                                      bytes_accessed=bytes_accessed),
    )(*cols_list, *w_list)

    # Cross-tile BN statistics (training-mode batch stats, biased variance, like PyTorch).
    # NOTE: f32 sum/sumsq is accurate at these magnitudes; switch to a two-pass / Welford
    # combine if E[x^2]-E[x]^2 cancellation ever matters at very large N*H*W.
    stats = jnp.sum(partial, axis=0)
    mean = stats[0] / M
    var = jnp.maximum(stats[1] / M - mean * mean, 0.0)
    scale = gamma * jax.lax.rsqrt(var + BN_EPS)
    shift = beta - mean * scale

    return _bn_relu_apply(raw.reshape(N, H, W, Cout), scale, shift, pool)


def conv_transpose2x2(x, w, bias):
    """ConvTranspose2d(Cin, Cout, kernel_size=2, stride=2).

    x: NHWC bf16; w: PyTorch layout (Cin, Cout, 2, 2) f32; bias: (Cout,) f32.
    Each tile does one lane-dense (TILE_M, 4*Cout) matmul producing all 4 sub-pixel taps
    (kept lane-dense through the store); the spatial interleave to (2H, 2W) is a cheap
    layout pass in XLA afterwards.
    """
    N, H, W, Cin = x.shape
    Cout = w.shape[1]
    M = N * H * W
    w_flat = jnp.transpose(w, (0, 2, 3, 1)).reshape(Cin, 4 * Cout).astype(jnp.bfloat16)
    b_flat = jnp.tile(bias, 4).reshape(1, 4 * Cout).astype(jnp.float32)
    tile_m = _choose_tile_m(M)
    n_tiles = M // tile_m
    out = pl.pallas_call(
        _matmul_bias_kernel,
        grid=(n_tiles,),
        in_specs=[pl.BlockSpec((tile_m, Cin), lambda i: (i, 0)),
                  pl.BlockSpec((Cin, 4 * Cout), lambda i: (0, 0)),
                  pl.BlockSpec((1, 4 * Cout), lambda i: (0, 0))],
        out_specs=pl.BlockSpec((tile_m, 4 * Cout), lambda i: (i, 0)),
        out_shape=jax.ShapeDtypeStruct((M, 4 * Cout), jnp.float32),
        compiler_params=_compiler_params(("parallel",)),
        cost_estimate=pl.CostEstimate(
            flops=2 * M * Cin * 4 * Cout, transcendentals=0,
            bytes_accessed=M * Cin * 2 + Cin * 4 * Cout * 2 + M * 4 * Cout * 4),
    )(x.reshape(M, Cin), w_flat, b_flat)
    out = out.reshape(N, H, W, 2, 2, Cout)
    out = jnp.transpose(out, (0, 1, 3, 2, 4, 5)).reshape(N, 2 * H, 2 * W, Cout)
    return out.astype(jnp.bfloat16)


def conv1x1_sigmoid(x, w, bias):
    """Final 1x1 conv + sigmoid. w: (Cin, Cout) f32; bias: (Cout,) f32."""
    N, H, W, Cin = x.shape
    Cout = w.shape[-1]
    M = N * H * W
    tile_m = _choose_tile_m(M)
    n_tiles = M // tile_m
    # TODO(synk): Cout=1 output is lane-sparse (masked stores); pad channels for real configs.
    out = pl.pallas_call(
        _matmul_bias_sigmoid_kernel,
        grid=(n_tiles,),
        in_specs=[pl.BlockSpec((tile_m, Cin), lambda i: (i, 0)),
                  pl.BlockSpec((Cin, Cout), lambda i: (0, 0)),
                  pl.BlockSpec((1, Cout), lambda i: (0, 0))],
        out_specs=pl.BlockSpec((tile_m, Cout), lambda i: (i, 0)),
        out_shape=jax.ShapeDtypeStruct((M, Cout), jnp.float32),
        compiler_params=_compiler_params(("parallel",)),
    )(x.reshape(M, Cin).astype(jnp.float32), w.astype(jnp.float32),
      bias.reshape(1, Cout).astype(jnp.float32))
    return out.reshape(N, H, W, Cout)


def double_conv_apply(inputs, p, pool=False):
    """DoubleConv over channel-concat(inputs); pool=True also returns MaxPool2d(2,2)(out)."""
    if len(inputs) == 1:
        w1_parts = [p["w1"]]
    else:
        w1_parts, off = [], 0
        for x in inputs:
            c = x.shape[-1]
            w1_parts.append(p["w1"][:, :, off:off + c, :])
            off += c
    h = conv3x3_bn_relu(inputs, w1_parts, p["g1"], p["b1"], pool=False)
    return conv3x3_bn_relu([h], [p["w2"]], p["g2"], p["b2"], pool=pool)


# ----------------------------- parameters ----------------------------------

def init_double_conv(key, cin, cout):
    k1, k2 = jax.random.split(key)
    return {
        "w1": jax.random.normal(k1, (3, 3, cin, cout), jnp.float32)
              * jnp.sqrt(2.0 / (9 * cin)),
        "g1": jnp.ones((cout,), jnp.float32),
        "b1": jnp.zeros((cout,), jnp.float32),
        "w2": jax.random.normal(k2, (3, 3, cout, cout), jnp.float32)
              * jnp.sqrt(2.0 / (9 * cout)),
        "g2": jnp.ones((cout,), jnp.float32),
        "b2": jnp.zeros((cout,), jnp.float32),
    }


def init_unet(key, in_channels, out_channels, features):
    keys = jax.random.split(key, 4 * len(features) + 4)
    ki = iter(range(len(keys)))
    params = {"downs": [], "ups": []}
    cin = in_channels
    for f in features:
        params["downs"].append(init_double_conv(keys[next(ki)], cin, f))
        cin = f
    params["left_over"] = init_double_conv(keys[next(ki)], features[-1],
                                           features[-1] * 2)
    for f in reversed(features):
        kt, kb = jax.random.split(keys[next(ki)])
        bound = 1.0 / jnp.sqrt(f * 2 * 4.0)
        params["ups"].append({
            # ConvTranspose2d(f*2, f, kernel_size=2, stride=2), PyTorch weight layout
            "tw": jax.random.uniform(kt, (f * 2, f, 2, 2), jnp.float32, -bound, bound),
            "tb": jax.random.uniform(kb, (f,), jnp.float32, -bound, bound),
            "dconv": init_double_conv(keys[next(ki)], f * 2, f),
        })
    kf, kfb = jax.random.split(keys[next(ki)])
    fbound = 1.0 / jnp.sqrt(float(features[0]))
    params["final_w"] = jax.random.uniform(kf, (features[0], out_channels),
                                           jnp.float32, -fbound, fbound)
    params["final_b"] = jax.random.uniform(kfb, (out_channels,), jnp.float32,
                                           -fbound, fbound)
    return params


# ----------------------------- forward --------------------------------------

def unet_apply(params, x_nchw):
    x = jnp.transpose(x_nchw, (0, 2, 3, 1)).astype(jnp.bfloat16)   # NCHW -> NHWC, bf16 MXU
    skips = []
    for p in params["downs"]:
        act, x = double_conv_apply([x], p, pool=True)   # conv+BN+ReLU with fused maxpool
        skips.append(act)
    x = double_conv_apply([x], params["left_over"], pool=False)
    skips = skips[::-1]
    for sc, up in zip(skips, params["ups"]):
        x = conv_transpose2x2(x, up["tw"], up["tb"])
        # shapes always match here (even spatial sizes); torch.cat((sc, x), dim=1) is
        # fused into the next conv as a K-split (no concatenated activation in HBM).
        # TODO(synk): TF.resize fallback for odd spatial sizes not implemented.
        x = double_conv_apply([sc, x], up["dconv"], pool=False)
    out = conv1x1_sigmoid(x, params["final_w"], params["final_b"])
    return jnp.transpose(out, (0, 3, 1, 2))  # NHWC -> NCHW


if __name__ == "__main__":
    key = jax.random.PRNGKey(0)
    k_param, k_x = jax.random.split(key)

    in_channels, out_channels = 3, 1
    features = [8, 16, 32, 64]          # scaled-down UNET features
    batch, spatial = 2, 16

    params = init_unet(k_param, in_channels, out_channels, features)
    x = jax.random.normal(k_x, (batch, in_channels, spatial, spatial), jnp.float32)

    fwd = jax.jit(unet_apply)
    out = fwd(params, x)
    out = jax.block_until_ready(out)

    assert out.shape == (batch, out_channels, spatial, spatial), out.shape
    assert bool(jnp.all(jnp.isfinite(out)))
    print("KERNEL_OK")
</pallas_src>

<mosaic_0001>
module attributes {stable_mosaic.version = 11 : i64} {
  func.func @kernel(%arg0: i32, %arg1: memref<256x27xbf16, #tpu.memory_space<vmem>>, %arg2: memref<27x8xbf16, #tpu.memory_space<vmem>>, %arg3: memref<256x8xf32, #tpu.memory_space<vmem>>, %arg4: memref<1x2x8xf32, #tpu.memory_space<vmem>>) attributes {dimension_semantics = [#tpu.dimension_semantics<parallel>], iteration_bounds = array<i64: 2>, scalar_prefetch = 0 : i64, scratch_operands = 0 : i64, tpu.core_type = #tpu.core_type<tc>, window_params = [{transform_indices = @transform_0, window_bounds = array<i64: 256, 27>}, {pipeline_mode = #tpu.pipeline_mode<synchronous>, transform_indices = @transform_1, window_bounds = array<i64: 27, 8>}, {transform_indices = @transform_2, window_bounds = array<i64: 256, 8>}, {transform_indices = @transform_3, window_bounds = array<i64: 1, 2, 8>}]} {
    %c0 = arith.constant 0 : index
    %c0_0 = arith.constant 0 : index
    %0 = vector.load %arg1[%c0, %c0_0] : memref<256x27xbf16, #tpu.memory_space<vmem>>, vector<256x27xbf16>
    %c0_1 = arith.constant 0 : index
    %c0_2 = arith.constant 0 : index
    %1 = vector.load %arg2[%c0_1, %c0_2] : memref<27x8xbf16, #tpu.memory_space<vmem>>, vector<27x8xbf16>
    %cst = arith.constant dense<0.000000e+00> : vector<256x8xf32>
    %2 = tpu.matmul %0, %1, %cst {dimension_numbers = #tpu.dot_dimension_numbers<[1], [0], [0], [1], [0, 0, 1, 1], [], []>} : vector<256x27xbf16>, vector<27x8xbf16>, vector<256x8xf32> -> vector<256x8xf32>
    %c0_3 = arith.constant 0 : index
    %c0_4 = arith.constant 0 : index
    %3 = vector.load %arg3[%c0_3, %c0_4] : memref<256x8xf32, #tpu.memory_space<vmem>>, vector<256x8xf32>
    tpu.vector_store %arg3[%c0_3, %c0_4], %2 {strides = array<i32>} : memref<256x8xf32, #tpu.memory_space<vmem>>, vector<256x8xf32>,
    %cst_5 = arith.constant dense<0.000000e+00> : vector<8xf32>
    %4 = vector.multi_reduction <add>, %2, %cst_5 [0] : vector<256x8xf32> to vector<8xf32>
    %5 = vector.shape_cast %4 : vector<8xf32> to vector<1x8xf32>
    %6 = arith.mulf %2, %2 : vector<256x8xf32>
    %cst_6 = arith.constant dense<0.000000e+00> : vector<8xf32>
    %7 = vector.multi_reduction <add>, %6, %cst_6 [0] : vector<256x8xf32> to vector<8xf32>
    %8 = vector.shape_cast %7 : vector<8xf32> to vector<1x8xf32>
    %9 = tpu.concatenate %5, %8 in 0 : vector<1x8xf32>, vector<1x8xf32> -> vector<2x8xf32>
    %10 = vector.shape_cast %9 : vector<2x8xf32> to vector<1x2x8xf32>
    %c0_7 = arith.constant 0 : index
    %c0_8 = arith.constant 0 : index
    %c0_9 = arith.constant 0 : index
    %11 = vector.load %arg4[%c0_7, %c0_8, %c0_9] : memref<1x2x8xf32, #tpu.memory_space<vmem>>, vector<1x2x8xf32>
    tpu.vector_store %arg4[%c0_7, %c0_8, %c0_9], %10 {strides = array<i32>} : memref<1x2x8xf32, #tpu.memory_space<vmem>>, vector<1x2x8xf32>,
    return
  }
  func.func @transform_0(%arg0: i32) -> (i32, i32) {
    %c0_i32 = arith.constant 0 : i32
    %c0_i32_0 = arith.constant 0 : i32
    return %arg0, %c0_i32 : i32, i32
  }
  func.func @transform_1(%arg0: i32) -> (i32, i32) {
    %c0_i32 = arith.constant 0 : i32
    %c0_i32_0 = arith.constant 0 : i32
    %c0_i32_1 = arith.constant 0 : i32
    return %c0_i32, %c0_i32_0 : i32, i32
  }
  func.func @transform_2(%arg0: i32) -> (i32, i32) {
    %c0_i32 = arith.constant 0 : i32
    %c0_i32_0 = arith.constant 0 : i32
    return %arg0, %c0_i32 : i32, i32
  }
  func.func @transform_3(%arg0: i32) -> (i32, i32, i32) {
    %c0_i32 = arith.constant 0 : i32
    %c0_i32_0 = arith.constant 0 : i32
    %c0_i32_1 = arith.constant 0 : i32
    return %arg0, %c0_i32, %c0_i32_0 : i32, i32, i32
  }
}

module attributes {stable_mosaic.version = 11 : i64} {
  func.func @_bn_relu_kernel(%arg0: i32, %arg1: i32, %arg2: memref<1x16x16x8xf32, #tpu.memory_space<vmem>>, %arg3: memref<1x8xf32, #tpu.memory_space<vmem>>, %arg4: memref<1x8xf32, #tpu.memory_space<vmem>>, %arg5: memref<1x16x16x8xbf16, #tpu.memory_space<vmem>>) attributes {dimension_semantics = [#tpu.dimension_semantics<parallel>, #tpu.dimension_semantics<parallel>], iteration_bounds = array<i64: 2, 1>, scalar_prefetch = 0 : i64, scratch_operands = 0 : i64, tpu.core_type = #tpu.core_type<tc>, window_params = [{transform_indices = @transform_0, window_bounds = array<i64: 1, 16, 16, 8>}, {pipeline_mode = #tpu.pipeline_mode<synchronous>, transform_indices = @transform_1, window_bounds = array<i64: 1, 8>}, {pipeline_mode = #tpu.pipeline_mode<synchronous>, transform_indices = @transform_2, window_bounds = array<i64: 1, 8>}, {transform_indices = @transform_3, window_bounds = array<i64: 1, 16, 16, 8>}]} {
    %c0 = arith.constant 0 : index
    %c0_0 = arith.constant 0 : index
    %0 = vector.load %arg3[%c0, %c0_0] : memref<1x8xf32, #tpu.memory_space<vmem>>, vector<1x8xf32>
    %1 = vector.shape_cast %0 : vector<1x8xf32> to vector<1x1x1x8xf32>
    %c0_1 = arith.constant 0 : index
    %c0_2 = arith.constant 0 : index
    %2 = vector.load %arg4[%c0_1, %c0_2] : memref<1x8xf32, #tpu.memory_space<vmem>>, vector<1x8xf32>
    %3 = vector.shape_cast %2 : vector<1x8xf32> to vector<1x1x1x8xf32>
    %c0_3 = arith.constant 0 : index
    %c0_4 = arith.constant 0 : index
    %c0_5 = arith.constant 0 : index
    %c0_6 = arith.constant 0 : index
    %4 = vector.load %arg2[%c0_3, %c0_4, %c0_5, %c0_6] : memref<1x16x16x8xf32, #tpu.memory_space<vmem>>, vector<1x16x16x8xf32>
    %5 = vector.broadcast %1 : vector<1x1x1x8xf32> to vector<1x16x16x8xf32>
    %6 = arith.mulf %4, %5 : vector<1x16x16x8xf32>
    %7 = vector.broadcast %3 : vector<1x1x1x8xf32> to vector<1x16x16x8xf32>
    %8 = arith.addf %6, %7 : vector<1x16x16x8xf32>
    %cst = arith.constant 0.000000e+00 : f32
    %9 = vector.broadcast %cst : f32 to vector<1x16x16x8xf32>
    %10 = arith.maximumf %8, %9 : vector<1x16x16x8xf32>
    %11 = arith.truncf %10 : vector<1x16x16x8xf32> to vector<1x16x16x8xbf16>
    %c0_7 = arith.constant 0 : index
    %c0_8 = arith.constant 0 : index
    %c0_9 = arith.constant 0 : index
    %c0_10 = arith.constant 0 : index
    %12 = vector.load %arg5[%c0_7, %c0_8, %c0_9, %c0_10] : memref<1x16x16x8xbf16, #tpu.memory_space<vmem>>, vector<1x16x16x8xbf16>
    tpu.vector_store %arg5[%c0_7, %c0_8, %c0_9, %c0_10], %11 {strides = array<i32>} : memref<1x16x16x8xbf16, #tpu.memory_space<vmem>>, vector<1x16x16x8xbf16>,
    return
  }
  func.func @transform_0(%arg0: i32, %arg1: i32) -> (i32, i32, i32, i32) {
    %c0_i32 = arith.constant 0 : i32
    %c0_i32_0 = arith.constant 0 : i32
    %c0_i32_1 = arith.constant 0 : i32
    return %arg0, %arg1, %c0_i32, %c0_i32_0 : i32, i32, i32, i32
  }
  func.func @transform_1(%arg0: i32, %arg1: i32) -> (i32, i32) {
    %c0_i32 = arith.constant 0 : i32
    %c0_i32_0 = arith.constant 0 : i32
    %c0_i32_1 = arith.constant 0 : i32
    return %c0_i32, %c0_i32_0 : i32, i32
  }
  func.func @transform_2(%arg0: i32, %arg1: i32) -> (i32, i32) {
    %c0_i32 = arith.constant 0 : i32
    %c0_i32_0 = arith.constant 0 : i32
    %c0_i32_1 = arith.constant 0 : i32
    return %c0_i32, %c0_i32_0 : i32, i32
  }
  func.func @transform_3(%arg0: i32, %arg1: i32) -> (i32, i32, i32, i32) {
    %c0_i32 = arith.constant 0 : i32
    %c0_i32_0 = arith.constant 0 : i32
    %c0_i32_1 = arith.constant 0 : i32
    return %arg0, %arg1, %c0_i32, %c0_i32_0 : i32, i32, i32, i32
  }
}

module attributes {stable_mosaic.version = 11 : i64} {
  func.func @kernel(%arg0: i32, %arg1: memref<256x72xbf16, #tpu.memory_space<vmem>>, %arg2: memref<72x8xbf16, #tpu.memory_space<vmem>>, %arg3: memref<256x8xf32, #tpu.memory_space<vmem>>, %arg4: memref<1x2x8xf32, #tpu.memory_space<vmem>>) attributes {dimension_semantics = [#tpu.dimension_semantics<parallel>], iteration_bounds = array<i64: 2>, scalar_prefetch = 0 : i64, scratch_operands = 0 : i64, tpu.core_type = #tpu.core_type<tc>, window_params = [{transform_indices = @transform_0, window_bounds = array<i64: 256, 72>}, {pipeline_mode = #tpu.pipeline_mode<synchronous>, transform_indices = @transform_1, window_bounds = array<i64: 72, 8>}, {transform_indices = @transform_2, window_bounds = array<i64: 256, 8>}, {transform_indices = @transform_3, window_bounds = array<i64: 1, 2, 8>}]} {
    %c0 = arith.constant 0 : index
    %c0_0 = arith.constant 0 : index
    %0 = vector.load %arg1[%c0, %c0_0] : memref<256x72xbf16, #tpu.memory_space<vmem>>, vector<256x72xbf16>
    %c0_1 = arith.constant 0 : index
    %c0_2 = arith.constant 0 : index
    %1 = vector.load %arg2[%c0_1, %c0_2] : memref<72x8xbf16, #tpu.memory_space<vmem>>, vector<72x8xbf16>
    %cst = arith.constant dense<0.000000e+00> : vector<256x8xf32>
    %2 = tpu.matmul %0, %1, %cst {dimension_numbers = #tpu.dot_dimension_numbers<[1], [0], [0], [1], [0, 0, 1, 1], [], []>} : vector<256x72xbf16>, vector<72x8xbf16>, vector<256x8xf32> -> vector<256x8xf32>
    %c0_3 = arith.constant 0 : index
    %c0_4 = arith.constant 0 : index
    %3 = vector.load %arg3[%c0_3, %c0_4] : memref<256x8xf32, #tpu.memory_space<vmem>>, vector<256x8xf32>
    tpu.vector_store %arg3[%c0_3, %c0_4], %2 {strides = array<i32>} : memref<256x8xf32, #tpu.memory_space<vmem>>, vector<256x8xf32>,
    %cst_5 = arith.constant dense<0.000000e+00> : vector<8xf32>
    %4 = vector.multi_reduction <add>, %2, %cst_5 [0] : vector<256x8xf32> to vector<8xf32>
    %5 = vector.shape_cast %4 : vector<8xf32> to vector<1x8xf32>
    %6 = arith.mulf %2, %2 : vector<256x8xf32>
    %cst_6 = arith.constant dense<0.000000e+00> : vector<8xf32>
    %7 = vector.multi_reduction <add>, %6, %cst_6 [0] : vector<256x8xf32> to vector<8xf32>
    %8 = vector.shape_cast %7 : vector<8xf32> to vector<1x8xf32>
    %9 = tpu.concatenate %5, %8 in 0 : vector<1x8xf32>, vector<1x8xf32> -> vector<2x8xf32>
    %10 = vector.shape_cast %9 : vector<2x8xf32> to vector<1x2x8xf32>
    %c0_7 = arith.constant 0 : index
    %c0_8 = arith.constant 0 : index
    %c0_9 = arith.constant 0 : index
    %11 = vector.load %arg4[%c0_7, %c0_8, %c0_9] : memref<1x2x8xf32, #tpu.memory_space<vmem>>, vector<1x2x8xf32>
    tpu.vector_store %arg4[%c0_7, %c0_8, %c0_9], %10 {strides = array<i32>} : memref<1x2x8xf32, #tpu.memory_space<vmem>>, vector<1x2x8xf32>,
    return
  }
  func.func @transform_0(%arg0: i32) -> (i32, i32) {
    %c0_i32 = arith.constant 0 : i32
    %c0_i32_0 = arith.constant 0 : i32
    return %arg0, %c0_i32 : i32, i32
  }
  func.func @transform_1(%arg0: i32) -> (i32, i32) {
    %c0_i32 = arith.constant 0 : i32
    %c0_i32_0 = arith.constant 0 : i32
    %c0_i32_1 = arith.constant 0 : i32
    return %c0_i32, %c0_i32_0 : i32, i32
  }
  func.func @transform_2(%arg0: i32) -> (i32, i32) {
    %c0_i32 = arith.constant 0 : i32
    %c0_i32_0 = arith.constant 0 : i32
    return %arg0, %c0_i32 : i32, i32
  }
  func.func @transform_3(%arg0: i32) -> (i32, i32, i32) {
    %c0_i32 = arith.constant 0 : i32
    %c0_i32_0 = arith.constant 0 : i32
    %c0_i32_1 = arith.constant 0 : i32
    return %arg0, %c0_i32, %c0_i32_0 : i32, i32, i32
  }
}

module attributes {stable_mosaic.version = 11 : i64} {
  func.func @_bn_relu_pool_kernel(%arg0: i32, %arg1: i32, %arg2: memref<1x16x16x8xf32, #tpu.memory_space<vmem>>, %arg3: memref<1x8xf32, #tpu.memory_space<vmem>>, %arg4: memref<1x8xf32, #tpu.memory_space<vmem>>, %arg5: memref<1x16x16x8xbf16, #tpu.memory_space<vmem>>, %arg6: memref<1x8x8x8xbf16, #tpu.memory_space<vmem>>, %arg7: memref<8x16x8xf32, #tpu.memory_space<vmem>>) attributes {dimension_semantics = [#tpu.dimension_semantics<parallel>, #tpu.dimension_semantics<parallel>], iteration_bounds = array<i64: 2, 1>, scalar_prefetch = 0 : i64, scratch_operands = 1 : i64, tpu.core_type = #tpu.core_type<tc>, window_params = [{transform_indices = @transform_0, window_bounds = array<i64: 1, 16, 16, 8>}, {pipeline_mode = #tpu.pipeline_mode<synchronous>, transform_indices = @transform_1, window_bounds = array<i64: 1, 8>}, {pipeline_mode = #tpu.pipeline_mode<synchronous>, transform_indices = @transform_2, window_bounds = array<i64: 1, 8>}, {transform_indices = @transform_3, window_bounds = array<i64: 1, 16, 16, 8>}, {transform_indices = @transform_4, window_bounds = array<i64: 1, 8, 8, 8>}]} {
    %c0 = arith.constant 0 : index
    %c0_0 = arith.constant 0 : index
    %0 = vector.load %arg3[%c0, %c0_0] : memref<1x8xf32, #tpu.memory_space<vmem>>, vector<1x8xf32>
    %1 = vector.shape_cast %0 : vector<1x8xf32> to vector<1x1x1x8xf32>
    %c0_1 = arith.constant 0 : index
    %c0_2 = arith.constant 0 : index
    %2 = vector.load %arg4[%c0_1, %c0_2] : memref<1x8xf32, #tpu.memory_space<vmem>>, vector<1x8xf32>
    %3 = vector.shape_cast %2 : vector<1x8xf32> to vector<1x1x1x8xf32>
    %c0_3 = arith.constant 0 : index
    %c0_4 = arith.constant 0 : index
    %c0_5 = arith.constant 0 : index
    %c0_6 = arith.constant 0 : index
    %4 = vector.load %arg2[%c0_3, %c0_4, %c0_5, %c0_6] : memref<1x16x16x8xf32, #tpu.memory_space<vmem>>, vector<1x16x16x8xf32>
    %5 = vector.broadcast %1 : vector<1x1x1x8xf32> to vector<1x16x16x8xf32>
    %6 = arith.mulf %4, %5 : vector<1x16x16x8xf32>
    %7 = vector.broadcast %3 : vector<1x1x1x8xf32> to vector<1x16x16x8xf32>
    %8 = arith.addf %6, %7 : vector<1x16x16x8xf32>
    %cst = arith.constant 0.000000e+00 : f32
    %9 = vector.broadcast %cst : f32 to vector<1x16x16x8xf32>
    %10 = arith.maximumf %8, %9 : vector<1x16x16x8xf32>
    %11 = arith.truncf %10 : vector<1x16x16x8xf32> to vector<1x16x16x8xbf16>
    %c0_7 = arith.constant 0 : index
    %c0_8 = arith.constant 0 : index
    %c0_9 = arith.constant 0 : index
    %c0_10 = arith.constant 0 : index
    %12 = vector.load %arg5[%c0_7, %c0_8, %c0_9, %c0_10] : memref<1x16x16x8xbf16, #tpu.memory_space<vmem>>, vector<1x16x16x8xbf16>
    tpu.vector_store %arg5[%c0_7, %c0_8, %c0_9, %c0_10], %11 {strides = array<i32>} : memref<1x16x16x8xbf16, #tpu.memory_space<vmem>>, vector<1x16x16x8xbf16>,
    %13 = vector.shape_cast %10 : vector<1x16x16x8xf32> to vector<8x2x16x8xf32>
    %cst_11 = arith.constant dense<0xFF800000> : vector<8x16x8xf32>
    %14 = vector.multi_reduction <maximumf>, %13, %cst_11 [1] : vector<8x2x16x8xf32> to vector<8x16x8xf32>
    %c0_12 = arith.constant 0 : index
    %c0_13 = arith.constant 0 : index
    %c0_14 = arith.constant 0 : index
    %15 = vector.load %arg7[%c0_12, %c0_13, %c0_14] : memref<8x16x8xf32, #tpu.memory_space<vmem>>, vector<8x16x8xf32>
    tpu.vector_store %arg7[%c0_12, %c0_13, %c0_14], %14 {strides = array<i32>} : memref<8x16x8xf32, #tpu.memory_space<vmem>>, vector<8x16x8xf32>,
    %c0_15 = arith.constant 0 : index
    %c0_16 = arith.constant 0 : index
    %c0_17 = arith.constant 0 : index
    %16 = tpu.strided_load %arg7[%c0_15, %c0_16, %c0_17] {strides = array<i32: 1, 2, 1>} : memref<8x16x8xf32, #tpu.memory_space<vmem>>, vector<8x8x8xf32>
    %c0_18 = arith.constant 0 : index
    %c1 = arith.constant 1 : index
    %c0_19 = arith.constant 0 : index
    %17 = tpu.strided_load %arg7[%c0_18, %c1, %c0_19] {strides = array<i32: 1, 2, 1>} : memref<8x16x8xf32, #tpu.memory_space<vmem>>, vector<8x8x8xf32>
    %18 = arith.maximumf %16, %17 : vector<8x8x8xf32>
    %19 = vector.shape_cast %18 : vector<8x8x8xf32> to vector<1x8x8x8xf32>
    %20 = arith.truncf %19 : vector<1x8x8x8xf32> to vector<1x8x8x8xbf16>
    %c0_20 = arith.constant 0 : index
    %c0_21 = arith.constant 0 : index
    %c0_22 = arith.constant 0 : index
    %c0_23 = arith.constant 0 : index
    %21 = vector.load %arg6[%c0_20, %c0_21, %c0_22, %c0_23] : memref<1x8x8x8xbf16, #tpu.memory_space<vmem>>, vector<1x8x8x8xbf16>
    tpu.vector_store %arg6[%c0_20, %c0_21, %c0_22, %c0_23], %20 {strides = array<i32>} : memref<1x8x8x8xbf16, #tpu.memory_space<vmem>>, vector<1x8x8x8xbf16>,
    return
  }
  func.func @transform_0(%arg0: i32, %arg1: i32) -> (i32, i32, i32, i32) {
    %c0_i32 = arith.constant 0 : i32
    %c0_i32_0 = arith.constant 0 : i32
    %c0_i32_1 = arith.constant 0 : i32
    return %arg0, %arg1, %c0_i32, %c0_i32_0 : i32, i32, i32, i32
  }
  func.func @transform_1(%arg0: i32, %arg1: i32) -> (i32, i32) {
    %c0_i32 = arith.constant 0 : i32
    %c0_i32_0 = arith.constant 0 : i32
    %c0_i32_1 = arith.constant 0 : i32
    return %c0_i32, %c0_i32_0 : i32, i32
  }
  func.func @transform_2(%arg0: i32, %arg1: i32) -> (i32, i32) {
    %c0_i32 = arith.constant 0 : i32
    %c0_i32_0 = arith.constant 0 : i32
    %c0_i32_1 = arith.constant 0 : i32
    return %c0_i32, %c0_i32_0 : i32, i32
  }
  func.func @transform_3(%arg0: i32, %arg1: i32) -> (i32, i32, i32, i32) {
    %c0_i32 = arith.constant 0 : i32
    %c0_i32_0 = arith.constant 0 : i32
    %c0_i32_1 = arith.constant 0 : i32
    return %arg0, %arg1, %c0_i32, %c0_i32_0 : i32, i32, i32, i32
  }
  func.func @transform_4(%arg0: i32, %arg1: i32) -> (i32, i32, i32, i32) {
    %c0_i32 = arith.constant 0 : i32
    %c0_i32_0 = arith.constant 0 : i32
    %c0_i32_1 = arith.constant 0 : i32
    return %arg0, %arg1, %c0_i32, %c0_i32_0 : i32, i32, i32, i32
  }
}

module attributes {stable_mosaic.version = 11 : i64} {
  func.func @_bn_relu_kernel(%arg0: i32, %arg1: i32, %arg2: memref<1x8x8x16xf32, #tpu.memory_space<vmem>>, %arg3: memref<1x16xf32, #tpu.memory_space<vmem>>, %arg4: memref<1x16xf32, #tpu.memory_space<vmem>>, %arg5: memref<1x8x8x16xbf16, #tpu.memory_space<vmem>>) attributes {dimension_semantics = [#tpu.dimension_semantics<parallel>, #tpu.dimension_semantics<parallel>], iteration_bounds = array<i64: 2, 1>, scalar_prefetch = 0 : i64, scratch_operands = 0 : i64, tpu.core_type = #tpu.core_type<tc>, window_params = [{transform_indices = @transform_0, window_bounds = array<i64: 1, 8, 8, 16>}, {pipeline_mode = #tpu.pipeline_mode<synchronous>, transform_indices = @transform_1, window_bounds = array<i64: 1, 16>}, {pipeline_mode = #tpu.pipeline_mode<synchronous>, transform_indices = @transform_2, window_bounds = array<i64: 1, 16>}, {transform_indices = @transform_3, window_bounds = array<i64: 1, 8, 8, 16>}]} {
    %c0 = arith.constant 0 : index
    %c0_0 = arith.constant 0 : index
    %0 = vector.load %arg3[%c0, %c0_0] : memref<1x16xf32, #tpu.memory_space<vmem>>, vector<1x16xf32>
    %1 = vector.shape_cast %0 : vector<1x16xf32> to vector<1x1x1x16xf32>
    %c0_1 = arith.constant 0 : index
    %c0_2 = arith.constant 0 : index
    %2 = vector.load %arg4[%c0_1, %c0_2] : memref<1x16xf32, #tpu.memory_space<vmem>>, vector<1x16xf32>
    %3 = vector.shape_cast %2 : vector<1x16xf32> to vector<1x1x1x16xf32>
    %c0_3 = arith.constant 0 : index
    %c0_4 = arith.constant 0 : index
    %c0_5 = arith.constant 0 : index
    %c0_6 = arith.constant 0 : index
    %4 = vector.load %arg2[%c0_3, %c0_4, %c0_5, %c0_6] : memref<1x8x8x16xf32, #tpu.memory_space<vmem>>, vector<1x8x8x16xf32>
    %5 = vector.broadcast %1 : vector<1x1x1x16xf32> to vector<1x8x8x16xf32>
    %6 = arith.mulf %4, %5 : vector<1x8x8x16xf32>
    %7 = vector.broadcast %3 : vector<1x1x1x16xf32> to vector<1x8x8x16xf32>
    %8 = arith.addf %6, %7 : vector<1x8x8x16xf32>
    %cst = arith.constant 0.000000e+00 : f32
    %9 = vector.broadcast %cst : f32 to vector<1x8x8x16xf32>
    %10 = arith.maximumf %8, %9 : vector<1x8x8x16xf32>
    %11 = arith.truncf %10 : vector<1x8x8x16xf32> to vector<1x8x8x16xbf16>
    %c0_7 = arith.constant 0 : index
    %c0_8 = arith.constant 0 : index
    %c0_9 = arith.constant 0 : index
    %c0_10 = arith.constant 0 : index
    %12 = vector.load %arg5[%c0_7, %c0_8, %c0_9, %c0_10] : memref<1x8x8x16xbf16, #tpu.memory_space<vmem>>, vector<1x8x8x16xbf16>
    tpu.vector_store %arg5[%c0_7, %c0_8, %c0_9, %c0_10], %11 {strides = array<i32>} : memref<1x8x8x16xbf16, #tpu.memory_space<vmem>>, vector<1x8x8x16xbf16>,
    return
  }
  func.func @transform_0(%arg0: i32, %arg1: i32) -> (i32, i32, i32, i32) {
    %c0_i32 = arith.constant 0 : i32
    %c0_i32_0 = arith.constant 0 : i32
    %c0_i32_1 = arith.constant 0 : i32
    return %arg0, %arg1, %c0_i32, %c0_i32_0 : i32, i32, i32, i32
  }
  func.func @transform_1(%arg0: i32, %arg1: i32) -> (i32, i32) {
    %c0_i32 = arith.constant 0 : i32
    %c0_i32_0 = arith.constant 0 : i32
    %c0_i32_1 = arith.constant 0 : i32
    return %c0_i32, %c0_i32_0 : i32, i32
  }
  func.func @transform_2(%arg0: i32, %arg1: i32) -> (i32, i32) {
    %c0_i32 = arith.constant 0 : i32
    %c0_i32_0 = arith.constant 0 : i32
    %c0_i32_1 = arith.constant 0 : i32
    return %c0_i32, %c0_i32_0 : i32, i32
  }
  func.func @transform_3(%arg0: i32, %arg1: i32) -> (i32, i32, i32, i32) {
    %c0_i32 = arith.constant 0 : i32
    %c0_i32_0 = arith.constant 0 : i32
    %c0_i32_1 = arith.constant 0 : i32
    return %arg0, %arg1, %c0_i32, %c0_i32_0 : i32, i32, i32, i32
  }
}

module attributes {stable_mosaic.version = 11 : i64} {
  func.func @kernel(%arg0: i32, %arg1: memref<128x72xbf16, #tpu.memory_space<vmem>>, %arg2: memref<72x16xbf16, #tpu.memory_space<vmem>>, %arg3: memref<128x16xf32, #tpu.memory_space<vmem>>, %arg4: memref<1x2x16xf32, #tpu.memory_space<vmem>>) attributes {dimension_semantics = [#tpu.dimension_semantics<parallel>], iteration_bounds = array<i64: 1>, scalar_prefetch = 0 : i64, scratch_operands = 0 : i64, tpu.core_type = #tpu.core_type<tc>, window_params = [{transform_indices = @transform_0, window_bounds = array<i64: 128, 72>}, {pipeline_mode = #tpu.pipeline_mode<synchronous>, transform_indices = @transform_1, window_bounds = array<i64: 72, 16>}, {transform_indices = @transform_2, window_bounds = array<i64: 128, 16>}, {transform_indices = @transform_3, window_bounds = array<i64: 1, 2, 16>}]} {
    %c0 = arith.constant 0 : index
    %c0_0 = arith.constant 0 : index
    %0 = vector.load %arg1[%c0, %c0_0] : memref<128x72xbf16, #tpu.memory_space<vmem>>, vector<128x72xbf16>
    %c0_1 = arith.constant 0 : index
    %c0_2 = arith.constant 0 : index
    %1 = vector.load %arg2[%c0_1, %c0_2] : memref<72x16xbf16, #tpu.memory_space<vmem>>, vector<72x16xbf16>
    %cst = arith.constant dense<0.000000e+00> : vector<128x16xf32>
    %2 = tpu.matmul %0, %1, %cst {dimension_numbers = #tpu.dot_dimension_numbers<[1], [0], [0], [1], [0, 0, 1, 1], [], []>} : vector<128x72xbf16>, vector<72x16xbf16>, vector<128x16xf32> -> vector<128x16xf32>
    %c0_3 = arith.constant 0 : index
    %c0_4 = arith.constant 0 : index
    %3 = vector.load %arg3[%c0_3, %c0_4] : memref<128x16xf32, #tpu.memory_space<vmem>>, vector<128x16xf32>
    tpu.vector_store %arg3[%c0_3, %c0_4], %2 {strides = array<i32>} : memref<128x16xf32, #tpu.memory_space<vmem>>, vector<128x16xf32>,
    %cst_5 = arith.constant dense<0.000000e+00> : vector<16xf32>
    %4 = vector.multi_reduction <add>, %2, %cst_5 [0] : vector<128x16xf32> to vector<16xf32>
    %5 = vector.shape_cast %4 : vector<16xf32> to vector<1x16xf32>
    %6 = arith.mulf %2, %2 : vector<128x16xf32>
    %cst_6 = arith.constant dense<0.000000e+00> : vector<16xf32>
    %7 = vector.multi_reduction <add>, %6, %cst_6 [0] : vector<128x16xf32> to vector<16xf32>
    %8 = vector.shape_cast %7 : vector<16xf32> to vector<1x16xf32>
    %9 = tpu.concatenate %5, %8 in 0 : vector<1x16xf32>, vector<1x16xf32> -> vector<2x16xf32>
    %10 = vector.shape_cast %9 : vector<2x16xf32> to vector<1x2x16xf32>
    %c0_7 = arith.constant 0 : index
    %c0_8 = arith.constant 0 : index
    %c0_9 = arith.constant 0 : index
    %11 = vector.load %arg4[%c0_7, %c0_8, %c0_9] : memref<1x2x16xf32, #tpu.memory_space<vmem>>, vector<1x2x16xf32>
    tpu.vector_store %arg4[%c0_7, %c0_8, %c0_9], %10 {strides = array<i32>} : memref<1x2x16xf32, #tpu.memory_space<vmem>>, vector<1x2x16xf32>,
    return
  }
  func.func @transform_0(%arg0: i32) -> (i32, i32) {
    %c0_i32 = arith.constant 0 : i32
    %c0_i32_0 = arith.constant 0 : i32
    return %arg0, %c0_i32 : i32, i32
  }
  func.func @transform_1(%arg0: i32) -> (i32, i32) {
    %c0_i32 = arith.constant 0 : i32
    %c0_i32_0 = arith.constant 0 : i32
    %c0_i32_1 = arith.constant 0 : i32
    return %c0_i32, %c0_i32_0 : i32, i32
  }
  func.func @transform_2(%arg0: i32) -> (i32, i32) {
    %c0_i32 = arith.constant 0 : i32
    %c0_i32_0 = arith.constant 0 : i32
    return %arg0, %c0_i32 : i32, i32
  }
  func.func @transform_3(%arg0: i32) -> (i32, i32, i32) {
    %c0_i32 = arith.constant 0 : i32
    %c0_i32_0 = arith.constant 0 : i32
    %c0_i32_1 = arith.constant 0 : i32
    return %arg0, %c0_i32, %c0_i32_0 : i32, i32, i32
  }
}

module attributes {stable_mosaic.version = 11 : i64} {
  func.func @_bn_relu_pool_kernel(%arg0: i32, %arg1: i32, %arg2: memref<1x8x8x16xf32, #tpu.memory_space<vmem>>, %arg3: memref<1x16xf32, #tpu.memory_space<vmem>>, %arg4: memref<1x16xf32, #tpu.memory_space<vmem>>, %arg5: memref<1x8x8x16xbf16, #tpu.memory_space<vmem>>, %arg6: memref<1x4x4x16xbf16, #tpu.memory_space<vmem>>, %arg7: memref<4x8x16xf32, #tpu.memory_space<vmem>>) attributes {dimension_semantics = [#tpu.dimension_semantics<parallel>, #tpu.dimension_semantics<parallel>], iteration_bounds = array<i64: 2, 1>, scalar_prefetch = 0 : i64, scratch_operands = 1 : i64, tpu.core_type = #tpu.core_type<tc>, window_params = [{transform_indices = @transform_0, window_bounds = array<i64: 1, 8, 8, 16>}, {pipeline_mode = #tpu.pipeline_mode<synchronous>, transform_indices = @transform_1, window_bounds = array<i64: 1, 16>}, {pipeline_mode = #tpu.pipeline_mode<synchronous>, transform_indices = @transform_2, window_bounds = array<i64: 1, 16>}, {transform_indices = @transform_3, window_bounds = array<i64: 1, 8, 8, 16>}, {transform_indices = @transform_4, window_bounds = array<i64: 1, 4, 4, 16>}]} {
    %c0 = arith.constant 0 : index
    %c0_0 = arith.constant 0 : index
    %0 = vector.load %arg3[%c0, %c0_0] : memref<1x16xf32, #tpu.memory_space<vmem>>, vector<1x16xf32>
    %1 = vector.shape_cast %0 : vector<1x16xf32> to vector<1x1x1x16xf32>
    %c0_1 = arith.constant 0 : index
    %c0_2 = arith.constant 0 : index
    %2 = vector.load %arg4[%c0_1, %c0_2] : memref<1x16xf32, #tpu.memory_space<vmem>>, vector<1x16xf32>
    %3 = vector.shape_cast %2 : vector<1x16xf32> to vector<1x1x1x16xf32>
    %c0_3 = arith.constant 0 : index
    %c0_4 = arith.constant 0 : index
    %c0_5 = arith.constant 0 : index
    %c0_6 = arith.constant 0 : index
    %4 = vector.load %arg2[%c0_3, %c0_4, %c0_5, %c0_6] : memref<1x8x8x16xf32, #tpu.memory_space<vmem>>, vector<1x8x8x16xf32>
    %5 = vector.broadcast %1 : vector<1x1x1x16xf32> to vector<1x8x8x16xf32>
    %6 = arith.mulf %4, %5 : vector<1x8x8x16xf32>
    %7 = vector.broadcast %3 : vector<1x1x1x16xf32> to vector<1x8x8x16xf32>
    %8 = arith.addf %6, %7 : vector<1x8x8x16xf32>
    %cst = arith.constant 0.000000e+00 : f32
    %9 = vector.broadcast %cst : f32 to vector<1x8x8x16xf32>
    %10 = arith.maximumf %8, %9 : vector<1x8x8x16xf32>
    %11 = arith.truncf %10 : vector<1x8x8x16xf32> to vector<1x8x8x16xbf16>
    %c0_7 = arith.constant 0 : index
    %c0_8 = arith.constant 0 : index
    %c0_9 = arith.constant 0 : index
    %c0_10 = arith.constant 0 : index
    %12 = vector.load %arg5[%c0_7, %c0_8, %c0_9, %c0_10] : memref<1x8x8x16xbf16, #tpu.memory_space<vmem>>, vector<1x8x8x16xbf16>
    tpu.vector_store %arg5[%c0_7, %c0_8, %c0_9, %c0_10], %11 {strides = array<i32>} : memref<1x8x8x16xbf16, #tpu.memory_space<vmem>>, vector<1x8x8x16xbf16>,
    %13 = vector.shape_cast %10 : vector<1x8x8x16xf32> to vector<4x2x8x16xf32>
    %cst_11 = arith.constant dense<0xFF800000> : vector<4x8x16xf32>
    %14 = vector.multi_reduction <maximumf>, %13, %cst_11 [1] : vector<4x2x8x16xf32> to vector<4x8x16xf32>
    %c0_12 = arith.constant 0 : index
    %c0_13 = arith.constant 0 : index
    %c0_14 = arith.constant 0 : index
    %15 = vector.load %arg7[%c0_12, %c0_13, %c0_14] : memref<4x8x16xf32, #tpu.memory_space<vmem>>, vector<4x8x16xf32>
    tpu.vector_store %arg7[%c0_12, %c0_13, %c0_14], %14 {strides = array<i32>} : memref<4x8x16xf32, #tpu.memory_space<vmem>>, vector<4x8x16xf32>,
    %c0_15 = arith.constant 0 : index
    %c0_16 = arith.constant 0 : index
    %c0_17 = arith.constant 0 : index
    %16 = tpu.strided_load %arg7[%c0_15, %c0_16, %c0_17] {strides = array<i32: 1, 2, 1>} : memref<4x8x16xf32, #tpu.memory_space<vmem>>, vector<4x4x16xf32>
    %c0_18 = arith.constant 0 : index
    %c1 = arith.constant 1 : index
    %c0_19 = arith.constant 0 : index
    %17 = tpu.strided_load %arg7[%c0_18, %c1, %c0_19] {strides = array<i32: 1, 2, 1>} : memref<4x8x16xf32, #tpu.memory_space<vmem>>, vector<4x4x16xf32>
    %18 = arith.maximumf %16, %17 : vector<4x4x16xf32>
    %19 = vector.shape_cast %18 : vector<4x4x16xf32> to vector<1x4x4x16xf32>
    %20 = arith.truncf %19 : vector<1x4x4x16xf32> to vector<1x4x4x16xbf16>
    %c0_20 = arith.constant 0 : index
    %c0_21 = arith.constant 0 : index
    %c0_22 = arith.constant 0 : index
    %c0_23 = arith.constant 0 : index
    %21 = vector.load %arg6[%c0_20, %c0_21, %c0_22, %c0_23] : memref<1x4x4x16xbf16, #tpu.memory_space<vmem>>, vector<1x4x4x16xbf16>
    tpu.vector_store %arg6[%c0_20, %c0_21, %c0_22, %c0_23], %20 {strides = array<i32>} : memref<1x4x4x16xbf16, #tpu.memory_space<vmem>>, vector<1x4x4x16xbf16>,
    return
  }
  func.func @transform_0(%arg0: i32, %arg1: i32) -> (i32, i32, i32, i32) {
    %c0_i32 = arith.constant 0 : i32
    %c0_i32_0 = arith.constant 0 : i32
    %c0_i32_1 = arith.constant 0 : i32
    return %arg0, %arg1, %c0_i32, %c0_i32_0 : i32, i32, i32, i32
  }
  func.func @transform_1(%arg0: i32, %arg1: i32) -> (i32, i32) {
    %c0_i32 = arith.constant 0 : i32
    %c0_i32_0 = arith.constant 0 : i32
    %c0_i32_1 = arith.constant 0 : i32
    return %c0_i32, %c0_i32_0 : i32, i32
  }
  func.func @transform_2(%arg0: i32, %arg1: i32) -> (i32, i32) {
    %c0_i32 = arith.constant 0 : i32
    %c0_i32_0 = arith.constant 0 : i32
    %c0_i32_1 = arith.constant 0 : i32
    return %c0_i32, %c0_i32_0 : i32, i32
  }
  func.func @transform_3(%arg0: i32, %arg1: i32) -> (i32, i32, i32, i32) {
    %c0_i32 = arith.constant 0 : i32
    %c0_i32_0 = arith.constant 0 : i32
    %c0_i32_1 = arith.constant 0 : i32
    return %arg0, %arg1, %c0_i32, %c0_i32_0 : i32, i32, i32, i32
  }
  func.func @transform_4(%arg0: i32, %arg1: i32) -> (i32, i32, i32, i32) {
    %c0_i32 = arith.constant 0 : i32
    %c0_i32_0 = arith.constant 0 : i32
    %c0_i32_1 = arith.constant 0 : i32
    return %arg0, %arg1, %c0_i32, %c0_i32_0 : i32, i32, i32, i32
  }
}

module attributes {stable_mosaic.version = 11 : i64} {
  func.func @kernel(%arg0: i32, %arg1: memref<128x144xbf16, #tpu.memory_space<vmem>>, %arg2: memref<144x16xbf16, #tpu.memory_space<vmem>>, %arg3: memref<128x16xf32, #tpu.memory_space<vmem>>, %arg4: memref<1x2x16xf32, #tpu.memory_space<vmem>>) attributes {dimension_semantics = [#tpu.dimension_semantics<parallel>], iteration_bounds = array<i64: 1>, scalar_prefetch = 0 : i64, scratch_operands = 0 : i64, tpu.core_type = #tpu.core_type<tc>, window_params = [{transform_indices = @transform_0, window_bounds = array<i64: 128, 144>}, {pipeline_mode = #tpu.pipeline_mode<synchronous>, transform_indices = @transform_1, window_bounds = array<i64: 144, 16>}, {transform_indices = @transform_2, window_bounds = array<i64: 128, 16>}, {transform_indices = @transform_3, window_bounds = array<i64: 1, 2, 16>}]} {
    %c0 = arith.constant 0 : index
    %c0_0 = arith.constant 0 : index
    %0 = vector.load %arg1[%c0, %c0_0] : memref<128x144xbf16, #tpu.memory_space<vmem>>, vector<128x144xbf16>
    %c0_1 = arith.constant 0 : index
    %c0_2 = arith.constant 0 : index
    %1 = vector.load %arg2[%c0_1, %c0_2] : memref<144x16xbf16, #tpu.memory_space<vmem>>, vector<144x16xbf16>
    %cst = arith.constant dense<0.000000e+00> : vector<128x16xf32>
    %2 = tpu.matmul %0, %1, %cst {dimension_numbers = #tpu.dot_dimension_numbers<[1], [0], [0], [1], [0, 0, 1, 1], [], []>} : vector<128x144xbf16>, vector<144x16xbf16>, vector<128x16xf32> -> vector<128x16xf32>
    %c0_3 = arith.constant 0 : index
    %c0_4 = arith.constant 0 : index
    %3 = vector.load %arg3[%c0_3, %c0_4] : memref<128x16xf32, #tpu.memory_space<vmem>>, vector<128x16xf32>
    tpu.vector_store %arg3[%c0_3, %c0_4], %2 {strides = array<i32>} : memref<128x16xf32, #tpu.memory_space<vmem>>, vector<128x16xf32>,
    %cst_5 = arith.constant dense<0.000000e+00> : vector<16xf32>
    %4 = vector.multi_reduction <add>, %2, %cst_5 [0] : vector<128x16xf32> to vector<16xf32>
    %5 = vector.shape_cast %4 : vector<16xf32> to vector<1x16xf32>
    %6 = arith.mulf %2, %2 : vector<128x16xf32>
    %cst_6 = arith.constant dense<0.000000e+00> : vector<16xf32>
    %7 = vector.multi_reduction <add>, %6, %cst_6 [0] : vector<128x16xf32> to vector<16xf32>
    %8 = vector.shape_cast %7 : vector<16xf32> to vector<1x16xf32>
    %9 = tpu.concatenate %5, %8 in 0 : vector<1x16xf32>, vector<1x16xf32> -> vector<2x16xf32>
    %10 = vector.shape_cast %9 : vector<2x16xf32> to vector<1x2x16xf32>
    %c0_7 = arith.constant 0 : index
    %c0_8 = arith.constant 0 : index
    %c0_9 = arith.constant 0 : index
    %11 = vector.load %arg4[%c0_7, %c0_8, %c0_9] : memref<1x2x16xf32, #tpu.memory_space<vmem>>, vector<1x2x16xf32>
    tpu.vector_store %arg4[%c0_7, %c0_8, %c0_9], %10 {strides = array<i32>} : memref<1x2x16xf32, #tpu.memory_space<vmem>>, vector<1x2x16xf32>,
    return
  }
  func.func @transform_0(%arg0: i32) -> (i32, i32) {
    %c0_i32 = arith.constant 0 : i32
    %c0_i32_0 = arith.constant 0 : i32
    return %arg0, %c0_i32 : i32, i32
  }
  func.func @transform_1(%arg0: i32) -> (i32, i32) {
    %c0_i32 = arith.constant 0 : i32
    %c0_i32_0 = arith.constant 0 : i32
    %c0_i32_1 = arith.constant 0 : i32
    return %c0_i32, %c0_i32_0 : i32, i32
  }
  func.func @transform_2(%arg0: i32) -> (i32, i32) {
    %c0_i32 = arith.constant 0 : i32
    %c0_i32_0 = arith.constant 0 : i32
    return %arg0, %c0_i32 : i32, i32
  }
  func.func @transform_3(%arg0: i32) -> (i32, i32, i32) {
    %c0_i32 = arith.constant 0 : i32
    %c0_i32_0 = arith.constant 0 : i32
    %c0_i32_1 = arith.constant 0 : i32
    return %arg0, %c0_i32, %c0_i32_0 : i32, i32, i32
  }
}

module attributes {stable_mosaic.version = 11 : i64} {
  func.func @_bn_relu_kernel(%arg0: i32, %arg1: i32, %arg2: memref<1x4x4x32xf32, #tpu.memory_space<vmem>>, %arg3: memref<1x32xf32, #tpu.memory_space<vmem>>, %arg4: memref<1x32xf32, #tpu.memory_space<vmem>>, %arg5: memref<1x4x4x32xbf16, #tpu.memory_space<vmem>>) attributes {dimension_semantics = [#tpu.dimension_semantics<parallel>, #tpu.dimension_semantics<parallel>], iteration_bounds = array<i64: 2, 1>, scalar_prefetch = 0 : i64, scratch_operands = 0 : i64, tpu.core_type = #tpu.core_type<tc>, window_params = [{transform_indices = @transform_0, window_bounds = array<i64: 1, 4, 4, 32>}, {pipeline_mode = #tpu.pipeline_mode<synchronous>, transform_indices = @transform_1, window_bounds = array<i64: 1, 32>}, {pipeline_mode = #tpu.pipeline_mode<synchronous>, transform_indices = @transform_2, window_bounds = array<i64: 1, 32>}, {transform_indices = @transform_3, window_bounds = array<i64: 1, 4, 4, 32>}]} {
    %c0 = arith.constant 0 : index
    %c0_0 = arith.constant 0 : index
    %0 = vector.load %arg3[%c0, %c0_0] : memref<1x32xf32, #tpu.memory_space<vmem>>, vector<1x32xf32>
    %1 = vector.shape_cast %0 : vector<1x32xf32> to vector<1x1x1x32xf32>
    %c0_1 = arith.constant 0 : index
    %c0_2 = arith.constant 0 : index
    %2 = vector.load %arg4[%c0_1, %c0_2] : memref<1x32xf32, #tpu.memory_space<vmem>>, vector<1x32xf32>
    %3 = vector.shape_cast %2 : vector<1x32xf32> to vector<1x1x1x32xf32>
    %c0_3 = arith.constant 0 : index
    %c0_4 = arith.constant 0 : index
    %c0_5 = arith.constant 0 : index
    %c0_6 = arith.constant 0 : index
    %4 = vector.load %arg2[%c0_3, %c0_4, %c0_5, %c0_6] : memref<1x4x4x32xf32, #tpu.memory_space<vmem>>, vector<1x4x4x32xf32>
    %5 = vector.broadcast %1 : vector<1x1x1x32xf32> to vector<1x4x4x32xf32>
    %6 = arith.mulf %4, %5 : vector<1x4x4x32xf32>
    %7 = vector.broadcast %3 : vector<1x1x1x32xf32> to vector<1x4x4x32xf32>
    %8 = arith.addf %6, %7 : vector<1x4x4x32xf32>
    %cst = arith.constant 0.000000e+00 : f32
    %9 = vector.broadcast %cst : f32 to vector<1x4x4x32xf32>
    %10 = arith.maximumf %8, %9 : vector<1x4x4x32xf32>
    %11 = arith.truncf %10 : vector<1x4x4x32xf32> to vector<1x4x4x32xbf16>
    %c0_7 = arith.constant 0 : index
    %c0_8 = arith.constant 0 : index
    %c0_9 = arith.constant 0 : index
    %c0_10 = arith.constant 0 : index
    %12 = vector.load %arg5[%c0_7, %c0_8, %c0_9, %c0_10] : memref<1x4x4x32xbf16, #tpu.memory_space<vmem>>, vector<1x4x4x32xbf16>
    tpu.vector_store %arg5[%c0_7, %c0_8, %c0_9, %c0_10], %11 {strides = array<i32>} : memref<1x4x4x32xbf16, #tpu.memory_space<vmem>>, vector<1x4x4x32xbf16>,
    return
  }
  func.func @transform_0(%arg0: i32, %arg1: i32) -> (i32, i32, i32, i32) {
    %c0_i32 = arith.constant 0 : i32
    %c0_i32_0 = arith.constant 0 : i32
    %c0_i32_1 = arith.constant 0 : i32
    return %arg0, %arg1, %c0_i32, %c0_i32_0 : i32, i32, i32, i32
  }
  func.func @transform_1(%arg0: i32, %arg1: i32) -> (i32, i32) {
    %c0_i32 = arith.constant 0 : i32
    %c0_i32_0 = arith.constant 0 : i32
    %c0_i32_1 = arith.constant 0 : i32
    return %c0_i32, %c0_i32_0 : i32, i32
  }
  func.func @transform_2(%arg0: i32, %arg1: i32) -> (i32, i32) {
    %c0_i32 = arith.constant 0 : i32
    %c0_i32_0 = arith.constant 0 : i32
    %c0_i32_1 = arith.constant 0 : i32
    return %c0_i32, %c0_i32_0 : i32, i32
  }
  func.func @transform_3(%arg0: i32, %arg1: i32) -> (i32, i32, i32, i32) {
    %c0_i32 = arith.constant 0 : i32
    %c0_i32_0 = arith.constant 0 : i32
    %c0_i32_1 = arith.constant 0 : i32
    return %arg0, %arg1, %c0_i32, %c0_i32_0 : i32, i32, i32, i32
  }
}

module attributes {stable_mosaic.version = 11 : i64} {
  func.func @kernel(%arg0: i32, %arg1: memref<32x144xbf16, #tpu.memory_space<vmem>>, %arg2: memref<144x32xbf16, #tpu.memory_space<vmem>>, %arg3: memref<32x32xf32, #tpu.memory_space<vmem>>, %arg4: memref<1x2x32xf32, #tpu.memory_space<vmem>>) attributes {dimension_semantics = [#tpu.dimension_semantics<parallel>], iteration_bounds = array<i64: 1>, scalar_prefetch = 0 : i64, scratch_operands = 0 : i64, tpu.core_type = #tpu.core_type<tc>, window_params = [{transform_indices = @transform_0, window_bounds = array<i64: 32, 144>}, {pipeline_mode = #tpu.pipeline_mode<synchronous>, transform_indices = @transform_1, window_bounds = array<i64: 144, 32>}, {transform_indices = @transform_2, window_bounds = array<i64: 32, 32>}, {transform_indices = @transform_3, window_bounds = array<i64: 1, 2, 32>}]} {
    %c0 = arith.constant 0 : index
    %c0_0 = arith.constant 0 : index
    %0 = vector.load %arg1[%c0, %c0_0] : memref<32x144xbf16, #tpu.memory_space<vmem>>, vector<32x144xbf16>
    %c0_1 = arith.constant 0 : index
    %c0_2 = arith.constant 0 : index
    %1 = vector.load %arg2[%c0_1, %c0_2] : memref<144x32xbf16, #tpu.memory_space<vmem>>, vector<144x32xbf16>
    %cst = arith.constant dense<0.000000e+00> : vector<32x32xf32>
    %2 = tpu.matmul %0, %1, %cst {dimension_numbers = #tpu.dot_dimension_numbers<[1], [0], [0], [1], [0, 0, 1, 1], [], []>} : vector<32x144xbf16>, vector<144x32xbf16>, vector<32x32xf32> -> vector<32x32xf32>
    %c0_3 = arith.constant 0 : index
    %c0_4 = arith.constant 0 : index
    %3 = vector.load %arg3[%c0_3, %c0_4] : memref<32x32xf32, #tpu.memory_space<vmem>>, vector<32x32xf32>
    tpu.vector_store %arg3[%c0_3, %c0_4], %2 {strides = array<i32>} : memref<32x32xf32, #tpu.memory_space<vmem>>, vector<32x32xf32>,
    %cst_5 = arith.constant dense<0.000000e+00> : vector<32xf32>
    %4 = vector.multi_reduction <add>, %2, %cst_5 [0] : vector<32x32xf32> to vector<32xf32>
    %5 = vector.shape_cast %4 : vector<32xf32> to vector<1x32xf32>
    %6 = arith.mulf %2, %2 : vector<32x32xf32>
    %cst_6 = arith.constant dense<0.000000e+00> : vector<32xf32>
    %7 = vector.multi_reduction <add>, %6, %cst_6 [0] : vector<32x32xf32> to vector<32xf32>
    %8 = vector.shape_cast %7 : vector<32xf32> to vector<1x32xf32>
    %9 = tpu.concatenate %5, %8 in 0 : vector<1x32xf32>, vector<1x32xf32> -> vector<2x32xf32>
    %10 = vector.shape_cast %9 : vector<2x32xf32> to vector<1x2x32xf32>
    %c0_7 = arith.constant 0 : index
    %c0_8 = arith.constant 0 : index
    %c0_9 = arith.constant 0 : index
    %11 = vector.load %arg4[%c0_7, %c0_8, %c0_9] : memref<1x2x32xf32, #tpu.memory_space<vmem>>, vector<1x2x32xf32>
    tpu.vector_store %arg4[%c0_7, %c0_8, %c0_9], %10 {strides = array<i32>} : memref<1x2x32xf32, #tpu.memory_space<vmem>>, vector<1x2x32xf32>,
    return
  }
  func.func @transform_0(%arg0: i32) -> (i32, i32) {
    %c0_i32 = arith.constant 0 : i32
    %c0_i32_0 = arith.constant 0 : i32
    return %arg0, %c0_i32 : i32, i32
  }
  func.func @transform_1(%arg0: i32) -> (i32, i32) {
    %c0_i32 = arith.constant 0 : i32
    %c0_i32_0 = arith.constant 0 : i32
    %c0_i32_1 = arith.constant 0 : i32
    return %c0_i32, %c0_i32_0 : i32, i32
  }
  func.func @transform_2(%arg0: i32) -> (i32, i32) {
    %c0_i32 = arith.constant 0 : i32
    %c0_i32_0 = arith.constant 0 : i32
    return %arg0, %c0_i32 : i32, i32
  }
  func.func @transform_3(%arg0: i32) -> (i32, i32, i32) {
    %c0_i32 = arith.constant 0 : i32
    %c0_i32_0 = arith.constant 0 : i32
    %c0_i32_1 = arith.constant 0 : i32
    return %arg0, %c0_i32, %c0_i32_0 : i32, i32, i32
  }
}

module attributes {stable_mosaic.version = 11 : i64} {
  func.func @_bn_relu_pool_kernel(%arg0: i32, %arg1: i32, %arg2: memref<1x4x4x32xf32, #tpu.memory_space<vmem>>, %arg3: memref<1x32xf32, #tpu.memory_space<vmem>>, %arg4: memref<1x32xf32, #tpu.memory_space<vmem>>, %arg5: memref<1x4x4x32xbf16, #tpu.memory_space<vmem>>, %arg6: memref<1x2x2x32xbf16, #tpu.memory_space<vmem>>, %arg7: memref<2x4x32xf32, #tpu.memory_space<vmem>>) attributes {dimension_semantics = [#tpu.dimension_semantics<parallel>, #tpu.dimension_semantics<parallel>], iteration_bounds = array<i64: 2, 1>, scalar_prefetch = 0 : i64, scratch_operands = 1 : i64, tpu.core_type = #tpu.core_type<tc>, window_params = [{transform_indices = @transform_0, window_bounds = array<i64: 1, 4, 4, 32>}, {pipeline_mode = #tpu.pipeline_mode<synchronous>, transform_indices = @transform_1, window_bounds = array<i64: 1, 32>}, {pipeline_mode = #tpu.pipeline_mode<synchronous>, transform_indices = @transform_2, window_bounds = array<i64: 1, 32>}, {transform_indices = @transform_3, window_bounds = array<i64: 1, 4, 4, 32>}, {transform_indices = @transform_4, window_bounds = array<i64: 1, 2, 2, 32>}]} {
    %c0 = arith.constant 0 : index
    %c0_0 = arith.constant 0 : index
    %0 = vector.load %arg3[%c0, %c0_0] : memref<1x32xf32, #tpu.memory_space<vmem>>, vector<1x32xf32>
    %1 = vector.shape_cast %0 : vector<1x32xf32> to vector<1x1x1x32xf32>
    %c0_1 = arith.constant 0 : index
    %c0_2 = arith.constant 0 : index
    %2 = vector.load %arg4[%c0_1, %c0_2] : memref<1x32xf32, #tpu.memory_space<vmem>>, vector<1x32xf32>
    %3 = vector.shape_cast %2 : vector<1x32xf32> to vector<1x1x1x32xf32>
    %c0_3 = arith.constant 0 : index
    %c0_4 = arith.constant 0 : index
    %c0_5 = arith.constant 0 : index
    %c0_6 = arith.constant 0 : index
    %4 = vector.load %arg2[%c0_3, %c0_4, %c0_5, %c0_6] : memref<1x4x4x32xf32, #tpu.memory_space<vmem>>, vector<1x4x4x32xf32>
    %5 = vector.broadcast %1 : vector<1x1x1x32xf32> to vector<1x4x4x32xf32>
    %6 = arith.mulf %4, %5 : vector<1x4x4x32xf32>
    %7 = vector.broadcast %3 : vector<1x1x1x32xf32> to vector<1x4x4x32xf32>
    %8 = arith.addf %6, %7 : vector<1x4x4x32xf32>
    %cst = arith.constant 0.000000e+00 : f32
    %9 = vector.broadcast %cst : f32 to vector<1x4x4x32xf32>
    %10 = arith.maximumf %8, %9 : vector<1x4x4x32xf32>
    %11 = arith.truncf %10 : vector<1x4x4x32xf32> to vector<1x4x4x32xbf16>
    %c0_7 = arith.constant 0 : index
    %c0_8 = arith.constant 0 : index
    %c0_9 = arith.constant 0 : index
    %c0_10 = arith.constant 0 : index
    %12 = vector.load %arg5[%c0_7, %c0_8, %c0_9, %c0_10] : memref<1x4x4x32xbf16, #tpu.memory_space<vmem>>, vector<1x4x4x32xbf16>
    tpu.vector_store %arg5[%c0_7, %c0_8, %c0_9, %c0_10], %11 {strides = array<i32>} : memref<1x4x4x32xbf16, #tpu.memory_space<vmem>>, vector<1x4x4x32xbf16>,
    %13 = vector.shape_cast %10 : vector<1x4x4x32xf32> to vector<2x2x4x32xf32>
    %cst_11 = arith.constant dense<0xFF800000> : vector<2x4x32xf32>
    %14 = vector.multi_reduction <maximumf>, %13, %cst_11 [1] : vector<2x2x4x32xf32> to vector<2x4x32xf32>
    %c0_12 = arith.constant 0 : index
    %c0_13 = arith.constant 0 : index
    %c0_14 = arith.constant 0 : index
    %15 = vector.load %arg7[%c0_12, %c0_13, %c0_14] : memref<2x4x32xf32, #tpu.memory_space<vmem>>, vector<2x4x32xf32>
    tpu.vector_store %arg7[%c0_12, %c0_13, %c0_14], %14 {strides = array<i32>} : memref<2x4x32xf32, #tpu.memory_space<vmem>>, vector<2x4x32xf32>,
    %c0_15 = arith.constant 0 : index
    %c0_16 = arith.constant 0 : index
    %c0_17 = arith.constant 0 : index
    %16 = tpu.strided_load %arg7[%c0_15, %c0_16, %c0_17] {strides = array<i32: 1, 2, 1>} : memref<2x4x32xf32, #tpu.memory_space<vmem>>, vector<2x2x32xf32>
    %c0_18 = arith.constant 0 : index
    %c1 = arith.constant 1 : index
    %c0_19 = arith.constant 0 : index
    %17 = tpu.strided_load %arg7[%c0_18, %c1, %c0_19] {strides = array<i32: 1, 2, 1>} : memref<2x4x32xf32, #tpu.memory_space<vmem>>, vector<2x2x32xf32>
    %18 = arith.maximumf %16, %17 : vector<2x2x32xf32>
    %19 = vector.shape_cast %18 : vector<2x2x32xf32> to vector<1x2x2x32xf32>
    %20 = arith.truncf %19 : vector<1x2x2x32xf32> to vector<1x2x2x32xbf16>
    %c0_20 = arith.constant 0 : index
    %c0_21 = arith.constant 0 : index
    %c0_22 = arith.constant 0 : index
    %c0_23 = arith.constant 0 : index
    %21 = vector.load %arg6[%c0_20, %c0_21, %c0_22, %c0_23] : memref<1x2x2x32xbf16, #tpu.memory_space<vmem>>, vector<1x2x2x32xbf16>
    tpu.vector_store %arg6[%c0_20, %c0_21, %c0_22, %c0_23], %20 {strides = array<i32>} : memref<1x2x2x32xbf16, #tpu.memory_space<vmem>>, vector<1x2x2x32xbf16>,
    return
  }
  func.func @transform_0(%arg0: i32, %arg1: i32) -> (i32, i32, i32, i32) {
    %c0_i32 = arith.constant 0 : i32
    %c0_i32_0 = arith.constant 0 : i32
    %c0_i32_1 = arith.constant 0 : i32
    return %arg0, %arg1, %c0_i32, %c0_i32_0 : i32, i32, i32, i32
  }
  func.func @transform_1(%arg0: i32, %arg1: i32) -> (i32, i32) {
    %c0_i32 = arith.constant 0 : i32
    %c0_i32_0 = arith.constant 0 : i32
    %c0_i32_1 = arith.constant 0 : i32
    return %c0_i32, %c0_i32_0 : i32, i32
  }
  func.func @transform_2(%arg0: i32, %arg1: i32) -> (i32, i32) {
    %c0_i32 = arith.constant 0 : i32
    %c0_i32_0 = arith.constant 0 : i32
    %c0_i32_1 = arith.constant 0 : i32
    return %c0_i32, %c0_i32_0 : i32, i32
  }
  func.func @transform_3(%arg0: i32, %arg1: i32) -> (i32, i32, i32, i32) {
    %c0_i32 = arith.constant 0 : i32
    %c0_i32_0 = arith.constant 0 : i32
    %c0_i32_1 = arith.constant 0 : i32
    return %arg0, %arg1, %c0_i32, %c0_i32_0 : i32, i32, i32, i32
  }
  func.func @transform_4(%arg0: i32, %arg1: i32) -> (i32, i32, i32, i32) {
    %c0_i32 = arith.constant 0 : i32
    %c0_i32_0 = arith.constant 0 : i32
    %c0_i32_1 = arith.constant 0 : i32
    return %arg0, %arg1, %c0_i32, %c0_i32_0 : i32, i32, i32, i32
  }
}

module attributes {stable_mosaic.version = 11 : i64} {
  func.func @kernel(%arg0: i32, %arg1: memref<32x288xbf16, #tpu.memory_space<vmem>>, %arg2: memref<288x32xbf16, #tpu.memory_space<vmem>>, %arg3: memref<32x32xf32, #tpu.memory_space<vmem>>, %arg4: memref<1x2x32xf32, #tpu.memory_space<vmem>>) attributes {dimension_semantics = [#tpu.dimension_semantics<parallel>], iteration_bounds = array<i64: 1>, scalar_prefetch = 0 : i64, scratch_operands = 0 : i64, tpu.core_type = #tpu.core_type<tc>, window_params = [{transform_indices = @transform_0, window_bounds = array<i64: 32, 288>}, {pipeline_mode = #tpu.pipeline_mode<synchronous>, transform_indices = @transform_1, window_bounds = array<i64: 288, 32>}, {transform_indices = @transform_2, window_bounds = array<i64: 32, 32>}, {transform_indices = @transform_3, window_bounds = array<i64: 1, 2, 32>}]} {
    %c0 = arith.constant 0 : index
    %c0_0 = arith.constant 0 : index
    %0 = vector.load %arg1[%c0, %c0_0] : memref<32x288xbf16, #tpu.memory_space<vmem>>, vector<32x288xbf16>
    %c0_1 = arith.constant 0 : index
    %c0_2 = arith.constant 0 : index
    %1 = vector.load %arg2[%c0_1, %c0_2] : memref<288x32xbf16, #tpu.memory_space<vmem>>, vector<288x32xbf16>
    %cst = arith.constant dense<0.000000e+00> : vector<32x32xf32>
    %2 = tpu.matmul %0, %1, %cst {dimension_numbers = #tpu.dot_dimension_numbers<[1], [0], [0], [1], [0, 0, 1, 1], [], []>} : vector<32x288xbf16>, vector<288x32xbf16>, vector<32x32xf32> -> vector<32x32xf32>
    %c0_3 = arith.constant 0 : index
    %c0_4 = arith.constant 0 : index
    %3 = vector.load %arg3[%c0_3, %c0_4] : memref<32x32xf32, #tpu.memory_space<vmem>>, vector<32x32xf32>
    tpu.vector_store %arg3[%c0_3, %c0_4], %2 {strides = array<i32>} : memref<32x32xf32, #tpu.memory_space<vmem>>, vector<32x32xf32>,
    %cst_5 = arith.constant dense<0.000000e+00> : vector<32xf32>
    %4 = vector.multi_reduction <add>, %2, %cst_5 [0] : vector<32x32xf32> to vector<32xf32>
    %5 = vector.shape_cast %4 : vector<32xf32> to vector<1x32xf32>
    %6 = arith.mulf %2, %2 : vector<32x32xf32>
    %cst_6 = arith.constant dense<0.000000e+00> : vector<32xf32>
    %7 = vector.multi_reduction <add>, %6, %cst_6 [0] : vector<32x32xf32> to vector<32xf32>
    %8 = vector.shape_cast %7 : vector<32xf32> to vector<1x32xf32>
    %9 = tpu.concatenate %5, %8 in 0 : vector<1x32xf32>, vector<1x32xf32> -> vector<2x32xf32>
    %10 = vector.shape_cast %9 : vector<2x32xf32> to vector<1x2x32xf32>
    %c0_7 = arith.constant 0 : index
    %c0_8 = arith.constant 0 : index
    %c0_9 = arith.constant 0 : index
    %11 = vector.load %arg4[%c0_7, %c0_8, %c0_9] : memref<1x2x32xf32, #tpu.memory_space<vmem>>, vector<1x2x32xf32>
    tpu.vector_store %arg4[%c0_7, %c0_8, %c0_9], %10 {strides = array<i32>} : memref<1x2x32xf32, #tpu.memory_space<vmem>>, vector<1x2x32xf32>,
    return
  }
  func.func @transform_0(%arg0: i32) -> (i32, i32) {
    %c0_i32 = arith.constant 0 : i32
    %c0_i32_0 = arith.constant 0 : i32
    return %arg0, %c0_i32 : i32, i32
  }
  func.func @transform_1(%arg0: i32) -> (i32, i32) {
    %c0_i32 = arith.constant 0 : i32
    %c0_i32_0 = arith.constant 0 : i32
    %c0_i32_1 = arith.constant 0 : i32
    return %c0_i32, %c0_i32_0 : i32, i32
  }
  func.func @transform_2(%arg0: i32) -> (i32, i32) {
    %c0_i32 = arith.constant 0 : i32
    %c0_i32_0 = arith.constant 0 : i32
    return %arg0, %c0_i32 : i32, i32
  }
  func.func @transform_3(%arg0: i32) -> (i32, i32, i32) {
    %c0_i32 = arith.constant 0 : i32
    %c0_i32_0 = arith.constant 0 : i32
    %c0_i32_1 = arith.constant 0 : i32
    return %arg0, %c0_i32, %c0_i32_0 : i32, i32, i32
  }
}

module attributes {stable_mosaic.version = 11 : i64} {
  func.func @kernel(%arg0: i32, %arg1: memref<8x288xbf16, #tpu.memory_space<vmem>>, %arg2: memref<288x64xbf16, #tpu.memory_space<vmem>>, %arg3: memref<8x64xf32, #tpu.memory_space<vmem>>, %arg4: memref<1x2x64xf32, #tpu.memory_space<vmem>>) attributes {dimension_semantics = [#tpu.dimension_semantics<parallel>], iteration_bounds = array<i64: 1>, scalar_prefetch = 0 : i64, scratch_operands = 0 : i64, tpu.core_type = #tpu.core_type<tc>, window_params = [{transform_indices = @transform_0, window_bounds = array<i64: 8, 288>}, {pipeline_mode = #tpu.pipeline_mode<synchronous>, transform_indices = @transform_1, window_bounds = array<i64: 288, 64>}, {transform_indices = @transform_2, window_bounds = array<i64: 8, 64>}, {transform_indices = @transform_3, window_bounds = array<i64: 1, 2, 64>}]} {
    %c0 = arith.constant 0 : index
    %c0_0 = arith.constant 0 : index
    %0 = vector.load %arg1[%c0, %c0_0] : memref<8x288xbf16, #tpu.memory_space<vmem>>, vector<8x288xbf16>
    %c0_1 = arith.constant 0 : index
    %c0_2 = arith.constant 0 : index
    %1 = vector.load %arg2[%c0_1, %c0_2] : memref<288x64xbf16, #tpu.memory_space<vmem>>, vector<288x64xbf16>
    %cst = arith.constant dense<0.000000e+00> : vector<8x64xf32>
    %2 = tpu.matmul %0, %1, %cst {dimension_numbers = #tpu.dot_dimension_numbers<[1], [0], [0], [1], [0, 0, 1, 1], [], []>} : vector<8x288xbf16>, vector<288x64xbf16>, vector<8x64xf32> -> vector<8x64xf32>
    %c0_3 = arith.constant 0 : index
    %c0_4 = arith.constant 0 : index
    %3 = vector.load %arg3[%c0_3, %c0_4] : memref<8x64xf32, #tpu.memory_space<vmem>>, vector<8x64xf32>
    tpu.vector_store %arg3[%c0_3, %c0_4], %2 {strides = array<i32>} : memref<8x64xf32, #tpu.memory_space<vmem>>, vector<8x64xf32>,
    %cst_5 = arith.constant dense<0.000000e+00> : vector<64xf32>
    %4 = vector.multi_reduction <add>, %2, %cst_5 [0] : vector<8x64xf32> to vector<64xf32>
    %5 = vector.shape_cast %4 : vector<64xf32> to vector<1x64xf32>
    %6 = arith.mulf %2, %2 : vector<8x64xf32>
    %cst_6 = arith.constant dense<0.000000e+00> : vector<64xf32>
    %7 = vector.multi_reduction <add>, %6, %cst_6 [0] : vector<8x64xf32> to vector<64xf32>
    %8 = vector.shape_cast %7 : vector<64xf32> to vector<1x64xf32>
    %9 = tpu.concatenate %5, %8 in 0 : vector<1x64xf32>, vector<1x64xf32> -> vector<2x64xf32>
    %10 = vector.shape_cast %9 : vector<2x64xf32> to vector<1x2x64xf32>
    %c0_7 = arith.constant 0 : index
    %c0_8 = arith.constant 0 : index
    %c0_9 = arith.constant 0 : index
    %11 = vector.load %arg4[%c0_7, %c0_8, %c0_9] : memref<1x2x64xf32, #tpu.memory_space<vmem>>, vector<1x2x64xf32>
    tpu.vector_store %arg4[%c0_7, %c0_8, %c0_9], %10 {strides = array<i32>} : memref<1x2x64xf32, #tpu.memory_space<vmem>>, vector<1x2x64xf32>,
    return
  }
  func.func @transform_0(%arg0: i32) -> (i32, i32) {
    %c0_i32 = arith.constant 0 : i32
    %c0_i32_0 = arith.constant 0 : i32
    return %arg0, %c0_i32 : i32, i32
  }
  func.func @transform_1(%arg0: i32) -> (i32, i32) {
    %c0_i32 = arith.constant 0 : i32
    %c0_i32_0 = arith.constant 0 : i32
    %c0_i32_1 = arith.constant 0 : i32
    return %c0_i32, %c0_i32_0 : i32, i32
  }
  func.func @transform_2(%arg0: i32) -> (i32, i32) {
    %c0_i32 = arith.constant 0 : i32
    %c0_i32_0 = arith.constant 0 : i32
    return %arg0, %c0_i32 : i32, i32
  }
  func.func @transform_3(%arg0: i32) -> (i32, i32, i32) {
    %c0_i32 = arith.constant 0 : i32
    %c0_i32_0 = arith.constant 0 : i32
    %c0_i32_1 = arith.constant 0 : i32
    return %arg0, %c0_i32, %c0_i32_0 : i32, i32, i32
  }
}

module attributes {stable_mosaic.version = 11 : i64} {
  func.func @_bn_relu_kernel(%arg0: i32, %arg1: i32, %arg2: memref<1x2x2x64xf32, #tpu.memory_space<vmem>>, %arg3: memref<1x64xf32, #tpu.memory_space<vmem>>, %arg4: memref<1x64xf32, #tpu.memory_space<vmem>>, %arg5: memref<1x2x2x64xbf16, #tpu.memory_space<vmem>>) attributes {dimension_semantics = [#tpu.dimension_semantics<parallel>, #tpu.dimension_semantics<parallel>], iteration_bounds = array<i64: 2, 1>, scalar_prefetch = 0 : i64, scratch_operands = 0 : i64, tpu.core_type = #tpu.core_type<tc>, window_params = [{transform_indices = @transform_0, window_bounds = array<i64: 1, 2, 2, 64>}, {pipeline_mode = #tpu.pipeline_mode<synchronous>, transform_indices = @transform_1, window_bounds = array<i64: 1, 64>}, {pipeline_mode = #tpu.pipeline_mode<synchronous>, transform_indices = @transform_2, window_bounds = array<i64: 1, 64>}, {transform_indices = @transform_3, window_bounds = array<i64: 1, 2, 2, 64>}]} {
    %c0 = arith.constant 0 : index
    %c0_0 = arith.constant 0 : index
    %0 = vector.load %arg3[%c0, %c0_0] : memref<1x64xf32, #tpu.memory_space<vmem>>, vector<1x64xf32>
    %1 = vector.shape_cast %0 : vector<1x64xf32> to vector<1x1x1x64xf32>
    %c0_1 = arith.constant 0 : index
    %c0_2 = arith.constant 0 : index
    %2 = vector.load %arg4[%c0_1, %c0_2] : memref<1x64xf32, #tpu.memory_space<vmem>>, vector<1x64xf32>
    %3 = vector.shape_cast %2 : vector<1x64xf32> to vector<1x1x1x64xf32>
    %c0_3 = arith.constant 0 : index
    %c0_4 = arith.constant 0 : index
    %c0_5 = arith.constant 0 : index
    %c0_6 = arith.constant 0 : index
    %4 = vector.load %arg2[%c0_3, %c0_4, %c0_5, %c0_6] : memref<1x2x2x64xf32, #tpu.memory_space<vmem>>, vector<1x2x2x64xf32>
    %5 = vector.broadcast %1 : vector<1x1x1x64xf32> to vector<1x2x2x64xf32>
    %6 = arith.mulf %4, %5 : vector<1x2x2x64xf32>
    %7 = vector.broadcast %3 : vector<1x1x1x64xf32> to vector<1x2x2x64xf32>
    %8 = arith.addf %6, %7 : vector<1x2x2x64xf32>
    %cst = arith.constant 0.000000e+00 : f32
    %9 = vector.broadcast %cst : f32 to vector<1x2x2x64xf32>
    %10 = arith.maximumf %8, %9 : vector<1x2x2x64xf32>
    %11 = arith.truncf %10 : vector<1x2x2x64xf32> to vector<1x2x2x64xbf16>
    %c0_7 = arith.constant 0 : index
    %c0_8 = arith.constant 0 : index
    %c0_9 = arith.constant 0 : index
    %c0_10 = arith.constant 0 : index
    %12 = vector.load %arg5[%c0_7, %c0_8, %c0_9, %c0_10] : memref<1x2x2x64xbf16, #tpu.memory_space<vmem>>, vector<1x2x2x64xbf16>
    tpu.vector_store %arg5[%c0_7, %c0_8, %c0_9, %c0_10], %11 {strides = array<i32>} : memref<1x2x2x64xbf16, #tpu.memory_space<vmem>>, vector<1x2x2x64xbf16>,
    return
  }
  func.func @transform_0(%arg0: i32, %arg1: i32) -> (i32, i32, i32, i32) {
    %c0_i32 = arith.constant 0 : i32
    %c0_i32_0 = arith.constant 0 : i32
    %c0_i32_1 = arith.constant 0 : i32
    return %arg0, %arg1, %c0_i32, %c0_i32_0 : i32, i32, i32, i32
  }
  func.func @transform_1(%arg0: i32, %arg1: i32) -> (i32, i32) {
    %c0_i32 = arith.constant 0 : i32
    %c0_i32_0 = arith.constant 0 : i32
    %c0_i32_1 = arith.constant 0 : i32
    return %c0_i32, %c0_i32_0 : i32, i32
  }
  func.func @transform_2(%arg0: i32, %arg1: i32) -> (i32, i32) {
    %c0_i32 = arith.constant 0 : i32
    %c0_i32_0 = arith.constant 0 : i32
    %c0_i32_1 = arith.constant 0 : i32
    return %c0_i32, %c0_i32_0 : i32, i32
  }
  func.func @transform_3(%arg0: i32, %arg1: i32) -> (i32, i32, i32, i32) {
    %c0_i32 = arith.constant 0 : i32
    %c0_i32_0 = arith.constant 0 : i32
    %c0_i32_1 = arith.constant 0 : i32
    return %arg0, %arg1, %c0_i32, %c0_i32_0 : i32, i32, i32, i32
  }
}

module attributes {stable_mosaic.version = 11 : i64} {
  func.func @_bn_relu_pool_kernel(%arg0: i32, %arg1: i32, %arg2: memref<1x2x2x64xf32, #tpu.memory_space<vmem>>, %arg3: memref<1x64xf32, #tpu.memory_space<vmem>>, %arg4: memref<1x64xf32, #tpu.memory_space<vmem>>, %arg5: memref<1x2x2x64xbf16, #tpu.memory_space<vmem>>, %arg6: memref<1x1x1x64xbf16, #tpu.memory_space<vmem>>, %arg7: memref<1x2x64xf32, #tpu.memory_space<vmem>>) attributes {dimension_semantics = [#tpu.dimension_semantics<parallel>, #tpu.dimension_semantics<parallel>], iteration_bounds = array<i64: 2, 1>, scalar_prefetch = 0 : i64, scratch_operands = 1 : i64, tpu.core_type = #tpu.core_type<tc>, window_params = [{transform_indices = @transform_0, window_bounds = array<i64: 1, 2, 2, 64>}, {pipeline_mode = #tpu.pipeline_mode<synchronous>, transform_indices = @transform_1, window_bounds = array<i64: 1, 64>}, {pipeline_mode = #tpu.pipeline_mode<synchronous>, transform_indices = @transform_2, window_bounds = array<i64: 1, 64>}, {transform_indices = @transform_3, window_bounds = array<i64: 1, 2, 2, 64>}, {transform_indices = @transform_4, window_bounds = array<i64: 1, 1, 1, 64>}]} {
    %c0 = arith.constant 0 : index
    %c0_0 = arith.constant 0 : index
    %0 = vector.load %arg3[%c0, %c0_0] : memref<1x64xf32, #tpu.memory_space<vmem>>, vector<1x64xf32>
    %1 = vector.shape_cast %0 : vector<1x64xf32> to vector<1x1x1x64xf32>
    %c0_1 = arith.constant 0 : index
    %c0_2 = arith.constant 0 : index
    %2 = vector.load %arg4[%c0_1, %c0_2] : memref<1x64xf32, #tpu.memory_space<vmem>>, vector<1x64xf32>
    %3 = vector.shape_cast %2 : vector<1x64xf32> to vector<1x1x1x64xf32>
    %c0_3 = arith.constant 0 : index
    %c0_4 = arith.constant 0 : index
    %c0_5 = arith.constant 0 : index
    %c0_6 = arith.constant 0 : index
    %4 = vector.load %arg2[%c0_3, %c0_4, %c0_5, %c0_6] : memref<1x2x2x64xf32, #tpu.memory_space<vmem>>, vector<1x2x2x64xf32>
    %5 = vector.broadcast %1 : vector<1x1x1x64xf32> to vector<1x2x2x64xf32>
    %6 = arith.mulf %4, %5 : vector<1x2x2x64xf32>
    %7 = vector.broadcast %3 : vector<1x1x1x64xf32> to vector<1x2x2x64xf32>
    %8 = arith.addf %6, %7 : vector<1x2x2x64xf32>
    %cst = arith.constant 0.000000e+00 : f32
    %9 = vector.broadcast %cst : f32 to vector<1x2x2x64xf32>
    %10 = arith.maximumf %8, %9 : vector<1x2x2x64xf32>
    %11 = arith.truncf %10 : vector<1x2x2x64xf32> to vector<1x2x2x64xbf16>
    %c0_7 = arith.constant 0 : index
    %c0_8 = arith.constant 0 : index
    %c0_9 = arith.constant 0 : index
    %c0_10 = arith.constant 0 : index
    %12 = vector.load %arg5[%c0_7, %c0_8, %c0_9, %c0_10] : memref<1x2x2x64xbf16, #tpu.memory_space<vmem>>, vector<1x2x2x64xbf16>
    tpu.vector_store %arg5[%c0_7, %c0_8, %c0_9, %c0_10], %11 {strides = array<i32>} : memref<1x2x2x64xbf16, #tpu.memory_space<vmem>>, vector<1x2x2x64xbf16>,
    %cst_11 = arith.constant dense<0xFF800000> : vector<1x2x64xf32>
    %13 = vector.multi_reduction <maximumf>, %10, %cst_11 [1] : vector<1x2x2x64xf32> to vector<1x2x64xf32>
    %c0_12 = arith.constant 0 : index
    %c0_13 = arith.constant 0 : index
    %c0_14 = arith.constant 0 : index
    %14 = vector.load %arg7[%c0_12, %c0_13, %c0_14] : memref<1x2x64xf32, #tpu.memory_space<vmem>>, vector<1x2x64xf32>
    tpu.vector_store %arg7[%c0_12, %c0_13, %c0_14], %13 {strides = array<i32>} : memref<1x2x64xf32, #tpu.memory_space<vmem>>, vector<1x2x64xf32>,
    %c0_15 = arith.constant 0 : index
    %c0_16 = arith.constant 0 : index
    %c0_17 = arith.constant 0 : index
    %15 = tpu.strided_load %arg7[%c0_15, %c0_16, %c0_17] {strides = array<i32: 1, 2, 1>} : memref<1x2x64xf32, #tpu.memory_space<vmem>>, vector<1x1x64xf32>
    %c0_18 = arith.constant 0 : index
    %c1 = arith.constant 1 : index
    %c0_19 = arith.constant 0 : index
    %16 = tpu.strided_load %arg7[%c0_18, %c1, %c0_19] {strides = array<i32: 1, 2, 1>} : memref<1x2x64xf32, #tpu.memory_space<vmem>>, vector<1x1x64xf32>
    %17 = arith.maximumf %15, %16 : vector<1x1x64xf32>
    %18 = vector.shape_cast %17 : vector<1x1x64xf32> to vector<1x1x1x64xf32>
    %19 = arith.truncf %18 : vector<1x1x1x64xf32> to vector<1x1x1x64xbf16>
    %c0_20 = arith.constant 0 : index
    %c0_21 = arith.constant 0 : index
    %c0_22 = arith.constant 0 : index
    %c0_23 = arith.constant 0 : index
    %20 = vector.load %arg6[%c0_20, %c0_21, %c0_22, %c0_23] : memref<1x1x1x64xbf16, #tpu.memory_space<vmem>>, vector<1x1x1x64xbf16>
    tpu.vector_store %arg6[%c0_20, %c0_21, %c0_22, %c0_23], %19 {strides = array<i32>} : memref<1x1x1x64xbf16, #tpu.memory_space<vmem>>, vector<1x1x1x64xbf16>,
    return
  }
  func.func @transform_0(%arg0: i32, %arg1: i32) -> (i32, i32, i32, i32) {
    %c0_i32 = arith.constant 0 : i32
    %c0_i32_0 = arith.constant 0 : i32
    %c0_i32_1 = arith.constant 0 : i32
    return %arg0, %arg1, %c0_i32, %c0_i32_0 : i32, i32, i32, i32
  }
  func.func @transform_1(%arg0: i32, %arg1: i32) -> (i32, i32) {
    %c0_i32 = arith.constant 0 : i32
    %c0_i32_0 = arith.constant 0 : i32
    %c0_i32_1 = arith.constant 0 : i32
    return %c0_i32, %c0_i32_0 : i32, i32
  }
  func.func @transform_2(%arg0: i32, %arg1: i32) -> (i32, i32) {
    %c0_i32 = arith.constant 0 : i32
    %c0_i32_0 = arith.constant 0 : i32
    %c0_i32_1 = arith.constant 0 : i32
    return %c0_i32, %c0_i32_0 : i32, i32
  }
  func.func @transform_3(%arg0: i32, %arg1: i32) -> (i32, i32, i32, i32) {
    %c0_i32 = arith.constant 0 : i32
    %c0_i32_0 = arith.constant 0 : i32
    %c0_i32_1 = arith.constant 0 : i32
    return %arg0, %arg1, %c0_i32, %c0_i32_0 : i32, i32, i32, i32
  }
  func.func @transform_4(%arg0: i32, %arg1: i32) -> (i32, i32, i32, i32) {
    %c0_i32 = arith.constant 0 : i32
    %c0_i32_0 = arith.constant 0 : i32
    %c0_i32_1 = arith.constant 0 : i32
    return %arg0, %arg1, %c0_i32, %c0_i32_0 : i32, i32, i32, i32
  }
}

module attributes {stable_mosaic.version = 11 : i64} {
  func.func @kernel(%arg0: i32, %arg1: memref<8x576xbf16, #tpu.memory_space<vmem>>, %arg2: memref<576x64xbf16, #tpu.memory_space<vmem>>, %arg3: memref<8x64xf32, #tpu.memory_space<vmem>>, %arg4: memref<1x2x64xf32, #tpu.memory_space<vmem>>) attributes {dimension_semantics = [#tpu.dimension_semantics<parallel>], iteration_bounds = array<i64: 1>, scalar_prefetch = 0 : i64, scratch_operands = 0 : i64, tpu.core_type = #tpu.core_type<tc>, window_params = [{transform_indices = @transform_0, window_bounds = array<i64: 8, 576>}, {pipeline_mode = #tpu.pipeline_mode<synchronous>, transform_indices = @transform_1, window_bounds = array<i64: 576, 64>}, {transform_indices = @transform_2, window_bounds = array<i64: 8, 64>}, {transform_indices = @transform_3, window_bounds = array<i64: 1, 2, 64>}]} {
    %c0 = arith.constant 0 : index
    %c0_0 = arith.constant 0 : index
    %0 = vector.load %arg1[%c0, %c0_0] : memref<8x576xbf16, #tpu.memory_space<vmem>>, vector<8x576xbf16>
    %c0_1 = arith.constant 0 : index
    %c0_2 = arith.constant 0 : index
    %1 = vector.load %arg2[%c0_1, %c0_2] : memref<576x64xbf16, #tpu.memory_space<vmem>>, vector<576x64xbf16>
    %cst = arith.constant dense<0.000000e+00> : vector<8x64xf32>
    %2 = tpu.matmul %0, %1, %cst {dimension_numbers = #tpu.dot_dimension_numbers<[1], [0], [0], [1], [0, 0, 1, 1], [], []>} : vector<8x576xbf16>, vector<576x64xbf16>, vector<8x64xf32> -> vector<8x64xf32>
    %c0_3 = arith.constant 0 : index
    %c0_4 = arith.constant 0 : index
    %3 = vector.load %arg3[%c0_3, %c0_4] : memref<8x64xf32, #tpu.memory_space<vmem>>, vector<8x64xf32>
    tpu.vector_store %arg3[%c0_3, %c0_4], %2 {strides = array<i32>} : memref<8x64xf32, #tpu.memory_space<vmem>>, vector<8x64xf32>,
    %cst_5 = arith.constant dense<0.000000e+00> : vector<64xf32>
    %4 = vector.multi_reduction <add>, %2, %cst_5 [0] : vector<8x64xf32> to vector<64xf32>
    %5 = vector.shape_cast %4 : vector<64xf32> to vector<1x64xf32>
    %6 = arith.mulf %2, %2 : vector<8x64xf32>
    %cst_6 = arith.constant dense<0.000000e+00> : vector<64xf32>
    %7 = vector.multi_reduction <add>, %6, %cst_6 [0] : vector<8x64xf32> to vector<64xf32>
    %8 = vector.shape_cast %7 : vector<64xf32> to vector<1x64xf32>
    %9 = tpu.concatenate %5, %8 in 0 : vector<1x64xf32>, vector<1x64xf32> -> vector<2x64xf32>
    %10 = vector.shape_cast %9 : vector<2x64xf32> to vector<1x2x64xf32>
    %c0_7 = arith.constant 0 : index
    %c0_8 = arith.constant 0 : index
    %c0_9 = arith.constant 0 : index
    %11 = vector.load %arg4[%c0_7, %c0_8, %c0_9] : memref<1x2x64xf32, #tpu.memory_space<vmem>>, vector<1x2x64xf32>
    tpu.vector_store %arg4[%c0_7, %c0_8, %c0_9], %10 {strides = array<i32>} : memref<1x2x64xf32, #tpu.memory_space<vmem>>, vector<1x2x64xf32>,
    return
  }
  func.func @transform_0(%arg0: i32) -> (i32, i32) {
    %c0_i32 = arith.constant 0 : i32
    %c0_i32_0 = arith.constant 0 : i32
    return %arg0, %c0_i32 : i32, i32
  }
  func.func @transform_1(%arg0: i32) -> (i32, i32) {
    %c0_i32 = arith.constant 0 : i32
    %c0_i32_0 = arith.constant 0 : i32
    %c0_i32_1 = arith.constant 0 : i32
    return %c0_i32, %c0_i32_0 : i32, i32
  }
  func.func @transform_2(%arg0: i32) -> (i32, i32) {
    %c0_i32 = arith.constant 0 : i32
    %c0_i32_0 = arith.constant 0 : i32
    return %arg0, %c0_i32 : i32, i32
  }
  func.func @transform_3(%arg0: i32) -> (i32, i32, i32) {
    %c0_i32 = arith.constant 0 : i32
    %c0_i32_0 = arith.constant 0 : i32
    %c0_i32_1 = arith.constant 0 : i32
    return %arg0, %c0_i32, %c0_i32_0 : i32, i32, i32
  }
}

module attributes {stable_mosaic.version = 11 : i64} {
  func.func @kernel(%arg0: i32, %arg1: memref<2x576xbf16, #tpu.memory_space<vmem>>, %arg2: memref<576x128xbf16, #tpu.memory_space<vmem>>, %arg3: memref<2x128xf32, #tpu.memory_space<vmem>>, %arg4: memref<1x2x128xf32, #tpu.memory_space<vmem>>) attributes {dimension_semantics = [#tpu.dimension_semantics<parallel>], iteration_bounds = array<i64: 1>, scalar_prefetch = 0 : i64, scratch_operands = 0 : i64, tpu.core_type = #tpu.core_type<tc>, window_params = [{transform_indices = @transform_0, window_bounds = array<i64: 2, 576>}, {pipeline_mode = #tpu.pipeline_mode<synchronous>, transform_indices = @transform_1, window_bounds = array<i64: 576, 128>}, {transform_indices = @transform_2, window_bounds = array<i64: 2, 128>}, {transform_indices = @transform_3, window_bounds = array<i64: 1, 2, 128>}]} {
    %c0 = arith.constant 0 : index
    %c0_0 = arith.constant 0 : index
    %0 = vector.load %arg1[%c0, %c0_0] : memref<2x576xbf16, #tpu.memory_space<vmem>>, vector<2x576xbf16>
    %c0_1 = arith.constant 0 : index
    %c0_2 = arith.constant 0 : index
    %1 = vector.load %arg2[%c0_1, %c0_2] : memref<576x128xbf16, #tpu.memory_space<vmem>>, vector<576x128xbf16>
    %cst = arith.constant dense<0.000000e+00> : vector<2x128xf32>
    %2 = tpu.matmul %0, %1, %cst {dimension_numbers = #tpu.dot_dimension_numbers<[1], [0], [0], [1], [0, 0, 1, 1], [], []>} : vector<2x576xbf16>, vector<576x128xbf16>, vector<2x128xf32> -> vector<2x128xf32>
    %c0_3 = arith.constant 0 : index
    %c0_4 = arith.constant 0 : index
    %3 = vector.load %arg3[%c0_3, %c0_4] : memref<2x128xf32, #tpu.memory_space<vmem>>, vector<2x128xf32>
    tpu.vector_store %arg3[%c0_3, %c0_4], %2 {strides = array<i32>} : memref<2x128xf32, #tpu.memory_space<vmem>>, vector<2x128xf32>,
    %cst_5 = arith.constant dense<0.000000e+00> : vector<128xf32>
    %4 = vector.multi_reduction <add>, %2, %cst_5 [0] : vector<2x128xf32> to vector<128xf32>
    %5 = vector.shape_cast %4 : vector<128xf32> to vector<1x128xf32>
    %6 = arith.mulf %2, %2 : vector<2x128xf32>
    %cst_6 = arith.constant dense<0.000000e+00> : vector<128xf32>
    %7 = vector.multi_reduction <add>, %6, %cst_6 [0] : vector<2x128xf32> to vector<128xf32>
    %8 = vector.shape_cast %7 : vector<128xf32> to vector<1x128xf32>
    %9 = tpu.concatenate %5, %8 in 0 : vector<1x128xf32>, vector<1x128xf32> -> vector<2x128xf32>
    %10 = vector.shape_cast %9 : vector<2x128xf32> to vector<1x2x128xf32>
    %c0_7 = arith.constant 0 : index
    %c0_8 = arith.constant 0 : index
    %c0_9 = arith.constant 0 : index
    %11 = vector.load %arg4[%c0_7, %c0_8, %c0_9] : memref<1x2x128xf32, #tpu.memory_space<vmem>>, vector<1x2x128xf32>
    tpu.vector_store %arg4[%c0_7, %c0_8, %c0_9], %10 {strides = array<i32>} : memref<1x2x128xf32, #tpu.memory_space<vmem>>, vector<1x2x128xf32>,
    return
  }
  func.func @transform_0(%arg0: i32) -> (i32, i32) {
    %c0_i32 = arith.constant 0 : i32
    %c0_i32_0 = arith.constant 0 : i32
    return %arg0, %c0_i32 : i32, i32
  }
  func.func @transform_1(%arg0: i32) -> (i32, i32) {
    %c0_i32 = arith.constant 0 : i32
    %c0_i32_0 = arith.constant 0 : i32
    %c0_i32_1 = arith.constant 0 : i32
    return %c0_i32, %c0_i32_0 : i32, i32
  }
  func.func @transform_2(%arg0: i32) -> (i32, i32) {
    %c0_i32 = arith.constant 0 : i32
    %c0_i32_0 = arith.constant 0 : i32
    return %arg0, %c0_i32 : i32, i32
  }
  func.func @transform_3(%arg0: i32) -> (i32, i32, i32) {
    %c0_i32 = arith.constant 0 : i32
    %c0_i32_0 = arith.constant 0 : i32
    %c0_i32_1 = arith.constant 0 : i32
    return %arg0, %c0_i32, %c0_i32_0 : i32, i32, i32
  }
}

module attributes {stable_mosaic.version = 11 : i64} {
  func.func @_bn_relu_kernel(%arg0: i32, %arg1: i32, %arg2: memref<1x1x1x128xf32, #tpu.memory_space<vmem>>, %arg3: memref<1x128xf32, #tpu.memory_space<vmem>>, %arg4: memref<1x128xf32, #tpu.memory_space<vmem>>, %arg5: memref<1x1x1x128xbf16, #tpu.memory_space<vmem>>) attributes {dimension_semantics = [#tpu.dimension_semantics<parallel>, #tpu.dimension_semantics<parallel>], iteration_bounds = array<i64: 2, 1>, scalar_prefetch = 0 : i64, scratch_operands = 0 : i64, tpu.core_type = #tpu.core_type<tc>, window_params = [{transform_indices = @transform_0, window_bounds = array<i64: 1, 1, 1, 128>}, {pipeline_mode = #tpu.pipeline_mode<synchronous>, transform_indices = @transform_1, window_bounds = array<i64: 1, 128>}, {pipeline_mode = #tpu.pipeline_mode<synchronous>, transform_indices = @transform_2, window_bounds = array<i64: 1, 128>}, {transform_indices = @transform_3, window_bounds = array<i64: 1, 1, 1, 128>}]} {
    %c0 = arith.constant 0 : index
    %c0_0 = arith.constant 0 : index
    %0 = vector.load %arg3[%c0, %c0_0] : memref<1x128xf32, #tpu.memory_space<vmem>>, vector<1x128xf32>
    %1 = vector.shape_cast %0 : vector<1x128xf32> to vector<1x1x1x128xf32>
    %c0_1 = arith.constant 0 : index
    %c0_2 = arith.constant 0 : index
    %2 = vector.load %arg4[%c0_1, %c0_2] : memref<1x128xf32, #tpu.memory_space<vmem>>, vector<1x128xf32>
    %3 = vector.shape_cast %2 : vector<1x128xf32> to vector<1x1x1x128xf32>
    %c0_3 = arith.constant 0 : index
    %c0_4 = arith.constant 0 : index
    %c0_5 = arith.constant 0 : index
    %c0_6 = arith.constant 0 : index
    %4 = vector.load %arg2[%c0_3, %c0_4, %c0_5, %c0_6] : memref<1x1x1x128xf32, #tpu.memory_space<vmem>>, vector<1x1x1x128xf32>
    %5 = arith.mulf %4, %1 : vector<1x1x1x128xf32>
    %6 = arith.addf %5, %3 : vector<1x1x1x128xf32>
    %cst = arith.constant 0.000000e+00 : f32
    %7 = vector.broadcast %cst : f32 to vector<1x1x1x128xf32>
    %8 = arith.maximumf %6, %7 : vector<1x1x1x128xf32>
    %9 = arith.truncf %8 : vector<1x1x1x128xf32> to vector<1x1x1x128xbf16>
    %c0_7 = arith.constant 0 : index
    %c0_8 = arith.constant 0 : index
    %c0_9 = arith.constant 0 : index
    %c0_10 = arith.constant 0 : index
    %10 = vector.load %arg5[%c0_7, %c0_8, %c0_9, %c0_10] : memref<1x1x1x128xbf16, #tpu.memory_space<vmem>>, vector<1x1x1x128xbf16>
    tpu.vector_store %arg5[%c0_7, %c0_8, %c0_9, %c0_10], %9 {strides = array<i32>} : memref<1x1x1x128xbf16, #tpu.memory_space<vmem>>, vector<1x1x1x128xbf16>,
    return
  }
  func.func @transform_0(%arg0: i32, %arg1: i32) -> (i32, i32, i32, i32) {
    %c0_i32 = arith.constant 0 : i32
    %c0_i32_0 = arith.constant 0 : i32
    %c0_i32_1 = arith.constant 0 : i32
    return %arg0, %arg1, %c0_i32, %c0_i32_0 : i32, i32, i32, i32
  }
  func.func @transform_1(%arg0: i32, %arg1: i32) -> (i32, i32) {
    %c0_i32 = arith.constant 0 : i32
    %c0_i32_0 = arith.constant 0 : i32
    %c0_i32_1 = arith.constant 0 : i32
    return %c0_i32, %c0_i32_0 : i32, i32
  }
  func.func @transform_2(%arg0: i32, %arg1: i32) -> (i32, i32) {
    %c0_i32 = arith.constant 0 : i32
    %c0_i32_0 = arith.constant 0 : i32
    %c0_i32_1 = arith.constant 0 : i32
    return %c0_i32, %c0_i32_0 : i32, i32
  }
  func.func @transform_3(%arg0: i32, %arg1: i32) -> (i32, i32, i32, i32) {
    %c0_i32 = arith.constant 0 : i32
    %c0_i32_0 = arith.constant 0 : i32
    %c0_i32_1 = arith.constant 0 : i32
    return %arg0, %arg1, %c0_i32, %c0_i32_0 : i32, i32, i32, i32
  }
}

module attributes {stable_mosaic.version = 11 : i64} {
  func.func @kernel(%arg0: i32, %arg1: memref<2x1152xbf16, #tpu.memory_space<vmem>>, %arg2: memref<1152x128xbf16, #tpu.memory_space<vmem>>, %arg3: memref<2x128xf32, #tpu.memory_space<vmem>>, %arg4: memref<1x2x128xf32, #tpu.memory_space<vmem>>) attributes {dimension_semantics = [#tpu.dimension_semantics<parallel>], iteration_bounds = array<i64: 1>, scalar_prefetch = 0 : i64, scratch_operands = 0 : i64, tpu.core_type = #tpu.core_type<tc>, window_params = [{transform_indices = @transform_0, window_bounds = array<i64: 2, 1152>}, {pipeline_mode = #tpu.pipeline_mode<synchronous>, transform_indices = @transform_1, window_bounds = array<i64: 1152, 128>}, {transform_indices = @transform_2, window_bounds = array<i64: 2, 128>}, {transform_indices = @transform_3, window_bounds = array<i64: 1, 2, 128>}]} {
    %c0 = arith.constant 0 : index
    %c0_0 = arith.constant 0 : index
    %0 = vector.load %arg1[%c0, %c0_0] : memref<2x1152xbf16, #tpu.memory_space<vmem>>, vector<2x1152xbf16>
    %c0_1 = arith.constant 0 : index
    %c0_2 = arith.constant 0 : index
    %1 = vector.load %arg2[%c0_1, %c0_2] : memref<1152x128xbf16, #tpu.memory_space<vmem>>, vector<1152x128xbf16>
    %cst = arith.constant dense<0.000000e+00> : vector<2x128xf32>
    %2 = tpu.matmul %0, %1, %cst {dimension_numbers = #tpu.dot_dimension_numbers<[1], [0], [0], [1], [0, 0, 1, 1], [], []>} : vector<2x1152xbf16>, vector<1152x128xbf16>, vector<2x128xf32> -> vector<2x128xf32>
    %c0_3 = arith.constant 0 : index
    %c0_4 = arith.constant 0 : index
    %3 = vector.load %arg3[%c0_3, %c0_4] : memref<2x128xf32, #tpu.memory_space<vmem>>, vector<2x128xf32>
    tpu.vector_store %arg3[%c0_3, %c0_4], %2 {strides = array<i32>} : memref<2x128xf32, #tpu.memory_space<vmem>>, vector<2x128xf32>,
    %cst_5 = arith.constant dense<0.000000e+00> : vector<128xf32>
    %4 = vector.multi_reduction <add>, %2, %cst_5 [0] : vector<2x128xf32> to vector<128xf32>
    %5 = vector.shape_cast %4 : vector<128xf32> to vector<1x128xf32>
    %6 = arith.mulf %2, %2 : vector<2x128xf32>
    %cst_6 = arith.constant dense<0.000000e+00> : vector<128xf32>
    %7 = vector.multi_reduction <add>, %6, %cst_6 [0] : vector<2x128xf32> to vector<128xf32>
    %8 = vector.shape_cast %7 : vector<128xf32> to vector<1x128xf32>
    %9 = tpu.concatenate %5, %8 in 0 : vector<1x128xf32>, vector<1x128xf32> -> vector<2x128xf32>
    %10 = vector.shape_cast %9 : vector<2x128xf32> to vector<1x2x128xf32>
    %c0_7 = arith.constant 0 : index
    %c0_8 = arith.constant 0 : index
    %c0_9 = arith.constant 0 : index
    %11 = vector.load %arg4[%c0_7, %c0_8, %c0_9] : memref<1x2x128xf32, #tpu.memory_space<vmem>>, vector<1x2x128xf32>
    tpu.vector_store %arg4[%c0_7, %c0_8, %c0_9], %10 {strides = array<i32>} : memref<1x2x128xf32, #tpu.memory_space<vmem>>, vector<1x2x128xf32>,
    return
  }
  func.func @transform_0(%arg0: i32) -> (i32, i32) {
    %c0_i32 = arith.constant 0 : i32
    %c0_i32_0 = arith.constant 0 : i32
    return %arg0, %c0_i32 : i32, i32
  }
  func.func @transform_1(%arg0: i32) -> (i32, i32) {
    %c0_i32 = arith.constant 0 : i32
    %c0_i32_0 = arith.constant 0 : i32
    %c0_i32_1 = arith.constant 0 : i32
    return %c0_i32, %c0_i32_0 : i32, i32
  }
  func.func @transform_2(%arg0: i32) -> (i32, i32) {
    %c0_i32 = arith.constant 0 : i32
    %c0_i32_0 = arith.constant 0 : i32
    return %arg0, %c0_i32 : i32, i32
  }
  func.func @transform_3(%arg0: i32) -> (i32, i32, i32) {
    %c0_i32 = arith.constant 0 : i32
    %c0_i32_0 = arith.constant 0 : i32
    %c0_i32_1 = arith.constant 0 : i32
    return %arg0, %c0_i32, %c0_i32_0 : i32, i32, i32
  }
}

module attributes {stable_mosaic.version = 11 : i64} {
  func.func @_matmul_bias_kernel(%arg0: i32, %arg1: memref<2x128xbf16, #tpu.memory_space<vmem>>, %arg2: memref<128x256xbf16, #tpu.memory_space<vmem>>, %arg3: memref<1x256xf32, #tpu.memory_space<vmem>>, %arg4: memref<2x256xf32, #tpu.memory_space<vmem>>) attributes {dimension_semantics = [#tpu.dimension_semantics<parallel>], iteration_bounds = array<i64: 1>, scalar_prefetch = 0 : i64, scratch_operands = 0 : i64, tpu.core_type = #tpu.core_type<tc>, window_params = [{transform_indices = @transform_0, window_bounds = array<i64: 2, 128>}, {pipeline_mode = #tpu.pipeline_mode<synchronous>, transform_indices = @transform_1, window_bounds = array<i64: 128, 256>}, {pipeline_mode = #tpu.pipeline_mode<synchronous>, transform_indices = @transform_2, window_bounds = array<i64: 1, 256>}, {transform_indices = @transform_3, window_bounds = array<i64: 2, 256>}]} {
    %c0 = arith.constant 0 : index
    %c0_0 = arith.constant 0 : index
    %0 = vector.load %arg1[%c0, %c0_0] : memref<2x128xbf16, #tpu.memory_space<vmem>>, vector<2x128xbf16>
    %c0_1 = arith.constant 0 : index
    %c0_2 = arith.constant 0 : index
    %1 = vector.load %arg2[%c0_1, %c0_2] : memref<128x256xbf16, #tpu.memory_space<vmem>>, vector<128x256xbf16>
    %cst = arith.constant dense<0.000000e+00> : vector<2x256xf32>
    %2 = tpu.matmul %0, %1, %cst {dimension_numbers = #tpu.dot_dimension_numbers<[1], [0], [0], [1], [0, 0, 1, 1], [], []>} : vector<2x128xbf16>, vector<128x256xbf16>, vector<2x256xf32> -> vector<2x256xf32>
    %c0_3 = arith.constant 0 : index
    %c0_4 = arith.constant 0 : index
    %3 = vector.load %arg3[%c0_3, %c0_4] : memref<1x256xf32, #tpu.memory_space<vmem>>, vector<1x256xf32>
    %4 = vector.broadcast %3 : vector<1x256xf32> to vector<2x256xf32>
    %5 = arith.addf %2, %4 : vector<2x256xf32>
    %c0_5 = arith.constant 0 : index
    %c0_6 = arith.constant 0 : index
    %6 = vector.load %arg4[%c0_5, %c0_6] : memref<2x256xf32, #tpu.memory_space<vmem>>, vector<2x256xf32>
    tpu.vector_store %arg4[%c0_5, %c0_6], %5 {strides = array<i32>} : memref<2x256xf32, #tpu.memory_space<vmem>>, vector<2x256xf32>,
    return
  }
  func.func @transform_0(%arg0: i32) -> (i32, i32) {
    %c0_i32 = arith.constant 0 : i32
    %c0_i32_0 = arith.constant 0 : i32
    return %arg0, %c0_i32 : i32, i32
  }
  func.func @transform_1(%arg0: i32) -> (i32, i32) {
    %c0_i32 = arith.constant 0 : i32
    %c0_i32_0 = arith.constant 0 : i32
    %c0_i32_1 = arith.constant 0 : i32
    return %c0_i32, %c0_i32_0 : i32, i32
  }
  func.func @transform_2(%arg0: i32) -> (i32, i32) {
    %c0_i32 = arith.constant 0 : i32
    %c0_i32_0 = arith.constant 0 : i32
    %c0_i32_1 = arith.constant 0 : i32
    return %c0_i32, %c0_i32_0 : i32, i32
  }
  func.func @transform_3(%arg0: i32) -> (i32, i32) {
    %c0_i32 = arith.constant 0 : i32
    %c0_i32_0 = arith.constant 0 : i32
    return %arg0, %c0_i32 : i32, i32
  }
}

module attributes {stable_mosaic.version = 11 : i64} {
  func.func @kernel(%arg0: i32, %arg1: memref<8x576xbf16, #tpu.memory_space<vmem>>, %arg2: memref<8x576xbf16, #tpu.memory_space<vmem>>, %arg3: memref<576x64xbf16, #tpu.memory_space<vmem>>, %arg4: memref<576x64xbf16, #tpu.memory_space<vmem>>, %arg5: memref<8x64xf32, #tpu.memory_space<vmem>>, %arg6: memref<1x2x64xf32, #tpu.memory_space<vmem>>) attributes {dimension_semantics = [#tpu.dimension_semantics<parallel>], iteration_bounds = array<i64: 1>, scalar_prefetch = 0 : i64, scratch_operands = 0 : i64, tpu.core_type = #tpu.core_type<tc>, window_params = [{transform_indices = @transform_0, window_bounds = array<i64: 8, 576>}, {transform_indices = @transform_1, window_bounds = array<i64: 8, 576>}, {pipeline_mode = #tpu.pipeline_mode<synchronous>, transform_indices = @transform_2, window_bounds = array<i64: 576, 64>}, {pipeline_mode = #tpu.pipeline_mode<synchronous>, transform_indices = @transform_3, window_bounds = array<i64: 576, 64>}, {transform_indices = @transform_4, window_bounds = array<i64: 8, 64>}, {transform_indices = @transform_5, window_bounds = array<i64: 1, 2, 64>}]} {
    %c0 = arith.constant 0 : index
    %c0_0 = arith.constant 0 : index
    %0 = vector.load %arg1[%c0, %c0_0] : memref<8x576xbf16, #tpu.memory_space<vmem>>, vector<8x576xbf16>
    %c0_1 = arith.constant 0 : index
    %c0_2 = arith.constant 0 : index
    %1 = vector.load %arg3[%c0_1, %c0_2] : memref<576x64xbf16, #tpu.memory_space<vmem>>, vector<576x64xbf16>
    %cst = arith.constant dense<0.000000e+00> : vector<8x64xf32>
    %2 = tpu.matmul %0, %1, %cst {dimension_numbers = #tpu.dot_dimension_numbers<[1], [0], [0], [1], [0, 0, 1, 1], [], []>} : vector<8x576xbf16>, vector<576x64xbf16>, vector<8x64xf32> -> vector<8x64xf32>
    %c0_3 = arith.constant 0 : index
    %c0_4 = arith.constant 0 : index
    %3 = vector.load %arg2[%c0_3, %c0_4] : memref<8x576xbf16, #tpu.memory_space<vmem>>, vector<8x576xbf16>
    %c0_5 = arith.constant 0 : index
    %c0_6 = arith.constant 0 : index
    %4 = vector.load %arg4[%c0_5, %c0_6] : memref<576x64xbf16, #tpu.memory_space<vmem>>, vector<576x64xbf16>
    %cst_7 = arith.constant dense<0.000000e+00> : vector<8x64xf32>
    %5 = tpu.matmul %3, %4, %cst_7 {dimension_numbers = #tpu.dot_dimension_numbers<[1], [0], [0], [1], [0, 0, 1, 1], [], []>} : vector<8x576xbf16>, vector<576x64xbf16>, vector<8x64xf32> -> vector<8x64xf32>
    %6 = arith.addf %2, %5 : vector<8x64xf32>
    %c0_8 = arith.constant 0 : index
    %c0_9 = arith.constant 0 : index
    %7 = vector.load %arg5[%c0_8, %c0_9] : memref<8x64xf32, #tpu.memory_space<vmem>>, vector<8x64xf32>
    tpu.vector_store %arg5[%c0_8, %c0_9], %6 {strides = array<i32>} : memref<8x64xf32, #tpu.memory_space<vmem>>, vector<8x64xf32>,
    %cst_10 = arith.constant dense<0.000000e+00> : vector<64xf32>
    %8 = vector.multi_reduction <add>, %6, %cst_10 [0] : vector<8x64xf32> to vector<64xf32>
    %9 = vector.shape_cast %8 : vector<64xf32> to vector<1x64xf32>
    %10 = arith.mulf %6, %6 : vector<8x64xf32>
    %cst_11 = arith.constant dense<0.000000e+00> : vector<64xf32>
    %11 = vector.multi_reduction <add>, %10, %cst_11 [0] : vector<8x64xf32> to vector<64xf32>
    %12 = vector.shape_cast %11 : vector<64xf32> to vector<1x64xf32>
    %13 = tpu.concatenate %9, %12 in 0 : vector<1x64xf32>, vector<1x64xf32> -> vector<2x64xf32>
    %14 = vector.shape_cast %13 : vector<2x64xf32> to vector<1x2x64xf32>
    %c0_12 = arith.constant 0 : index
    %c0_13 = arith.constant 0 : index
    %c0_14 = arith.constant 0 : index
    %15 = vector.load %arg6[%c0_12, %c0_13, %c0_14] : memref<1x2x64xf32, #tpu.memory_space<vmem>>, vector<1x2x64xf32>
    tpu.vector_store %arg6[%c0_12, %c0_13, %c0_14], %14 {strides = array<i32>} : memref<1x2x64xf32, #tpu.memory_space<vmem>>, vector<1x2x64xf32>,
    return
  }
  func.func @transform_0(%arg0: i32) -> (i32, i32) {
    %c0_i32 = arith.constant 0 : i32
    %c0_i32_0 = arith.constant 0 : i32
    return %arg0, %c0_i32 : i32, i32
  }
  func.func @transform_1(%arg0: i32) -> (i32, i32) {
    %c0_i32 = arith.constant 0 : i32
    %c0_i32_0 = arith.constant 0 : i32
    return %arg0, %c0_i32 : i32, i32
  }
  func.func @transform_2(%arg0: i32) -> (i32, i32) {
    %c0_i32 = arith.constant 0 : i32
    %c0_i32_0 = arith.constant 0 : i32
    %c0_i32_1 = arith.constant 0 : i32
    return %c0_i32, %c0_i32_0 : i32, i32
  }
  func.func @transform_3(%arg0: i32) -> (i32, i32) {
    %c0_i32 = arith.constant 0 : i32
    %c0_i32_0 = arith.constant 0 : i32
    %c0_i32_1 = arith.constant 0 : i32
    return %c0_i32, %c0_i32_0 : i32, i32
  }
  func.func @transform_4(%arg0: i32) -> (i32, i32) {
    %c0_i32 = arith.constant 0 : i32
    %c0_i32_0 = arith.constant 0 : i32
    return %arg0, %c0_i32 : i32, i32
  }
  func.func @transform_5(%arg0: i32) -> (i32, i32, i32) {
    %c0_i32 = arith.constant 0 : i32
    %c0_i32_0 = arith.constant 0 : i32
    %c0_i32_1 = arith.constant 0 : i32
    return %arg0, %c0_i32, %c0_i32_0 : i32, i32, i32
  }
}

module attributes {stable_mosaic.version = 11 : i64} {
  func.func @_matmul_bias_kernel(%arg0: i32, %arg1: memref<8x64xbf16, #tpu.memory_space<vmem>>, %arg2: memref<64x128xbf16, #tpu.memory_space<vmem>>, %arg3: memref<1x128xf32, #tpu.memory_space<vmem>>, %arg4: memref<8x128xf32, #tpu.memory_space<vmem>>) attributes {dimension_semantics = [#tpu.dimension_semantics<parallel>], iteration_bounds = array<i64: 1>, scalar_prefetch = 0 : i64, scratch_operands = 0 : i64, tpu.core_type = #tpu.core_type<tc>, window_params = [{transform_indices = @transform_0, window_bounds = array<i64: 8, 64>}, {pipeline_mode = #tpu.pipeline_mode<synchronous>, transform_indices = @transform_1, window_bounds = array<i64: 64, 128>}, {pipeline_mode = #tpu.pipeline_mode<synchronous>, transform_indices = @transform_2, window_bounds = array<i64: 1, 128>}, {transform_indices = @transform_3, window_bounds = array<i64: 8, 128>}]} {
    %c0 = arith.constant 0 : index
    %c0_0 = arith.constant 0 : index
    %0 = vector.load %arg1[%c0, %c0_0] : memref<8x64xbf16, #tpu.memory_space<vmem>>, vector<8x64xbf16>
    %c0_1 = arith.constant 0 : index
    %c0_2 = arith.constant 0 : index
    %1 = vector.load %arg2[%c0_1, %c0_2] : memref<64x128xbf16, #tpu.memory_space<vmem>>, vector<64x128xbf16>
    %cst = arith.constant dense<0.000000e+00> : vector<8x128xf32>
    %2 = tpu.matmul %0, %1, %cst {dimension_numbers = #tpu.dot_dimension_numbers<[1], [0], [0], [1], [0, 0, 1, 1], [], []>} : vector<8x64xbf16>, vector<64x128xbf16>, vector<8x128xf32> -> vector<8x128xf32>
    %c0_3 = arith.constant 0 : index
    %c0_4 = arith.constant 0 : index
    %3 = vector.load %arg3[%c0_3, %c0_4] : memref<1x128xf32, #tpu.memory_space<vmem>>, vector<1x128xf32>
    %4 = vector.broadcast %3 : vector<1x128xf32> to vector<8x128xf32>
    %5 = arith.addf %2, %4 : vector<8x128xf32>
    %c0_5 = arith.constant 0 : index
    %c0_6 = arith.constant 0 : index
    %6 = vector.load %arg4[%c0_5, %c0_6] : memref<8x128xf32, #tpu.memory_space<vmem>>, vector<8x128xf32>
    tpu.vector_store %arg4[%c0_5, %c0_6], %5 {strides = array<i32>} : memref<8x128xf32, #tpu.memory_space<vmem>>, vector<8x128xf32>,
    return
  }
  func.func @transform_0(%arg0: i32) -> (i32, i32) {
    %c0_i32 = arith.constant 0 : i32
    %c0_i32_0 = arith.constant 0 : i32
    return %arg0, %c0_i32 : i32, i32
  }
  func.func @transform_1(%arg0: i32) -> (i32, i32) {
    %c0_i32 = arith.constant 0 : i32
    %c0_i32_0 = arith.constant 0 : i32
    %c0_i32_1 = arith.constant 0 : i32
    return %c0_i32, %c0_i32_0 : i32, i32
  }
  func.func @transform_2(%arg0: i32) -> (i32, i32) {
    %c0_i32 = arith.constant 0 : i32
    %c0_i32_0 = arith.constant 0 : i32
    %c0_i32_1 = arith.constant 0 : i32
    return %c0_i32, %c0_i32_0 : i32, i32
  }
  func.func @transform_3(%arg0: i32) -> (i32, i32) {
    %c0_i32 = arith.constant 0 : i32
    %c0_i32_0 = arith.constant 0 : i32
    return %arg0, %c0_i32 : i32, i32
  }
}

module attributes {stable_mosaic.version = 11 : i64} {
  func.func @kernel(%arg0: i32, %arg1: memref<32x288xbf16, #tpu.memory_space<vmem>>, %arg2: memref<32x288xbf16, #tpu.memory_space<vmem>>, %arg3: memref<288x32xbf16, #tpu.memory_space<vmem>>, %arg4: memref<288x32xbf16, #tpu.memory_space<vmem>>, %arg5: memref<32x32xf32, #tpu.memory_space<vmem>>, %arg6: memref<1x2x32xf32, #tpu.memory_space<vmem>>) attributes {dimension_semantics = [#tpu.dimension_semantics<parallel>], iteration_bounds = array<i64: 1>, scalar_prefetch = 0 : i64, scratch_operands = 0 : i64, tpu.core_type = #tpu.core_type<tc>, window_params = [{transform_indices = @transform_0, window_bounds = array<i64: 32, 288>}, {transform_indices = @transform_1, window_bounds = array<i64: 32, 288>}, {pipeline_mode = #tpu.pipeline_mode<synchronous>, transform_indices = @transform_2, window_bounds = array<i64: 288, 32>}, {pipeline_mode = #tpu.pipeline_mode<synchronous>, transform_indices = @transform_3, window_bounds = array<i64: 288, 32>}, {transform_indices = @transform_4, window_bounds = array<i64: 32, 32>}, {transform_indices = @transform_5, window_bounds = array<i64: 1, 2, 32>}]} {
    %c0 = arith.constant 0 : index
    %c0_0 = arith.constant 0 : index
    %0 = vector.load %arg1[%c0, %c0_0] : memref<32x288xbf16, #tpu.memory_space<vmem>>, vector<32x288xbf16>
    %c0_1 = arith.constant 0 : index
    %c0_2 = arith.constant 0 : index
    %1 = vector.load %arg3[%c0_1, %c0_2] : memref<288x32xbf16, #tpu.memory_space<vmem>>, vector<288x32xbf16>
    %cst = arith.constant dense<0.000000e+00> : vector<32x32xf32>
    %2 = tpu.matmul %0, %1, %cst {dimension_numbers = #tpu.dot_dimension_numbers<[1], [0], [0], [1], [0, 0, 1, 1], [], []>} : vector<32x288xbf16>, vector<288x32xbf16>, vector<32x32xf32> -> vector<32x32xf32>
    %c0_3 = arith.constant 0 : index
    %c0_4 = arith.constant 0 : index
    %3 = vector.load %arg2[%c0_3, %c0_4] : memref<32x288xbf16, #tpu.memory_space<vmem>>, vector<32x288xbf16>
    %c0_5 = arith.constant 0 : index
    %c0_6 = arith.constant 0 : index
    %4 = vector.load %arg4[%c0_5, %c0_6] : memref<288x32xbf16, #tpu.memory_space<vmem>>, vector<288x32xbf16>
    %cst_7 = arith.constant dense<0.000000e+00> : vector<32x32xf32>
    %5 = tpu.matmul %3, %4, %cst_7 {dimension_numbers = #tpu.dot_dimension_numbers<[1], [0], [0], [1], [0, 0, 1, 1], [], []>} : vector<32x288xbf16>, vector<288x32xbf16>, vector<32x32xf32> -> vector<32x32xf32>
    %6 = arith.addf %2, %5 : vector<32x32xf32>
    %c0_8 = arith.constant 0 : index
    %c0_9 = arith.constant 0 : index
    %7 = vector.load %arg5[%c0_8, %c0_9] : memref<32x32xf32, #tpu.memory_space<vmem>>, vector<32x32xf32>
    tpu.vector_store %arg5[%c0_8, %c0_9], %6 {strides = array<i32>} : memref<32x32xf32, #tpu.memory_space<vmem>>, vector<32x32xf32>,
    %cst_10 = arith.constant dense<0.000000e+00> : vector<32xf32>
    %8 = vector.multi_reduction <add>, %6, %cst_10 [0] : vector<32x32xf32> to vector<32xf32>
    %9 = vector.shape_cast %8 : vector<32xf32> to vector<1x32xf32>
    %10 = arith.mulf %6, %6 : vector<32x32xf32>
    %cst_11 = arith.constant dense<0.000000e+00> : vector<32xf32>
    %11 = vector.multi_reduction <add>, %10, %cst_11 [0] : vector<32x32xf32> to vector<32xf32>
    %12 = vector.shape_cast %11 : vector<32xf32> to vector<1x32xf32>
    %13 = tpu.concatenate %9, %12 in 0 : vector<1x32xf32>, vector<1x32xf32> -> vector<2x32xf32>
    %14 = vector.shape_cast %13 : vector<2x32xf32> to vector<1x2x32xf32>
    %c0_12 = arith.constant 0 : index
    %c0_13 = arith.constant 0 : index
    %c0_14 = arith.constant 0 : index
    %15 = vector.load %arg6[%c0_12, %c0_13, %c0_14] : memref<1x2x32xf32, #tpu.memory_space<vmem>>, vector<1x2x32xf32>
    tpu.vector_store %arg6[%c0_12, %c0_13, %c0_14], %14 {strides = array<i32>} : memref<1x2x32xf32, #tpu.memory_space<vmem>>, vector<1x2x32xf32>,
    return
  }
  func.func @transform_0(%arg0: i32) -> (i32, i32) {
    %c0_i32 = arith.constant 0 : i32
    %c0_i32_0 = arith.constant 0 : i32
    return %arg0, %c0_i32 : i32, i32
  }
  func.func @transform_1(%arg0: i32) -> (i32, i32) {
    %c0_i32 = arith.constant 0 : i32
    %c0_i32_0 = arith.constant 0 : i32
    return %arg0, %c0_i32 : i32, i32
  }
  func.func @transform_2(%arg0: i32) -> (i32, i32) {
    %c0_i32 = arith.constant 0 : i32
    %c0_i32_0 = arith.constant 0 : i32
    %c0_i32_1 = arith.constant 0 : i32
    return %c0_i32, %c0_i32_0 : i32, i32
  }
  func.func @transform_3(%arg0: i32) -> (i32, i32) {
    %c0_i32 = arith.constant 0 : i32
    %c0_i32_0 = arith.constant 0 : i32
    %c0_i32_1 = arith.constant 0 : i32
    return %c0_i32, %c0_i32_0 : i32, i32
  }
  func.func @transform_4(%arg0: i32) -> (i32, i32) {
    %c0_i32 = arith.constant 0 : i32
    %c0_i32_0 = arith.constant 0 : i32
    return %arg0, %c0_i32 : i32, i32
  }
  func.func @transform_5(%arg0: i32) -> (i32, i32, i32) {
    %c0_i32 = arith.constant 0 : i32
    %c0_i32_0 = arith.constant 0 : i32
    %c0_i32_1 = arith.constant 0 : i32
    return %arg0, %c0_i32, %c0_i32_0 : i32, i32, i32
  }
}

module attributes {stable_mosaic.version = 11 : i64} {
  func.func @_matmul_bias_kernel(%arg0: i32, %arg1: memref<32x32xbf16, #tpu.memory_space<vmem>>, %arg2: memref<32x64xbf16, #tpu.memory_space<vmem>>, %arg3: memref<1x64xf32, #tpu.memory_space<vmem>>, %arg4: memref<32x64xf32, #tpu.memory_space<vmem>>) attributes {dimension_semantics = [#tpu.dimension_semantics<parallel>], iteration_bounds = array<i64: 1>, scalar_prefetch = 0 : i64, scratch_operands = 0 : i64, tpu.core_type = #tpu.core_type<tc>, window_params = [{transform_indices = @transform_0, window_bounds = array<i64: 32, 32>}, {pipeline_mode = #tpu.pipeline_mode<synchronous>, transform_indices = @transform_1, window_bounds = array<i64: 32, 64>}, {pipeline_mode = #tpu.pipeline_mode<synchronous>, transform_indices = @transform_2, window_bounds = array<i64: 1, 64>}, {transform_indices = @transform_3, window_bounds = array<i64: 32, 64>}]} {
    %c0 = arith.constant 0 : index
    %c0_0 = arith.constant 0 : index
    %0 = vector.load %arg1[%c0, %c0_0] : memref<32x32xbf16, #tpu.memory_space<vmem>>, vector<32x32xbf16>
    %c0_1 = arith.constant 0 : index
    %c0_2 = arith.constant 0 : index
    %1 = vector.load %arg2[%c0_1, %c0_2] : memref<32x64xbf16, #tpu.memory_space<vmem>>, vector<32x64xbf16>
    %cst = arith.constant dense<0.000000e+00> : vector<32x64xf32>
    %2 = tpu.matmul %0, %1, %cst {dimension_numbers = #tpu.dot_dimension_numbers<[1], [0], [0], [1], [0, 0, 1, 1], [], []>} : vector<32x32xbf16>, vector<32x64xbf16>, vector<32x64xf32> -> vector<32x64xf32>
    %c0_3 = arith.constant 0 : index
    %c0_4 = arith.constant 0 : index
    %3 = vector.load %arg3[%c0_3, %c0_4] : memref<1x64xf32, #tpu.memory_space<vmem>>, vector<1x64xf32>
    %4 = vector.broadcast %3 : vector<1x64xf32> to vector<32x64xf32>
    %5 = arith.addf %2, %4 : vector<32x64xf32>
    %c0_5 = arith.constant 0 : index
    %c0_6 = arith.constant 0 : index
    %6 = vector.load %arg4[%c0_5, %c0_6] : memref<32x64xf32, #tpu.memory_space<vmem>>, vector<32x64xf32>
    tpu.vector_store %arg4[%c0_5, %c0_6], %5 {strides = array<i32>} : memref<32x64xf32, #tpu.memory_space<vmem>>, vector<32x64xf32>,
    return
  }
  func.func @transform_0(%arg0: i32) -> (i32, i32) {
    %c0_i32 = arith.constant 0 : i32
    %c0_i32_0 = arith.constant 0 : i32
    return %arg0, %c0_i32 : i32, i32
  }
  func.func @transform_1(%arg0: i32) -> (i32, i32) {
    %c0_i32 = arith.constant 0 : i32
    %c0_i32_0 = arith.constant 0 : i32
    %c0_i32_1 = arith.constant 0 : i32
    return %c0_i32, %c0_i32_0 : i32, i32
  }
  func.func @transform_2(%arg0: i32) -> (i32, i32) {
    %c0_i32 = arith.constant 0 : i32
    %c0_i32_0 = arith.constant 0 : i32
    %c0_i32_1 = arith.constant 0 : i32
    return %c0_i32, %c0_i32_0 : i32, i32
  }
  func.func @transform_3(%arg0: i32) -> (i32, i32) {
    %c0_i32 = arith.constant 0 : i32
    %c0_i32_0 = arith.constant 0 : i32
    return %arg0, %c0_i32 : i32, i32
  }
}

module attributes {stable_mosaic.version = 11 : i64} {
  func.func @kernel(%arg0: i32, %arg1: memref<128x144xbf16, #tpu.memory_space<vmem>>, %arg2: memref<128x144xbf16, #tpu.memory_space<vmem>>, %arg3: memref<144x16xbf16, #tpu.memory_space<vmem>>, %arg4: memref<144x16xbf16, #tpu.memory_space<vmem>>, %arg5: memref<128x16xf32, #tpu.memory_space<vmem>>, %arg6: memref<1x2x16xf32, #tpu.memory_space<vmem>>) attributes {dimension_semantics = [#tpu.dimension_semantics<parallel>], iteration_bounds = array<i64: 1>, scalar_prefetch = 0 : i64, scratch_operands = 0 : i64, tpu.core_type = #tpu.core_type<tc>, window_params = [{transform_indices = @transform_0, window_bounds = array<i64: 128, 144>}, {transform_indices = @transform_1, window_bounds = array<i64: 128, 144>}, {pipeline_mode = #tpu.pipeline_mode<synchronous>, transform_indices = @transform_2, window_bounds = array<i64: 144, 16>}, {pipeline_mode = #tpu.pipeline_mode<synchronous>, transform_indices = @transform_3, window_bounds = array<i64: 144, 16>}, {transform_indices = @transform_4, window_bounds = array<i64: 128, 16>}, {transform_indices = @transform_5, window_bounds = array<i64: 1, 2, 16>}]} {
    %c0 = arith.constant 0 : index
    %c0_0 = arith.constant 0 : index
    %0 = vector.load %arg1[%c0, %c0_0] : memref<128x144xbf16, #tpu.memory_space<vmem>>, vector<128x144xbf16>
    %c0_1 = arith.constant 0 : index
    %c0_2 = arith.constant 0 : index
    %1 = vector.load %arg3[%c0_1, %c0_2] : memref<144x16xbf16, #tpu.memory_space<vmem>>, vector<144x16xbf16>
    %cst = arith.constant dense<0.000000e+00> : vector<128x16xf32>
    %2 = tpu.matmul %0, %1, %cst {dimension_numbers = #tpu.dot_dimension_numbers<[1], [0], [0], [1], [0, 0, 1, 1], [], []>} : vector<128x144xbf16>, vector<144x16xbf16>, vector<128x16xf32> -> vector<128x16xf32>
    %c0_3 = arith.constant 0 : index
    %c0_4 = arith.constant 0 : index
    %3 = vector.load %arg2[%c0_3, %c0_4] : memref<128x144xbf16, #tpu.memory_space<vmem>>, vector<128x144xbf16>
    %c0_5 = arith.constant 0 : index
    %c0_6 = arith.constant 0 : index
    %4 = vector.load %arg4[%c0_5, %c0_6] : memref<144x16xbf16, #tpu.memory_space<vmem>>, vector<144x16xbf16>
    %cst_7 = arith.constant dense<0.000000e+00> : vector<128x16xf32>
    %5 = tpu.matmul %3, %4, %cst_7 {dimension_numbers = #tpu.dot_dimension_numbers<[1], [0], [0], [1], [0, 0, 1, 1], [], []>} : vector<128x144xbf16>, vector<144x16xbf16>, vector<128x16xf32> -> vector<128x16xf32>
    %6 = arith.addf %2, %5 : vector<128x16xf32>
    %c0_8 = arith.constant 0 : index
    %c0_9 = arith.constant 0 : index
    %7 = vector.load %arg5[%c0_8, %c0_9] : memref<128x16xf32, #tpu.memory_space<vmem>>, vector<128x16xf32>
    tpu.vector_store %arg5[%c0_8, %c0_9], %6 {strides = array<i32>} : memref<128x16xf32, #tpu.memory_space<vmem>>, vector<128x16xf32>,
    %cst_10 = arith.constant dense<0.000000e+00> : vector<16xf32>
    %8 = vector.multi_reduction <add>, %6, %cst_10 [0] : vector<128x16xf32> to vector<16xf32>
    %9 = vector.shape_cast %8 : vector<16xf32> to vector<1x16xf32>
    %10 = arith.mulf %6, %6 : vector<128x16xf32>
    %cst_11 = arith.constant dense<0.000000e+00> : vector<16xf32>
    %11 = vector.multi_reduction <add>, %10, %cst_11 [0] : vector<128x16xf32> to vector<16xf32>
    %12 = vector.shape_cast %11 : vector<16xf32> to vector<1x16xf32>
    %13 = tpu.concatenate %9, %12 in 0 : vector<1x16xf32>, vector<1x16xf32> -> vector<2x16xf32>
    %14 = vector.shape_cast %13 : vector<2x16xf32> to vector<1x2x16xf32>
    %c0_12 = arith.constant 0 : index
    %c0_13 = arith.constant 0 : index
    %c0_14 = arith.constant 0 : index
    %15 = vector.load %arg6[%c0_12, %c0_13, %c0_14] : memref<1x2x16xf32, #tpu.memory_space<vmem>>, vector<1x2x16xf32>
    tpu.vector_store %arg6[%c0_12, %c0_13, %c0_14], %14 {strides = array<i32>} : memref<1x2x16xf32, #tpu.memory_space<vmem>>, vector<1x2x16xf32>,
    return
  }
  func.func @transform_0(%arg0: i32) -> (i32, i32) {
    %c0_i32 = arith.constant 0 : i32
    %c0_i32_0 = arith.constant 0 : i32
    return %arg0, %c0_i32 : i32, i32
  }
  func.func @transform_1(%arg0: i32) -> (i32, i32) {
    %c0_i32 = arith.constant 0 : i32
    %c0_i32_0 = arith.constant 0 : i32
    return %arg0, %c0_i32 : i32, i32
  }
  func.func @transform_2(%arg0: i32) -> (i32, i32) {
    %c0_i32 = arith.constant 0 : i32
    %c0_i32_0 = arith.constant 0 : i32
    %c0_i32_1 = arith.constant 0 : i32
    return %c0_i32, %c0_i32_0 : i32, i32
  }
  func.func @transform_3(%arg0: i32) -> (i32, i32) {
    %c0_i32 = arith.constant 0 : i32
    %c0_i32_0 = arith.constant 0 : i32
    %c0_i32_1 = arith.constant 0 : i32
    return %c0_i32, %c0_i32_0 : i32, i32
  }
  func.func @transform_4(%arg0: i32) -> (i32, i32) {
    %c0_i32 = arith.constant 0 : i32
    %c0_i32_0 = arith.constant 0 : i32
    return %arg0, %c0_i32 : i32, i32
  }
  func.func @transform_5(%arg0: i32) -> (i32, i32, i32) {
    %c0_i32 = arith.constant 0 : i32
    %c0_i32_0 = arith.constant 0 : i32
    %c0_i32_1 = arith.constant 0 : i32
    return %arg0, %c0_i32, %c0_i32_0 : i32, i32, i32
  }
}

module attributes {stable_mosaic.version = 11 : i64} {
  func.func @_matmul_bias_kernel(%arg0: i32, %arg1: memref<128x16xbf16, #tpu.memory_space<vmem>>, %arg2: memref<16x32xbf16, #tpu.memory_space<vmem>>, %arg3: memref<1x32xf32, #tpu.memory_space<vmem>>, %arg4: memref<128x32xf32, #tpu.memory_space<vmem>>) attributes {dimension_semantics = [#tpu.dimension_semantics<parallel>], iteration_bounds = array<i64: 1>, scalar_prefetch = 0 : i64, scratch_operands = 0 : i64, tpu.core_type = #tpu.core_type<tc>, window_params = [{transform_indices = @transform_0, window_bounds = array<i64: 128, 16>}, {pipeline_mode = #tpu.pipeline_mode<synchronous>, transform_indices = @transform_1, window_bounds = array<i64: 16, 32>}, {pipeline_mode = #tpu.pipeline_mode<synchronous>, transform_indices = @transform_2, window_bounds = array<i64: 1, 32>}, {transform_indices = @transform_3, window_bounds = array<i64: 128, 32>}]} {
    %c0 = arith.constant 0 : index
    %c0_0 = arith.constant 0 : index
    %0 = vector.load %arg1[%c0, %c0_0] : memref<128x16xbf16, #tpu.memory_space<vmem>>, vector<128x16xbf16>
    %c0_1 = arith.constant 0 : index
    %c0_2 = arith.constant 0 : index
    %1 = vector.load %arg2[%c0_1, %c0_2] : memref<16x32xbf16, #tpu.memory_space<vmem>>, vector<16x32xbf16>
    %cst = arith.constant dense<0.000000e+00> : vector<128x32xf32>
    %2 = tpu.matmul %0, %1, %cst {dimension_numbers = #tpu.dot_dimension_numbers<[1], [0], [0], [1], [0, 0, 1, 1], [], []>} : vector<128x16xbf16>, vector<16x32xbf16>, vector<128x32xf32> -> vector<128x32xf32>
    %c0_3 = arith.constant 0 : index
    %c0_4 = arith.constant 0 : index
    %3 = vector.load %arg3[%c0_3, %c0_4] : memref<1x32xf32, #tpu.memory_space<vmem>>, vector<1x32xf32>
    %4 = vector.broadcast %3 : vector<1x32xf32> to vector<128x32xf32>
    %5 = arith.addf %2, %4 : vector<128x32xf32>
    %c0_5 = arith.constant 0 : index
    %c0_6 = arith.constant 0 : index
    %6 = vector.load %arg4[%c0_5, %c0_6] : memref<128x32xf32, #tpu.memory_space<vmem>>, vector<128x32xf32>
    tpu.vector_store %arg4[%c0_5, %c0_6], %5 {strides = array<i32>} : memref<128x32xf32, #tpu.memory_space<vmem>>, vector<128x32xf32>,
    return
  }
  func.func @transform_0(%arg0: i32) -> (i32, i32) {
    %c0_i32 = arith.constant 0 : i32
    %c0_i32_0 = arith.constant 0 : i32
    return %arg0, %c0_i32 : i32, i32
  }
  func.func @transform_1(%arg0: i32) -> (i32, i32) {
    %c0_i32 = arith.constant 0 : i32
    %c0_i32_0 = arith.constant 0 : i32
    %c0_i32_1 = arith.constant 0 : i32
    return %c0_i32, %c0_i32_0 : i32, i32
  }
  func.func @transform_2(%arg0: i32) -> (i32, i32) {
    %c0_i32 = arith.constant 0 : i32
    %c0_i32_0 = arith.constant 0 : i32
    %c0_i32_1 = arith.constant 0 : i32
    return %c0_i32, %c0_i32_0 : i32, i32
  }
  func.func @transform_3(%arg0: i32) -> (i32, i32) {
    %c0_i32 = arith.constant 0 : i32
    %c0_i32_0 = arith.constant 0 : i32
    return %arg0, %c0_i32 : i32, i32
  }
}

module attributes {stable_mosaic.version = 11 : i64} {
  func.func @kernel(%arg0: i32, %arg1: memref<256x72xbf16, #tpu.memory_space<vmem>>, %arg2: memref<256x72xbf16, #tpu.memory_space<vmem>>, %arg3: memref<72x8xbf16, #tpu.memory_space<vmem>>, %arg4: memref<72x8xbf16, #tpu.memory_space<vmem>>, %arg5: memref<256x8xf32, #tpu.memory_space<vmem>>, %arg6: memref<1x2x8xf32, #tpu.memory_space<vmem>>) attributes {dimension_semantics = [#tpu.dimension_semantics<parallel>], iteration_bounds = array<i64: 2>, scalar_prefetch = 0 : i64, scratch_operands = 0 : i64, tpu.core_type = #tpu.core_type<tc>, window_params = [{transform_indices = @transform_0, window_bounds = array<i64: 256, 72>}, {transform_indices = @transform_1, window_bounds = array<i64: 256, 72>}, {pipeline_mode = #tpu.pipeline_mode<synchronous>, transform_indices = @transform_2, window_bounds = array<i64: 72, 8>}, {pipeline_mode = #tpu.pipeline_mode<synchronous>, transform_indices = @transform_3, window_bounds = array<i64: 72, 8>}, {transform_indices = @transform_4, window_bounds = array<i64: 256, 8>}, {transform_indices = @transform_5, window_bounds = array<i64: 1, 2, 8>}]} {
    %c0 = arith.constant 0 : index
    %c0_0 = arith.constant 0 : index
    %0 = vector.load %arg1[%c0, %c0_0] : memref<256x72xbf16, #tpu.memory_space<vmem>>, vector<256x72xbf16>
    %c0_1 = arith.constant 0 : index
    %c0_2 = arith.constant 0 : index
    %1 = vector.load %arg3[%c0_1, %c0_2] : memref<72x8xbf16, #tpu.memory_space<vmem>>, vector<72x8xbf16>
    %cst = arith.constant dense<0.000000e+00> : vector<256x8xf32>
    %2 = tpu.matmul %0, %1, %cst {dimension_numbers = #tpu.dot_dimension_numbers<[1], [0], [0], [1], [0, 0, 1, 1], [], []>} : vector<256x72xbf16>, vector<72x8xbf16>, vector<256x8xf32> -> vector<256x8xf32>
    %c0_3 = arith.constant 0 : index
    %c0_4 = arith.constant 0 : index
    %3 = vector.load %arg2[%c0_3, %c0_4] : memref<256x72xbf16, #tpu.memory_space<vmem>>, vector<256x72xbf16>
    %c0_5 = arith.constant 0 : index
    %c0_6 = arith.constant 0 : index
    %4 = vector.load %arg4[%c0_5, %c0_6] : memref<72x8xbf16, #tpu.memory_space<vmem>>, vector<72x8xbf16>
    %cst_7 = arith.constant dense<0.000000e+00> : vector<256x8xf32>
    %5 = tpu.matmul %3, %4, %cst_7 {dimension_numbers = #tpu.dot_dimension_numbers<[1], [0], [0], [1], [0, 0, 1, 1], [], []>} : vector<256x72xbf16>, vector<72x8xbf16>, vector<256x8xf32> -> vector<256x8xf32>
    %6 = arith.addf %2, %5 : vector<256x8xf32>
    %c0_8 = arith.constant 0 : index
    %c0_9 = arith.constant 0 : index
    %7 = vector.load %arg5[%c0_8, %c0_9] : memref<256x8xf32, #tpu.memory_space<vmem>>, vector<256x8xf32>
    tpu.vector_store %arg5[%c0_8, %c0_9], %6 {strides = array<i32>} : memref<256x8xf32, #tpu.memory_space<vmem>>, vector<256x8xf32>,
    %cst_10 = arith.constant dense<0.000000e+00> : vector<8xf32>
    %8 = vector.multi_reduction <add>, %6, %cst_10 [0] : vector<256x8xf32> to vector<8xf32>
    %9 = vector.shape_cast %8 : vector<8xf32> to vector<1x8xf32>
    %10 = arith.mulf %6, %6 : vector<256x8xf32>
    %cst_11 = arith.constant dense<0.000000e+00> : vector<8xf32>
    %11 = vector.multi_reduction <add>, %10, %cst_11 [0] : vector<256x8xf32> to vector<8xf32>
    %12 = vector.shape_cast %11 : vector<8xf32> to vector<1x8xf32>
    %13 = tpu.concatenate %9, %12 in 0 : vector<1x8xf32>, vector<1x8xf32> -> vector<2x8xf32>
    %14 = vector.shape_cast %13 : vector<2x8xf32> to vector<1x2x8xf32>
    %c0_12 = arith.constant 0 : index
    %c0_13 = arith.constant 0 : index
    %c0_14 = arith.constant 0 : index
    %15 = vector.load %arg6[%c0_12, %c0_13, %c0_14] : memref<1x2x8xf32, #tpu.memory_space<vmem>>, vector<1x2x8xf32>
    tpu.vector_store %arg6[%c0_12, %c0_13, %c0_14], %14 {strides = array<i32>} : memref<1x2x8xf32, #tpu.memory_space<vmem>>, vector<1x2x8xf32>,
    return
  }
  func.func @transform_0(%arg0: i32) -> (i32, i32) {
    %c0_i32 = arith.constant 0 : i32
    %c0_i32_0 = arith.constant 0 : i32
    return %arg0, %c0_i32 : i32, i32
  }
  func.func @transform_1(%arg0: i32) -> (i32, i32) {
    %c0_i32 = arith.constant 0 : i32
    %c0_i32_0 = arith.constant 0 : i32
    return %arg0, %c0_i32 : i32, i32
  }
  func.func @transform_2(%arg0: i32) -> (i32, i32) {
    %c0_i32 = arith.constant 0 : i32
    %c0_i32_0 = arith.constant 0 : i32
    %c0_i32_1 = arith.constant 0 : i32
    return %c0_i32, %c0_i32_0 : i32, i32
  }
  func.func @transform_3(%arg0: i32) -> (i32, i32) {
    %c0_i32 = arith.constant 0 : i32
    %c0_i32_0 = arith.constant 0 : i32
    %c0_i32_1 = arith.constant 0 : i32
    return %c0_i32, %c0_i32_0 : i32, i32
  }
  func.func @transform_4(%arg0: i32) -> (i32, i32) {
    %c0_i32 = arith.constant 0 : i32
    %c0_i32_0 = arith.constant 0 : i32
    return %arg0, %c0_i32 : i32, i32
  }
  func.func @transform_5(%arg0: i32) -> (i32, i32, i32) {
    %c0_i32 = arith.constant 0 : i32
    %c0_i32_0 = arith.constant 0 : i32
    %c0_i32_1 = arith.constant 0 : i32
    return %arg0, %c0_i32, %c0_i32_0 : i32, i32, i32
  }
}

module attributes {stable_mosaic.version = 11 : i64} {
  func.func @_matmul_bias_sigmoid_kernel(%arg0: i32, %arg1: memref<256x8xf32, #tpu.memory_space<vmem>>, %arg2: memref<8x1xf32, #tpu.memory_space<vmem>>, %arg3: memref<1x1xf32, #tpu.memory_space<vmem>>, %arg4: memref<256x1xf32, #tpu.memory_space<vmem>>) attributes {dimension_semantics = [#tpu.dimension_semantics<parallel>], iteration_bounds = array<i64: 2>, scalar_prefetch = 0 : i64, scratch_operands = 0 : i64, tpu.core_type = #tpu.core_type<tc>, window_params = [{transform_indices = @transform_0, window_bounds = array<i64: 256, 8>}, {pipeline_mode = #tpu.pipeline_mode<synchronous>, transform_indices = @transform_1, window_bounds = array<i64: 8, 1>}, {pipeline_mode = #tpu.pipeline_mode<synchronous>, transform_indices = @transform_2, window_bounds = array<i64: 1, 1>}, {transform_indices = @transform_3, window_bounds = array<i64: 256, 1>}]} {
    %c0 = arith.constant 0 : index
    %c0_0 = arith.constant 0 : index
    %0 = vector.load %arg1[%c0, %c0_0] : memref<256x8xf32, #tpu.memory_space<vmem>>, vector<256x8xf32>
    %c0_1 = arith.constant 0 : index
    %c0_2 = arith.constant 0 : index
    %1 = vector.load %arg2[%c0_1, %c0_2] : memref<8x1xf32, #tpu.memory_space<vmem>>, vector<8x1xf32>
    %cst = arith.constant dense<0.000000e+00> : vector<256x1xf32>
    %2 = tpu.matmul %0, %1, %cst {dimension_numbers = #tpu.dot_dimension_numbers<[1], [0], [0], [1], [0, 0, 1, 1], [], []>} : vector<256x8xf32>, vector<8x1xf32>, vector<256x1xf32> -> vector<256x1xf32>
    %c0_3 = arith.constant 0 : index
    %c0_4 = arith.constant 0 : index
    %3 = vector.load %arg3[%c0_3, %c0_4] : memref<1x1xf32, #tpu.memory_space<vmem>>, vector<1x1xf32>
    %4 = vector.broadcast %3 : vector<1x1xf32> to vector<256x1xf32>
    %5 = arith.addf %2, %4 : vector<256x1xf32>
    %6 = arith.negf %5 : vector<256x1xf32>
    %7 = math.exp %6 : vector<256x1xf32>
    %cst_5 = arith.constant 1.000000e+00 : f32
    %8 = vector.broadcast %cst_5 : f32 to vector<256x1xf32>
    %9 = arith.addf %8, %7 : vector<256x1xf32>
    %10 = arith.divf %8, %9 : vector<256x1xf32>
    %c0_6 = arith.constant 0 : index
    %c0_7 = arith.constant 0 : index
    %11 = vector.load %arg4[%c0_6, %c0_7] : memref<256x1xf32, #tpu.memory_space<vmem>>, vector<256x1xf32>
    tpu.vector_store %arg4[%c0_6, %c0_7], %10 {strides = array<i32>} : memref<256x1xf32, #tpu.memory_space<vmem>>, vector<256x1xf32>,
    return
  }
  func.func @transform_0(%arg0: i32) -> (i32, i32) {
    %c0_i32 = arith.constant 0 : i32
    %c0_i32_0 = arith.constant 0 : i32
    return %arg0, %c0_i32 : i32, i32
  }
  func.func @transform_1(%arg0: i32) -> (i32, i32) {
    %c0_i32 = arith.constant 0 : i32
    %c0_i32_0 = arith.constant 0 : i32
    %c0_i32_1 = arith.constant 0 : i32
    return %c0_i32, %c0_i32_0 : i32, i32
  }
  func.func @transform_2(%arg0: i32) -> (i32, i32) {
    %c0_i32 = arith.constant 0 : i32
    %c0_i32_0 = arith.constant 0 : i32
    %c0_i32_1 = arith.constant 0 : i32
    return %c0_i32, %c0_i32_0 : i32, i32
  }
  func.func @transform_3(%arg0: i32) -> (i32, i32) {
    %c0_i32 = arith.constant 0 : i32
    %c0_i32_0 = arith.constant 0 : i32
    return %arg0, %c0_i32 : i32, i32
  }
}

</mosaic_0001>

<bundles_post_ra>
// kernel: unet_apply.42
= control target key start
LH: loop header
LB: loop body
LE: loop exit
PB: predicated region body
PF: predicated region fallthrough
CT: control target
= control target key end

     0   :  { %s761_s12 = smov 0   ;;  %s763_s13 = smov 0   ;;  %s972_s0 = inlined_call_operand.vmem [shape: f32[2,16,16,8], index: 0, kind: input, shape index: {}]   ;;  %s973_s1 = inlined_call_operand.vmem [shape: f32[1,8], index: 1, kind: input, shape index: {}]   ;;  %s974_s2 = inlined_call_operand.vmem [shape: f32[1,8], index: 2, kind: input, shape index: {}]   ;;  %s975_s3 = inlined_call_operand.vmem [shape: bf16[2,16,16,8], index: 3, kind: output, shape index: {}]  }
   0x1   :  { %s765_s14 = smov 0  }
   0x2 LB: > { %s25_s15 = sadd.s32 1, %s735_s13  ;;  %p618_p0 = scmp.ge.s32.totalorder %s739_s14, 1  ;;  %s739_s14 = sphi %s765_s14, %s13_s14   ;;  %s735_s13 = sphi %s763_s13, %s977_s13   ;;  %s731_s12 = sphi %s761_s12, %s976_s12  }
   0x3   : > { %p27_p1 = scmp.ge.s32.totalorder %s25_s15, 2  ;;  %p159_p2 = scmp.lt.s32.totalorder %s739_s14, 3 }
   0x5   : > { %s979_s15 = smov (%p27_p1, %s25_s15), 0  ;;  %p160_p3 = pnand %p618_p0, %p159_p2 }
   0x6   : > { %p194_p4 = scmp.lt.s32.totalorder (!%p160_p3), %s731_s12, 1  ;;  %v785_v0 = vld [vmem:[%s973_s1] ss:$0 sm:$0xff] (!%p160_p3)  ;;  %vm485_vm0 = vcmask (!%p160_p3), 60416  }
   0x7   : > { %163 = sbr.rel (%p160_p3) target bundleno = 57 (0x39), region = 32  ;;  %v795_v1 = vld [vmem:[%s974_s2] ss:$0 sm:$0xff] (!%p160_p3) }
   0xe   : > { %s981_s12 = smov (!%p194_p4, %s731_s12), 1 }
   0xf   : > { %s659_s16 = sshll.u32 %s981_s12, 8  ;;  %s660_s24 = sshll.u32 %s981_s12, 7 }
  0x10   : > { %s790_s21 = scalar_lea.vmem %s972_s0, %s659_s16  ;;  %s824_s27 = scalar_lea.vmem %s975_s3, %s660_s24 }
  0x11   : > { %v217_v2 = vld [vmem:[%s790_s21] sm:$0xff]  ;;  %v218_v3 = vld [vmem:[%s790_s21 + $0x8] sm:$0xff]  ;;  %v219_v4 = vld [vmem:[%s790_s21 + $0x10] sm:$0xff] }
  0x12   : > { %v255_v5 = vmul.f32 %v785_v0, %v217_v2  ;;  %v256_v6 = vmul.f32 %v785_v0, %v218_v3  ;;  %v257_v7 = vmul.f32 %v785_v0, %v219_v4  ;;  %v220_v8 = vld [vmem:[%s790_s21 + $0x18] sm:$0xff]  ;;  %v221_v9 = vld [vmem:[%s790_s21 + $0x20] sm:$0xff]  ;;  %v222_v10 = vld [vmem:[%s790_s21 + $0x28] sm:$0xff] }
  0x13   : > { %v258_v11 = vmul.f32 %v785_v0, %v220_v8  ;;  %v259_v12 = vmul.f32 %v785_v0, %v221_v9  ;;  %v260_v13 = vmul.f32 %v785_v0, %v222_v10  ;;  %v223_v14 = vld [vmem:[%s790_s21 + $0x30] sm:$0xff]  ;;  %v224_v15 = vld [vmem:[%s790_s21 + $0x38] sm:$0xff]  ;;  %v225_v32 = vld [vmem:[%s790_s21 + $0x40] sm:$0xff] }
  0x14   : > { %v293_v16 = vadd.f32 %v795_v1, %v255_v5  ;;  %v294_v17 = vadd.f32 %v795_v1, %v256_v6  ;;  %v295_v18 = vadd.f32 %v795_v1, %v257_v7  ;;  %v261_v19 = vmul.f32 %v785_v0, %v223_v14  ;;  %v226_v33 = vld [vmem:[%s790_s21 + $0x48] sm:$0xff]  ;;  %v227_v34 = vld [vmem:[%s790_s21 + $0x50] sm:$0xff]  ;;  %v228_v39 = vld [vmem:[%s790_s21 + $0x58] sm:$0xff] }
  0x15   : > { %v296_v20 = vadd.f32 %v795_v1, %v258_v11  ;;  %v297_v21 = vadd.f32 %v795_v1, %v259_v12  ;;  %v298_v22 = vadd.f32 %v795_v1, %v260_v13  ;;  %v262_v23 = vmul.f32 %v785_v0, %v224_v15  ;;  %v229_v40 = vld [vmem:[%s790_s21 + $0x60] sm:$0xff]  ;;  %v230_v41 = vld [vmem:[%s790_s21 + $0x68] sm:$0xff]  ;;  %v231_v46 = vld [vmem:[%s790_s21 + $0x70] sm:$0xff] }
  0x16   : > { %v325_v24 = vmax.f32 %v293_v16, 0.0  ;;  %v326_v25 = vmax.f32 %v294_v17, 0.0  ;;  %v327_v26 = vmax.f32 %v295_v18, 0.0  ;;  %v299_v27 = vadd.f32 %v795_v1, %v261_v19  ;;  %v232_v51 = vld [vmem:[%s790_s21 + $0x78] sm:$0xff]  ;;  %v233_v10 = vld [vmem:[%s790_s21 + $0x80] sm:$0xff]  ;;  %v234_v11 = vld [vmem:[%s790_s21 + $0x88] sm:$0xff] }
  0x17   : > { %v328_v28 = vmax.f32 %v296_v20, 0.0  ;;  %v329_v29 = vmax.f32 %v297_v21, 0.0  ;;  %v330_v30 = vmax.f32 %v298_v22, 0.0  ;;  %v300_v31 = vadd.f32 %v795_v1, %v262_v23  ;;  %v235_v12 = vld [vmem:[%s790_s21 + $0x90] sm:$0xff]  ;;  %v236_v17 = vld [vmem:[%s790_s21 + $0x98] sm:$0xff]  ;;  %v237_v18 = vld [vmem:[%s790_s21 + $0xa0] sm:$0xff] }
  0x18   : > { %v661_v35 = vpack.c.bf16 %v325_v24, %v325_v24  ;;  %v662_v36 = vpack.c.bf16 %v326_v25, %v326_v25  ;;  %v663_v37 = vpack.c.bf16 %v327_v26, %v327_v26  ;;  %v331_v38 = vmax.f32 %v299_v27, 0.0  ;;  %v238_v19 = vld [vmem:[%s790_s21 + $0xa8] sm:$0xff]  ;;  %v239_v24 = vld [vmem:[%s790_s21 + $0xb0] sm:$0xff] }
  0x19   : > { %v664_v42 = vpack.c.bf16 %v328_v28, %v328_v28  ;;  %v665_v43 = vpack.c.bf16 %v329_v29, %v329_v29  ;;  %v666_v44 = vpack.c.bf16 %v330_v30, %v330_v30  ;;  %v332_v45 = vmax.f32 %v300_v31, 0.0  ;;  %v240_v29 = vld [vmem:[%s790_s21 + $0xb8] sm:$0xff] }
  0x1a   : > { %486 = vst.msk [vmem:[%s824_s27] sm:$0xf] %vm485_vm0, %v661_v35  ;;  %487 = vst.msk [vmem:[%s824_s27 + $0x4] sm:$0xf] %vm485_vm0, %v662_v36  ;;  %v667_v47 = vpack.c.bf16 %v331_v38, %v331_v38  ;;  %v263_v48 = vmul.f32 %v785_v0, %v225_v32  ;;  %v264_v49 = vmul.f32 %v785_v0, %v226_v33 }
  0x1b   : > { %488 = vst.msk [vmem:[%s824_s27 + $0x8] sm:$0xf] %vm485_vm0, %v663_v37  ;;  %v265_v50 = vmul.f32 %v785_v0, %v227_v34  ;;  %489 = vst.msk [vmem:[%s824_s27 + $0xc] sm:$0xf] %vm485_vm0, %v664_v42  ;;  %v668_v52 = vpack.c.bf16 %v332_v45, %v332_v45  ;;  %v266_v53 = vmul.f32 %v785_v0, %v228_v39 }
  0x1c   : > { %490 = vst.msk [vmem:[%s824_s27 + $0x10] sm:$0xf] %vm485_vm0, %v665_v43  ;;  %491 = vst.msk [vmem:[%s824_s27 + $0x14] sm:$0xf] %vm485_vm0, %v666_v44  ;;  %v267_v54 = vmul.f32 %v785_v0, %v229_v40  ;;  %v268_v55 = vmul.f32 %v785_v0, %v230_v41  ;;  %v301_v56 = vadd.f32 %v795_v1, %v263_v48 }
  0x1d   : > { %492 = vst.msk [vmem:[%s824_s27 + $0x18] sm:$0xf] %vm485_vm0, %v667_v47  ;;  %v302_v57 = vadd.f32 %v795_v1, %v264_v49  ;;  %v303_v58 = vadd.f32 %v795_v1, %v265_v50  ;;  %v269_v59 = vmul.f32 %v785_v0, %v231_v46  ;;  %493 = vst.msk [vmem:[%s824_s27 + $0x1c] sm:$0xf] %vm485_vm0, %v668_v52  ;;  %v241_v50 = vld [vmem:[%s790_s21 + $0xc0] sm:$0xff]  ;;  %v243_v52 = vld [vmem:[%s790_s21 + $0xd0] sm:$0xff] }
  0x1e   : > { %v304_v60 = vadd.f32 %v795_v1, %v266_v53  ;;  %v305_v61 = vadd.f32 %v795_v1, %v267_v54  ;;  %v306_v62 = vadd.f32 %v795_v1, %v268_v55  ;;  %v270_v63 = vmul.f32 %v785_v0, %v232_v51  ;;  %v242_v51 = vld [vmem:[%s790_s21 + $0xc8] sm:$0xff] }
  0x1f   : > { %v333_v2 = vmax.f32 %v301_v56, 0.0  ;;  %v334_v3 = vmax.f32 %v302_v57, 0.0  ;;  %v335_v4 = vmax.f32 %v303_v58, 0.0  ;;  %v307_v5 = vadd.f32 %v795_v1, %v269_v59  ;;  %v244_v57 = vld [vmem:[%s790_s21 + $0xd8] sm:$0xff]  ;;  %v245_v58 = vld [vmem:[%s790_s21 + $0xe0] sm:$0xff]  ;;  %v246_v59 = vld [vmem:[%s790_s21 + $0xe8] sm:$0xff] }
  0x20   : > { %v336_v6 = vmax.f32 %v304_v60, 0.0  ;;  %v337_v7 = vmax.f32 %v305_v61, 0.0  ;;  %v338_v8 = vmax.f32 %v306_v62, 0.0  ;;  %v308_v9 = vadd.f32 %v795_v1, %v270_v63 }
  0x21   : > { %v669_v13 = vpack.c.bf16 %v333_v2, %v333_v2  ;;  %v670_v14 = vpack.c.bf16 %v334_v3, %v334_v3  ;;  %v671_v15 = vpack.c.bf16 %v335_v4, %v335_v4  ;;  %v339_v16 = vmax.f32 %v307_v5, 0.0  ;;  %v247_v2 = vld [vmem:[%s790_s21 + $0xf0] sm:$0xff] }
  0x22   : > { %v672_v20 = vpack.c.bf16 %v336_v6, %v336_v6  ;;  %v673_v21 = vpack.c.bf16 %v337_v7, %v337_v7  ;;  %v674_v22 = vpack.c.bf16 %v338_v8, %v338_v8  ;;  %v340_v23 = vmax.f32 %v308_v9, 0.0  ;;  %v248_v7 = vld [vmem:[%s790_s21 + $0xf8] sm:$0xff] }
  0x23   : > { %494 = vst.msk [vmem:[%s824_s27 + $0x20] sm:$0xf] %vm485_vm0, %v669_v13  ;;  %495 = vst.msk [vmem:[%s824_s27 + $0x24] sm:$0xf] %vm485_vm0, %v670_v14  ;;  %v675_v25 = vpack.c.bf16 %v339_v16, %v339_v16  ;;  %v271_v26 = vmul.f32 %v785_v0, %v233_v10  ;;  %v272_v27 = vmul.f32 %v785_v0, %v234_v11 }
  0x24   : > { %496 = vst.msk [vmem:[%s824_s27 + $0x28] sm:$0xf] %vm485_vm0, %v671_v15  ;;  %v273_v28 = vmul.f32 %v785_v0, %v235_v12  ;;  %497 = vst.msk [vmem:[%s824_s27 + $0x2c] sm:$0xf] %vm485_vm0, %v672_v20  ;;  %v676_v30 = vpack.c.bf16 %v340_v23, %v340_v23  ;;  %v274_v31 = vmul.f32 %v785_v0, %v236_v17 }
  0x25   : > { %498 = vst.msk [vmem:[%s824_s27 + $0x30] sm:$0xf] %vm485_vm0, %v673_v21  ;;  %499 = vst.msk [vmem:[%s824_s27 + $0x34] sm:$0xf] %vm485_vm0, %v674_v22  ;;  %v275_v32 = vmul.f32 %v785_v0, %v237_v18  ;;  %v276_v33 = vmul.f32 %v785_v0, %v238_v19  ;;  %v309_v34 = vadd.f32 %v795_v1, %v271_v26 }
  0x26   : > { %500 = vst.msk [vmem:[%s824_s27 + $0x38] sm:$0xf] %vm485_vm0, %v675_v25  ;;  %v310_v35 = vadd.f32 %v795_v1, %v272_v27  ;;  %v311_v36 = vadd.f32 %v795_v1, %v273_v28  ;;  %v277_v37 = vmul.f32 %v785_v0, %v239_v24  ;;  %501 = vst.msk [vmem:[%s824_s27 + $0x3c] sm:$0xf] %vm485_vm0, %v676_v30 }
  0x27   : > { %v312_v38 = vadd.f32 %v795_v1, %v274_v31  ;;  %v313_v39 = vadd.f32 %v795_v1, %v275_v32  ;;  %v314_v40 = vadd.f32 %v795_v1, %v276_v33  ;;  %v278_v41 = vmul.f32 %v785_v0, %v240_v29 }
  0x28   : > { %v341_v42 = vmax.f32 %v309_v34, 0.0  ;;  %v342_v43 = vmax.f32 %v310_v35, 0.0  ;;  %v343_v44 = vmax.f32 %v311_v36, 0.0  ;;  %v315_v45 = vadd.f32 %v795_v1, %v277_v37 }
  0x29   : > { %v344_v46 = vmax.f32 %v312_v38, 0.0  ;;  %v345_v47 = vmax.f32 %v313_v39, 0.0  ;;  %v346_v48 = vmax.f32 %v314_v40, 0.0  ;;  %v316_v49 = vadd.f32 %v795_v1, %v278_v41 }
  0x2a   : > { %v677_v53 = vpack.c.bf16 %v341_v42, %v341_v42  ;;  %v678_v54 = vpack.c.bf16 %v342_v43, %v342_v43  ;;  %v679_v55 = vpack.c.bf16 %v343_v44, %v343_v44  ;;  %v347_v56 = vmax.f32 %v315_v45, 0.0 }
  0x2b   : > { %v680_v60 = vpack.c.bf16 %v344_v46, %v344_v46  ;;  %v681_v61 = vpack.c.bf16 %v345_v47, %v345_v47  ;;  %v682_v62 = vpack.c.bf16 %v346_v48, %v346_v48  ;;  %v348_v63 = vmax.f32 %v316_v49, 0.0 }
  0x2c   : > { %502 = vst.msk [vmem:[%s824_s27 + $0x40] sm:$0xf] %vm485_vm0, %v677_v53  ;;  %503 = vst.msk [vmem:[%s824_s27 + $0x44] sm:$0xf] %vm485_vm0, %v678_v54  ;;  %v683_v3 = vpack.c.bf16 %v347_v56, %v347_v56  ;;  %v279_v4 = vmul.f32 %v785_v0, %v241_v50  ;;  %v280_v5 = vmul.f32 %v785_v0, %v242_v51 }
  0x2d   : > { %504 = vst.msk [vmem:[%s824_s27 + $0x48] sm:$0xf] %vm485_vm0, %v679_v55  ;;  %v281_v6 = vmul.f32 %v785_v0, %v243_v52  ;;  %505 = vst.msk [vmem:[%s824_s27 + $0x4c] sm:$0xf] %vm485_vm0, %v680_v60  ;;  %v684_v8 = vpack.c.bf16 %v348_v63, %v348_v63  ;;  %v282_v9 = vmul.f32 %v785_v0, %v244_v57 }
  0x2e   : > { %506 = vst.msk [vmem:[%s824_s27 + $0x50] sm:$0xf] %vm485_vm0, %v681_v61  ;;  %507 = vst.msk [vmem:[%s824_s27 + $0x54] sm:$0xf] %vm485_vm0, %v682_v62  ;;  %v283_v10 = vmul.f32 %v785_v0, %v245_v58  ;;  %v284_v11 = vmul.f32 %v785_v0, %v246_v59  ;;  %v317_v12 = vadd.f32 %v795_v1, %v279_v4 }
  0x2f   : > { %508 = vst.msk [vmem:[%s824_s27 + $0x58] sm:$0xf] %vm485_vm0, %v683_v3  ;;  %v318_v13 = vadd.f32 %v795_v1, %v280_v5  ;;  %v319_v14 = vadd.f32 %v795_v1, %v281_v6  ;;  %v285_v15 = vmul.f32 %v785_v0, %v247_v2  ;;  %509 = vst.msk [vmem:[%s824_s27 + $0x5c] sm:$0xf] %vm485_vm0, %v684_v8 }
  0x30   : > { %v320_v16 = vadd.f32 %v795_v1, %v282_v9  ;;  %v321_v17 = vadd.f32 %v795_v1, %v283_v10  ;;  %v322_v18 = vadd.f32 %v795_v1, %v284_v11  ;;  %v286_v19 = vmul.f32 %v785_v0, %v248_v7 }
  0x31   : > { %v349_v20 = vmax.f32 %v317_v12, 0.0  ;;  %v350_v21 = vmax.f32 %v318_v13, 0.0  ;;  %v351_v22 = vmax.f32 %v319_v14, 0.0  ;;  %v323_v23 = vadd.f32 %v795_v1, %v285_v15 }
  0x32   : > { %v352_v24 = vmax.f32 %v320_v16, 0.0  ;;  %v353_v25 = vmax.f32 %v321_v17, 0.0  ;;  %v354_v26 = vmax.f32 %v322_v18, 0.0  ;;  %v324_v27 = vadd.f32 %v795_v1, %v286_v19 }
  0x33   : > { %v685_v28 = vpack.c.bf16 %v349_v20, %v349_v20  ;;  %v686_v29 = vpack.c.bf16 %v350_v21, %v350_v21  ;;  %v687_v0 = vpack.c.bf16 %v351_v22, %v351_v22  ;;  %v355_v30 = vmax.f32 %v323_v23, 0.0 }
  0x34   : > { %v688_v31 = vpack.c.bf16 %v352_v24, %v352_v24  ;;  %v689_v32 = vpack.c.bf16 %v353_v25, %v353_v25  ;;  %v690_v33 = vpack.c.bf16 %v354_v26, %v354_v26  ;;  %v356_v34 = vmax.f32 %v324_v27, 0.0 }
  0x35   : > { %510 = vst.msk [vmem:[%s824_s27 + $0x60] sm:$0xf] %vm485_vm0, %v685_v28  ;;  %511 = vst.msk [vmem:[%s824_s27 + $0x64] sm:$0xf] %vm485_vm0, %v686_v29  ;;  %v691_v35 = vpack.c.bf16 %v355_v30, %v355_v30 }
  0x36   : > { %512 = vst.msk [vmem:[%s824_s27 + $0x68] sm:$0xf] %vm485_vm0, %v687_v0  ;;  %513 = vst.msk [vmem:[%s824_s27 + $0x6c] sm:$0xf] %vm485_vm0, %v688_v31  ;;  %v692_v1 = vpack.c.bf16 %v356_v34, %v356_v34 }
  0x37   : > { %514 = vst.msk [vmem:[%s824_s27 + $0x70] sm:$0xf] %vm485_vm0, %v689_v32  ;;  %515 = vst.msk [vmem:[%s824_s27 + $0x74] sm:$0xf] %vm485_vm0, %v690_v33 }
  0x38   : > { %516 = vst.msk [vmem:[%s824_s27 + $0x78] sm:$0xf] %vm485_vm0, %v691_v35  ;;  %517 = vst.msk [vmem:[%s824_s27 + $0x7c] sm:$0xf] %vm485_vm0, %v692_v1 }
  0x39 PF: > { %s13_s14 = sadd.s32 1, %s739_s14   ;;  %s976_s12 = smov %s735_s13 }
  0x3a   : > { %p10_p5 = scmp.ge.s32.totalorder %s13_s14, 4   ;;  %s977_s13 = smov %s979_s15 }
  0x3c   :  { %12 = sbr.rel (!%p10_p5) target bundleno = 2 (0x2), region = 62 }

// kernel: unet_apply.41
= control target key start
LH: loop header
LB: loop body
LE: loop exit
PB: predicated region body
PF: predicated region fallthrough
CT: control target
= control target key end

     0   :  { %s984_s12 = smov 0   ;;  %s1279_s0 = inlined_call_operand.vmem [shape: bf16[512,27], index: 0, kind: input, shape index: {}]   ;;  %s1280_s1 = inlined_call_operand.vmem [shape: bf16[27,8], index: 1, kind: input, shape index: {}]   ;;  %s1281_s2 = inlined_call_operand.vmem [shape: f32[512,8], index: 2, kind: output, shape index: {0}]   ;;  %s1282_s3 = inlined_call_operand.vmem [shape: f32[2,2,8], index: 3, kind: output, shape index: {1}]  }
   0x1 LB: > { %s990_s13 = sadd.s32 4294967295, %s961_s12   ;;  %p828_p0 = scmp.ge.s32.totalorder %s961_s12, 1  ;;  %s961_s12 = sphi %s984_s12, %s14_s12  }
   0x2   : > { %p141_p1 = scmp.lt.s32.totalorder %s961_s12, 3 }
   0x4   : > { %p142_p2 = pnand %p828_p0, %p141_p1 }
   0x5   : > { %v937_v0 = vld [vmem:[%s1280_s1] sm:$0xff] (!%p142_p2)   ;;  %vm362_vm0 = vcmask (!%p142_p2), 1044480   ;;  %v938_v1 = vld [vmem:[%s1280_s1 + $0x8] sm:$0x3f] (!%p142_p2)   ;;  %vm363_vm1 = vcmask (!%p142_p2), 1045504   ;;  %s829_s18 = sshll.u32 (!%p142_p2), %s990_s13, 5 }
   0x6   : > { %145 = sbr.rel (%p142_p2) target bundleno = 312 (0x138), region = 28  ;;  %888 = vmatprep.subr.bf16.mxu0 (!%p142_p2), %v937_v0  ;;  %924 = vmatprep.subr.bf16.mxu1 (!%p142_p2), %v937_v0  ;;  %v963_v2 = vmov (!%p142_p2), 65535   ;;  %p170_p3 = scmp.lt.s32.totalorder (!%p142_p2), %s829_s18, 63  ;;  %vm313_vm2 = vcmask (!%p142_p2), 220160   ;;  %vm530_vm3 = vcmask (!%p142_p2), 64512   ;;  %vm733_vm4 = vcmask (!%p142_p2), 1040384  }
   0x7   : > { %889 = vmatpush3.bf16.msra.mxu0 (!%p142_p2), %v937_v0  ;;  %v364_v3 = vsel (!%p142_p2), %vm362_vm0, 4294967295, %v963_v2  ;;  %926 = vmatpush3.bf16.msra.mxu1 (!%p142_p2), %v937_v0  ;;  %p181_p4 = scmp.lt.s32.totalorder (!%p142_p2), %s990_s13, 1  ;;  %vm735_vm5 = vcmask (!%p142_p2), 58368  }
   0x8   : > { %v365_v4 = vsel (!%p142_p2), %vm363_vm1, %v364_v3, 0 }
   0x9   : > { %v367_v5 = vand.u32 (!%p142_p2), %v938_v1, %v365_v4 }
   0xb   : > { %890 = vmatprep.subr.bf16.mxu0 (!%p142_p2), %v367_v5  ;;  %925 = vmatprep.subr.bf16.mxu1 (!%p142_p2), %v367_v5 }
   0xc   : > { %891 = vmatpush3.bf16.msra.mxu0 (!%p142_p2), %v367_v5  ;;  %927 = vmatpush3.bf16.msra.mxu1 (!%p142_p2), %v367_v5 }
   0xd   : > { %s1284_s18 = smov (!%p170_p3, %s829_s18), 63  ;;  %s1286_s13 = smov (!%p181_p4, %s990_s13), 1 }
   0xe   : > { %s830_s19 = sshll.u32 %s1284_s18, 2  ;;  %s832_s23 = sshll.u32 %s1284_s18, 3 }
   0xf   : > { %s1007_s22 = scalar_lea.vmem %s1279_s0, %s830_s19  ;;  %s1045_s26 = scalar_lea.vmem %s1281_s2, %s832_s23 }
  0x10   : > { %v939_v6 = vld [vmem:[%s1007_s22] sm:$0xff]   ;;  %v940_v7 = vld [vmem:[%s1007_s22 + $0x8] sm:$0xff]   ;;  %v941_v8 = vld [vmem:[%s1007_s22 + $0x10] sm:$0xff]   ;;  %s833_s27 = sshll.u32 %s1286_s13, 1 }
  0x11   : > { %892 = vmatprep.mubr.msk.bf16.mxu0 %vm313_vm2, %v939_v6  ;;  %v942_v9 = vld [vmem:[%s1007_s22 + $0x18] sm:$0xff]   ;;  %v943_v10 = vld [vmem:[%s1007_s22 + $0x20] sm:$0xff]   ;;  %v948_v12 = vld [vmem:[%s1007_s22 + $0x48] sm:$0xff]   ;;  %s184_s30 = scalar_lea.vmem %s1282_s3, %s833_s27 }
  0x12   : > { %893 = vmatmul.mubr.msk.bf16.vlgmr.msra.gmra.mrb[0].mxu0 %vm313_vm2, %v940_v7  ;;  %v947_v11 = vld [vmem:[%s1007_s22 + $0x40] sm:$0xff]   ;;  %v949_v13 = vld [vmem:[%s1007_s22 + $0x50] sm:$0xff]   ;;  %v944_v14 = vld [vmem:[%s1007_s22 + $0x28] sm:$0xff]  }
  0x13   : > { %896 = vmatprep.mubr.msk.bf16.mxu0 %vm313_vm2, %v941_v8  ;;  %908 = vmatprep.mubr.msk.bf16.mxu1 %vm313_vm2, %v947_v11  ;;  %v950_v15 = vld [vmem:[%s1007_s22 + $0x58] sm:$0xff]   ;;  %v945_v16 = vld [vmem:[%s1007_s22 + $0x30] sm:$0xff]   ;;  %v951_v17 = vld [vmem:[%s1007_s22 + $0x60] sm:$0xff]  }
  0x14   : > { %909 = vmatmul.mubr.msk.bf16.vlgmr.msra.gmra.mrb[0].mxu1 %vm313_vm2, %v948_v12  ;;  %v946_v18 = vld [vmem:[%s1007_s22 + $0x38] sm:$0xff]   ;;  %v952_v19 = vld [vmem:[%s1007_s22 + $0x68] sm:$0xff]   ;;  %v953_v20 = vld [vmem:[%s1007_s22 + $0x70] sm:$0xff]  }
  0x15   : > { %912 = vmatprep.mubr.msk.bf16.mxu1 %vm313_vm2, %v949_v13  ;;  %v954_v21 = vld [vmem:[%s1007_s22 + $0x78] sm:$0xff]  }
  0x1a   : > { %897 = vmatmul.mubr.msk.bf16.gmra.mrb[4].mxu0 %vm313_vm2, %v942_v9 }
  0x1b   : > { %900 = vmatprep.mubr.msk.bf16.mxu0 %vm313_vm2, %v943_v10 }
  0x1c   : > { %913 = vmatmul.mubr.msk.bf16.gmra.mrb[4].mxu1 %vm313_vm2, %v950_v15 }
  0x1d   : > { %916 = vmatprep.mubr.msk.bf16.mxu1 %vm313_vm2, %v951_v17 }
  0x22   : > { %901 = vmatmul.mubr.msk.bf16.gmra.mrb[8].mxu0 %vm313_vm2, %v944_v14 }
  0x23   : > { %904 = vmatprep.mubr.msk.bf16.mxu0 %vm313_vm2, %v945_v16 }
  0x24   : > { %917 = vmatmul.mubr.msk.bf16.gmra.mrb[8].mxu1 %vm313_vm2, %v952_v19 }
  0x25   : > { %920 = vmatprep.mubr.msk.bf16.mxu1 %vm313_vm2, %v953_v20 }
  0x2a   : > { %905 = vmatmul.mubr.msk.bf16.gmra.mrb[12].mxu0 %vm313_vm2, %v946_v18 }
  0x2c   : > { %921 = vmatmul.mubr.msk.bf16.gmra.mrb[12].mxu1 %vm313_vm2, %v954_v21 }
  0xe5   : > { %v894_v22 = vpop.f32.mrb[0].mxu0 }
  0xe6   : > { %533 = vst.msk [vmem:[%s1045_s26 + $0x10] sm:$0xff] %vm530_vm3, %v894_v22  ;;  %v403_v23 = vpop.f32.mrb[1].mxu0  ;;  %v634_v27 = vmul.f32 %v894_v22, %v894_v22  ;;  %v566_v32 = vsel %vm530_vm3, %v894_v22, 0.0 }
  0xe7   : > { %531 = vst.msk [vmem:[%s1045_s26] sm:$0xff] %vm530_vm3, %v403_v23  ;;  %v632_v24 = vmul.f32 %v403_v23, %v403_v23  ;;  %v895_v25 = vpop.f32.mrb[2].mxu0  ;;  %v563_v28 = vsel %vm530_vm3, %v403_v23, 0.0  ;;  %v1062_v41 = vpop.f32.mrb[0].mxu1 }
  0xe8   : > { %534 = vst.msk [vmem:[%s1045_s26 + $0x18] sm:$0xff] %vm530_vm3, %v895_v25  ;;  %v406_v26 = vpop.f32.mrb[3].mxu0  ;;  %v635_v34 = vmul.f32 %v895_v25, %v895_v25  ;;  %v667_v38 = vsel %vm530_vm3, %v634_v27, 0.0  ;;  %v568_v39 = vsel %vm530_vm3, %v895_v25, 0.0  ;;  %549 = vst.msk [vmem:[%s1045_s26 + $0x90] sm:$0xff] %vm530_vm3, %v1062_v41  ;;  %v1069_v45 = vpop.f32.mrb[1].mxu1 }
  0xe9   : > { %532 = vst.msk [vmem:[%s1045_s26 + $0x8] sm:$0xff] %vm530_vm3, %v406_v26  ;;  %v564_v29 = vsel %vm530_vm3, %v406_v26, 0.0  ;;  %v633_v30 = vmul.f32 %v406_v26, %v406_v26  ;;  %v664_v33 = vsel %vm530_vm3, %v632_v24, 0.0  ;;  %547 = vst.msk [vmem:[%s1045_s26 + $0x80] sm:$0xff] %vm530_vm3, %v1069_v45  ;;  %v1078_v50 = vpop.f32.mrb[2].mxu1 }
  0xea   : > { %v565_v31 = vadd.f32 %v564_v29, %v563_v28  ;;  %v669_v46 = vsel %vm530_vm3, %v635_v34, 0.0  ;;  %550 = vst.msk [vmem:[%s1045_s26 + $0x98] sm:$0xff] %vm530_vm3, %v1078_v50  ;;  %v1085_v54 = vpop.f32.mrb[3].mxu1 }
  0xeb   : > { %v665_v35 = vsel %vm530_vm3, %v633_v30, 0.0  ;;  %548 = vst.msk [vmem:[%s1045_s26 + $0x88] sm:$0xff] %vm530_vm3, %v1085_v54 }
  0xec   : > { %v567_v36 = vadd.f32 %v566_v32, %v565_v31  ;;  %v666_v37 = vadd.f32 %v665_v35, %v664_v33 }
  0xed   : > { %v898_v40 = vpop.f32.mrb[4].mxu0 }
  0xee   : > { %v668_v42 = vadd.f32 %v667_v38, %v666_v37  ;;  %537 = vst.msk [vmem:[%s1045_s26 + $0x30] sm:$0xff] %vm530_vm3, %v898_v40  ;;  %v419_v43 = vpop.f32.mrb[5].mxu0  ;;  %v569_v44 = vadd.f32 %v568_v39, %v567_v36  ;;  %v638_v55 = vmul.f32 %v898_v40, %v898_v40  ;;  %v574_v61 = vsel %vm530_vm3, %v898_v40, 0.0 }
  0xef   : > { %535 = vst.msk [vmem:[%s1045_s26 + $0x20] sm:$0xff] %vm530_vm3, %v419_v43  ;;  %v570_v47 = vsel %vm530_vm3, %v419_v43, 0.0  ;;  %v636_v48 = vmul.f32 %v419_v43, %v419_v43  ;;  %v899_v49 = vpop.f32.mrb[6].mxu0  ;;  %v1098_v5 = vpop.f32.mrb[4].mxu1 }
  0xf0   : > { %v571_v51 = vadd.f32 %v570_v47, %v569_v44  ;;  %v670_v52 = vadd.f32 %v669_v46, %v668_v42  ;;  %538 = vst.msk [vmem:[%s1045_s26 + $0x38] sm:$0xff] %vm530_vm3, %v899_v49  ;;  %v422_v53 = vpop.f32.mrb[7].mxu0  ;;  %v639_v62 = vmul.f32 %v899_v49, %v899_v49  ;;  %v675_v2 = vsel %vm530_vm3, %v638_v55, 0.0  ;;  %553 = vst.msk [vmem:[%s1045_s26 + $0xb0] sm:$0xff] %vm530_vm3, %v1098_v5  ;;  %v1105_v9 = vpop.f32.mrb[5].mxu1 }
  0xf1   : > { %v671_v56 = vsel %vm530_vm3, %v636_v48, 0.0  ;;  %536 = vst.msk [vmem:[%s1045_s26 + $0x28] sm:$0xff] %vm530_vm3, %v422_v53  ;;  %v572_v57 = vsel %vm530_vm3, %v422_v53, 0.0  ;;  %v637_v58 = vmul.f32 %v422_v53, %v422_v53  ;;  %v576_v3 = vsel %vm530_vm3, %v899_v49, 0.0  ;;  %551 = vst.msk [vmem:[%s1045_s26 + $0xa0] sm:$0xff] %vm530_vm3, %v1105_v9  ;;  %v1114_v14 = vpop.f32.mrb[6].mxu1 }
  0xf2   : > { %v672_v59 = vadd.f32 %v671_v56, %v670_v52  ;;  %v573_v60 = vadd.f32 %v572_v57, %v571_v51  ;;  %v677_v10 = vsel %vm530_vm3, %v639_v62, 0.0  ;;  %554 = vst.msk [vmem:[%s1045_s26 + $0xb8] sm:$0xff] %vm530_vm3, %v1114_v14  ;;  %v1121_v18 = vpop.f32.mrb[7].mxu1 }
  0xf3   : > { %v673_v63 = vsel %vm530_vm3, %v637_v58, 0.0  ;;  %552 = vst.msk [vmem:[%s1045_s26 + $0xa8] sm:$0xff] %vm530_vm3, %v1121_v18 }
  0xf4   : > { %v575_v0 = vadd.f32 %v574_v61, %v573_v60  ;;  %v674_v1 = vadd.f32 %v673_v63, %v672_v59  ;;  %v648_v60 = vmul.f32 %v1069_v45, %v1069_v45 }
  0xf5   : > { %v902_v4 = vpop.f32.mrb[8].mxu0 }
  0xf6   : > { %v676_v6 = vadd.f32 %v675_v2, %v674_v1  ;;  %541 = vst.msk [vmem:[%s1045_s26 + $0x50] sm:$0xff] %vm530_vm3, %v902_v4  ;;  %v435_v7 = vpop.f32.mrb[9].mxu0  ;;  %v577_v8 = vadd.f32 %v576_v3, %v575_v0  ;;  %v642_v19 = vmul.f32 %v902_v4, %v902_v4  ;;  %v582_v25 = vsel %vm530_vm3, %v902_v4, 0.0 }
  0xf7   : > { %539 = vst.msk [vmem:[%s1045_s26 + $0x40] sm:$0xff] %vm530_vm3, %v435_v7  ;;  %v578_v11 = vsel %vm530_vm3, %v435_v7, 0.0  ;;  %v640_v12 = vmul.f32 %v435_v7, %v435_v7  ;;  %v903_v13 = vpop.f32.mrb[10].mxu0  ;;  %v1134_v33 = vpop.f32.mrb[8].mxu1  ;;  %v594_v1 = vsel %vm530_vm3, %v1069_v45, 0.0 }
  0xf8   : > { %v579_v15 = vadd.f32 %v578_v11, %v577_v8  ;;  %v678_v16 = vadd.f32 %v677_v10, %v676_v6  ;;  %542 = vst.msk [vmem:[%s1045_s26 + $0x58] sm:$0xff] %vm530_vm3, %v903_v13  ;;  %v438_v17 = vpop.f32.mrb[11].mxu0  ;;  %v643_v26 = vmul.f32 %v903_v13, %v903_v13  ;;  %v683_v30 = vsel %vm530_vm3, %v642_v19, 0.0  ;;  %557 = vst.msk [vmem:[%s1045_s26 + $0xd0] sm:$0xff] %vm530_vm3, %v1134_v33  ;;  %v1141_v37 = vpop.f32.mrb[9].mxu1 }
  0xf9   : > { %v679_v20 = vsel %vm530_vm3, %v640_v12, 0.0  ;;  %540 = vst.msk [vmem:[%s1045_s26 + $0x48] sm:$0xff] %vm530_vm3, %v438_v17  ;;  %v580_v21 = vsel %vm530_vm3, %v438_v17, 0.0  ;;  %v641_v22 = vmul.f32 %v438_v17, %v438_v17  ;;  %v584_v31 = vsel %vm530_vm3, %v903_v13, 0.0  ;;  %555 = vst.msk [vmem:[%s1045_s26 + $0xc0] sm:$0xff] %vm530_vm3, %v1141_v37  ;;  %v1150_v43 = vpop.f32.mrb[10].mxu1 }
  0xfa   : > { %v680_v23 = vadd.f32 %v679_v20, %v678_v16  ;;  %v581_v24 = vadd.f32 %v580_v21, %v579_v15  ;;  %v685_v38 = vsel %vm530_vm3, %v643_v26, 0.0  ;;  %558 = vst.msk [vmem:[%s1045_s26 + $0xd8] sm:$0xff] %vm530_vm3, %v1150_v43  ;;  %v1157_v48 = vpop.f32.mrb[11].mxu1  ;;  %v695_v8 = vsel %vm530_vm3, %v648_v60, 0.0 }
  0xfb   : > { %v681_v27 = vsel %vm530_vm3, %v641_v22, 0.0  ;;  %556 = vst.msk [vmem:[%s1045_s26 + $0xc8] sm:$0xff] %vm530_vm3, %v1157_v48  ;;  %v649_v10 = vmul.f32 %v1085_v54, %v1085_v54  ;;  %v650_v16 = vmul.f32 %v1062_v41, %v1062_v41  ;;  %v596_v17 = vsel %vm530_vm3, %v1085_v54, 0.0 }
  0xfc   : > { %v583_v28 = vadd.f32 %v582_v25, %v581_v24  ;;  %v682_v29 = vadd.f32 %v681_v27, %v680_v23  ;;  %v598_v20 = vsel %vm530_vm3, %v1062_v41, 0.0  ;;  %v651_v23 = vmul.f32 %v1078_v50, %v1078_v50 }
  0xfd   : > { %v906_v32 = vpop.f32.mrb[12].mxu0  ;;  %v697_v24 = vsel %vm530_vm3, %v649_v10, 0.0  ;;  %v652_v25 = vmul.f32 %v1105_v9, %v1105_v9  ;;  %v600_v41 = vsel %vm530_vm3, %v1078_v50, 0.0  ;;  %v604_v50 = vsel %vm530_vm3, %v1121_v18, 0.0 }
  0xfe   : > { %v684_v34 = vadd.f32 %v683_v30, %v682_v29  ;;  %545 = vst.msk [vmem:[%s1045_s26 + $0x70] sm:$0xff] %vm530_vm3, %v906_v32  ;;  %v451_v35 = vpop.f32.mrb[13].mxu0  ;;  %v585_v36 = vadd.f32 %v584_v31, %v583_v28  ;;  %v646_v49 = vmul.f32 %v906_v32, %v906_v32  ;;  %v590_v57 = vsel %vm530_vm3, %v906_v32, 0.0 }
  0xff   : > { %543 = vst.msk [vmem:[%s1045_s26 + $0x60] sm:$0xff] %vm530_vm3, %v451_v35  ;;  %v586_v39 = vsel %vm530_vm3, %v451_v35, 0.0  ;;  %v644_v40 = vmul.f32 %v451_v35, %v451_v35  ;;  %v907_v42 = vpop.f32.mrb[14].mxu0  ;;  %v1174_v2 = vpop.f32.mrb[12].mxu1  ;;  %v699_v28 = vsel %vm530_vm3, %v650_v16, 0.0  ;;  %v602_v29 = vsel %vm530_vm3, %v1105_v9, 0.0 }
 0x100   : > { %v587_v44 = vadd.f32 %v586_v39, %v585_v36  ;;  %v686_v46 = vadd.f32 %v685_v38, %v684_v34  ;;  %546 = vst.msk [vmem:[%s1045_s26 + $0x78] sm:$0xff] %vm530_vm3, %v907_v42  ;;  %v454_v47 = vpop.f32.mrb[15].mxu0  ;;  %v647_v58 = vmul.f32 %v907_v42, %v907_v42  ;;  %v691_v63 = vsel %vm530_vm3, %v646_v49, 0.0  ;;  %561 = vst.msk [vmem:[%s1045_s26 + $0xf0] sm:$0xff] %vm530_vm3, %v1174_v2  ;;  %v1179_v6 = vpop.f32.mrb[13].mxu1 }
 0x101   : > { %v687_v51 = vsel %vm530_vm3, %v644_v40, 0.0  ;;  %544 = vst.msk [vmem:[%s1045_s26 + $0x68] sm:$0xff] %vm530_vm3, %v454_v47  ;;  %v588_v52 = vsel %vm530_vm3, %v454_v47, 0.0  ;;  %v645_v53 = vmul.f32 %v454_v47, %v454_v47  ;;  %v592_v0 = vsel %vm530_vm3, %v907_v42, 0.0  ;;  %559 = vst.msk [vmem:[%s1045_s26 + $0xe0] sm:$0xff] %vm530_vm3, %v1179_v6  ;;  %v923_v45 = vpop.f32.mrb[14].mxu1 }
 0x102   : > { %v688_v55 = vadd.f32 %v687_v51, %v686_v46  ;;  %v589_v56 = vadd.f32 %v588_v52, %v587_v44  ;;  %v693_v7 = vsel %vm530_vm3, %v647_v58, 0.0  ;;  %562 = vst.msk [vmem:[%s1045_s26 + $0xf8] sm:$0xff] %vm530_vm3, %v923_v45  ;;  %v1191_v13 = vsel %vm530_vm3, %v923_v45, 0.0  ;;  %v1193_v15 = vpop.f32.mrb[15].mxu1 }
 0x103   : > { %v689_v59 = vsel %vm530_vm3, %v645_v53, 0.0  ;;  %v663_v19 = vmul.f32 %v923_v45, %v923_v45  ;;  %560 = vst.msk [vmem:[%s1045_s26 + $0xe8] sm:$0xff] %vm530_vm3, %v1193_v15  ;;  %v701_v32 = vsel %vm530_vm3, %v651_v23, 0.0  ;;  %v703_v34 = vsel %vm530_vm3, %v652_v25, 0.0 }
 0x104   : > { %v591_v61 = vadd.f32 %v590_v57, %v589_v56  ;;  %v690_v62 = vadd.f32 %v689_v59, %v688_v55  ;;  %v653_v35 = vmul.f32 %v1121_v18, %v1121_v18  ;;  %v654_v39 = vmul.f32 %v1098_v5, %v1098_v5 }
 0x105   : > { %v1210_v26 = vsel %vm530_vm3, %v663_v19, 0.0  ;;  %v606_v9 = vsel %vm530_vm3, %v1098_v5, 0.0  ;;  %v655_v44 = vmul.f32 %v1114_v14, %v1114_v14  ;;  %v656_v47 = vmul.f32 %v1141_v37, %v1141_v37 }
 0x106   : > { %v692_v3 = vadd.f32 %v691_v63, %v690_v62  ;;  %v593_v4 = vadd.f32 %v592_v0, %v591_v61  ;;  %v705_v46 = vsel %vm530_vm3, %v653_v35, 0.0  ;;  %v707_v52 = vsel %vm530_vm3, %v654_v39, 0.0 }
 0x107   : > { %v608_v18 = vsel %vm530_vm3, %v1114_v14, 0.0  ;;  %v610_v53 = vsel %vm530_vm3, %v1141_v37, 0.0  ;;  %v709_v56 = vsel %vm530_vm3, %v655_v44, 0.0  ;;  %v711_v57 = vsel %vm530_vm3, %v656_v47, 0.0 }
 0x108   : > { %v595_v11 = vadd.f32 %v594_v1, %v593_v4  ;;  %v694_v12 = vadd.f32 %v693_v7, %v692_v3  ;;  %v657_v58 = vmul.f32 %v1157_v48, %v1157_v48  ;;  %v658_v61 = vmul.f32 %v1134_v33, %v1134_v33 }
 0x109   : > { %v612_v14 = vsel %vm530_vm3, %v1157_v48, 0.0  ;;  %v614_v37 = vsel %vm530_vm3, %v1134_v33, 0.0  ;;  %v659_v0 = vmul.f32 %v1150_v43, %v1150_v43  ;;  %v660_v3 = vmul.f32 %v1179_v6, %v1179_v6 }
 0x10a   : > { %v696_v21 = vadd.f32 %v695_v8, %v694_v12  ;;  %v597_v22 = vadd.f32 %v596_v17, %v595_v11  ;;  %v713_v1 = vsel %vm530_vm3, %v657_v58, 0.0  ;;  %v715_v8 = vsel %vm530_vm3, %v658_v61, 0.0 }
 0x10b   : > { %v616_v48 = vsel %vm530_vm3, %v1150_v43, 0.0  ;;  %v618_v10 = vsel %vm530_vm3, %v1179_v6, 0.0  ;;  %v717_v11 = vsel %vm530_vm3, %v659_v0, 0.0  ;;  %v719_v12 = vsel %vm530_vm3, %v660_v3, 0.0 }
 0x10c   : > { %v599_v54 = vadd.f32 %v598_v20, %v597_v22  ;;  %v698_v27 = vadd.f32 %v697_v24, %v696_v21  ;;  %v661_v16 = vmul.f32 %v1193_v15, %v1193_v15  ;;  %v662_v20 = vmul.f32 %v1174_v2, %v1174_v2 }
 0x10d   : > { %v620_v43 = vsel %vm530_vm3, %v1193_v15, 0.0  ;;  %v622_v22 = vsel %vm530_vm3, %v1174_v2, 0.0 }
 0x10e   : > { %v700_v30 = vadd.f32 %v699_v28, %v698_v27  ;;  %v601_v31 = vadd.f32 %v600_v41, %v599_v54  ;;  %v721_v23 = vsel %vm530_vm3, %v661_v16, 0.0  ;;  %v723_v54 = vsel %vm530_vm3, %v662_v20, 0.0 }
 0x110   : > { %v603_v36 = vadd.f32 %v602_v29, %v601_v31  ;;  %v702_v38 = vadd.f32 %v701_v32, %v700_v30 }
 0x112   : > { %v704_v40 = vadd.f32 %v703_v34, %v702_v38  ;;  %v605_v42 = vadd.f32 %v604_v50, %v603_v36 }
 0x114   : > { %v607_v49 = vadd.f32 %v606_v9, %v605_v42  ;;  %v706_v51 = vadd.f32 %v705_v46, %v704_v40 }
 0x116   : > { %v708_v55 = vadd.f32 %v707_v52, %v706_v51  ;;  %v609_v5 = vadd.f32 %v608_v18, %v607_v49 }
 0x118   : > { %v611_v59 = vadd.f32 %v610_v53, %v609_v5  ;;  %v710_v60 = vadd.f32 %v709_v56, %v708_v55 }
 0x11a   : > { %v712_v62 = vadd.f32 %v711_v57, %v710_v60  ;;  %v613_v63 = vadd.f32 %v612_v14, %v611_v59 }
 0x11c   : > { %v615_v4 = vadd.f32 %v614_v37, %v613_v63  ;;  %v714_v7 = vadd.f32 %v713_v1, %v712_v62 }
 0x11e   : > { %v716_v45 = vadd.f32 %v715_v8, %v714_v7  ;;  %v617_v33 = vadd.f32 %v616_v48, %v615_v4 }
 0x120   : > { %v619_v17 = vadd.f32 %v618_v10, %v617_v33  ;;  %v718_v19 = vadd.f32 %v717_v11, %v716_v45 }
 0x122   : > { %v720_v21 = vadd.f32 %v719_v12, %v718_v19  ;;  %v621_v6 = vadd.f32 %v620_v43, %v619_v17 }
 0x124   : > { %v623_v24 = vadd.f32 %v622_v22, %v621_v6  ;;  %v722_v25 = vadd.f32 %v721_v23, %v720_v21 }
 0x126   : > { %v625_v27 = vadd.f32 %v1191_v13, %v623_v24  ;;  %v724_v28 = vadd.f32 %v723_v54, %v722_v25 }
 0x128   : > { %v626_v41 = vrot.slane %v625_v27, 4  ;;  %v726_v29 = vadd.f32 %v1210_v26, %v724_v28 }
 0x12a   : > { %v627_v15 = vadd.f32 %v626_v41, %v625_v27  ;;  %v727_v30 = vrot.slane %v726_v29, 4 }
 0x12c   : > { %v628_v31 = vrot.slane %v627_v15, 2  ;;  %v728_v32 = vadd.f32 %v727_v30, %v726_v29 }
 0x12e   : > { %v629_v34 = vadd.f32 %v628_v31, %v627_v15  ;;  %v729_v2 = vrot.slane %v728_v32, 2 }
 0x130   : > { %v630_v35 = vrot.slane %v629_v34, 1  ;;  %v730_v36 = vadd.f32 %v729_v2, %v728_v32 }
 0x132   : > { %v731_v38 = vrot.slane %v730_v36, 1  ;;  %v631_v13 = vadd.f32 %v630_v35, %v629_v34 }
 0x134   : > { %v732_v39 = vadd.f32 %v731_v38, %v730_v36 }
 0x136   : > { %v734_v26 = vsel %vm733_vm4, %v631_v13, %v732_v39 }
 0x137   : > { %736 = vst.msk [vmem:[%s184_s30] sm:$0x3] %vm735_vm5, %v734_v26 }
 0x138 PF: > { %s14_s12 = sadd.s32 1, %s961_s12  }
 0x139   : > { %p11_p5 = scmp.ge.s32.totalorder %s14_s12, 4  }
 0x13b   :  { %13 = sbr.rel (!%p11_p5) target bundleno = 1 (0x1), region = 70 }

// kernel: unet_apply.43
= control target key start
LH: loop header
LB: loop body
LE: loop exit
PB: predicated region body
PF: predicated region fallthrough
CT: control target
= control target key end

     0   :  { %s1023_s12 = smov 0   ;;  %s1327_s0 = inlined_call_operand.vmem [shape: bf16[512,72], index: 0, kind: input, shape index: {}]   ;;  %s1328_s1 = inlined_call_operand.vmem [shape: bf16[72,8], index: 1, kind: input, shape index: {}]   ;;  %s1329_s2 = inlined_call_operand.vmem [shape: f32[512,8], index: 2, kind: output, shape index: {0}]   ;;  %s1330_s3 = inlined_call_operand.vmem [shape: f32[2,2,8], index: 3, kind: output, shape index: {1}]  }
   0x1 LB: > { %s1029_s13 = sadd.s32 4294967295, %s1001_s12   ;;  %p846_p0 = scmp.ge.s32.totalorder %s1001_s12, 1  ;;  %s1001_s12 = sphi %s1023_s12, %s14_s12  }
   0x2   : > { %p141_p1 = scmp.lt.s32.totalorder %s1001_s12, 3 }
   0x4   : > { %p142_p2 = pnand %p846_p0, %p141_p1 }
   0x5   : > { %v974_v0 = vld [vmem:[%s1328_s1] sm:$0xff] (!%p142_p2)   ;;  %v975_v1 = vld [vmem:[%s1328_s1 + $0x8] sm:$0xff] (!%p142_p2)   ;;  %s847_s18 = sshll.u32 (!%p142_p2), %s1029_s13, 5  ;;  %v976_v2 = vld [vmem:[%s1328_s1 + $0x10] sm:$0xff] (!%p142_p2)   ;;  %vm334_vm0 = vcmask (!%p142_p2), 588800   ;;  %vm383_vm1 = vcmask (!%p142_p2), 1043456  }
   0x6   : > { %145 = sbr.rel (%p142_p2) target bundleno = 320 (0x140), region = 28  ;;  %912 = vmatprep.subr.bf16.mxu0 (!%p142_p2), %v974_v0  ;;  %p170_p3 = scmp.lt.s32.totalorder (!%p142_p2), %s847_s18, 63  ;;  %954 = vmatprep.subr.bf16.mxu1 (!%p142_p2), %v974_v0  ;;  %v977_v3 = vld [vmem:[%s1328_s1 + $0x18] sm:$0xff] (!%p142_p2)   ;;  %v978_v5 = vld [vmem:[%s1328_s1 + $0x20] ss:$0 sps:$4 sm:$0xff] (!%p142_p2)   ;;  %vm548_vm2 = vcmask (!%p142_p2), 64512  }
   0x7   : > { %913 = vmatpush3.bf16.msra.mxu0 (!%p142_p2), %v974_v0  ;;  %959 = vmatpush3.bf16.msra.mxu1 (!%p142_p2), %v974_v0  ;;  %v385_v6 = vsel (!%p142_p2), %vm383_vm1, %v978_v5, 0  ;;  %p181_p4 = scmp.lt.s32.totalorder (!%p142_p2), %s1029_s13, 1  ;;  %vm751_vm3 = vcmask (!%p142_p2), 1040384   ;;  %vm753_vm4 = vcmask (!%p142_p2), 58368  }
   0x8   : > { %914 = vmatprep.subr.bf16.mxu0 (!%p142_p2), %v975_v1  ;;  %955 = vmatprep.subr.bf16.mxu1 (!%p142_p2), %v975_v1 }
   0xb   : > { %915 = vmatpush3.bf16.msra.mxu0 (!%p142_p2), %v975_v1  ;;  %960 = vmatpush3.bf16.msra.mxu1 (!%p142_p2), %v975_v1 }
   0xc   : > { %916 = vmatprep.subr.bf16.mxu0 (!%p142_p2), %v976_v2  ;;  %956 = vmatprep.subr.bf16.mxu1 (!%p142_p2), %v976_v2 }
   0xd   : > { %s1332_s18 = smov (!%p170_p3, %s847_s18), 63  ;;  %s1334_s13 = smov (!%p181_p4, %s1029_s13), 1 }
   0xe   : > { %s848_s21 = sshll.u32 %s1332_s18, 2  ;;  %s850_s29 = sshll.u32 %s1332_s18, 3 }
   0xf   : > { %s1052_s26 = scalar_lea.vmem %s1327_s0, %s848_s21  ;;  %917 = vmatpush3.bf16.msra.mxu0 %v976_v2  ;;  %961 = vmatpush3.bf16.msra.mxu1 %v976_v2  ;;  %s1093_s5 = scalar_lea.vmem %s1329_s2, %s850_s29 }
  0x10   : > { %v979_v4 = vld [vmem:[%s1052_s26] sm:$0xff]   ;;  %918 = vmatprep.subr.bf16.mxu0 %v977_v3  ;;  %957 = vmatprep.subr.bf16.mxu1 %v977_v3  ;;  %v980_v7 = vld [vmem:[%s1052_s26 + $0x8] sm:$0xff]   ;;  %v981_v9 = vld [vmem:[%s1052_s26 + $0x10] sm:$0xff]   ;;  %s851_s6 = sshll.u32 %s1334_s13, 1 }
  0x11   : > { %922 = vmatprep.mubr.msk.bf16.mxu0 %vm334_vm0, %v979_v4  ;;  %v987_v8 = vld [vmem:[%s1052_s26 + $0x40] sm:$0xff]   ;;  %v988_v10 = vld [vmem:[%s1052_s26 + $0x48] sm:$0xff]   ;;  %v989_v11 = vld [vmem:[%s1052_s26 + $0x50] sm:$0xff]   ;;  %s184_s9 = scalar_lea.vmem %s1330_s3, %s851_s6 }
  0x12   : > { %938 = vmatprep.mubr.msk.bf16.mxu1 %vm334_vm0, %v987_v8  ;;  %v982_v12 = vld [vmem:[%s1052_s26 + $0x18] sm:$0xff]   ;;  %v983_v14 = vld [vmem:[%s1052_s26 + $0x20] sm:$0xff]   ;;  %v984_v16 = vld [vmem:[%s1052_s26 + $0x28] sm:$0xff]  }
  0x13   : > { %919 = vmatpush3.bf16.msra.mxu0 %v977_v3  ;;  %962 = vmatpush3.bf16.msra.mxu1 %v977_v3  ;;  %v990_v13 = vld [vmem:[%s1052_s26 + $0x58] sm:$0xff]   ;;  %v991_v15 = vld [vmem:[%s1052_s26 + $0x60] sm:$0xff]   ;;  %v992_v17 = vld [vmem:[%s1052_s26 + $0x68] sm:$0xff]  }
  0x14   : > { %964 = vmatprep.subr.msk.bf16.mxu0 %vm383_vm1, %v978_v5  ;;  %965 = vmatprep.subr.msk.bf16.mxu1 %vm383_vm1, %v978_v5  ;;  %v985_v18 = vld [vmem:[%s1052_s26 + $0x30] sm:$0xff]   ;;  %v986_v20 = vld [vmem:[%s1052_s26 + $0x38] sm:$0xff]  }
  0x15   : > { %v993_v19 = vld [vmem:[%s1052_s26 + $0x70] sm:$0xff]   ;;  %v994_v21 = vld [vmem:[%s1052_s26 + $0x78] sm:$0xff]  }
  0x17   : > { %921 = vmatpush3.bf16.msra.mxu0 %v385_v6  ;;  %963 = vmatpush3.bf16.msra.mxu1 %v385_v6 }
  0x1a   : > { %923 = vmatmul.mubr.msk.bf16.vlgmr.msra.gmra.mrb[0].mxu0 %vm334_vm0, %v980_v7  ;;  %939 = vmatmul.mubr.msk.bf16.vlgmr.msra.gmra.mrb[0].mxu1 %vm334_vm0, %v988_v10 }
  0x1b   : > { %926 = vmatprep.mubr.msk.bf16.mxu0 %vm334_vm0, %v981_v9  ;;  %942 = vmatprep.mubr.msk.bf16.mxu1 %vm334_vm0, %v989_v11 }
  0x22   : > { %927 = vmatmul.mubr.msk.bf16.gmra.mrb[4].mxu0 %vm334_vm0, %v982_v12  ;;  %943 = vmatmul.mubr.msk.bf16.gmra.mrb[4].mxu1 %vm334_vm0, %v990_v13 }
  0x23   : > { %930 = vmatprep.mubr.msk.bf16.mxu0 %vm334_vm0, %v983_v14  ;;  %946 = vmatprep.mubr.msk.bf16.mxu1 %vm334_vm0, %v991_v15 }
  0x2a   : > { %931 = vmatmul.mubr.msk.bf16.gmra.mrb[8].mxu0 %vm334_vm0, %v984_v16  ;;  %947 = vmatmul.mubr.msk.bf16.gmra.mrb[8].mxu1 %vm334_vm0, %v992_v17 }
  0x2b   : > { %934 = vmatprep.mubr.msk.bf16.mxu0 %vm334_vm0, %v985_v18  ;;  %950 = vmatprep.mubr.msk.bf16.mxu1 %vm334_vm0, %v993_v19 }
  0x32   : > { %935 = vmatmul.mubr.msk.bf16.gmra.mrb[12].mxu0 %vm334_vm0, %v986_v20  ;;  %951 = vmatmul.mubr.msk.bf16.gmra.mrb[12].mxu1 %vm334_vm0, %v994_v21 }
  0xed   : > { %v924_v22 = vpop.f32.mrb[0].mxu0  ;;  %v1095_v23 = vpop.f32.mrb[0].mxu1 }
  0xee   : > { %551 = vst.msk [vmem:[%s1093_s5 + $0x10] sm:$0xff] %vm548_vm2, %v924_v22  ;;  %v421_v24 = vpop.f32.mrb[1].mxu0  ;;  %567 = vst.msk [vmem:[%s1093_s5 + $0x90] sm:$0xff] %vm548_vm2, %v1095_v23  ;;  %v1102_v25 = vpop.f32.mrb[1].mxu1  ;;  %v652_v31 = vmul.f32 %v924_v22, %v924_v22  ;;  %v584_v36 = vsel %vm548_vm2, %v924_v22, 0.0 }
  0xef   : > { %549 = vst.msk [vmem:[%s1093_s5] sm:$0xff] %vm548_vm2, %v421_v24  ;;  %v650_v26 = vmul.f32 %v421_v24, %v421_v24  ;;  %v925_v27 = vpop.f32.mrb[2].mxu0  ;;  %565 = vst.msk [vmem:[%s1093_s5 + $0x80] sm:$0xff] %vm548_vm2, %v1102_v25  ;;  %v1109_v28 = vpop.f32.mrb[2].mxu1  ;;  %v581_v32 = vsel %vm548_vm2, %v421_v24, 0.0 }
  0xf0   : > { %552 = vst.msk [vmem:[%s1093_s5 + $0x18] sm:$0xff] %vm548_vm2, %v925_v27  ;;  %v424_v29 = vpop.f32.mrb[3].mxu0  ;;  %568 = vst.msk [vmem:[%s1093_s5 + $0x98] sm:$0xff] %vm548_vm2, %v1109_v28  ;;  %v1116_v30 = vpop.f32.mrb[3].mxu1  ;;  %v653_v38 = vmul.f32 %v925_v27, %v925_v27  ;;  %v685_v42 = vsel %vm548_vm2, %v652_v31, 0.0  ;;  %v586_v43 = vsel %vm548_vm2, %v925_v27, 0.0 }
  0xf1   : > { %550 = vst.msk [vmem:[%s1093_s5 + $0x8] sm:$0xff] %vm548_vm2, %v424_v29  ;;  %v582_v33 = vsel %vm548_vm2, %v424_v29, 0.0  ;;  %v651_v34 = vmul.f32 %v424_v29, %v424_v29  ;;  %566 = vst.msk [vmem:[%s1093_s5 + $0x88] sm:$0xff] %vm548_vm2, %v1116_v30  ;;  %v682_v37 = vsel %vm548_vm2, %v650_v26, 0.0 }
  0xf2   : > { %v583_v35 = vadd.f32 %v582_v33, %v581_v32  ;;  %v687_v50 = vsel %vm548_vm2, %v653_v38, 0.0 }
  0xf3   : > { %v683_v39 = vsel %vm548_vm2, %v651_v34, 0.0 }
  0xf4   : > { %v585_v40 = vadd.f32 %v584_v36, %v583_v35  ;;  %v684_v41 = vadd.f32 %v683_v39, %v682_v37 }
  0xf5   : > { %v928_v44 = vpop.f32.mrb[4].mxu0  ;;  %v1130_v45 = vpop.f32.mrb[4].mxu1 }
  0xf6   : > { %v686_v46 = vadd.f32 %v685_v42, %v684_v41  ;;  %555 = vst.msk [vmem:[%s1093_s5 + $0x30] sm:$0xff] %vm548_vm2, %v928_v44  ;;  %v437_v47 = vpop.f32.mrb[5].mxu0  ;;  %v587_v48 = vadd.f32 %v586_v43, %v585_v40  ;;  %571 = vst.msk [vmem:[%s1093_s5 + $0xb0] sm:$0xff] %vm548_vm2, %v1130_v45  ;;  %v1137_v49 = vpop.f32.mrb[5].mxu1  ;;  %v656_v59 = vmul.f32 %v928_v44, %v928_v44  ;;  %v592_v1 = vsel %vm548_vm2, %v928_v44, 0.0 }
  0xf7   : > { %553 = vst.msk [vmem:[%s1093_s5 + $0x20] sm:$0xff] %vm548_vm2, %v437_v47  ;;  %v588_v51 = vsel %vm548_vm2, %v437_v47, 0.0  ;;  %v654_v52 = vmul.f32 %v437_v47, %v437_v47  ;;  %v929_v53 = vpop.f32.mrb[6].mxu0  ;;  %569 = vst.msk [vmem:[%s1093_s5 + $0xa0] sm:$0xff] %vm548_vm2, %v1137_v49  ;;  %v1146_v54 = vpop.f32.mrb[6].mxu1 }
  0xf8   : > { %v589_v55 = vadd.f32 %v588_v51, %v587_v48  ;;  %v688_v56 = vadd.f32 %v687_v50, %v686_v46  ;;  %556 = vst.msk [vmem:[%s1093_s5 + $0x38] sm:$0xff] %vm548_vm2, %v929_v53  ;;  %v440_v57 = vpop.f32.mrb[7].mxu0  ;;  %572 = vst.msk [vmem:[%s1093_s5 + $0xb8] sm:$0xff] %vm548_vm2, %v1146_v54  ;;  %v1153_v58 = vpop.f32.mrb[7].mxu1  ;;  %v657_v2 = vmul.f32 %v929_v53, %v929_v53  ;;  %v693_v6 = vsel %vm548_vm2, %v656_v59, 0.0 }
  0xf9   : > { %v689_v60 = vsel %vm548_vm2, %v654_v52, 0.0  ;;  %554 = vst.msk [vmem:[%s1093_s5 + $0x28] sm:$0xff] %vm548_vm2, %v440_v57  ;;  %v590_v61 = vsel %vm548_vm2, %v440_v57, 0.0  ;;  %v655_v62 = vmul.f32 %v440_v57, %v440_v57  ;;  %570 = vst.msk [vmem:[%s1093_s5 + $0xa8] sm:$0xff] %vm548_vm2, %v1153_v58  ;;  %v594_v7 = vsel %vm548_vm2, %v929_v53, 0.0 }
  0xfa   : > { %v690_v63 = vadd.f32 %v689_v60, %v688_v56  ;;  %v591_v0 = vadd.f32 %v590_v61, %v589_v55  ;;  %v695_v14 = vsel %vm548_vm2, %v657_v2, 0.0 }
  0xfb   : > { %v691_v3 = vsel %vm548_vm2, %v655_v62, 0.0 }
  0xfc   : > { %v593_v4 = vadd.f32 %v592_v1, %v591_v0  ;;  %v692_v5 = vadd.f32 %v691_v3, %v690_v63 }
  0xfd   : > { %v932_v8 = vpop.f32.mrb[8].mxu0  ;;  %v1166_v9 = vpop.f32.mrb[8].mxu1 }
  0xfe   : > { %v694_v10 = vadd.f32 %v693_v6, %v692_v5  ;;  %559 = vst.msk [vmem:[%s1093_s5 + $0x50] sm:$0xff] %vm548_vm2, %v932_v8  ;;  %v453_v11 = vpop.f32.mrb[9].mxu0  ;;  %v595_v12 = vadd.f32 %v594_v7, %v593_v4  ;;  %575 = vst.msk [vmem:[%s1093_s5 + $0xd0] sm:$0xff] %vm548_vm2, %v1166_v9  ;;  %v1173_v13 = vpop.f32.mrb[9].mxu1  ;;  %v660_v24 = vmul.f32 %v932_v8, %v932_v8  ;;  %v600_v33 = vsel %vm548_vm2, %v932_v8, 0.0 }
  0xff   : > { %557 = vst.msk [vmem:[%s1093_s5 + $0x40] sm:$0xff] %vm548_vm2, %v453_v11  ;;  %v596_v15 = vsel %vm548_vm2, %v453_v11, 0.0  ;;  %v658_v16 = vmul.f32 %v453_v11, %v453_v11  ;;  %v933_v17 = vpop.f32.mrb[10].mxu0  ;;  %573 = vst.msk [vmem:[%s1093_s5 + $0xc0] sm:$0xff] %vm548_vm2, %v1173_v13  ;;  %v1182_v18 = vpop.f32.mrb[10].mxu1  ;;  %v666_v4 = vmul.f32 %v1102_v25, %v1102_v25  ;;  %v612_v11 = vsel %vm548_vm2, %v1102_v25, 0.0 }
 0x100   : > { %v597_v19 = vadd.f32 %v596_v15, %v595_v12  ;;  %v696_v20 = vadd.f32 %v695_v14, %v694_v10  ;;  %560 = vst.msk [vmem:[%s1093_s5 + $0x58] sm:$0xff] %vm548_vm2, %v933_v17  ;;  %v456_v21 = vpop.f32.mrb[11].mxu0  ;;  %576 = vst.msk [vmem:[%s1093_s5 + $0xd8] sm:$0xff] %vm548_vm2, %v1182_v18  ;;  %v1189_v22 = vpop.f32.mrb[11].mxu1  ;;  %v661_v34 = vmul.f32 %v933_v17, %v933_v17  ;;  %v701_v38 = vsel %vm548_vm2, %v660_v24, 0.0 }
 0x101   : > { %v697_v26 = vsel %vm548_vm2, %v658_v16, 0.0  ;;  %558 = vst.msk [vmem:[%s1093_s5 + $0x48] sm:$0xff] %vm548_vm2, %v456_v21  ;;  %v598_v27 = vsel %vm548_vm2, %v456_v21, 0.0  ;;  %v659_v29 = vmul.f32 %v456_v21, %v456_v21  ;;  %574 = vst.msk [vmem:[%s1093_s5 + $0xc8] sm:$0xff] %vm548_vm2, %v1189_v22  ;;  %v602_v39 = vsel %vm548_vm2, %v933_v17, 0.0 }
 0x102   : > { %v698_v31 = vadd.f32 %v697_v26, %v696_v20  ;;  %v599_v32 = vadd.f32 %v598_v27, %v597_v19  ;;  %v703_v47 = vsel %vm548_vm2, %v661_v34, 0.0  ;;  %v713_v17 = vsel %vm548_vm2, %v666_v4, 0.0 }
 0x103   : > { %v699_v35 = vsel %vm548_vm2, %v659_v29, 0.0  ;;  %v667_v19 = vmul.f32 %v1116_v30, %v1116_v30  ;;  %v668_v26 = vmul.f32 %v1095_v23, %v1095_v23  ;;  %v614_v25 = vsel %vm548_vm2, %v1116_v30, 0.0 }
 0x104   : > { %v601_v36 = vadd.f32 %v600_v33, %v599_v32  ;;  %v700_v37 = vadd.f32 %v699_v35, %v698_v31  ;;  %v616_v31 = vsel %vm548_vm2, %v1095_v23, 0.0  ;;  %v669_v32 = vmul.f32 %v1109_v28, %v1109_v28 }
 0x105   : > { %v936_v40 = vpop.f32.mrb[12].mxu0  ;;  %v1202_v41 = vpop.f32.mrb[12].mxu1  ;;  %v715_v33 = vsel %vm548_vm2, %v667_v19, 0.0  ;;  %v670_v34 = vmul.f32 %v1137_v49, %v1137_v49  ;;  %v618_v30 = vsel %vm548_vm2, %v1109_v28, 0.0  ;;  %v622_v28 = vsel %vm548_vm2, %v1153_v58, 0.0 }
 0x106   : > { %v702_v42 = vadd.f32 %v701_v38, %v700_v37  ;;  %563 = vst.msk [vmem:[%s1093_s5 + $0x70] sm:$0xff] %vm548_vm2, %v936_v40  ;;  %v469_v43 = vpop.f32.mrb[13].mxu0  ;;  %v603_v44 = vadd.f32 %v602_v39, %v601_v36  ;;  %579 = vst.msk [vmem:[%s1093_s5 + $0xf0] sm:$0xff] %vm548_vm2, %v1202_v41  ;;  %v1209_v46 = vpop.f32.mrb[13].mxu1  ;;  %v664_v59 = vmul.f32 %v936_v40, %v936_v40  ;;  %v608_v1 = vsel %vm548_vm2, %v936_v40, 0.0 }
 0x107   : > { %561 = vst.msk [vmem:[%s1093_s5 + $0x60] sm:$0xff] %vm548_vm2, %v469_v43  ;;  %v604_v48 = vsel %vm548_vm2, %v469_v43, 0.0  ;;  %v662_v50 = vmul.f32 %v469_v43, %v469_v43  ;;  %v937_v51 = vpop.f32.mrb[14].mxu0  ;;  %577 = vst.msk [vmem:[%s1093_s5 + $0xe0] sm:$0xff] %vm548_vm2, %v1209_v46  ;;  %v953_v52 = vpop.f32.mrb[14].mxu1  ;;  %v717_v37 = vsel %vm548_vm2, %v668_v26, 0.0  ;;  %v671_v43 = vmul.f32 %v1153_v58, %v1153_v58 }
 0x108   : > { %v605_v53 = vadd.f32 %v604_v48, %v603_v44  ;;  %v704_v55 = vadd.f32 %v703_v47, %v702_v42  ;;  %564 = vst.msk [vmem:[%s1093_s5 + $0x78] sm:$0xff] %vm548_vm2, %v937_v51  ;;  %v472_v56 = vpop.f32.mrb[15].mxu0  ;;  %580 = vst.msk [vmem:[%s1093_s5 + $0xf8] sm:$0xff] %vm548_vm2, %v953_v52  ;;  %v1222_v57 = vpop.f32.mrb[15].mxu1  ;;  %v665_v2 = vmul.f32 %v937_v51, %v937_v51  ;;  %v1236_v7 = vsel %vm548_vm2, %v953_v52, 0.0 }
 0x109   : > { %v705_v60 = vsel %vm548_vm2, %v662_v50, 0.0  ;;  %562 = vst.msk [vmem:[%s1093_s5 + $0x68] sm:$0xff] %vm548_vm2, %v472_v56  ;;  %v606_v61 = vsel %vm548_vm2, %v472_v56, 0.0  ;;  %v663_v62 = vmul.f32 %v472_v56, %v472_v56  ;;  %578 = vst.msk [vmem:[%s1093_s5 + $0xe8] sm:$0xff] %vm548_vm2, %v1222_v57  ;;  %v709_v8 = vsel %vm548_vm2, %v664_v59, 0.0 }
 0x10a   : > { %v706_v63 = vadd.f32 %v705_v60, %v704_v55  ;;  %v607_v0 = vadd.f32 %v606_v61, %v605_v53  ;;  %v610_v10 = vsel %vm548_vm2, %v937_v51, 0.0  ;;  %v681_v12 = vmul.f32 %v953_v52, %v953_v52 }
 0x10b   : > { %v707_v3 = vsel %vm548_vm2, %v663_v62, 0.0  ;;  %v711_v16 = vsel %vm548_vm2, %v665_v2, 0.0  ;;  %v620_v38 = vsel %vm548_vm2, %v1137_v49, 0.0  ;;  %v719_v40 = vsel %vm548_vm2, %v669_v32, 0.0 }
 0x10c   : > { %v609_v5 = vadd.f32 %v608_v1, %v607_v0  ;;  %v708_v6 = vadd.f32 %v707_v3, %v706_v63  ;;  %v1247_v20 = vsel %vm548_vm2, %v681_v12, 0.0  ;;  %v721_v42 = vsel %vm548_vm2, %v670_v34, 0.0 }
 0x10d   : > { %v672_v48 = vmul.f32 %v1130_v45, %v1130_v45  ;;  %v624_v49 = vsel %vm548_vm2, %v1130_v45, 0.0  ;;  %v673_v52 = vmul.f32 %v1146_v54, %v1146_v54  ;;  %v723_v53 = vsel %vm548_vm2, %v671_v43, 0.0 }
 0x10e   : > { %v710_v14 = vadd.f32 %v709_v8, %v708_v6  ;;  %v611_v15 = vadd.f32 %v610_v10, %v609_v5  ;;  %v674_v55 = vmul.f32 %v1173_v13, %v1173_v13  ;;  %v626_v58 = vsel %vm548_vm2, %v1146_v54, 0.0 }
 0x10f   : > { %v725_v60 = vsel %vm548_vm2, %v672_v48, 0.0  ;;  %v628_v61 = vsel %vm548_vm2, %v1173_v13, 0.0  ;;  %v727_v63 = vsel %vm548_vm2, %v673_v52, 0.0  ;;  %v675_v1 = vmul.f32 %v1189_v22, %v1189_v22 }
 0x110   : > { %v613_v21 = vadd.f32 %v612_v11, %v611_v15  ;;  %v712_v24 = vadd.f32 %v711_v16, %v710_v14  ;;  %v729_v0 = vsel %vm548_vm2, %v674_v55, 0.0  ;;  %v676_v4 = vmul.f32 %v1166_v9, %v1166_v9 }
 0x111   : > { %v630_v54 = vsel %vm548_vm2, %v1189_v22, 0.0  ;;  %v632_v13 = vsel %vm548_vm2, %v1166_v9, 0.0  ;;  %v677_v8 = vmul.f32 %v1182_v18, %v1182_v18  ;;  %v731_v10 = vsel %vm548_vm2, %v675_v1, 0.0 }
 0x112   : > { %v714_v27 = vadd.f32 %v713_v17, %v712_v24  ;;  %v615_v29 = vadd.f32 %v614_v25, %v613_v21  ;;  %v678_v11 = vmul.f32 %v1209_v46, %v1209_v46  ;;  %v733_v15 = vsel %vm548_vm2, %v676_v4, 0.0 }
 0x113   : > { %v634_v22 = vsel %vm548_vm2, %v1182_v18, 0.0  ;;  %v636_v16 = vsel %vm548_vm2, %v1209_v46, 0.0  ;;  %v735_v19 = vsel %vm548_vm2, %v677_v8, 0.0  ;;  %v679_v24 = vmul.f32 %v1222_v57, %v1222_v57 }
 0x114   : > { %v617_v35 = vadd.f32 %v616_v31, %v615_v29  ;;  %v716_v36 = vadd.f32 %v715_v33, %v714_v27  ;;  %v737_v21 = vsel %vm548_vm2, %v678_v11, 0.0  ;;  %v680_v27 = vmul.f32 %v1202_v41, %v1202_v41 }
 0x115   : > { %v638_v18 = vsel %vm548_vm2, %v1222_v57, 0.0  ;;  %v640_v31 = vsel %vm548_vm2, %v1202_v41, 0.0  ;;  %v739_v32 = vsel %vm548_vm2, %v679_v24, 0.0 }
 0x116   : > { %v718_v39 = vadd.f32 %v717_v37, %v716_v36  ;;  %v619_v23 = vadd.f32 %v618_v30, %v617_v35  ;;  %v741_v35 = vsel %vm548_vm2, %v680_v27, 0.0 }
 0x118   : > { %v621_v44 = vadd.f32 %v620_v38, %v619_v23  ;;  %v720_v47 = vadd.f32 %v719_v40, %v718_v39 }
 0x11a   : > { %v722_v50 = vadd.f32 %v721_v42, %v720_v47  ;;  %v623_v51 = vadd.f32 %v622_v28, %v621_v44 }
 0x11c   : > { %v625_v56 = vadd.f32 %v624_v49, %v623_v51  ;;  %v724_v59 = vadd.f32 %v723_v53, %v722_v50 }
 0x11e   : > { %v726_v62 = vadd.f32 %v725_v60, %v724_v59  ;;  %v627_v45 = vadd.f32 %v626_v58, %v625_v56 }
 0x120   : > { %v629_v2 = vadd.f32 %v628_v61, %v627_v45  ;;  %v728_v3 = vadd.f32 %v727_v63, %v726_v62 }
 0x122   : > { %v730_v5 = vadd.f32 %v729_v0, %v728_v3  ;;  %v631_v6 = vadd.f32 %v630_v54, %v629_v2 }
 0x124   : > { %v633_v12 = vadd.f32 %v632_v13, %v631_v6  ;;  %v732_v14 = vadd.f32 %v731_v10, %v730_v5 }
 0x126   : > { %v734_v17 = vadd.f32 %v733_v15, %v732_v14  ;;  %v635_v9 = vadd.f32 %v634_v22, %v633_v12 }
 0x128   : > { %v637_v26 = vadd.f32 %v636_v16, %v635_v9  ;;  %v736_v25 = vadd.f32 %v735_v19, %v734_v17 }
 0x12a   : > { %v738_v29 = vadd.f32 %v737_v21, %v736_v25  ;;  %v639_v46 = vadd.f32 %v638_v18, %v637_v26 }
 0x12c   : > { %v641_v33 = vadd.f32 %v640_v31, %v639_v46  ;;  %v740_v34 = vadd.f32 %v739_v32, %v738_v29 }
 0x12e   : > { %v643_v36 = vadd.f32 %v1236_v7, %v641_v33  ;;  %v742_v37 = vadd.f32 %v741_v35, %v740_v34 }
 0x130   : > { %v644_v30 = vrot.slane %v643_v36, 4  ;;  %v744_v38 = vadd.f32 %v1247_v20, %v742_v37 }
 0x132   : > { %v645_v57 = vadd.f32 %v644_v30, %v643_v36  ;;  %v745_v39 = vrot.slane %v744_v38, 4 }
 0x134   : > { %v646_v23 = vrot.slane %v645_v57, 2  ;;  %v746_v40 = vadd.f32 %v745_v39, %v744_v38 }
 0x136   : > { %v647_v42 = vadd.f32 %v646_v23, %v645_v57  ;;  %v747_v41 = vrot.slane %v746_v40, 2 }
 0x138   : > { %v648_v43 = vrot.slane %v647_v42, 1  ;;  %v748_v44 = vadd.f32 %v747_v41, %v746_v40 }
 0x13a   : > { %v749_v47 = vrot.slane %v748_v44, 1  ;;  %v649_v7 = vadd.f32 %v648_v43, %v647_v42 }
 0x13c   : > { %v750_v48 = vadd.f32 %v749_v47, %v748_v44 }
 0x13e   : > { %v752_v20 = vsel %vm751_vm3, %v649_v7, %v750_v48 }
 0x13f   : > { %754 = vst.msk [vmem:[%s184_s9] sm:$0x3] %vm753_vm4, %v752_v20 }
 0x140 PF: > { %s14_s12 = sadd.s32 1, %s1001_s12  }
 0x141   : > { %p11_p5 = scmp.ge.s32.totalorder %s14_s12, 4  }
 0x143   :  { %13 = sbr.rel (!%p11_p5) target bundleno = 1 (0x1), region = 70 }

// kernel: unet_apply.44
= control target key start
LH: loop header
LB: loop body
LE: loop exit
PB: predicated region body
PF: predicated region fallthrough
CT: control target
= control target key end

     0   :  { %s990_s15 = smov 0   ;;  %s992_s16 = smov 0   ;;  %s1423_s0 = inlined_call_operand.vmem [shape: f32[2,16,16,8], index: 0, kind: input, shape index: {}]   ;;  %s1424_s1 = inlined_call_operand.vmem [shape: f32[1,8], index: 1, kind: input, shape index: {}]   ;;  %s1425_s2 = inlined_call_operand.vmem [shape: f32[1,8], index: 2, kind: input, shape index: {}]   ;;  %s1426_s3 = inlined_call_operand.vmem [shape: bf16[2,16,16,8], index: 3, kind: output, shape index: {0}]   ;;  %s1427_s4 = inlined_call_operand.vmem [shape: bf16[2,8,8,8], index: 4, kind: output, shape index: {1}]  }
   0x1   :  { %s994_s17 = smov 0  }
   0x2 LB: > { %s27_s18 = sadd.s32 1, %s959_s16  ;;  %p839_p0 = scmp.ge.s32.totalorder %s963_s17, 1  ;;  %s963_s17 = sphi %s994_s17, %s15_s17   ;;  %s959_s16 = sphi %s992_s16, %s1429_s16   ;;  %s955_s15 = sphi %s990_s15, %s1428_s15  }
   0x3   : > { %p29_p1 = scmp.ge.s32.totalorder %s27_s18, 2  ;;  %p189_p2 = scmp.lt.s32.totalorder %s963_s17, 3 }
   0x5   : > { %s1431_s18 = smov (%p29_p1, %s27_s18), 0  ;;  %p190_p3 = pnand %p839_p0, %p189_p2 }
   0x6   : > { %p235_p4 = scmp.lt.s32.totalorder (!%p190_p3), %s955_s15, 1  ;;  %v1014_v0 = vld [vmem:[%s1424_s1] ss:$0 sm:$0xff] (!%p190_p3)  ;;  %vm569_vm0 = vcmask (!%p190_p3), 64512   ;;  %vm536_vm1 = vcmask (!%p190_p3), 60416  }
   0x7   : > { %193 = sbr.rel (%p190_p3) target bundleno = 77 (0x4d), region = 32  ;;  %v1024_v1 = vld [vmem:[%s1425_s2] ss:$0 sm:$0xff] (!%p190_p3) }
   0xe   : > { %s1433_s15 = smov (!%p235_p4, %s955_s15), 1 }
   0xf   : > { %s882_s19 = sshll.u32 %s1433_s15, 8  ;;  %s883_s27 = sshll.u32 %s1433_s15, 7 }
  0x10   : > { %s1019_s24 = scalar_lea.vmem %s1423_s0, %s882_s19  ;;  %s1264_s30 = scalar_lea.vmem %s1426_s3, %s883_s27 }
  0x11   : > { %v268_v2 = vld [vmem:[%s1019_s24] sm:$0xff]  ;;  %v270_v3 = vld [vmem:[%s1019_s24 + $0x10] sm:$0xff]  ;;  %v269_v4 = vld [vmem:[%s1019_s24 + $0x8] sm:$0xff]  ;;  %s884_s5 = sshll.u32 %s1433_s15, 5 }
  0x12   : > { %v306_v5 = vmul.f32 %v1014_v0, %v268_v2  ;;  %v308_v6 = vmul.f32 %v1014_v0, %v270_v3  ;;  %v271_v7 = vld [vmem:[%s1019_s24 + $0x18] sm:$0xff]  ;;  %v307_v8 = vmul.f32 %v1014_v0, %v269_v4  ;;  %v272_v9 = vld [vmem:[%s1019_s24 + $0x20] sm:$0xff]  ;;  %v274_v10 = vld [vmem:[%s1019_s24 + $0x30] sm:$0xff]  ;;  %s264_s8 = scalar_lea.vmem %s1427_s4, %s884_s5 }
  0x13   : > { %v309_v11 = vmul.f32 %v1014_v0, %v271_v7  ;;  %v310_v12 = vmul.f32 %v1014_v0, %v272_v9  ;;  %v312_v13 = vmul.f32 %v1014_v0, %v274_v10  ;;  %v273_v14 = vld [vmem:[%s1019_s24 + $0x28] sm:$0xff]  ;;  %v275_v15 = vld [vmem:[%s1019_s24 + $0x38] sm:$0xff]  ;;  %v276_v32 = vld [vmem:[%s1019_s24 + $0x40] sm:$0xff] }
  0x14   : > { %v344_v16 = vadd.f32 %v1024_v1, %v306_v5  ;;  %v346_v17 = vadd.f32 %v1024_v1, %v308_v6  ;;  %v345_v18 = vadd.f32 %v1024_v1, %v307_v8  ;;  %v311_v19 = vmul.f32 %v1014_v0, %v273_v14  ;;  %v278_v33 = vld [vmem:[%s1019_s24 + $0x50] sm:$0xff]  ;;  %v277_v38 = vld [vmem:[%s1019_s24 + $0x48] sm:$0xff]  ;;  %v279_v39 = vld [vmem:[%s1019_s24 + $0x58] sm:$0xff] }
  0x15   : > { %v347_v20 = vadd.f32 %v1024_v1, %v309_v11  ;;  %v348_v21 = vadd.f32 %v1024_v1, %v310_v12  ;;  %v350_v22 = vadd.f32 %v1024_v1, %v312_v13  ;;  %v313_v23 = vmul.f32 %v1014_v0, %v275_v15  ;;  %v280_v44 = vld [vmem:[%s1019_s24 + $0x60] sm:$0xff]  ;;  %v282_v45 = vld [vmem:[%s1019_s24 + $0x70] sm:$0xff]  ;;  %v281_v46 = vld [vmem:[%s1019_s24 + $0x68] sm:$0xff] }
  0x16   : > { %v1048_v24 = vmax.f32 %v344_v16, 0.0  ;;  %v1050_v25 = vmax.f32 %v346_v17, 0.0  ;;  %v1052_v26 = vmax.f32 %v345_v18, 0.0  ;;  %v349_v27 = vadd.f32 %v1024_v1, %v311_v19  ;;  %v283_v55 = vld [vmem:[%s1019_s24 + $0x78] sm:$0xff]  ;;  %v284_v14 = vld [vmem:[%s1019_s24 + $0x80] sm:$0xff]  ;;  %v286_v15 = vld [vmem:[%s1019_s24 + $0x90] sm:$0xff] }
  0x17   : > { %v1055_v28 = vmax.f32 %v347_v20, 0.0  ;;  %v1057_v29 = vmax.f32 %v348_v21, 0.0  ;;  %v1059_v30 = vmax.f32 %v350_v22, 0.0  ;;  %v351_v31 = vadd.f32 %v1024_v1, %v313_v23  ;;  %v285_v20 = vld [vmem:[%s1019_s24 + $0x88] sm:$0xff]  ;;  %v287_v21 = vld [vmem:[%s1019_s24 + $0x98] sm:$0xff] }
  0x18   : > { %v570_v34 = vsel %vm569_vm0, %v1048_v24, -inf  ;;  %v571_v35 = vsel %vm569_vm0, %v1050_v25, -inf  ;;  %v573_v36 = vsel %vm569_vm0, %v1052_v26, -inf  ;;  %v1070_v37 = vmax.f32 %v349_v27, 0.0 }
  0x19   : > { %v572_v40 = vmax.f32 %v570_v34, %v571_v35  ;;  %v574_v41 = vsel %vm569_vm0, %v1055_v28, -inf  ;;  %v576_v42 = vsel %vm569_vm0, %v1057_v29, -inf  ;;  %v577_v43 = vsel %vm569_vm0, %v1059_v30, -inf  ;;  %v289_v34 = vld [vmem:[%s1019_s24 + $0xa8] sm:$0xff] }
  0x1a   : > { %v575_v47 = vmax.f32 %v573_v36, %v574_v41  ;;  %v578_v48 = vmax.f32 %v576_v42, %v577_v43  ;;  %v1083_v49 = vmax.f32 %v351_v31, 0.0  ;;  %v579_v50 = vsel %vm569_vm0, %v1070_v37, -inf }
  0x1b   : > { %618 = vst.msk [vmem:[#allocation2] sm:$0xff] %vm569_vm0, %v572_v40  ;;  %v314_v51 = vmul.f32 %v1014_v0, %v276_v32  ;;  %v316_v52 = vmul.f32 %v1014_v0, %v278_v33  ;;  %v315_v53 = vmul.f32 %v1014_v0, %v277_v38  ;;  %v317_v54 = vmul.f32 %v1014_v0, %v279_v39  ;;  %v288_v32 = vld [vmem:[%s1019_s24 + $0xa0] sm:$0xff]  ;;  %v290_v33 = vld [vmem:[%s1019_s24 + $0xb0] sm:$0xff] }
  0x1c   : > { %619 = vst.msk [vmem:[#allocation2 + $0x8] sm:$0xff] %vm569_vm0, %v575_v47  ;;  %620 = vst.msk [vmem:[#allocation2 + $0x10] sm:$0xff] %vm569_vm0, %v578_v48  ;;  %v580_v56 = vsel %vm569_vm0, %v1083_v49, -inf  ;;  %v318_v57 = vmul.f32 %v1014_v0, %v280_v44  ;;  %v320_v58 = vmul.f32 %v1014_v0, %v282_v45  ;;  %v319_v59 = vmul.f32 %v1014_v0, %v281_v46  ;;  %v291_v44 = vld [vmem:[%s1019_s24 + $0xb8] sm:$0xff] }
  0x1d   : > { %v581_v60 = vmax.f32 %v579_v50, %v580_v56  ;;  %v352_v61 = vadd.f32 %v1024_v1, %v314_v51  ;;  %v354_v62 = vadd.f32 %v1024_v1, %v316_v52  ;;  %v353_v63 = vadd.f32 %v1024_v1, %v315_v53 }
  0x1e   : > { %v355_v2 = vadd.f32 %v1024_v1, %v317_v54  ;;  %v356_v3 = vadd.f32 %v1024_v1, %v318_v57  ;;  %v358_v4 = vadd.f32 %v1024_v1, %v320_v58  ;;  %v321_v5 = vmul.f32 %v1014_v0, %v283_v55 }
  0x1f   : > { %621 = vst.msk [vmem:[#allocation2 + $0x18] sm:$0xff] %vm569_vm0, %v581_v60  ;;  %v1108_v6 = vmax.f32 %v352_v61, 0.0  ;;  %v1110_v7 = vmax.f32 %v354_v62, 0.0  ;;  %v1112_v8 = vmax.f32 %v353_v63, 0.0  ;;  %v357_v9 = vadd.f32 %v1024_v1, %v319_v59 }
  0x20   : > { %v1115_v10 = vmax.f32 %v355_v2, 0.0  ;;  %v1117_v11 = vmax.f32 %v356_v3, 0.0  ;;  %v1119_v12 = vmax.f32 %v358_v4, 0.0  ;;  %v359_v13 = vadd.f32 %v1024_v1, %v321_v5  ;;  %v292_v4 = vld [vmem:[%s1019_s24 + $0xc0] sm:$0xff]  ;;  %v294_v5 = vld [vmem:[%s1019_s24 + $0xd0] sm:$0xff] }
  0x21   : > { %v582_v16 = vsel %vm569_vm0, %v1108_v6, -inf  ;;  %v583_v17 = vsel %vm569_vm0, %v1110_v7, -inf  ;;  %v585_v18 = vsel %vm569_vm0, %v1112_v8, -inf  ;;  %v1130_v19 = vmax.f32 %v357_v9, 0.0 }
  0x22   : > { %v584_v22 = vmax.f32 %v582_v16, %v583_v17  ;;  %v586_v23 = vsel %vm569_vm0, %v1115_v10, -inf  ;;  %v588_v27 = vsel %vm569_vm0, %v1117_v11, -inf  ;;  %v589_v31 = vsel %vm569_vm0, %v1119_v12, -inf  ;;  %v293_v16 = vld [vmem:[%s1019_s24 + $0xc8] sm:$0xff]  ;;  %v295_v17 = vld [vmem:[%s1019_s24 + $0xd8] sm:$0xff] }
  0x23   : > { %v587_v35 = vmax.f32 %v585_v18, %v586_v23  ;;  %v590_v36 = vmax.f32 %v588_v27, %v589_v31  ;;  %v1143_v38 = vmax.f32 %v359_v13, 0.0  ;;  %v591_v39 = vsel %vm569_vm0, %v1130_v19, -inf  ;;  %v296_v23 = vld [vmem:[%s1019_s24 + $0xe0] sm:$0xff]  ;;  %v298_v27 = vld [vmem:[%s1019_s24 + $0xf0] sm:$0xff]  ;;  %v297_v31 = vld [vmem:[%s1019_s24 + $0xe8] sm:$0xff] }
  0x24   : > { %622 = vst.msk [vmem:[#allocation2 + $0x20] sm:$0xff] %vm569_vm0, %v584_v22  ;;  %v322_v40 = vmul.f32 %v1014_v0, %v284_v14  ;;  %v324_v41 = vmul.f32 %v1014_v0, %v286_v15  ;;  %v323_v42 = vmul.f32 %v1014_v0, %v285_v20  ;;  %v325_v43 = vmul.f32 %v1014_v0, %v287_v21 }
  0x25   : > { %623 = vst.msk [vmem:[#allocation2 + $0x28] sm:$0xff] %vm569_vm0, %v587_v35  ;;  %624 = vst.msk [vmem:[#allocation2 + $0x30] sm:$0xff] %vm569_vm0, %v590_v36  ;;  %v592_v45 = vsel %vm569_vm0, %v1143_v38, -inf  ;;  %v326_v46 = vmul.f32 %v1014_v0, %v288_v32  ;;  %v328_v47 = vmul.f32 %v1014_v0, %v290_v33  ;;  %v327_v48 = vmul.f32 %v1014_v0, %v289_v34 }
  0x26   : > { %v593_v50 = vmax.f32 %v591_v39, %v592_v45  ;;  %v360_v51 = vadd.f32 %v1024_v1, %v322_v40  ;;  %v362_v52 = vadd.f32 %v1024_v1, %v324_v41  ;;  %v361_v53 = vadd.f32 %v1024_v1, %v323_v42  ;;  %v299_v42 = vld [vmem:[%s1019_s24 + $0xf8] sm:$0xff] }
  0x27   : > { %v363_v54 = vadd.f32 %v1024_v1, %v325_v43  ;;  %v364_v55 = vadd.f32 %v1024_v1, %v326_v46  ;;  %v366_v56 = vadd.f32 %v1024_v1, %v328_v47  ;;  %v329_v57 = vmul.f32 %v1014_v0, %v291_v44 }
  0x28   : > { %625 = vst.msk [vmem:[#allocation2 + $0x38] sm:$0xff] %vm569_vm0, %v593_v50  ;;  %v1168_v58 = vmax.f32 %v360_v51, 0.0  ;;  %v1170_v59 = vmax.f32 %v362_v52, 0.0  ;;  %v1172_v60 = vmax.f32 %v361_v53, 0.0  ;;  %v365_v61 = vadd.f32 %v1024_v1, %v327_v48 }
  0x29   : > { %v1175_v62 = vmax.f32 %v363_v54, 0.0  ;;  %v1177_v63 = vmax.f32 %v364_v55, 0.0  ;;  %v1179_v2 = vmax.f32 %v366_v56, 0.0  ;;  %v367_v3 = vadd.f32 %v1024_v1, %v329_v57 }
  0x2a   : > { %v594_v9 = vsel %vm569_vm0, %v1168_v58, -inf  ;;  %v595_v13 = vsel %vm569_vm0, %v1170_v59, -inf  ;;  %v597_v14 = vsel %vm569_vm0, %v1172_v60, -inf  ;;  %v1190_v15 = vmax.f32 %v365_v61, 0.0 }
  0x2b   : > { %v596_v18 = vmax.f32 %v594_v9, %v595_v13  ;;  %v598_v20 = vsel %vm569_vm0, %v1175_v62, -inf  ;;  %v600_v21 = vsel %vm569_vm0, %v1177_v63, -inf  ;;  %v601_v22 = vsel %vm569_vm0, %v1179_v2, -inf }
  0x2c   : > { %v599_v32 = vmax.f32 %v597_v14, %v598_v20  ;;  %v602_v33 = vmax.f32 %v600_v21, %v601_v22  ;;  %v1203_v34 = vmax.f32 %v367_v3, 0.0  ;;  %v603_v35 = vsel %vm569_vm0, %v1190_v15, -inf }
  0x2d   : > { %626 = vst.msk [vmem:[#allocation2 + $0x40] sm:$0xff] %vm569_vm0, %v596_v18  ;;  %v330_v36 = vmul.f32 %v1014_v0, %v292_v4  ;;  %v332_v39 = vmul.f32 %v1014_v0, %v294_v5  ;;  %v331_v40 = vmul.f32 %v1014_v0, %v293_v16  ;;  %v333_v41 = vmul.f32 %v1014_v0, %v295_v17 }
  0x2e   : > { %627 = vst.msk [vmem:[#allocation2 + $0x48] sm:$0xff] %vm569_vm0, %v599_v32  ;;  %628 = vst.msk [vmem:[#allocation2 + $0x50] sm:$0xff] %vm569_vm0, %v602_v33  ;;  %v604_v43 = vsel %vm569_vm0, %v1203_v34, -inf  ;;  %v334_v44 = vmul.f32 %v1014_v0, %v296_v23  ;;  %v336_v45 = vmul.f32 %v1014_v0, %v298_v27  ;;  %v335_v46 = vmul.f32 %v1014_v0, %v297_v31 }
  0x2f   : > { %v605_v47 = vmax.f32 %v603_v35, %v604_v43  ;;  %v368_v48 = vadd.f32 %v1024_v1, %v330_v36  ;;  %v370_v50 = vadd.f32 %v1024_v1, %v332_v39  ;;  %v369_v51 = vadd.f32 %v1024_v1, %v331_v40  ;;  %v636_v43 = vld [vmem:[#allocation2 + $0x10] ss:$2 sm:$0xff] }
  0x30   : > { %v371_v52 = vadd.f32 %v1024_v1, %v333_v41  ;;  %v372_v53 = vadd.f32 %v1024_v1, %v334_v44  ;;  %v374_v54 = vadd.f32 %v1024_v1, %v336_v45  ;;  %v337_v55 = vmul.f32 %v1014_v0, %v299_v42  ;;  %v634_v41 = vld [vmem:[#allocation2] ss:$2 sm:$0xff]  ;;  %v650_v42 = vld [vmem:[#allocation2 + $0x1] ss:$2 sm:$0xff]  ;;  %v652_v44 = vld [vmem:[#allocation2 + $0x11] ss:$2 sm:$0xff] }
  0x31   : > { %629 = vst.msk [vmem:[#allocation2 + $0x58] sm:$0xff] %vm569_vm0, %v605_v47  ;;  %v1228_v56 = vmax.f32 %v368_v48, 0.0  ;;  %v1230_v57 = vmax.f32 %v370_v50, 0.0  ;;  %v1232_v61 = vmax.f32 %v369_v51, 0.0  ;;  %v373_v3 = vadd.f32 %v1024_v1, %v335_v46  ;;  %v638_v45 = vld [vmem:[#allocation2 + $0x20] ss:$2 sm:$0xff] }
  0x32   : > { %v1235_v4 = vmax.f32 %v371_v52, 0.0  ;;  %v1237_v5 = vmax.f32 %v372_v53, 0.0  ;;  %v1239_v9 = vmax.f32 %v374_v54, 0.0  ;;  %v375_v13 = vadd.f32 %v1024_v1, %v337_v55  ;;  %v654_v46 = vld [vmem:[#allocation2 + $0x21] ss:$2 sm:$0xff] }
  0x33   : > { %v606_v0 = vsel %vm569_vm0, %v1228_v56, -inf  ;;  %v607_v14 = vsel %vm569_vm0, %v1230_v57, -inf  ;;  %v609_v16 = vsel %vm569_vm0, %v1232_v61, -inf  ;;  %v1249_v17 = vmax.f32 %v373_v3, 0.0  ;;  %v640_v47 = vld [vmem:[#allocation2 + $0x30] ss:$2 sm:$0xff] }
  0x34   : > { %v608_v18 = vmax.f32 %v606_v0, %v607_v14  ;;  %v610_v20 = vsel %vm569_vm0, %v1235_v4, -inf  ;;  %v612_v21 = vsel %vm569_vm0, %v1237_v5, -inf  ;;  %v613_v1 = vsel %vm569_vm0, %v1239_v9, -inf  ;;  %v656_v48 = vld [vmem:[#allocation2 + $0x31] ss:$2 sm:$0xff] }
  0x35   : > { %v611_v22 = vmax.f32 %v609_v16, %v610_v20  ;;  %v614_v23 = vmax.f32 %v612_v21, %v613_v1  ;;  %v1257_v27 = vmax.f32 %v375_v13, 0.0  ;;  %v615_v31 = vsel %vm569_vm0, %v1249_v17, -inf  ;;  %v642_v50 = vld [vmem:[#allocation2 + $0x40] ss:$2 sm:$0xff]  ;;  %v658_v51 = vld [vmem:[#allocation2 + $0x41] ss:$2 sm:$0xff] }
  0x36   : > { %630 = vst.msk [vmem:[#allocation2 + $0x60] sm:$0xff] %vm569_vm0, %v608_v18  ;;  %v885_v32 = vpack.c.bf16 %v1048_v24, %v1048_v24  ;;  %v886_v33 = vpack.c.bf16 %v1052_v26, %v1052_v26  ;;  %v887_v35 = vpack.c.bf16 %v1050_v25, %v1050_v25  ;;  %v888_v36 = vpack.c.bf16 %v1055_v28, %v1055_v28 }
  0x37   : > { %631 = vst.msk [vmem:[#allocation2 + $0x68] sm:$0xff] %vm569_vm0, %v611_v22  ;;  %632 = vst.msk [vmem:[#allocation2 + $0x70] sm:$0xff] %vm569_vm0, %v614_v23  ;;  %v616_v24 = vsel %vm569_vm0, %v1257_v27, -inf  ;;  %v889_v26 = vpack.c.bf16 %v1057_v29, %v1057_v29  ;;  %v890_v25 = vpack.c.bf16 %v1070_v37, %v1070_v37  ;;  %v891_v39 = vpack.c.bf16 %v1059_v30, %v1059_v30 }
  0x38   : > { %v617_v28 = vmax.f32 %v615_v31, %v616_v24  ;;  %537 = vst.msk [vmem:[%s1264_s30] sm:$0xf] %vm536_vm1, %v885_v32  ;;  %538 = vst.msk [vmem:[%s1264_s30 + $0x4] sm:$0xf] %vm536_vm1, %v886_v33  ;;  %v892_v40 = vpack.c.bf16 %v1083_v49, %v1083_v49  ;;  %v893_v29 = vpack.c.bf16 %v1108_v6, %v1108_v6  ;;  %v644_v52 = vld [vmem:[#allocation2 + $0x50] ss:$2 sm:$0xff] }
  0x39   : > { %539 = vst.msk [vmem:[%s1264_s30 + $0x8] sm:$0xf] %vm536_vm1, %v887_v35  ;;  %540 = vst.msk [vmem:[%s1264_s30 + $0xc] sm:$0xf] %vm536_vm1, %v888_v36  ;;  %v894_v30 = vpack.c.bf16 %v1112_v8, %v1112_v8  ;;  %v895_v37 = vpack.c.bf16 %v1110_v7, %v1110_v7  ;;  %v896_v49 = vpack.c.bf16 %v1115_v10, %v1115_v10  ;;  %v660_v53 = vld [vmem:[#allocation2 + $0x51] ss:$2 sm:$0xff] }
  0x3a   : > { %541 = vst.msk [vmem:[%s1264_s30 + $0x10] sm:$0xf] %vm536_vm1, %v889_v26  ;;  %542 = vst.msk [vmem:[%s1264_s30 + $0x14] sm:$0xf] %vm536_vm1, %v890_v25  ;;  %v897_v6 = vpack.c.bf16 %v1117_v11, %v1117_v11  ;;  %v898_v8 = vpack.c.bf16 %v1130_v19, %v1130_v19  ;;  %v899_v7 = vpack.c.bf16 %v1119_v12, %v1119_v12 }
  0x3b   : > { %543 = vst.msk [vmem:[%s1264_s30 + $0x18] sm:$0xf] %vm536_vm1, %v891_v39  ;;  %544 = vst.msk [vmem:[%s1264_s30 + $0x1c] sm:$0xf] %vm536_vm1, %v892_v40  ;;  %v900_v10 = vpack.c.bf16 %v1143_v38, %v1143_v38  ;;  %v901_v11 = vpack.c.bf16 %v1168_v58, %v1168_v58  ;;  %v902_v19 = vpack.c.bf16 %v1172_v60, %v1172_v60 }
  0x3c   : > { %633 = vst.msk [vmem:[#allocation2 + $0x78] sm:$0xff] %vm569_vm0, %v617_v28  ;;  %v903_v12 = vpack.c.bf16 %v1170_v59, %v1170_v59  ;;  %v904_v38 = vpack.c.bf16 %v1175_v62, %v1175_v62  ;;  %v905_v58 = vpack.c.bf16 %v1177_v63, %v1177_v63  ;;  %v906_v60 = vpack.c.bf16 %v1190_v15, %v1190_v15 }
  0x3d   : > { %545 = vst.msk [vmem:[%s1264_s30 + $0x20] sm:$0xf] %vm536_vm1, %v893_v29  ;;  %546 = vst.msk [vmem:[%s1264_s30 + $0x24] sm:$0xf] %vm536_vm1, %v894_v30  ;;  %v907_v59 = vpack.c.bf16 %v1179_v2, %v1179_v2  ;;  %v908_v62 = vpack.c.bf16 %v1203_v34, %v1203_v34  ;;  %v909_v63 = vpack.c.bf16 %v1228_v56, %v1228_v56 }
  0x3e   : > { %547 = vst.msk [vmem:[%s1264_s30 + $0x28] sm:$0xf] %vm536_vm1, %v895_v37  ;;  %548 = vst.msk [vmem:[%s1264_s30 + $0x2c] sm:$0xf] %vm536_vm1, %v896_v49  ;;  %v910_v15 = vpack.c.bf16 %v1232_v61, %v1232_v61  ;;  %v911_v2 = vpack.c.bf16 %v1230_v57, %v1230_v57  ;;  %v912_v34 = vpack.c.bf16 %v1235_v4, %v1235_v4  ;;  %v646_v4 = vld [vmem:[#allocation2 + $0x60] ss:$2 sm:$0xff] }
  0x3f   : > { %549 = vst.msk [vmem:[%s1264_s30 + $0x30] sm:$0xf] %vm536_vm1, %v897_v6  ;;  %550 = vst.msk [vmem:[%s1264_s30 + $0x34] sm:$0xf] %vm536_vm1, %v898_v8  ;;  %v913_v54 = vpack.c.bf16 %v1237_v5, %v1237_v5  ;;  %v914_v55 = vpack.c.bf16 %v1249_v17, %v1249_v17  ;;  %v915_v56 = vpack.c.bf16 %v1239_v9, %v1239_v9  ;;  %v662_v5 = vld [vmem:[#allocation2 + $0x61] ss:$2 sm:$0xff] }
  0x40   : > { %551 = vst.msk [vmem:[%s1264_s30 + $0x38] sm:$0xf] %vm536_vm1, %v899_v7  ;;  %552 = vst.msk [vmem:[%s1264_s30 + $0x3c] sm:$0xf] %vm536_vm1, %v900_v10  ;;  %v916_v57 = vpack.c.bf16 %v1257_v27, %v1257_v27  ;;  %v665_v61 = vmax.f32 %v634_v41, %v650_v42  ;;  %v666_v3 = vmax.f32 %v636_v43, %v652_v44 }
  0x41   : > { %553 = vst.msk [vmem:[%s1264_s30 + $0x40] sm:$0xf] %vm536_vm1, %v901_v11  ;;  %554 = vst.msk [vmem:[%s1264_s30 + $0x44] sm:$0xf] %vm536_vm1, %v902_v19  ;;  %v667_v9 = vmax.f32 %v638_v45, %v654_v46  ;;  %v668_v13 = vmax.f32 %v640_v47, %v656_v48  ;;  %v669_v0 = vmax.f32 %v642_v50, %v658_v51 }
  0x42   : > { %555 = vst.msk [vmem:[%s1264_s30 + $0x48] sm:$0xf] %vm536_vm1, %v903_v12  ;;  %556 = vst.msk [vmem:[%s1264_s30 + $0x4c] sm:$0xf] %vm536_vm1, %v904_v38  ;;  %v670_v14 = vmax.f32 %v644_v52, %v660_v53  ;;  %v673_v16 = vpack.c.bf16 %v665_v61, %v665_v61  ;;  %v674_v17 = vpack.c.bf16 %v666_v3, %v666_v3 }
  0x43   : > { %557 = vst.msk [vmem:[%s1264_s30 + $0x50] sm:$0xf] %vm536_vm1, %v905_v58  ;;  %558 = vst.msk [vmem:[%s1264_s30 + $0x54] sm:$0xf] %vm536_vm1, %v906_v60  ;;  %v671_v18 = vmax.f32 %v646_v4, %v662_v5  ;;  %v675_v20 = vpack.c.bf16 %v667_v9, %v667_v9  ;;  %v676_v21 = vpack.c.bf16 %v668_v13, %v668_v13  ;;  %v648_v23 = vld [vmem:[#allocation2 + $0x70] ss:$2 sm:$0xff] }
  0x44   : > { %559 = vst.msk [vmem:[%s1264_s30 + $0x58] sm:$0xf] %vm536_vm1, %v907_v59  ;;  %560 = vst.msk [vmem:[%s1264_s30 + $0x5c] sm:$0xf] %vm536_vm1, %v908_v62  ;;  %v677_v1 = vpack.c.bf16 %v669_v0, %v669_v0  ;;  %v678_v22 = vpack.c.bf16 %v670_v14, %v670_v14  ;;  %v664_v27 = vld [vmem:[#allocation2 + $0x71] ss:$2 sm:$0xff] }
  0x45   : > { %561 = vst.msk [vmem:[%s1264_s30 + $0x60] sm:$0xf] %vm536_vm1, %v909_v63  ;;  %562 = vst.msk [vmem:[%s1264_s30 + $0x64] sm:$0xf] %vm536_vm1, %v910_v15  ;;  %v679_v31 = vpack.c.bf16 %v671_v18, %v671_v18  ;;  %v672_v32 = vmax.f32 %v648_v23, %v664_v27 }
  0x46   : > { %563 = vst.msk [vmem:[%s1264_s30 + $0x68] sm:$0xf] %vm536_vm1, %v911_v2  ;;  %564 = vst.msk [vmem:[%s1264_s30 + $0x6c] sm:$0xf] %vm536_vm1, %v912_v34 }
  0x47   : > { %565 = vst.msk [vmem:[%s1264_s30 + $0x70] sm:$0xf] %vm536_vm1, %v913_v54  ;;  %566 = vst.msk [vmem:[%s1264_s30 + $0x74] sm:$0xf] %vm536_vm1, %v914_v55  ;;  %v680_v33 = vpack.c.bf16 %v672_v32, %v672_v32 }
  0x48   : > { %567 = vst.msk [vmem:[%s1264_s30 + $0x78] sm:$0xf] %vm536_vm1, %v915_v56  ;;  %568 = vst.msk [vmem:[%s1264_s30 + $0x7c] sm:$0xf] %vm536_vm1, %v916_v57 }
  0x49   : > { %681 = vst.msk [vmem:[%s264_s8] sm:$0xf] %vm536_vm1, %v673_v16  ;;  %682 = vst.msk [vmem:[%s264_s8 + $0x4] sm:$0xf] %vm536_vm1, %v674_v17 }
  0x4a   : > { %683 = vst.msk [vmem:[%s264_s8 + $0x8] sm:$0xf] %vm536_vm1, %v675_v20  ;;  %684 = vst.msk [vmem:[%s264_s8 + $0xc] sm:$0xf] %vm536_vm1, %v676_v21 }
  0x4b   : > { %685 = vst.msk [vmem:[%s264_s8 + $0x10] sm:$0xf] %vm536_vm1, %v677_v1  ;;  %686 = vst.msk [vmem:[%s264_s8 + $0x14] sm:$0xf] %vm536_vm1, %v678_v22 }
  0x4c   : > { %687 = vst.msk [vmem:[%s264_s8 + $0x18] sm:$0xf] %vm536_vm1, %v679_v31  ;;  %688 = vst.msk [vmem:[%s264_s8 + $0x1c] sm:$0xf] %vm536_vm1, %v680_v33 }
  0x4d PF: > { %s15_s17 = sadd.s32 1, %s963_s17   ;;  %s1428_s15 = smov %s959_s16 }
  0x4e   : > { %p12_p5 = scmp.ge.s32.totalorder %s15_s17, 4   ;;  %s1429_s16 = smov %s1431_s18 }
  0x50   :  { %14 = sbr.rel (!%p12_p5) target bundleno = 2 (0x2), region = 89 }

// kernel: unet_apply.46
= control target key start
LH: loop header
LB: loop body
LE: loop exit
PB: predicated region body
PF: predicated region fallthrough
CT: control target
= control target key end

     0   :  { %s443_s12 = smov 0   ;;  %s445_s13 = smov 0   ;;  %s494_s0 = inlined_call_operand.vmem [shape: f32[2,8,8,16], index: 0, kind: input, shape index: {}]   ;;  %s495_s1 = inlined_call_operand.vmem [shape: f32[1,16], index: 1, kind: input, shape index: {}]   ;;  %s496_s2 = inlined_call_operand.vmem [shape: f32[1,16], index: 2, kind: input, shape index: {}]   ;;  %s497_s3 = inlined_call_operand.vmem [shape: bf16[2,8,8,16], index: 3, kind: output, shape index: {}]  }
   0x1   :  { %s447_s14 = smov 0  }
   0x2 LB: > { %s25_s15 = sadd.s32 1, %s417_s13  ;;  %p364_p0 = scmp.ge.s32.totalorder %s421_s14, 1  ;;  %s421_s14 = sphi %s447_s14, %s13_s14   ;;  %s417_s13 = sphi %s445_s13, %s499_s13   ;;  %s413_s12 = sphi %s443_s12, %s498_s12  }
   0x3   : > { %p27_p1 = scmp.ge.s32.totalorder %s25_s15, 2  ;;  %p158_p2 = scmp.lt.s32.totalorder %s421_s14, 3 }
   0x5   : > { %s501_s15 = smov (%p27_p1, %s25_s15), 0  ;;  %p159_p3 = pnand %p364_p0, %p158_p2 }
   0x6   : > { %p191_p4 = scmp.lt.s32.totalorder (!%p159_p3), %s413_s12, 1  ;;  %v369_v0 = vld [vmem:[%s495_s1] ss:$0 sm:$0xff] (!%p159_p3)  ;;  %vm264_vm0 = vcmask (!%p159_p3), 125952  }
   0x7   : > { %162 = sbr.rel (%p159_p3) target bundleno = 30 (0x1e), region = 32  ;;  %v370_v1 = vld [vmem:[%s496_s2] ss:$0 sm:$0xff] (!%p159_p3) }
   0xe   : > { %s503_s12 = smov (!%p191_p4, %s413_s12), 1 }
   0xf   : > { %s373_s16 = sshll.u32 %s503_s12, 6  ;;  %s374_s24 = sshll.u32 %s503_s12, 5 }
  0x10   : > { %s198_s21 = scalar_lea.vmem %s494_s0, %s373_s16  ;;  %s208_s27 = scalar_lea.vmem %s497_s3, %s374_s24 }
  0x11   : > { %v212_v2 = vld [vmem:[%s198_s21] sm:$0xff]  ;;  %v213_v3 = vld [vmem:[%s198_s21 + $0x8] sm:$0xff]  ;;  %v214_v4 = vld [vmem:[%s198_s21 + $0x10] sm:$0xff] }
  0x12   : > { %v226_v5 = vmul.f32 %v369_v0, %v212_v2  ;;  %v227_v6 = vmul.f32 %v369_v0, %v213_v3  ;;  %v228_v7 = vmul.f32 %v369_v0, %v214_v4  ;;  %v215_v8 = vld [vmem:[%s198_s21 + $0x18] sm:$0xff]  ;;  %v216_v9 = vld [vmem:[%s198_s21 + $0x20] sm:$0xff]  ;;  %v217_v10 = vld [vmem:[%s198_s21 + $0x28] sm:$0xff] }
  0x13   : > { %v229_v11 = vmul.f32 %v369_v0, %v215_v8  ;;  %v230_v12 = vmul.f32 %v369_v0, %v216_v9  ;;  %v231_v13 = vmul.f32 %v369_v0, %v217_v10  ;;  %v218_v14 = vld [vmem:[%s198_s21 + $0x30] sm:$0xff]  ;;  %v219_v15 = vld [vmem:[%s198_s21 + $0x38] sm:$0xff] }
  0x14   : > { %v240_v16 = vadd.f32 %v370_v1, %v226_v5  ;;  %v241_v17 = vadd.f32 %v370_v1, %v227_v6  ;;  %v242_v18 = vadd.f32 %v370_v1, %v228_v7  ;;  %v232_v19 = vmul.f32 %v369_v0, %v218_v14 }
  0x15   : > { %v243_v20 = vadd.f32 %v370_v1, %v229_v11  ;;  %v244_v21 = vadd.f32 %v370_v1, %v230_v12  ;;  %v245_v22 = vadd.f32 %v370_v1, %v231_v13  ;;  %v233_v23 = vmul.f32 %v369_v0, %v219_v15 }
  0x16   : > { %v248_v24 = vmax.f32 %v240_v16, 0.0  ;;  %v249_v25 = vmax.f32 %v241_v17, 0.0  ;;  %v250_v26 = vmax.f32 %v242_v18, 0.0  ;;  %v246_v27 = vadd.f32 %v370_v1, %v232_v19 }
  0x17   : > { %v251_v28 = vmax.f32 %v243_v20, 0.0  ;;  %v252_v29 = vmax.f32 %v244_v21, 0.0  ;;  %v253_v30 = vmax.f32 %v245_v22, 0.0  ;;  %v247_v31 = vadd.f32 %v370_v1, %v233_v23 }
  0x18   : > { %v256_v32 = vpack.c.bf16 %v248_v24, %v248_v24  ;;  %v257_v33 = vpack.c.bf16 %v249_v25, %v249_v25  ;;  %v258_v34 = vpack.c.bf16 %v250_v26, %v250_v26  ;;  %v254_v35 = vmax.f32 %v246_v27, 0.0 }
  0x19   : > { %v259_v36 = vpack.c.bf16 %v251_v28, %v251_v28  ;;  %v260_v37 = vpack.c.bf16 %v252_v29, %v252_v29  ;;  %v261_v38 = vpack.c.bf16 %v253_v30, %v253_v30  ;;  %v255_v39 = vmax.f32 %v247_v31, 0.0 }
  0x1a   : > { %265 = vst.msk [vmem:[%s208_s27] sm:$0xf] %vm264_vm0, %v256_v32  ;;  %266 = vst.msk [vmem:[%s208_s27 + $0x4] sm:$0xf] %vm264_vm0, %v257_v33  ;;  %v262_v40 = vpack.c.bf16 %v254_v35, %v254_v35 }
  0x1b   : > { %267 = vst.msk [vmem:[%s208_s27 + $0x8] sm:$0xf] %vm264_vm0, %v258_v34  ;;  %268 = vst.msk [vmem:[%s208_s27 + $0xc] sm:$0xf] %vm264_vm0, %v259_v36  ;;  %v263_v41 = vpack.c.bf16 %v255_v39, %v255_v39 }
  0x1c   : > { %269 = vst.msk [vmem:[%s208_s27 + $0x10] sm:$0xf] %vm264_vm0, %v260_v37  ;;  %270 = vst.msk [vmem:[%s208_s27 + $0x14] sm:$0xf] %vm264_vm0, %v261_v38 }
  0x1d   : > { %271 = vst.msk [vmem:[%s208_s27 + $0x18] sm:$0xf] %vm264_vm0, %v262_v40  ;;  %272 = vst.msk [vmem:[%s208_s27 + $0x1c] sm:$0xf] %vm264_vm0, %v263_v41 }
  0x1e PF: > { %s13_s14 = sadd.s32 1, %s421_s14   ;;  %s498_s12 = smov %s417_s13 }
  0x1f   : > { %p10_p5 = scmp.ge.s32.totalorder %s13_s14, 4   ;;  %s499_s13 = smov %s501_s15 }
  0x21   :  { %12 = sbr.rel (!%p10_p5) target bundleno = 2 (0x2), region = 62 }

// kernel: unet_apply.45
= control target key start
LH: loop header
LB: loop body
LE: loop exit
PB: predicated region body
PF: predicated region fallthrough
CT: control target
= control target key end

     0   :  { %vm106_vm0 = vcmask 588800   ;;  %vm131_vm1 = vcmask 1043456   ;;  %vm232_vm2 = vcmask 130048   ;;  %vm339_vm3 = vcmask 1040384   ;;  %s620_s1 = inlined_call_operand.vmem [shape: bf16[72,16], index: 1, kind: input, shape index: {}]   ;;  %s621_s0 = inlined_call_operand.vmem [shape: bf16[128,72], index: 0, kind: input, shape index: {}]   ;;  %s622_s2 = inlined_call_operand.vmem [shape: f32[128,16], index: 2, kind: output, shape index: {0}]   ;;  %s623_s3 = inlined_call_operand.vmem [shape: f32[1,2,16], index: 3, kind: output, shape index: {1}]  }
   0x1   :  { %v423_v0 = vld [vmem:[%s620_s1] sm:$0xff]   ;;  %v424_v1 = vld [vmem:[%s620_s1 + $0x8] sm:$0xff]   ;;  %v425_v2 = vld [vmem:[%s620_s1 + $0x10] sm:$0xff]   ;;  %vm341_vm4 = vcmask 123904  }
   0x2   :  { %385 = vmatprep.subr.bf16.mxu0 %v423_v0  ;;  %411 = vmatprep.subr.bf16.mxu1 %v423_v0  ;;  %v428_v3 = vld [vmem:[%s621_s0] sm:$0xff]   ;;  %v426_v4 = vld [vmem:[%s620_s1 + $0x18] sm:$0xff]   ;;  %v429_v8 = vld [vmem:[%s621_s0 + $0x8] sm:$0xff]  }
   0x3   :  { %386 = vmatpush3.bf16.msra.mxu0 %v423_v0  ;;  %416 = vmatpush3.bf16.msra.mxu1 %v423_v0  ;;  %v432_v5 = vld [vmem:[%s621_s0 + $0x20] sm:$0xff]   ;;  %v433_v9 = vld [vmem:[%s621_s0 + $0x28] sm:$0xff]   ;;  %v430_v10 = vld [vmem:[%s621_s0 + $0x10] sm:$0xff]  }
   0x4   :  { %387 = vmatprep.subr.bf16.mxu0 %v424_v1  ;;  %412 = vmatprep.subr.bf16.mxu1 %v424_v1  ;;  %v427_v6 = vld [vmem:[%s620_s1 + $0x20] ss:$0 sps:$4 sm:$0xff]   ;;  %v434_v11 = vld [vmem:[%s621_s0 + $0x30] sm:$0xff]   ;;  %v431_v12 = vld [vmem:[%s621_s0 + $0x18] sm:$0xff]  }
   0x5   :  { %395 = vmatprep.mubr.msk.bf16.mxu0 %vm106_vm0, %v428_v3  ;;  %403 = vmatprep.mubr.msk.bf16.mxu1 %vm106_vm0, %v432_v5  ;;  %v133_v7 = vsel %vm131_vm1, %v427_v6, 0  ;;  %v435_v13 = vld [vmem:[%s621_s0 + $0x38] sm:$0xff]  }
   0x7   :  { %388 = vmatpush3.bf16.msra.mxu0 %v424_v1  ;;  %417 = vmatpush3.bf16.msra.mxu1 %v424_v1 }
   0x8   :  { %389 = vmatprep.subr.bf16.mxu0 %v425_v2  ;;  %413 = vmatprep.subr.bf16.mxu1 %v425_v2 }
   0xb   :  { %390 = vmatpush3.bf16.msra.mxu0 %v425_v2  ;;  %418 = vmatpush3.bf16.msra.mxu1 %v425_v2 }
   0xc   :  { %391 = vmatprep.subr.bf16.mxu0 %v426_v4  ;;  %414 = vmatprep.subr.bf16.mxu1 %v426_v4 }
   0xf   :  { %392 = vmatpush3.bf16.msra.mxu0 %v426_v4  ;;  %419 = vmatpush3.bf16.msra.mxu1 %v426_v4 }
  0x10   :  { %421 = vmatprep.subr.msk.bf16.mxu0 %vm131_vm1, %v427_v6  ;;  %422 = vmatprep.subr.msk.bf16.mxu1 %vm131_vm1, %v427_v6 }
  0x13   :  { %394 = vmatpush3.bf16.msra.mxu0 %v133_v7  ;;  %420 = vmatpush3.bf16.msra.mxu1 %v133_v7 }
  0x16   :  { %396 = vmatmul.mubr.msk.bf16.vlgmr.msra.gmra.mrb[0].mxu0 %vm106_vm0, %v429_v8  ;;  %404 = vmatmul.mubr.msk.bf16.vlgmr.msra.gmra.mrb[0].mxu1 %vm106_vm0, %v433_v9 }
  0x17   :  { %399 = vmatprep.mubr.msk.bf16.mxu0 %vm106_vm0, %v430_v10  ;;  %407 = vmatprep.mubr.msk.bf16.mxu1 %vm106_vm0, %v434_v11 }
  0x1e   :  { %400 = vmatmul.mubr.msk.bf16.gmra.mrb[4].mxu0 %vm106_vm0, %v431_v12  ;;  %408 = vmatmul.mubr.msk.bf16.gmra.mrb[4].mxu1 %vm106_vm0, %v435_v13 }
  0xe9   :  { %v397_v14 = vpop.f32.mrb[0].mxu0  ;;  %v503_v15 = vpop.f32.mrb[0].mxu1 }
  0xea   :  { %235 = vst.msk [vmem:[%s622_s2 + $0x10] sm:$0xff] %vm232_vm2, %v397_v14  ;;  %v169_v16 = vpop.f32.mrb[1].mxu0  ;;  %243 = vst.msk [vmem:[%s622_s2 + $0x50] sm:$0xff] %vm232_vm2, %v503_v15  ;;  %v201_v17 = vpop.f32.mrb[1].mxu1  ;;  %v288_v23 = vmul.f32 %v397_v14, %v397_v14  ;;  %v252_v28 = vsel %vm232_vm2, %v397_v14, 0.0  ;;  %v296_v9 = vmul.f32 %v503_v15, %v503_v15  ;;  %v268_v13 = vsel %vm232_vm2, %v503_v15, 0.0 }
  0xeb   :  { %233 = vst.msk [vmem:[%s622_s2] sm:$0xff] %vm232_vm2, %v169_v16  ;;  %v286_v18 = vmul.f32 %v169_v16, %v169_v16  ;;  %v398_v19 = vpop.f32.mrb[2].mxu0  ;;  %241 = vst.msk [vmem:[%s622_s2 + $0x40] sm:$0xff] %vm232_vm2, %v201_v17  ;;  %v522_v20 = vpop.f32.mrb[2].mxu1  ;;  %v249_v24 = vsel %vm232_vm2, %v169_v16, 0.0  ;;  %v294_v60 = vmul.f32 %v201_v17, %v201_v17  ;;  %v264_v1 = vsel %vm232_vm2, %v201_v17, 0.0 }
  0xec   :  { %236 = vst.msk [vmem:[%s622_s2 + $0x18] sm:$0xff] %vm232_vm2, %v398_v19  ;;  %v172_v21 = vpop.f32.mrb[3].mxu0  ;;  %244 = vst.msk [vmem:[%s622_s2 + $0x58] sm:$0xff] %vm232_vm2, %v522_v20  ;;  %v204_v22 = vpop.f32.mrb[3].mxu1  ;;  %v289_v30 = vmul.f32 %v398_v19, %v398_v19  ;;  %v305_v34 = vsel %vm232_vm2, %v288_v23, 0.0  ;;  %v254_v35 = vsel %vm232_vm2, %v398_v19, 0.0  ;;  %v297_v14 = vmul.f32 %v522_v20, %v522_v20 }
  0xed   :  { %234 = vst.msk [vmem:[%s622_s2 + $0x8] sm:$0xff] %vm232_vm2, %v172_v21  ;;  %v250_v25 = vsel %vm232_vm2, %v172_v21, 0.0  ;;  %v287_v26 = vmul.f32 %v172_v21, %v172_v21  ;;  %242 = vst.msk [vmem:[%s622_s2 + $0x48] sm:$0xff] %vm232_vm2, %v204_v22  ;;  %v302_v29 = vsel %vm232_vm2, %v286_v18, 0.0  ;;  %v317_v5 = vsel %vm232_vm2, %v294_v60, 0.0 }
  0xee   :  { %v251_v27 = vadd.f32 %v250_v25, %v249_v24  ;;  %v307_v42 = vsel %vm232_vm2, %v289_v30, 0.0  ;;  %v295_v6 = vmul.f32 %v204_v22, %v204_v22  ;;  %v266_v10 = vsel %vm232_vm2, %v204_v22, 0.0 }
  0xef   :  { %v303_v31 = vsel %vm232_vm2, %v287_v26, 0.0  ;;  %v321_v21 = vsel %vm232_vm2, %v296_v9, 0.0  ;;  %v270_v23 = vsel %vm232_vm2, %v522_v20, 0.0  ;;  %v323_v26 = vsel %vm232_vm2, %v297_v14, 0.0 }
  0xf0   :  { %v253_v32 = vadd.f32 %v252_v28, %v251_v27  ;;  %v304_v33 = vadd.f32 %v303_v31, %v302_v29  ;;  %v319_v16 = vsel %vm232_vm2, %v295_v6, 0.0 }
  0xf1   :  { %v401_v36 = vpop.f32.mrb[4].mxu0  ;;  %v548_v37 = vpop.f32.mrb[4].mxu1 }
  0xf2   :  { %v306_v38 = vadd.f32 %v305_v34, %v304_v33  ;;  %239 = vst.msk [vmem:[%s622_s2 + $0x30] sm:$0xff] %vm232_vm2, %v401_v36  ;;  %v185_v39 = vpop.f32.mrb[5].mxu0  ;;  %v255_v40 = vadd.f32 %v254_v35, %v253_v32  ;;  %247 = vst.msk [vmem:[%s622_s2 + $0x70] sm:$0xff] %vm232_vm2, %v548_v37  ;;  %v217_v41 = vpop.f32.mrb[5].mxu1  ;;  %v292_v51 = vmul.f32 %v401_v36, %v401_v36  ;;  %v260_v57 = vsel %vm232_vm2, %v401_v36, 0.0 }
  0xf3   :  { %237 = vst.msk [vmem:[%s622_s2 + $0x20] sm:$0xff] %vm232_vm2, %v185_v39  ;;  %v256_v43 = vsel %vm232_vm2, %v185_v39, 0.0  ;;  %v290_v44 = vmul.f32 %v185_v39, %v185_v39  ;;  %v402_v45 = vpop.f32.mrb[6].mxu0  ;;  %245 = vst.msk [vmem:[%s622_s2 + $0x60] sm:$0xff] %vm232_vm2, %v217_v41  ;;  %v410_v46 = vpop.f32.mrb[6].mxu1  ;;  %v298_v17 = vmul.f32 %v217_v41, %v217_v41  ;;  %v272_v22 = vsel %vm232_vm2, %v217_v41, 0.0 }
  0xf4   :  { %v257_v47 = vadd.f32 %v256_v43, %v255_v40  ;;  %v308_v48 = vadd.f32 %v307_v42, %v306_v38  ;;  %240 = vst.msk [vmem:[%s622_s2 + $0x38] sm:$0xff] %vm232_vm2, %v402_v45  ;;  %v188_v49 = vpop.f32.mrb[7].mxu0  ;;  %248 = vst.msk [vmem:[%s622_s2 + $0x78] sm:$0xff] %vm232_vm2, %v410_v46  ;;  %v220_v50 = vpop.f32.mrb[7].mxu1  ;;  %v293_v58 = vmul.f32 %v402_v45, %v402_v45  ;;  %v313_v63 = vsel %vm232_vm2, %v292_v51, 0.0 }
  0xf5   :  { %v309_v52 = vsel %vm232_vm2, %v290_v44, 0.0  ;;  %238 = vst.msk [vmem:[%s622_s2 + $0x28] sm:$0xff] %vm232_vm2, %v188_v49  ;;  %v258_v53 = vsel %vm232_vm2, %v188_v49, 0.0  ;;  %v291_v54 = vmul.f32 %v188_v49, %v188_v49  ;;  %246 = vst.msk [vmem:[%s622_s2 + $0x68] sm:$0xff] %vm232_vm2, %v220_v50  ;;  %v262_v0 = vsel %vm232_vm2, %v402_v45, 0.0 }
  0xf6   :  { %v310_v55 = vadd.f32 %v309_v52, %v308_v48  ;;  %v259_v56 = vadd.f32 %v258_v53, %v257_v47  ;;  %v315_v4 = vsel %vm232_vm2, %v293_v58, 0.0  ;;  %v325_v15 = vsel %vm232_vm2, %v298_v17, 0.0 }
  0xf7   :  { %v311_v59 = vsel %vm232_vm2, %v291_v54, 0.0  ;;  %v299_v27 = vmul.f32 %v220_v50, %v220_v50  ;;  %v300_v30 = vmul.f32 %v548_v37, %v548_v37  ;;  %v274_v31 = vsel %vm232_vm2, %v220_v50, 0.0 }
  0xf8   :  { %v261_v61 = vadd.f32 %v260_v57, %v259_v56  ;;  %v312_v62 = vadd.f32 %v311_v59, %v310_v55  ;;  %v276_v20 = vsel %vm232_vm2, %v548_v37, 0.0  ;;  %v301_v34 = vmul.f32 %v410_v46, %v410_v46 }
  0xf9   :  { %v327_v35 = vsel %vm232_vm2, %v299_v27, 0.0  ;;  %v329_v39 = vsel %vm232_vm2, %v300_v30, 0.0  ;;  %v278_v40 = vsel %vm232_vm2, %v410_v46, 0.0 }
  0xfa   :  { %v314_v2 = vadd.f32 %v313_v63, %v312_v62  ;;  %v263_v3 = vadd.f32 %v262_v0, %v261_v61  ;;  %v331_v43 = vsel %vm232_vm2, %v301_v34, 0.0 }
  0xfc   :  { %v265_v7 = vadd.f32 %v264_v1, %v263_v3  ;;  %v316_v8 = vadd.f32 %v315_v4, %v314_v2 }
  0xfe   :  { %v318_v11 = vadd.f32 %v317_v5, %v316_v8  ;;  %v267_v12 = vadd.f32 %v266_v10, %v265_v7 }
 0x100   :  { %v269_v18 = vadd.f32 %v268_v13, %v267_v12  ;;  %v320_v19 = vadd.f32 %v319_v16, %v318_v11 }
 0x102   :  { %v322_v24 = vadd.f32 %v321_v21, %v320_v19  ;;  %v271_v25 = vadd.f32 %v270_v23, %v269_v18 }
 0x104   :  { %v273_v28 = vadd.f32 %v272_v22, %v271_v25  ;;  %v324_v29 = vadd.f32 %v323_v26, %v322_v24 }
 0x106   :  { %v326_v32 = vadd.f32 %v325_v15, %v324_v29  ;;  %v275_v33 = vadd.f32 %v274_v31, %v273_v28 }
 0x108   :  { %v277_v36 = vadd.f32 %v276_v20, %v275_v33  ;;  %v328_v38 = vadd.f32 %v327_v35, %v326_v32 }
 0x10a   :  { %v279_v41 = vadd.f32 %v278_v40, %v277_v36  ;;  %v330_v42 = vadd.f32 %v329_v39, %v328_v38 }
 0x10c   :  { %v280_v44 = vrot.slane %v279_v41, 4  ;;  %v332_v45 = vadd.f32 %v331_v43, %v330_v42 }
 0x10e   :  { %v281_v47 = vadd.f32 %v280_v44, %v279_v41  ;;  %v333_v48 = vrot.slane %v332_v45, 4 }
 0x110   :  { %v282_v49 = vrot.slane %v281_v47, 2  ;;  %v334_v50 = vadd.f32 %v333_v48, %v332_v45 }
 0x112   :  { %v283_v37 = vadd.f32 %v282_v49, %v281_v47  ;;  %v335_v51 = vrot.slane %v334_v50, 2 }
 0x114   :  { %v284_v52 = vrot.slane %v283_v37, 1  ;;  %v336_v53 = vadd.f32 %v335_v51, %v334_v50 }
 0x116   :  { %v337_v54 = vrot.slane %v336_v53, 1  ;;  %v285_v55 = vadd.f32 %v284_v52, %v283_v37 }
 0x118   :  { %v338_v56 = vadd.f32 %v337_v54, %v336_v53 }
 0x11a   :  { %v340_v46 = vsel %vm339_vm3, %v285_v55, %v338_v56 }
 0x11b   :  { %342 = vst.msk [vmem:[%s623_s3] sm:$0x3] %vm341_vm4, %v340_v46 }

// kernel: unet_apply.48
= control target key start
LH: loop header
LB: loop body
LE: loop exit
PB: predicated region body
PF: predicated region fallthrough
CT: control target
= control target key end

     0   :  { %s597_s15 = smov 0   ;;  %s599_s16 = smov 0   ;;  %s668_s0 = inlined_call_operand.vmem [shape: f32[2,8,8,16], index: 0, kind: input, shape index: {}]   ;;  %s669_s1 = inlined_call_operand.vmem [shape: f32[1,16], index: 1, kind: input, shape index: {}]   ;;  %s670_s2 = inlined_call_operand.vmem [shape: f32[1,16], index: 2, kind: input, shape index: {}]   ;;  %s671_s3 = inlined_call_operand.vmem [shape: bf16[2,8,8,16], index: 3, kind: output, shape index: {0}]   ;;  %s672_s4 = inlined_call_operand.vmem [shape: bf16[2,4,4,16], index: 4, kind: output, shape index: {1}]  }
   0x1   :  { %s601_s17 = smov 0  }
   0x2 LB: > { %s27_s18 = sadd.s32 1, %s566_s16  ;;  %p510_p0 = scmp.ge.s32.totalorder %s570_s17, 1  ;;  %s570_s17 = sphi %s601_s17, %s15_s17   ;;  %s566_s16 = sphi %s599_s16, %s674_s16   ;;  %s562_s15 = sphi %s597_s15, %s673_s15  }
   0x3   : > { %p29_p1 = scmp.ge.s32.totalorder %s27_s18, 2  ;;  %p188_p2 = scmp.lt.s32.totalorder %s570_s17, 3 }
   0x5   : > { %s676_s18 = smov (%p29_p1, %s27_s18), 0  ;;  %p189_p3 = pnand %p510_p0, %p188_p2 }
   0x6   : > { %p232_p4 = scmp.lt.s32.totalorder (!%p189_p3), %s562_s15, 1  ;;  %v517_v0 = vld [vmem:[%s669_s1] ss:$0 sm:$0xff] (!%p189_p3)  ;;  %vm324_vm0 = vcmask (!%p189_p3), 130048   ;;  %vm315_vm1 = vcmask (!%p189_p3), 125952   ;;  %vm364_vm2 = vcmask (!%p189_p3), 123904  }
   0x7   : > { %192 = sbr.rel (%p189_p3) target bundleno = 46 (0x2e), region = 32  ;;  %v518_v1 = vld [vmem:[%s670_s2] ss:$0 sm:$0xff] (!%p189_p3) }
   0xe   : > { %s678_s15 = smov (!%p232_p4, %s562_s15), 1 }
   0xf   : > { %s521_s19 = sshll.u32 %s678_s15, 6  ;;  %s522_s27 = sshll.u32 %s678_s15, 5 }
  0x10   : > { %s239_s24 = scalar_lea.vmem %s668_s0, %s521_s19  ;;  %s249_s30 = scalar_lea.vmem %s671_s3, %s522_s27 }
  0x11   : > { %v263_v2 = vld [vmem:[%s239_s24] sm:$0xff]  ;;  %v264_v3 = vld [vmem:[%s239_s24 + $0x8] sm:$0xff]  ;;  %v265_v4 = vld [vmem:[%s239_s24 + $0x10] sm:$0xff]  ;;  %s523_s5 = sshll.u32 %s678_s15, 3 }
  0x12   : > { %v277_v5 = vmul.f32 %v517_v0, %v263_v2  ;;  %v278_v6 = vmul.f32 %v517_v0, %v264_v3  ;;  %v266_v7 = vld [vmem:[%s239_s24 + $0x18] sm:$0xff]  ;;  %v279_v8 = vmul.f32 %v517_v0, %v265_v4  ;;  %v267_v9 = vld [vmem:[%s239_s24 + $0x20] sm:$0xff]  ;;  %v268_v10 = vld [vmem:[%s239_s24 + $0x28] sm:$0xff]  ;;  %s259_s8 = scalar_lea.vmem %s672_s4, %s523_s5 }
  0x13   : > { %v280_v11 = vmul.f32 %v517_v0, %v266_v7  ;;  %v281_v12 = vmul.f32 %v517_v0, %v267_v9  ;;  %v282_v13 = vmul.f32 %v517_v0, %v268_v10  ;;  %v269_v14 = vld [vmem:[%s239_s24 + $0x30] sm:$0xff]  ;;  %v270_v15 = vld [vmem:[%s239_s24 + $0x38] sm:$0xff] }
  0x14   : > { %v291_v16 = vadd.f32 %v518_v1, %v277_v5  ;;  %v292_v17 = vadd.f32 %v518_v1, %v278_v6  ;;  %v293_v18 = vadd.f32 %v518_v1, %v279_v8  ;;  %v283_v19 = vmul.f32 %v517_v0, %v269_v14 }
  0x15   : > { %v294_v20 = vadd.f32 %v518_v1, %v280_v11  ;;  %v295_v21 = vadd.f32 %v518_v1, %v281_v12  ;;  %v296_v22 = vadd.f32 %v518_v1, %v282_v13  ;;  %v284_v23 = vmul.f32 %v517_v0, %v270_v15 }
  0x16   : > { %v299_v24 = vmax.f32 %v291_v16, 0.0  ;;  %v300_v25 = vmax.f32 %v292_v17, 0.0  ;;  %v301_v26 = vmax.f32 %v293_v18, 0.0  ;;  %v297_v27 = vadd.f32 %v518_v1, %v283_v19 }
  0x17   : > { %v302_v28 = vmax.f32 %v294_v20, 0.0  ;;  %v303_v29 = vmax.f32 %v295_v21, 0.0  ;;  %v304_v30 = vmax.f32 %v296_v22, 0.0  ;;  %v298_v31 = vadd.f32 %v518_v1, %v284_v23 }
  0x18   : > { %v325_v32 = vsel %vm324_vm0, %v299_v24, -inf  ;;  %v326_v33 = vsel %vm324_vm0, %v300_v25, -inf  ;;  %v328_v34 = vsel %vm324_vm0, %v301_v26, -inf  ;;  %v305_v35 = vmax.f32 %v297_v27, 0.0 }
  0x19   : > { %v327_v36 = vmax.f32 %v325_v32, %v326_v33  ;;  %v329_v37 = vsel %vm324_vm0, %v302_v28, -inf  ;;  %v331_v38 = vsel %vm324_vm0, %v303_v29, -inf  ;;  %v332_v39 = vsel %vm324_vm0, %v304_v30, -inf }
  0x1a   : > { %v330_v40 = vmax.f32 %v328_v34, %v329_v37  ;;  %v333_v41 = vmax.f32 %v331_v38, %v332_v39  ;;  %v306_v42 = vmax.f32 %v298_v31, 0.0  ;;  %v334_v43 = vsel %vm324_vm0, %v305_v35, -inf }
  0x1b   : > { %337 = vst.msk [vmem:[#allocation2] sm:$0xff] %vm324_vm0, %v327_v36  ;;  %v307_v44 = vpack.c.bf16 %v299_v24, %v299_v24  ;;  %v308_v45 = vpack.c.bf16 %v300_v25, %v300_v25  ;;  %v309_v46 = vpack.c.bf16 %v301_v26, %v301_v26  ;;  %v310_v47 = vpack.c.bf16 %v302_v28, %v302_v28 }
  0x1c   : > { %338 = vst.msk [vmem:[#allocation2 + $0x8] sm:$0xff] %vm324_vm0, %v330_v40  ;;  %339 = vst.msk [vmem:[#allocation2 + $0x10] sm:$0xff] %vm324_vm0, %v333_v41  ;;  %v335_v48 = vsel %vm324_vm0, %v306_v42, -inf  ;;  %v311_v49 = vpack.c.bf16 %v303_v29, %v303_v29  ;;  %v312_v50 = vpack.c.bf16 %v304_v30, %v304_v30  ;;  %v313_v51 = vpack.c.bf16 %v305_v35, %v305_v35 }
  0x1d   : > { %v336_v52 = vmax.f32 %v334_v43, %v335_v48  ;;  %316 = vst.msk [vmem:[%s249_s30] sm:$0xf] %vm315_vm1, %v307_v44  ;;  %317 = vst.msk [vmem:[%s249_s30 + $0x4] sm:$0xf] %vm315_vm1, %v308_v45  ;;  %v314_v53 = vpack.c.bf16 %v306_v42, %v306_v42 }
  0x1e   : > { %318 = vst.msk [vmem:[%s249_s30 + $0x8] sm:$0xf] %vm315_vm1, %v309_v46  ;;  %319 = vst.msk [vmem:[%s249_s30 + $0xc] sm:$0xf] %vm315_vm1, %v310_v47 }
  0x1f   : > { %320 = vst.msk [vmem:[%s249_s30 + $0x10] sm:$0xf] %vm315_vm1, %v311_v49  ;;  %321 = vst.msk [vmem:[%s249_s30 + $0x14] sm:$0xf] %vm315_vm1, %v312_v50 }
  0x20   : > { %322 = vst.msk [vmem:[%s249_s30 + $0x18] sm:$0xf] %vm315_vm1, %v313_v51  ;;  %323 = vst.msk [vmem:[%s249_s30 + $0x1c] sm:$0xf] %vm315_vm1, %v314_v53 }
  0x21   : > { %340 = vst.msk [vmem:[#allocation2 + $0x18] sm:$0xff] %vm324_vm0, %v336_v52 }
  0x22   : > { %v341_v54 = vld [vmem:[#allocation2] ss:$2 sm:$0xf]  ;;  %v349_v55 = vld [vmem:[#allocation2 + $0x1] ss:$2 sm:$0xf] }
  0x23   : > { %v356_v56 = vmax.f32 %v341_v54, %v349_v55  ;;  %v343_v57 = vld [vmem:[#allocation2 + $0x8] ss:$2 sm:$0xf]  ;;  %v351_v58 = vld [vmem:[#allocation2 + $0x9] ss:$2 sm:$0xf] }
  0x24   : > { %v357_v59 = vmax.f32 %v343_v57, %v351_v58  ;;  %v345_v60 = vld [vmem:[#allocation2 + $0x10] ss:$2 sm:$0xf]  ;;  %v353_v61 = vld [vmem:[#allocation2 + $0x11] ss:$2 sm:$0xf] }
  0x25   : > { %v360_v62 = vpack.c.bf16 %v356_v56, %v356_v56  ;;  %v358_v63 = vmax.f32 %v345_v60, %v353_v61 }
  0x26   : > { %v361_v0 = vpack.c.bf16 %v357_v59, %v357_v59 }
  0x27   : > { %365 = vst.msk [vmem:[%s259_s8] sm:$0x3] %vm364_vm2, %v360_v62  ;;  %v362_v3 = vpack.c.bf16 %v358_v63, %v358_v63 }
  0x28   : > { %v347_v1 = vld [vmem:[#allocation2 + $0x18] ss:$2 sm:$0xf]  ;;  %v355_v2 = vld [vmem:[#allocation2 + $0x19] ss:$2 sm:$0xf] }
  0x29   : > { %v359_v4 = vmax.f32 %v347_v1, %v355_v2  ;;  %366 = vst.msk [vmem:[%s259_s8 + $0x2] sm:$0x3] %vm364_vm2, %v361_v0  ;;  %367 = vst.msk [vmem:[%s259_s8 + $0x4] sm:$0x3] %vm364_vm2, %v362_v3 }
  0x2b   : > { %v363_v5 = vpack.c.bf16 %v359_v4, %v359_v4 }
  0x2d   : > { %368 = vst.msk [vmem:[%s259_s8 + $0x6] sm:$0x3] %vm364_vm2, %v363_v5 }
  0x2e PF: > { %s15_s17 = sadd.s32 1, %s570_s17   ;;  %s673_s15 = smov %s566_s16 }
  0x2f   : > { %p12_p5 = scmp.ge.s32.totalorder %s15_s17, 4   ;;  %s674_s16 = smov %s676_s18 }
  0x31   :  { %14 = sbr.rel (!%p12_p5) target bundleno = 2 (0x2), region = 81 }

// kernel: unet_apply.47
= control target key start
LH: loop header
LB: loop body
LE: loop exit
PB: predicated region body
PF: predicated region fallthrough
CT: control target
= control target key end

     0   :  { %v499_v0 = vmov 0   ;;  %vm174_vm0 = vcmask 130048   ;;  %vm402_vm1 = vcmask 1040384   ;;  %vm404_vm2 = vcmask 123904   ;;  %s732_s1 = inlined_call_operand.vmem [shape: bf16[144,16], index: 1, kind: input, shape index: {}]   ;;  %s733_s0 = inlined_call_operand.vmem [shape: bf16[128,144], index: 0, kind: input, shape index: {}]   ;;  %s734_s2 = inlined_call_operand.vmem [shape: f32[128,16], index: 2, kind: output, shape index: {0}]   ;;  %s735_s3 = inlined_call_operand.vmem [shape: f32[1,2,16], index: 3, kind: output, shape index: {1}]  }
   0x1   :  { %199 = vmatprep.subr.bf16.mxu0 %v499_v0  ;;  %v466_v1 = vld [vmem:[%s732_s1] sm:$0xff]   ;;  %447 = vmatprep.subr.bf16.mxu1 %v499_v0  ;;  %v467_v2 = vld [vmem:[%s732_s1 + $0x8] sm:$0xff]   ;;  %v468_v3 = vld [vmem:[%s732_s1 + $0x10] sm:$0xff]  }
   0x2   :  { %200 = vmatpush1.bf16.msra.mxu0 %v466_v1  ;;  %456 = vmatpush1.bf16.msra.mxu1 %v466_v1  ;;  %v469_v4 = vld [vmem:[%s732_s1 + $0x18] sm:$0xff]   ;;  %v477_v5 = vld [vmem:[%s733_s0 + $0x4] ss:$8 sps:$4 sm:$0xff]   ;;  %v472_v9 = vld [vmem:[%s732_s1 + $0x30] sm:$0xff]  }
   0x3   :  { %201 = vmatprep.subr.bf16.mxu0 %v499_v0  ;;  %448 = vmatprep.subr.bf16.mxu1 %v499_v0  ;;  %v483_v6 = vld [vmem:[%s733_s0 + $0x44] ss:$8 sps:$4 sm:$0xff]   ;;  %v473_v10 = vld [vmem:[%s732_s1 + $0x38] sm:$0xff]   ;;  %v475_v12 = vld [vmem:[%s733_s0] ss:$8 sps:$4 sm:$0xff]  }
   0x4   :  { %439 = vmatprep.mubr.msk.bf16.mxu0 %vm174_vm0, %v477_v5  ;;  %v470_v7 = vld [vmem:[%s732_s1 + $0x20] sm:$0xff]   ;;  %443 = vmatprep.mubr.msk.bf16.mxu1 %vm174_vm0, %v483_v6  ;;  %v471_v8 = vld [vmem:[%s732_s1 + $0x28] sm:$0xff]   ;;  %v478_v14 = vld [vmem:[%s733_s0 + $0x14] ss:$8 sps:$4 sm:$0xff]  }
   0x5   :  { %v474_v11 = vld [vmem:[%s732_s1 + $0x40] sm:$0xff]   ;;  %v487_v15 = vld [vmem:[%s733_s0 + $0x54] ss:$8 sps:$4 sm:$0xff]   ;;  %v480_v16 = vld [vmem:[%s733_s0 + $0x10] ss:$8 sps:$4 sm:$0xff]  }
   0x6   :  { %202 = vmatpush1.bf16.msra.mxu0 %v467_v2  ;;  %457 = vmatpush1.bf16.msra.mxu1 %v467_v2  ;;  %v481_v13 = vld [vmem:[%s733_s0 + $0x40] ss:$8 sps:$4 sm:$0xff]   ;;  %v489_v17 = vld [vmem:[%s733_s0 + $0x50] ss:$8 sps:$4 sm:$0xff]   ;;  %v484_v18 = vld [vmem:[%s733_s0 + $0x24] ss:$8 sps:$4 sm:$0xff]  }
   0x7   :  { %203 = vmatprep.subr.bf16.mxu0 %v499_v0  ;;  %449 = vmatprep.subr.bf16.mxu1 %v499_v0  ;;  %v493_v19 = vld [vmem:[%s733_s0 + $0x64] ss:$8 sps:$4 sm:$0xff]   ;;  %v486_v20 = vld [vmem:[%s733_s0 + $0x20] ss:$8 sps:$4 sm:$0xff]   ;;  %v490_v22 = vld [vmem:[%s733_s0 + $0x34] ss:$8 sps:$4 sm:$0xff]  }
   0x8   :  { %v495_v21 = vld [vmem:[%s733_s0 + $0x60] ss:$8 sps:$4 sm:$0xff]   ;;  %v496_v23 = vld [vmem:[%s733_s0 + $0x74] ss:$8 sps:$4 sm:$0xff]   ;;  %v492_v24 = vld [vmem:[%s733_s0 + $0x30] ss:$8 sps:$4 sm:$0xff]  }
   0x9   :  { %v498_v25 = vld [vmem:[%s733_s0 + $0x70] ss:$8 sps:$4 sm:$0xff]  }
   0xa   :  { %204 = vmatpush1.bf16.msra.mxu0 %v468_v3  ;;  %458 = vmatpush1.bf16.msra.mxu1 %v468_v3 }
   0xb   :  { %205 = vmatprep.subr.bf16.mxu0 %v499_v0  ;;  %450 = vmatprep.subr.bf16.mxu1 %v499_v0 }
   0xe   :  { %206 = vmatpush1.bf16.msra.mxu0 %v469_v4  ;;  %459 = vmatpush1.bf16.msra.mxu1 %v469_v4 }
   0xf   :  { %207 = vmatprep.subr.bf16.mxu0 %v499_v0  ;;  %451 = vmatprep.subr.bf16.mxu1 %v499_v0 }
  0x12   :  { %208 = vmatpush1.bf16.msra.mxu0 %v470_v7  ;;  %460 = vmatpush1.bf16.msra.mxu1 %v470_v7 }
  0x13   :  { %209 = vmatprep.subr.bf16.mxu0 %v499_v0  ;;  %452 = vmatprep.subr.bf16.mxu1 %v499_v0 }
  0x16   :  { %210 = vmatpush1.bf16.msra.mxu0 %v471_v8  ;;  %461 = vmatpush1.bf16.msra.mxu1 %v471_v8 }
  0x17   :  { %211 = vmatprep.subr.bf16.mxu0 %v499_v0  ;;  %453 = vmatprep.subr.bf16.mxu1 %v499_v0 }
  0x1a   :  { %212 = vmatpush1.bf16.msra.mxu0 %v472_v9  ;;  %462 = vmatpush1.bf16.msra.mxu1 %v472_v9 }
  0x1b   :  { %213 = vmatprep.subr.bf16.mxu0 %v499_v0  ;;  %454 = vmatprep.subr.bf16.mxu1 %v499_v0 }
  0x1e   :  { %214 = vmatpush1.bf16.msra.mxu0 %v473_v10  ;;  %463 = vmatpush1.bf16.msra.mxu1 %v473_v10 }
  0x1f   :  { %215 = vmatprep.subr.bf16.mxu0 %v499_v0  ;;  %455 = vmatprep.subr.bf16.mxu1 %v499_v0 }
  0x22   :  { %216 = vmatpush1.bf16.msra.mxu0 %v474_v11  ;;  %464 = vmatpush1.bf16.msra.mxu1 %v474_v11 }
  0x25   :  { %232 = vmatmul.mubr.bf16.vlgmr.msra.gmra.mrb[0].mxu0 %v475_v12  ;;  %264 = vmatmul.mubr.bf16.vlgmr.msra.gmra.mrb[0].mxu1 %v481_v13 }
  0x26   :  { %440 = vmatprep.mubr.msk.bf16.mxu0 %vm174_vm0, %v478_v14  ;;  %444 = vmatprep.mubr.msk.bf16.mxu1 %vm174_vm0, %v487_v15 }
  0x2d   :  { %240 = vmatmul.mubr.bf16.gmra.mrb[4].mxu0 %v480_v16  ;;  %272 = vmatmul.mubr.bf16.gmra.mrb[4].mxu1 %v489_v17 }
  0x2e   :  { %441 = vmatprep.mubr.msk.bf16.mxu0 %vm174_vm0, %v484_v18  ;;  %445 = vmatprep.mubr.msk.bf16.mxu1 %vm174_vm0, %v493_v19 }
  0x35   :  { %248 = vmatmul.mubr.bf16.gmra.mrb[8].mxu0 %v486_v20  ;;  %280 = vmatmul.mubr.bf16.gmra.mrb[8].mxu1 %v495_v21 }
  0x36   :  { %442 = vmatprep.mubr.msk.bf16.mxu0 %vm174_vm0, %v490_v22  ;;  %446 = vmatprep.mubr.msk.bf16.mxu1 %vm174_vm0, %v496_v23 }
  0x3d   :  { %256 = vmatmul.mubr.bf16.gmra.mrb[12].mxu0 %v492_v24  ;;  %288 = vmatmul.mubr.bf16.gmra.mrb[12].mxu1 %v498_v25 }
  0xf8   :  { %v233_v26 = vpop.f32.mrb[0].mxu0  ;;  %v603_v27 = vpop.f32.mrb[0].mxu1 }
  0xf9   :  { %296 = vst.msk [vmem:[%s734_s2] sm:$0xff] %vm174_vm0, %v233_v26  ;;  %v349_v28 = vmul.f32 %v233_v26, %v233_v26  ;;  %v235_v29 = vpop.f32.mrb[1].mxu0  ;;  %304 = vst.msk [vmem:[%s734_s2 + $0x40] sm:$0xff] %vm174_vm0, %v603_v27  ;;  %v267_v30 = vpop.f32.mrb[1].mxu1  ;;  %v312_v33 = vsel %vm174_vm0, %v233_v26, 0.0  ;;  %v357_v23 = vmul.f32 %v603_v27, %v603_v27 }
  0xfa   :  { %v236_v31 = vpop.f32.mrb[2].mxu0  ;;  %v614_v32 = vpop.f32.mrb[2].mxu1 }
  0xfb   :  { %297 = vst.msk [vmem:[%s734_s2 + $0x8] sm:$0xff] %vm174_vm0, %v236_v31  ;;  %v313_v34 = vsel %vm174_vm0, %v236_v31, 0.0  ;;  %v350_v35 = vmul.f32 %v236_v31, %v236_v31  ;;  %v238_v36 = vpop.f32.mrb[3].mxu0  ;;  %305 = vst.msk [vmem:[%s734_s2 + $0x48] sm:$0xff] %vm174_vm0, %v614_v32  ;;  %v270_v37 = vpop.f32.mrb[3].mxu1  ;;  %v365_v39 = vsel %vm174_vm0, %v349_v28, 0.0 }
  0xfc   :  { %v314_v38 = vadd.f32 %v313_v34, %v312_v33  ;;  %v327_v33 = vsel %vm174_vm0, %v603_v27, 0.0  ;;  %v358_v34 = vmul.f32 %v614_v32, %v614_v32 }
  0xfd   :  { %v366_v40 = vsel %vm174_vm0, %v350_v35, 0.0 }
  0xfe   :  { %v367_v41 = vadd.f32 %v366_v40, %v365_v39  ;;  %v329_v39 = vsel %vm174_vm0, %v614_v32, 0.0 }
 0x100   :  { %v241_v42 = vpop.f32.mrb[4].mxu0  ;;  %v629_v43 = vpop.f32.mrb[4].mxu1 }
 0x101   :  { %298 = vst.msk [vmem:[%s734_s2 + $0x10] sm:$0xff] %vm174_vm0, %v241_v42  ;;  %v315_v44 = vsel %vm174_vm0, %v241_v42, 0.0  ;;  %v351_v45 = vmul.f32 %v241_v42, %v241_v42  ;;  %v243_v46 = vpop.f32.mrb[5].mxu0  ;;  %306 = vst.msk [vmem:[%s734_s2 + $0x50] sm:$0xff] %vm174_vm0, %v629_v43  ;;  %v275_v47 = vpop.f32.mrb[5].mxu1  ;;  %v359_v40 = vmul.f32 %v629_v43, %v629_v43  ;;  %v331_v27 = vsel %vm174_vm0, %v629_v43, 0.0 }
 0x102   :  { %v316_v48 = vadd.f32 %v315_v44, %v314_v38  ;;  %v244_v49 = vpop.f32.mrb[6].mxu0  ;;  %v641_v50 = vpop.f32.mrb[6].mxu1  ;;  %v380_v38 = vsel %vm174_vm0, %v357_v23, 0.0  ;;  %v382_v44 = vsel %vm174_vm0, %v358_v34, 0.0 }
 0x103   :  { %v368_v51 = vsel %vm174_vm0, %v351_v45, 0.0  ;;  %299 = vst.msk [vmem:[%s734_s2 + $0x18] sm:$0xff] %vm174_vm0, %v244_v49  ;;  %v317_v52 = vsel %vm174_vm0, %v244_v49, 0.0  ;;  %v352_v53 = vmul.f32 %v244_v49, %v244_v49  ;;  %v246_v54 = vpop.f32.mrb[7].mxu0  ;;  %307 = vst.msk [vmem:[%s734_s2 + $0x58] sm:$0xff] %vm174_vm0, %v641_v50  ;;  %v278_v55 = vpop.f32.mrb[7].mxu1  ;;  %v360_v45 = vmul.f32 %v641_v50, %v641_v50 }
 0x104   :  { %v369_v56 = vadd.f32 %v368_v51, %v367_v41  ;;  %v318_v57 = vadd.f32 %v317_v52, %v316_v48  ;;  %v384_v48 = vsel %vm174_vm0, %v359_v40, 0.0  ;;  %v333_v32 = vsel %vm174_vm0, %v641_v50, 0.0 }
 0x105   :  { %v370_v58 = vsel %vm174_vm0, %v352_v53, 0.0  ;;  %v386_v53 = vsel %vm174_vm0, %v360_v45, 0.0 }
 0x106   :  { %v371_v59 = vadd.f32 %v370_v58, %v369_v56 }
 0x108   :  { %v249_v60 = vpop.f32.mrb[8].mxu0  ;;  %v655_v61 = vpop.f32.mrb[8].mxu1 }
 0x109   :  { %300 = vst.msk [vmem:[%s734_s2 + $0x20] sm:$0xff] %vm174_vm0, %v249_v60  ;;  %v319_v62 = vsel %vm174_vm0, %v249_v60, 0.0  ;;  %v353_v63 = vmul.f32 %v249_v60, %v249_v60  ;;  %v251_v0 = vpop.f32.mrb[9].mxu0  ;;  %308 = vst.msk [vmem:[%s734_s2 + $0x60] sm:$0xff] %vm174_vm0, %v655_v61  ;;  %v283_v1 = vpop.f32.mrb[9].mxu1  ;;  %v361_v49 = vmul.f32 %v655_v61, %v655_v61  ;;  %v335_v43 = vsel %vm174_vm0, %v655_v61, 0.0 }
 0x10a   :  { %v320_v2 = vadd.f32 %v319_v62, %v318_v57  ;;  %v252_v3 = vpop.f32.mrb[10].mxu0  ;;  %v284_v4 = vpop.f32.mrb[10].mxu1 }
 0x10b   :  { %v372_v5 = vsel %vm174_vm0, %v353_v63, 0.0  ;;  %301 = vst.msk [vmem:[%s734_s2 + $0x28] sm:$0xff] %vm174_vm0, %v252_v3  ;;  %v321_v6 = vsel %vm174_vm0, %v252_v3, 0.0  ;;  %v354_v7 = vmul.f32 %v252_v3, %v252_v3  ;;  %v254_v8 = vpop.f32.mrb[11].mxu0  ;;  %309 = vst.msk [vmem:[%s734_s2 + $0x68] sm:$0xff] %vm174_vm0, %v284_v4  ;;  %v286_v9 = vpop.f32.mrb[11].mxu1  ;;  %v362_v54 = vmul.f32 %v284_v4, %v284_v4 }
 0x10c   :  { %v373_v10 = vadd.f32 %v372_v5, %v371_v59  ;;  %v322_v11 = vadd.f32 %v321_v6, %v320_v2  ;;  %v388_v58 = vsel %vm174_vm0, %v361_v49, 0.0  ;;  %v337_v59 = vsel %vm174_vm0, %v284_v4, 0.0 }
 0x10d   :  { %v374_v12 = vsel %vm174_vm0, %v354_v7, 0.0  ;;  %v390_v63 = vsel %vm174_vm0, %v362_v54, 0.0 }
 0x10e   :  { %v375_v13 = vadd.f32 %v374_v12, %v373_v10 }
 0x110   :  { %v257_v14 = vpop.f32.mrb[12].mxu0  ;;  %v289_v15 = vpop.f32.mrb[12].mxu1 }
 0x111   :  { %302 = vst.msk [vmem:[%s734_s2 + $0x30] sm:$0xff] %vm174_vm0, %v257_v14  ;;  %v323_v16 = vsel %vm174_vm0, %v257_v14, 0.0  ;;  %v355_v17 = vmul.f32 %v257_v14, %v257_v14  ;;  %v259_v18 = vpop.f32.mrb[13].mxu0  ;;  %310 = vst.msk [vmem:[%s734_s2 + $0x70] sm:$0xff] %vm174_vm0, %v289_v15  ;;  %v291_v19 = vpop.f32.mrb[13].mxu1  ;;  %v363_v55 = vmul.f32 %v289_v15, %v289_v15  ;;  %v339_v50 = vsel %vm174_vm0, %v289_v15, 0.0 }
 0x112   :  { %v324_v20 = vadd.f32 %v323_v16, %v322_v11  ;;  %v260_v21 = vpop.f32.mrb[14].mxu0  ;;  %v292_v22 = vpop.f32.mrb[14].mxu1 }
 0x113   :  { %v376_v24 = vsel %vm174_vm0, %v355_v17, 0.0  ;;  %303 = vst.msk [vmem:[%s734_s2 + $0x38] sm:$0xff] %vm174_vm0, %v260_v21  ;;  %v325_v25 = vsel %vm174_vm0, %v260_v21, 0.0  ;;  %v356_v26 = vmul.f32 %v260_v21, %v260_v21  ;;  %v262_v28 = vpop.f32.mrb[15].mxu0  ;;  %311 = vst.msk [vmem:[%s734_s2 + $0x78] sm:$0xff] %vm174_vm0, %v292_v22  ;;  %v294_v29 = vpop.f32.mrb[15].mxu1  ;;  %v364_v1 = vmul.f32 %v292_v22, %v292_v22 }
 0x114   :  { %v377_v30 = vadd.f32 %v376_v24, %v375_v13  ;;  %v326_v31 = vadd.f32 %v325_v25, %v324_v20  ;;  %v392_v0 = vsel %vm174_vm0, %v363_v55, 0.0  ;;  %v341_v61 = vsel %vm174_vm0, %v292_v22, 0.0 }
 0x115   :  { %v378_v35 = vsel %vm174_vm0, %v356_v26, 0.0  ;;  %v394_v7 = vsel %vm174_vm0, %v364_v1, 0.0 }
 0x116   :  { %v328_v36 = vadd.f32 %v327_v33, %v326_v31  ;;  %v379_v37 = vadd.f32 %v378_v35, %v377_v30 }
 0x118   :  { %v330_v41 = vadd.f32 %v329_v39, %v328_v36  ;;  %v381_v42 = vadd.f32 %v380_v38, %v379_v37 }
 0x11a   :  { %v383_v46 = vadd.f32 %v382_v44, %v381_v42  ;;  %v332_v47 = vadd.f32 %v331_v27, %v330_v41 }
 0x11c   :  { %v334_v51 = vadd.f32 %v333_v32, %v332_v47  ;;  %v385_v52 = vadd.f32 %v384_v48, %v383_v46 }
 0x11e   :  { %v336_v56 = vadd.f32 %v335_v43, %v334_v51  ;;  %v387_v57 = vadd.f32 %v386_v53, %v385_v52 }
 0x120   :  { %v389_v60 = vadd.f32 %v388_v58, %v387_v57  ;;  %v338_v62 = vadd.f32 %v337_v59, %v336_v56 }
 0x122   :  { %v391_v2 = vadd.f32 %v390_v63, %v389_v60  ;;  %v340_v3 = vadd.f32 %v339_v50, %v338_v62 }
 0x124   :  { %v393_v5 = vadd.f32 %v392_v0, %v391_v2  ;;  %v342_v6 = vadd.f32 %v341_v61, %v340_v3 }
 0x126   :  { %v343_v8 = vrot.slane %v342_v6, 4  ;;  %v395_v9 = vadd.f32 %v394_v7, %v393_v5 }
 0x128   :  { %v344_v4 = vadd.f32 %v343_v8, %v342_v6  ;;  %v396_v10 = vrot.slane %v395_v9, 4 }
 0x12a   :  { %v345_v11 = vrot.slane %v344_v4, 2  ;;  %v397_v12 = vadd.f32 %v396_v10, %v395_v9 }
 0x12c   :  { %v346_v13 = vadd.f32 %v345_v11, %v344_v4  ;;  %v398_v14 = vrot.slane %v397_v12, 2 }
 0x12e   :  { %v347_v15 = vrot.slane %v346_v13, 1  ;;  %v399_v16 = vadd.f32 %v398_v14, %v397_v12 }
 0x130   :  { %v400_v17 = vrot.slane %v399_v16, 1  ;;  %v348_v18 = vadd.f32 %v347_v15, %v346_v13 }
 0x132   :  { %v401_v19 = vadd.f32 %v400_v17, %v399_v16 }
 0x134   :  { %v403_v20 = vsel %vm402_vm1, %v348_v18, %v401_v19 }
 0x135   :  { %405 = vst.msk [vmem:[%s735_s3] sm:$0x3] %vm404_vm2, %v403_v20 }

// kernel: unet_apply.50
= control target key start
LH: loop header
LB: loop body
LE: loop exit
PB: predicated region body
PF: predicated region fallthrough
CT: control target
= control target key end

     0   :  { %s419_s12 = smov 0   ;;  %s421_s13 = smov 0   ;;  %s458_s0 = inlined_call_operand.vmem [shape: f32[2,4,4,32], index: 0, kind: input, shape index: {}]   ;;  %s459_s1 = inlined_call_operand.vmem [shape: f32[1,32], index: 1, kind: input, shape index: {}]   ;;  %s460_s2 = inlined_call_operand.vmem [shape: f32[1,32], index: 2, kind: input, shape index: {}]   ;;  %s461_s3 = inlined_call_operand.vmem [shape: bf16[2,4,4,32], index: 3, kind: output, shape index: {}]  }
   0x1   :  { %s423_s14 = smov 0  }
   0x2 LB: > { %s25_s15 = sadd.s32 1, %s393_s13  ;;  %p340_p0 = scmp.ge.s32.totalorder %s397_s14, 1  ;;  %s397_s14 = sphi %s423_s14, %s13_s14   ;;  %s393_s13 = sphi %s421_s13, %s463_s13   ;;  %s389_s12 = sphi %s419_s12, %s462_s12  }
   0x3   : > { %p27_p1 = scmp.ge.s32.totalorder %s25_s15, 2  ;;  %p158_p2 = scmp.lt.s32.totalorder %s397_s14, 3 }
   0x5   : > { %s465_s15 = smov (%p27_p1, %s25_s15), 0  ;;  %p159_p3 = pnand %p340_p0, %p158_p2 }
   0x6   : > { %p191_p4 = scmp.lt.s32.totalorder (!%p159_p3), %s389_s12, 1  ;;  %v345_v0 = vld [vmem:[%s459_s1] ss:$0 sm:$0xff] (!%p159_p3)  ;;  %vm244_vm0 = vcmask (!%p159_p3), 254976  }
   0x7   : > { %162 = sbr.rel (%p159_p3) target bundleno = 28 (0x1c), region = 32  ;;  %v346_v1 = vld [vmem:[%s460_s2] ss:$0 sm:$0xff] (!%p159_p3) }
   0xe   : > { %s467_s12 = smov (!%p191_p4, %s389_s12), 1 }
   0xf   : > { %s349_s16 = sshll.u32 %s467_s12, 4  ;;  %s350_s24 = sshll.u32 %s467_s12, 3 }
  0x10   : > { %s198_s21 = scalar_lea.vmem %s458_s0, %s349_s16  ;;  %s208_s27 = scalar_lea.vmem %s461_s3, %s350_s24 }
  0x11   : > { %v212_v2 = vld [vmem:[%s198_s21] sm:$0xf]  ;;  %v213_v3 = vld [vmem:[%s198_s21 + $0x4] sm:$0xf]  ;;  %v214_v4 = vld [vmem:[%s198_s21 + $0x8] sm:$0xf] }
  0x12   : > { %v222_v5 = vmul.f32 %v345_v0, %v212_v2  ;;  %v223_v6 = vmul.f32 %v345_v0, %v213_v3  ;;  %v224_v7 = vmul.f32 %v345_v0, %v214_v4  ;;  %v215_v8 = vld [vmem:[%s198_s21 + $0xc] sm:$0xf] }
  0x13   : > { %v225_v9 = vmul.f32 %v345_v0, %v215_v8 }
  0x14   : > { %v232_v10 = vadd.f32 %v346_v1, %v222_v5  ;;  %v233_v11 = vadd.f32 %v346_v1, %v223_v6  ;;  %v234_v12 = vadd.f32 %v346_v1, %v224_v7 }
  0x15   : > { %v235_v13 = vadd.f32 %v346_v1, %v225_v9 }
  0x16   : > { %v236_v14 = vmax.f32 %v232_v10, 0.0  ;;  %v237_v15 = vmax.f32 %v233_v11, 0.0  ;;  %v238_v16 = vmax.f32 %v234_v12, 0.0 }
  0x17   : > { %v239_v17 = vmax.f32 %v235_v13, 0.0 }
  0x18   : > { %v240_v18 = vpack.c.bf16 %v236_v14, %v236_v14  ;;  %v241_v19 = vpack.c.bf16 %v237_v15, %v237_v15  ;;  %v242_v20 = vpack.c.bf16 %v238_v16, %v238_v16 }
  0x19   : > { %v243_v21 = vpack.c.bf16 %v239_v17, %v239_v17 }
  0x1a   : > { %245 = vst.msk [vmem:[%s208_s27] sm:$0x3] %vm244_vm0, %v240_v18  ;;  %246 = vst.msk [vmem:[%s208_s27 + $0x2] sm:$0x3] %vm244_vm0, %v241_v19 }
  0x1b   : > { %247 = vst.msk [vmem:[%s208_s27 + $0x4] sm:$0x3] %vm244_vm0, %v242_v20  ;;  %248 = vst.msk [vmem:[%s208_s27 + $0x6] sm:$0x3] %vm244_vm0, %v243_v21 }
  0x1c PF: > { %s13_s14 = sadd.s32 1, %s397_s14   ;;  %s462_s12 = smov %s393_s13 }
  0x1d   : > { %p10_p5 = scmp.ge.s32.totalorder %s13_s14, 4   ;;  %s463_s13 = smov %s465_s15 }
  0x1f   :  { %12 = sbr.rel (!%p10_p5) target bundleno = 2 (0x2), region = 62 }

// kernel: unet_apply.49
= control target key start
LH: loop header
LB: loop body
LE: loop exit
PB: predicated region body
PF: predicated region fallthrough
CT: control target
= control target key end

     0   :  { %v260_v0 = vmov 0   ;;  %vm108_vm0 = vcmask 130048   ;;  %vm164_vm1 = vcmask 261120   ;;  %vm199_vm2 = vcmask 1040384   ;;  %s347_s1 = inlined_call_operand.vmem [shape: bf16[144,32], index: 1, kind: input, shape index: {}]   ;;  %s348_s0 = inlined_call_operand.vmem [shape: bf16[32,144], index: 0, kind: input, shape index: {}]   ;;  %s349_s2 = inlined_call_operand.vmem [shape: f32[32,32], index: 2, kind: output, shape index: {0}]   ;;  %s350_s3 = inlined_call_operand.vmem [shape: f32[1,2,32], index: 3, kind: output, shape index: {1}]  }
   0x1   :  { %115 = vmatprep.subr.bf16.mxu0 %v260_v0  ;;  %226 = vmatprep.subr.bf16.mxu1 %v260_v0  ;;  %v245_v1 = vld [vmem:[%s347_s1] sm:$0xff]   ;;  %v246_v2 = vld [vmem:[%s347_s1 + $0x8] sm:$0xff]   ;;  %v247_v3 = vld [vmem:[%s347_s1 + $0x10] sm:$0xff]   ;;  %vm201_vm3 = vcmask 254976  }
   0x2   :  { %116 = vmatpush1.bf16.msra.mxu0 %v245_v1  ;;  %235 = vmatpush1.bf16.msra.mxu1 %v245_v1  ;;  %v248_v4 = vld [vmem:[%s347_s1 + $0x18] sm:$0xff]   ;;  %v256_v5 = vld [vmem:[%s348_s0 + $0x4] ss:$8 sps:$4 sm:$0xff]   ;;  %v251_v9 = vld [vmem:[%s347_s1 + $0x30] sm:$0xff]  }
   0x3   :  { %117 = vmatprep.subr.bf16.mxu0 %v260_v0  ;;  %227 = vmatprep.subr.bf16.mxu1 %v260_v0  ;;  %v259_v6 = vld [vmem:[%s348_s0 + $0x14] ss:$8 sps:$4 sm:$0xff]   ;;  %v249_v7 = vld [vmem:[%s347_s1 + $0x20] sm:$0xff]   ;;  %v250_v8 = vld [vmem:[%s347_s1 + $0x28] sm:$0xff]  }
   0x4   :  { %224 = vmatprep.mubr.msk.bf16.mxu0 %vm108_vm0, %v256_v5  ;;  %225 = vmatprep.mubr.msk.bf16.mxu1 %vm108_vm0, %v259_v6  ;;  %v252_v10 = vld [vmem:[%s347_s1 + $0x38] sm:$0xff]   ;;  %v253_v11 = vld [vmem:[%s347_s1 + $0x40] sm:$0xff]  }
   0x5   :  { %v254_v12 = vld [vmem:[%s348_s0] ss:$8 sps:$4 sm:$0xff]   ;;  %v257_v13 = vld [vmem:[%s348_s0 + $0x10] ss:$8 sps:$4 sm:$0xff]  }
   0x6   :  { %118 = vmatpush1.bf16.msra.mxu0 %v246_v2  ;;  %236 = vmatpush1.bf16.msra.mxu1 %v246_v2 }
   0x7   :  { %119 = vmatprep.subr.bf16.mxu0 %v260_v0  ;;  %228 = vmatprep.subr.bf16.mxu1 %v260_v0 }
   0xa   :  { %120 = vmatpush1.bf16.msra.mxu0 %v247_v3  ;;  %237 = vmatpush1.bf16.msra.mxu1 %v247_v3 }
   0xb   :  { %121 = vmatprep.subr.bf16.mxu0 %v260_v0  ;;  %229 = vmatprep.subr.bf16.mxu1 %v260_v0 }
   0xe   :  { %122 = vmatpush1.bf16.msra.mxu0 %v248_v4  ;;  %238 = vmatpush1.bf16.msra.mxu1 %v248_v4 }
   0xf   :  { %123 = vmatprep.subr.bf16.mxu0 %v260_v0  ;;  %230 = vmatprep.subr.bf16.mxu1 %v260_v0 }
  0x12   :  { %124 = vmatpush1.bf16.msra.mxu0 %v249_v7  ;;  %239 = vmatpush1.bf16.msra.mxu1 %v249_v7 }
  0x13   :  { %125 = vmatprep.subr.bf16.mxu0 %v260_v0  ;;  %231 = vmatprep.subr.bf16.mxu1 %v260_v0 }
  0x16   :  { %126 = vmatpush1.bf16.msra.mxu0 %v250_v8  ;;  %240 = vmatpush1.bf16.msra.mxu1 %v250_v8 }
  0x17   :  { %127 = vmatprep.subr.bf16.mxu0 %v260_v0  ;;  %232 = vmatprep.subr.bf16.mxu1 %v260_v0 }
  0x1a   :  { %128 = vmatpush1.bf16.msra.mxu0 %v251_v9  ;;  %241 = vmatpush1.bf16.msra.mxu1 %v251_v9 }
  0x1b   :  { %129 = vmatprep.subr.bf16.mxu0 %v260_v0  ;;  %233 = vmatprep.subr.bf16.mxu1 %v260_v0 }
  0x1e   :  { %130 = vmatpush1.bf16.msra.mxu0 %v252_v10  ;;  %242 = vmatpush1.bf16.msra.mxu1 %v252_v10 }
  0x1f   :  { %131 = vmatprep.subr.bf16.mxu0 %v260_v0  ;;  %234 = vmatprep.subr.bf16.mxu1 %v260_v0 }
  0x22   :  { %132 = vmatpush1.bf16.msra.mxu0 %v253_v11  ;;  %243 = vmatpush1.bf16.msra.mxu1 %v253_v11 }
  0x25   :  { %148 = vmatmul.mubr.bf16.vlgmr.msra.gmra.mrb[0].mxu0 %v254_v12  ;;  %156 = vmatmul.mubr.bf16.vlgmr.msra.gmra.mrb[0].mxu1 %v257_v13 }
  0xf8   :  { %v149_v14 = vpop.f32.mrb[0].mxu0  ;;  %v157_v15 = vpop.f32.mrb[0].mxu1 }
  0xf9   :  { %165 = vst.msk [vmem:[%s349_s2] sm:$0xff] %vm164_vm1, %v149_v14  ;;  %v182_v16 = vmul.f32 %v149_v14, %v149_v14  ;;  %v151_v17 = vpop.f32.mrb[1].mxu0  ;;  %167 = vst.msk [vmem:[%s349_s2 + $0x10] sm:$0xff] %vm164_vm1, %v157_v15  ;;  %v184_v18 = vmul.f32 %v157_v15, %v157_v15  ;;  %v159_v19 = vpop.f32.mrb[1].mxu1  ;;  %v169_v22 = vsel %vm164_vm1, %v149_v14, 0.0  ;;  %v172_v23 = vsel %vm164_vm1, %v157_v15, 0.0 }
  0xfa   :  { %v152_v20 = vpop.f32.mrb[2].mxu0  ;;  %v160_v21 = vpop.f32.mrb[2].mxu1 }
  0xfb   :  { %166 = vst.msk [vmem:[%s349_s2 + $0x8] sm:$0xff] %vm164_vm1, %v152_v20  ;;  %v170_v24 = vsel %vm164_vm1, %v152_v20, 0.0  ;;  %v183_v25 = vmul.f32 %v152_v20, %v152_v20  ;;  %v154_v26 = vpop.f32.mrb[3].mxu0  ;;  %168 = vst.msk [vmem:[%s349_s2 + $0x18] sm:$0xff] %vm164_vm1, %v160_v21  ;;  %v162_v27 = vpop.f32.mrb[3].mxu1  ;;  %v186_v29 = vsel %vm164_vm1, %v182_v16, 0.0  ;;  %v185_v32 = vmul.f32 %v160_v21, %v160_v21 }
  0xfc   :  { %v171_v28 = vadd.f32 %v170_v24, %v169_v22  ;;  %v189_v30 = vsel %vm164_vm1, %v184_v18, 0.0  ;;  %v174_v35 = vsel %vm164_vm1, %v160_v21, 0.0 }
  0xfd   :  { %v187_v31 = vsel %vm164_vm1, %v183_v25, 0.0  ;;  %v191_v38 = vsel %vm164_vm1, %v185_v32, 0.0 }
  0xfe   :  { %v188_v33 = vadd.f32 %v187_v31, %v186_v29  ;;  %v173_v34 = vadd.f32 %v172_v23, %v171_v28 }
 0x100   :  { %v175_v36 = vadd.f32 %v174_v35, %v173_v34  ;;  %v190_v37 = vadd.f32 %v189_v30, %v188_v33 }
 0x102   :  { %v176_v39 = vrot.slane %v175_v36, 4  ;;  %v192_v40 = vadd.f32 %v191_v38, %v190_v37 }
 0x104   :  { %v177_v41 = vadd.f32 %v176_v39, %v175_v36  ;;  %v193_v42 = vrot.slane %v192_v40, 4 }
 0x106   :  { %v178_v43 = vrot.slane %v177_v41, 2  ;;  %v194_v44 = vadd.f32 %v193_v42, %v192_v40 }
 0x108   :  { %v179_v45 = vadd.f32 %v178_v43, %v177_v41  ;;  %v195_v46 = vrot.slane %v194_v44, 2 }
 0x10a   :  { %v180_v47 = vrot.slane %v179_v45, 1  ;;  %v196_v48 = vadd.f32 %v195_v46, %v194_v44 }
 0x10c   :  { %v197_v49 = vrot.slane %v196_v48, 1  ;;  %v181_v50 = vadd.f32 %v180_v47, %v179_v45 }
 0x10e   :  { %v198_v51 = vadd.f32 %v197_v49, %v196_v48 }
 0x110   :  { %v200_v52 = vsel %vm199_vm2, %v181_v50, %v198_v51 }
 0x111   :  { %202 = vst.msk [vmem:[%s350_s3] sm:$0x3] %vm201_vm3, %v200_v52 }

// kernel: unet_apply.52
= control target key start
LH: loop header
LB: loop body
LE: loop exit
PB: predicated region body
PF: predicated region fallthrough
CT: control target
= control target key end

     0   :  { %s541_s15 = smov 0   ;;  %s543_s16 = smov 0   ;;  %s598_s0 = inlined_call_operand.vmem [shape: f32[2,4,4,32], index: 0, kind: input, shape index: {}]   ;;  %s599_s1 = inlined_call_operand.vmem [shape: f32[1,32], index: 1, kind: input, shape index: {}]   ;;  %s600_s2 = inlined_call_operand.vmem [shape: f32[1,32], index: 2, kind: input, shape index: {}]   ;;  %s601_s3 = inlined_call_operand.vmem [shape: bf16[2,4,4,32], index: 3, kind: output, shape index: {0}]   ;;  %s602_s4 = inlined_call_operand.vmem [shape: bf16[2,2,2,32], index: 4, kind: output, shape index: {1}]  }
   0x1   :  { %s545_s17 = smov 0  }
   0x2 LB: > { %s27_s18 = sadd.s32 1, %s510_s16  ;;  %p456_p0 = scmp.ge.s32.totalorder %s514_s17, 1  ;;  %s514_s17 = sphi %s545_s17, %s15_s17   ;;  %s510_s16 = sphi %s543_s16, %s604_s16   ;;  %s506_s15 = sphi %s541_s15, %s603_s15  }
   0x3   : > { %p29_p1 = scmp.ge.s32.totalorder %s27_s18, 2  ;;  %p188_p2 = scmp.lt.s32.totalorder %s514_s17, 3 }
   0x5   : > { %s606_s18 = smov (%p29_p1, %s27_s18), 0  ;;  %p189_p3 = pnand %p456_p0, %p188_p2 }
   0x6   : > { %p231_p4 = scmp.lt.s32.totalorder (!%p189_p3), %s506_s15, 1  ;;  %v462_v0 = vld [vmem:[%s599_s1] ss:$0 sm:$0xff] (!%p189_p3)  ;;  %vm298_vm0 = vcmask (!%p189_p3), 257024   ;;  %vm293_vm1 = vcmask (!%p189_p3), 254976   ;;  %vm318_vm2 = vcmask (!%p189_p3), 253952  }
   0x7   : > { %192 = sbr.rel (%p189_p3) target bundleno = 42 (0x2a), region = 32  ;;  %v463_v1 = vld [vmem:[%s600_s2] ss:$0 sm:$0xff] (!%p189_p3) }
   0xe   : > { %s608_s15 = smov (!%p231_p4, %s506_s15), 1 }
   0xf   : > { %s466_s19 = sshll.u32 %s608_s15, 4  ;;  %s467_s27 = sshll.u32 %s608_s15, 3 }
  0x10   : > { %s238_s24 = scalar_lea.vmem %s598_s0, %s466_s19  ;;  %s248_s30 = scalar_lea.vmem %s601_s3, %s467_s27 }
  0x11   : > { %v261_v2 = vld [vmem:[%s238_s24] sm:$0xf]  ;;  %v262_v3 = vld [vmem:[%s238_s24 + $0x4] sm:$0xf]  ;;  %v263_v4 = vld [vmem:[%s238_s24 + $0x8] sm:$0xf] }
  0x12   : > { %v271_v5 = vmul.f32 %v462_v0, %v261_v2  ;;  %v272_v6 = vmul.f32 %v462_v0, %v262_v3  ;;  %v264_v7 = vld [vmem:[%s238_s24 + $0xc] sm:$0xf]  ;;  %v273_v8 = vmul.f32 %v462_v0, %v263_v4  ;;  %s461_s5 = sshll.u32 %s608_s15, 1 }
  0x13   : > { %v274_v9 = vmul.f32 %v462_v0, %v264_v7  ;;  %s257_s8 = scalar_lea.vmem %s602_s4, %s461_s5 }
  0x14   : > { %v281_v10 = vadd.f32 %v463_v1, %v271_v5  ;;  %v282_v11 = vadd.f32 %v463_v1, %v272_v6  ;;  %v283_v12 = vadd.f32 %v463_v1, %v273_v8 }
  0x15   : > { %v284_v13 = vadd.f32 %v463_v1, %v274_v9 }
  0x16   : > { %v285_v14 = vmax.f32 %v281_v10, 0.0  ;;  %v286_v15 = vmax.f32 %v282_v11, 0.0  ;;  %v287_v16 = vmax.f32 %v283_v12, 0.0 }
  0x17   : > { %v288_v17 = vmax.f32 %v284_v13, 0.0 }
  0x18   : > { %v299_v18 = vsel %vm298_vm0, %v285_v14, -inf  ;;  %v300_v19 = vsel %vm298_vm0, %v286_v15, -inf  ;;  %v302_v20 = vsel %vm298_vm0, %v287_v16, -inf  ;;  %v289_v21 = vpack.c.bf16 %v285_v14, %v285_v14 }
  0x19   : > { %v301_v22 = vmax.f32 %v299_v18, %v300_v19  ;;  %v303_v23 = vsel %vm298_vm0, %v288_v17, -inf  ;;  %v290_v24 = vpack.c.bf16 %v286_v15, %v286_v15  ;;  %v291_v25 = vpack.c.bf16 %v287_v16, %v287_v16 }
  0x1a   : > { %v304_v26 = vmax.f32 %v302_v20, %v303_v23  ;;  %294 = vst.msk [vmem:[%s248_s30] sm:$0x3] %vm293_vm1, %v289_v21  ;;  %v292_v27 = vpack.c.bf16 %v288_v17, %v288_v17 }
  0x1b   : > { %305 = vst.msk [vmem:[#allocation2] sm:$0xf] %vm298_vm0, %v301_v22 }
  0x1c   : > { %295 = vst.msk [vmem:[%s248_s30 + $0x2] sm:$0x3] %vm293_vm1, %v290_v24  ;;  %296 = vst.msk [vmem:[%s248_s30 + $0x4] sm:$0x3] %vm293_vm1, %v291_v25 }
  0x1d   : > { %306 = vst.msk [vmem:[#allocation2 + $0x4] sm:$0xf] %vm298_vm0, %v304_v26 }
  0x1e   : > { %297 = vst.msk [vmem:[%s248_s30 + $0x6] sm:$0x3] %vm293_vm1, %v292_v27 }
  0x22   : > { %v307_v28 = vld [vmem:[#allocation2] ss:$2 sm:$0x3]  ;;  %v311_v29 = vld [vmem:[#allocation2 + $0x1] ss:$2 sm:$0x3] }
  0x23   : > { %v314_v30 = vmax.f32 %v307_v28, %v311_v29 }
  0x24   : > { %v309_v31 = vld [vmem:[#allocation2 + $0x4] ss:$2 sm:$0x3]  ;;  %v313_v32 = vld [vmem:[#allocation2 + $0x5] ss:$2 sm:$0x3] }
  0x25   : > { %v315_v33 = vmax.f32 %v309_v31, %v313_v32  ;;  %v316_v34 = vpack.c.bf16 %v314_v30, %v314_v30 }
  0x27   : > { %v317_v35 = vpack.c.bf16 %v315_v33, %v315_v33  ;;  %319 = vst.msk [vmem:[%s257_s8] sm:$0x1] %vm318_vm2, %v316_v34 }
  0x29   : > { %320 = vst.msk [vmem:[%s257_s8 + $0x1] sm:$0x1] %vm318_vm2, %v317_v35 }
  0x2a PF: > { %s15_s17 = sadd.s32 1, %s514_s17   ;;  %s603_s15 = smov %s510_s16 }
  0x2b   : > { %p12_p5 = scmp.ge.s32.totalorder %s15_s17, 4   ;;  %s604_s16 = smov %s606_s18 }
  0x2d   :  { %14 = sbr.rel (!%p12_p5) target bundleno = 2 (0x2), region = 77 }

// kernel: unet_apply.51
= control target key start
LH: loop header
LB: loop body
LE: loop exit
PB: predicated region body
PF: predicated region fallthrough
CT: control target
= control target key end

     0   :  { %vm196_vm0 = vcmask 261120   ;;  %vm335_vm1 = vcmask 1040384   ;;  %vm337_vm2 = vcmask 254976   ;;  %s560_s1 = inlined_call_operand.vmem [shape: bf16[288,32], index: 1, kind: input, shape index: {}]   ;;  %s561_s0 = inlined_call_operand.vmem [shape: bf16[32,288], index: 0, kind: input, shape index: {}]   ;;  %s562_s2 = inlined_call_operand.vmem [shape: f32[32,32], index: 2, kind: output, shape index: {0}]   ;;  %s563_s3 = inlined_call_operand.vmem [shape: f32[1,2,32], index: 3, kind: output, shape index: {1}]  }
   0x1   :  { %v413_v0 = vld [vmem:[%s560_s1 + $0x40] sm:$0xff]   ;;  %v415_v2 = vld [vmem:[%s560_s1 + $0x48] sm:$0xff]   ;;  %v417_v4 = vld [vmem:[%s560_s1 + $0x50] sm:$0xff]  }
   0x2   :  { %v414_v1 = vld [vmem:[%s560_s1] sm:$0xff]   ;;  %373 = vmatprep.subr.bf16.mxu0 %v413_v0  ;;  %v416_v3 = vld [vmem:[%s560_s1 + $0x8] sm:$0xff]   ;;  %v418_v5 = vld [vmem:[%s560_s1 + $0x10] sm:$0xff]  }
   0x3   :  { %374 = vmatpush3.bf16.msra.mxu0 %v414_v1  ;;  %v419_v6 = vld [vmem:[%s560_s1 + $0x58] sm:$0xff]   ;;  %v421_v8 = vld [vmem:[%s560_s1 + $0x60] sm:$0xff]   ;;  %v423_v11 = vld [vmem:[%s560_s1 + $0x68] sm:$0xff]  }
   0x4   :  { %375 = vmatprep.subr.bf16.mxu0 %v415_v2  ;;  %v420_v7 = vld [vmem:[%s560_s1 + $0x18] sm:$0xff]   ;;  %v427_v9 = vld [vmem:[%s560_s1 + $0x80] sm:$0xff]   ;;  %v424_v12 = vld [vmem:[%s560_s1 + $0x28] sm:$0xff]  }
   0x5   :  { %v422_v10 = vld [vmem:[%s560_s1 + $0x20] sm:$0xff]   ;;  %405 = vmatprep.subr.bf16.mxu1 %v427_v9  ;;  %v430_v13 = vld [vmem:[%s560_s1 + $0x88] sm:$0xff]   ;;  %v425_v14 = vld [vmem:[%s560_s1 + $0x70] sm:$0xff]  }
   0x6   :  { %406 = vmatpush3.bf16.msra.mxu1 %v427_v9  ;;  %v433_v15 = vld [vmem:[%s561_s0 + $0x4] ss:$12 sps:$4 sm:$0xff]   ;;  %v434_v16 = vld [vmem:[%s561_s0 + $0x8] ss:$12 sps:$4 sm:$0xff]   ;;  %v435_v17 = vld [vmem:[%s561_s0 + $0x20] ss:$12 sps:$4 sm:$0xff]  }
   0x7   :  { %376 = vmatpush3.bf16.msra.mxu0 %v416_v3  ;;  %407 = vmatprep.subr.bf16.mxu1 %v430_v13  ;;  %v426_v18 = vld [vmem:[%s560_s1 + $0x30] sm:$0xff]   ;;  %v428_v19 = vld [vmem:[%s560_s1 + $0x78] sm:$0xff]   ;;  %v431_v21 = vld [vmem:[%s561_s0] ss:$12 sps:$4 sm:$0xff]  }
   0x8   :  { %377 = vmatprep.subr.bf16.mxu0 %v417_v4  ;;  %235 = vmatprep.mubr.bf16.mxu0 %v433_v15  ;;  %v429_v20 = vld [vmem:[%s560_s1 + $0x38] sm:$0xff]  }
   0x9   :  { %409 = vmatprep.mubr.msk.bf16.mxu1 %vm196_vm0, %v434_v16  ;;  %v436_v22 = vld [vmem:[%s561_s0 + $0x1c] ss:$12 sps:$4 sm:$0xff]   ;;  %v438_v23 = vld [vmem:[%s561_s0 + $0x18] ss:$12 sps:$4 sm:$0xff]  }
   0xa   :  { %408 = vmatpush3.bf16.msra.mxu1 %v430_v13 }
   0xb   :  { %378 = vmatpush3.bf16.msra.mxu0 %v418_v5 }
   0xc   :  { %379 = vmatprep.subr.bf16.mxu0 %v419_v6 }
   0xd   :  { %410 = vmatmul.mubr.msk.bf16.vlgmr.msra.gmra.mrb[0].mxu1 %vm196_vm0, %v435_v17 }
   0xf   :  { %380 = vmatpush3.bf16.msra.mxu0 %v420_v7 }
  0x10   :  { %381 = vmatprep.subr.bf16.mxu0 %v421_v8 }
  0x13   :  { %382 = vmatpush3.bf16.msra.mxu0 %v422_v10 }
  0x14   :  { %383 = vmatprep.subr.bf16.mxu0 %v423_v11 }
  0x17   :  { %384 = vmatpush3.bf16.msra.mxu0 %v424_v12 }
  0x18   :  { %385 = vmatprep.subr.bf16.mxu0 %v425_v14 }
  0x1b   :  { %386 = vmatpush3.bf16.msra.mxu0 %v426_v18 }
  0x1c   :  { %387 = vmatprep.subr.bf16.mxu0 %v428_v19 }
  0x1f   :  { %388 = vmatpush3.bf16.msra.mxu0 %v429_v20 }
  0x22   :  { %236 = vmatmul.mubr.bf16.vlgmr.msra.gmra.mrb[0].mxu0 %v431_v21 }
  0x23   :  { %243 = vmatprep.mubr.bf16.mxu0 %v436_v22 }
  0x2a   :  { %244 = vmatmul.mubr.bf16.gmra.mrb[4].mxu0 %v438_v23 }
  0xe0   :  { %v411_v24 = vpop.f32.mrb[0].mxu1 }
  0xe1   :  { %v286_v25 = vpop.f32.mrb[1].mxu1 }
  0xe2   :  { %v412_v26 = vpop.f32.mrb[2].mxu1 }
  0xe3   :  { %v289_v27 = vpop.f32.mrb[3].mxu1 }
  0xf5   :  { %v389_v28 = vpop.f32.mrb[0].mxu0 }
  0xf6   :  { %v390_v29 = vpop.f32.mrb[1].mxu0 }
  0xf7   :  { %v391_v30 = vadd.f32 %v390_v29, %v389_v28  ;;  %v392_v31 = vpop.f32.mrb[2].mxu0 }
  0xf8   :  { %v393_v32 = vpop.f32.mrb[3].mxu0 }
  0xf9   :  { %v394_v33 = vadd.f32 %v393_v32, %v392_v31  ;;  %v287_v34 = vadd.f32 %v391_v30, %v286_v25 }
  0xfb   :  { %301 = vst.msk [vmem:[%s562_s2] sm:$0xff] %vm196_vm0, %v287_v34  ;;  %v318_v35 = vmul.f32 %v287_v34, %v287_v34  ;;  %v290_v36 = vadd.f32 %v394_v33, %v289_v27  ;;  %v305_v37 = vsel %vm196_vm0, %v287_v34, 0.0 }
  0xfd   :  { %302 = vst.msk [vmem:[%s562_s2 + $0x8] sm:$0xff] %vm196_vm0, %v290_v36  ;;  %v306_v38 = vsel %vm196_vm0, %v290_v36, 0.0  ;;  %v319_v39 = vmul.f32 %v290_v36, %v290_v36  ;;  %v395_v40 = vpop.f32.mrb[4].mxu0  ;;  %v322_v43 = vsel %vm196_vm0, %v318_v35, 0.0 }
  0xfe   :  { %v307_v41 = vadd.f32 %v306_v38, %v305_v37  ;;  %v396_v42 = vpop.f32.mrb[5].mxu0 }
  0xff   :  { %v323_v44 = vsel %vm196_vm0, %v319_v39, 0.0  ;;  %v397_v45 = vadd.f32 %v396_v42, %v395_v40  ;;  %v398_v46 = vpop.f32.mrb[6].mxu0 }
 0x100   :  { %v324_v47 = vadd.f32 %v323_v44, %v322_v43  ;;  %v399_v48 = vpop.f32.mrb[7].mxu0 }
 0x101   :  { %v295_v49 = vadd.f32 %v411_v24, %v397_v45  ;;  %v400_v50 = vadd.f32 %v399_v48, %v398_v46 }
 0x103   :  { %303 = vst.msk [vmem:[%s562_s2 + $0x10] sm:$0xff] %vm196_vm0, %v295_v49  ;;  %v308_v51 = vsel %vm196_vm0, %v295_v49, 0.0  ;;  %v320_v52 = vmul.f32 %v295_v49, %v295_v49  ;;  %v298_v53 = vadd.f32 %v412_v26, %v400_v50 }
 0x104   :  { %v309_v54 = vadd.f32 %v308_v51, %v307_v41 }
 0x105   :  { %v325_v55 = vsel %vm196_vm0, %v320_v52, 0.0  ;;  %304 = vst.msk [vmem:[%s562_s2 + $0x18] sm:$0xff] %vm196_vm0, %v298_v53  ;;  %v310_v56 = vsel %vm196_vm0, %v298_v53, 0.0  ;;  %v321_v57 = vmul.f32 %v298_v53, %v298_v53 }
 0x106   :  { %v326_v58 = vadd.f32 %v325_v55, %v324_v47  ;;  %v311_v59 = vadd.f32 %v310_v56, %v309_v54 }
 0x107   :  { %v327_v60 = vsel %vm196_vm0, %v321_v57, 0.0 }
 0x108   :  { %v312_v61 = vrot.slane %v311_v59, 4  ;;  %v328_v62 = vadd.f32 %v327_v60, %v326_v58 }
 0x10a   :  { %v313_v63 = vadd.f32 %v312_v61, %v311_v59  ;;  %v329_v0 = vrot.slane %v328_v62, 4 }
 0x10c   :  { %v314_v1 = vrot.slane %v313_v63, 2  ;;  %v330_v2 = vadd.f32 %v329_v0, %v328_v62 }
 0x10e   :  { %v315_v3 = vadd.f32 %v314_v1, %v313_v63  ;;  %v331_v4 = vrot.slane %v330_v2, 2 }
 0x110   :  { %v316_v5 = vrot.slane %v315_v3, 1  ;;  %v332_v6 = vadd.f32 %v331_v4, %v330_v2 }
 0x112   :  { %v333_v7 = vrot.slane %v332_v6, 1  ;;  %v317_v8 = vadd.f32 %v316_v5, %v315_v3 }
 0x114   :  { %v334_v9 = vadd.f32 %v333_v7, %v332_v6 }
 0x116   :  { %v336_v10 = vsel %vm335_vm1, %v317_v8, %v334_v9 }
 0x117   :  { %338 = vst.msk [vmem:[%s563_s3] sm:$0x3] %vm337_vm2, %v336_v10 }

// kernel: unet_apply.53
= control target key start
LH: loop header
LB: loop body
LE: loop exit
PB: predicated region body
PF: predicated region fallthrough
CT: control target
= control target key end

     0   :  { %v361_v1 = vmov 0.0   ;;  %vm362_vm0 = vmmov 0   ;;  %vm170_vm1 = vcmask 261120   ;;  %vm254_vm2 = vcmask 523264   ;;  %s449_s1 = inlined_call_operand.vmem [shape: bf16[288,64], index: 1, kind: input, shape index: {}]   ;;  %s450_s0 = inlined_call_operand.vmem [shape: bf16[8,288], index: 0, kind: input, shape index: {}]   ;;  %s451_s2 = inlined_call_operand.vmem [shape: f32[8,64], index: 2, kind: output, shape index: {0}]   ;;  %s452_s3 = inlined_call_operand.vmem [shape: f32[1,2,64], index: 3, kind: output, shape index: {1}]  }
   0x1   :  { %v340_v0 = vld [vmem:[%s449_s1 + $0x40] sm:$0xff]   ;;  %330 = vmatprep.subr.bf16.mxu1 %v361_v1  ;;  %334 = vmatprep.mubr.msk.bf16.mxu1 %vm362_vm0, %v361_v1  ;;  %v342_v3 = vld [vmem:[%s449_s1 + $0x48] sm:$0xff]   ;;  %v344_v5 = vld [vmem:[%s449_s1 + $0x50] sm:$0xff]   ;;  %vm271_vm3 = vcmask 1040384   ;;  %vm273_vm4 = vcmask 517120  }
   0x2   :  { %v341_v2 = vld [vmem:[%s449_s1] sm:$0xff]   ;;  %305 = vmatprep.subr.bf16.mxu0 %v340_v0  ;;  %v343_v4 = vld [vmem:[%s449_s1 + $0x8] sm:$0xff]   ;;  %v345_v6 = vld [vmem:[%s449_s1 + $0x10] sm:$0xff]  }
   0x3   :  { %306 = vmatpush3.bf16.msra.mxu0 %v341_v2  ;;  %v346_v7 = vld [vmem:[%s449_s1 + $0x58] sm:$0xff]   ;;  %v348_v9 = vld [vmem:[%s449_s1 + $0x60] sm:$0xff]   ;;  %v350_v12 = vld [vmem:[%s449_s1 + $0x68] sm:$0xff]  }
   0x4   :  { %307 = vmatprep.subr.bf16.mxu0 %v342_v3  ;;  %v347_v8 = vld [vmem:[%s449_s1 + $0x18] sm:$0xff]   ;;  %v354_v10 = vld [vmem:[%s449_s1 + $0x80] sm:$0xff]   ;;  %v357_v13 = vld [vmem:[%s449_s1 + $0x88] sm:$0xff]  }
   0x5   :  { %v349_v11 = vld [vmem:[%s449_s1 + $0x20] sm:$0xff]   ;;  %331 = vmatpush3.bf16.msra.mxu1 %v354_v10  ;;  %v351_v15 = vld [vmem:[%s449_s1 + $0x28] sm:$0xff]   ;;  %v352_v18 = vld [vmem:[%s449_s1 + $0x70] sm:$0xff]  }
   0x6   :  { %332 = vmatprep.subr.bf16.mxu1 %v361_v1  ;;  %v14_v14 = vld [vmem:[%s450_s0] sm:$0xff]  ;;  %v360_v17 = vld [vmem:[%s450_s0 + $0x8] ss:$0 sps:$4 sm:$0xff]   ;;  %v353_v19 = vld [vmem:[%s449_s1 + $0x30] sm:$0xff]  }
   0x7   :  { %308 = vmatpush3.bf16.msra.mxu0 %v343_v4  ;;  %v284_v16 = vcombine.high %v14_v14, %v14_v14  ;;  %v355_v20 = vld [vmem:[%s449_s1 + $0x78] sm:$0xff]   ;;  %v283_v22 = vcombine.low %v14_v14, %v14_v14 }
   0x8   :  { %309 = vmatprep.subr.bf16.mxu0 %v344_v5  ;;  %v356_v21 = vld [vmem:[%s449_s1 + $0x38] sm:$0xff]  }
   0x9   :  { %333 = vmatpush3.bf16.msra.mxu1 %v357_v13  ;;  %206 = vmatprep.mubr.bf16.mxu0 %v284_v16 }
   0xb   :  { %310 = vmatpush3.bf16.msra.mxu0 %v345_v6 }
   0xc   :  { %311 = vmatprep.subr.bf16.mxu0 %v346_v7  ;;  %335 = vmatmul.mubr.msk.bf16.vlgmr.msra.gmra.mrb[0].mxu1 %vm170_vm1, %v360_v17 }
   0xf   :  { %312 = vmatpush3.bf16.msra.mxu0 %v347_v8 }
  0x10   :  { %313 = vmatprep.subr.bf16.mxu0 %v348_v9 }
  0x13   :  { %314 = vmatpush3.bf16.msra.mxu0 %v349_v11 }
  0x14   :  { %315 = vmatprep.subr.bf16.mxu0 %v350_v12 }
  0x17   :  { %316 = vmatpush3.bf16.msra.mxu0 %v351_v15 }
  0x18   :  { %317 = vmatprep.subr.bf16.mxu0 %v352_v18 }
  0x1b   :  { %318 = vmatpush3.bf16.msra.mxu0 %v353_v19 }
  0x1c   :  { %319 = vmatprep.subr.bf16.mxu0 %v355_v20 }
  0x1f   :  { %320 = vmatpush3.bf16.msra.mxu0 %v356_v21 }
  0x22   :  { %207 = vmatmul.mubr.bf16.vlgmr.msra.gmra.mrb[0].mxu0 %v283_v22 }
  0xdf   :  { %v248_v23 = vpop.f32.mrb[0].mxu1 }
  0xe0   :  { %v336_v24 = vpop.f32.mrb[1].mxu1 }
  0xe1   :  { %v251_v25 = vpop.f32.mrb[2].mxu1 }
  0xe2   :  { %v337_v26 = vpop.f32.mrb[3].mxu1 }
  0xf5   :  { %v321_v27 = vpop.f32.mrb[0].mxu0 }
  0xf6   :  { %v322_v28 = vpop.f32.mrb[1].mxu0 }
  0xf7   :  { %v323_v29 = vadd.f32 %v322_v28, %v321_v27  ;;  %v324_v30 = vpop.f32.mrb[2].mxu0 }
  0xf8   :  { %v325_v31 = vpop.f32.mrb[3].mxu0 }
  0xf9   :  { %v249_v32 = vadd.f32 %v323_v29, %v248_v23 }
  0xfb   :  { %255 = vst.msk [vmem:[%s451_s2] sm:$0xff] %vm254_vm2, %v249_v32  ;;  %v256_v33 = vsel %vm254_vm2, %v249_v32, 0.0  ;;  %v263_v34 = vmul.f32 %v249_v32, %v249_v32 }
  0xfc   :  { %v257_v35 = vrot.slane %v256_v33, 4 }
  0xfd   :  { %v264_v36 = vsel %vm254_vm2, %v263_v34, 0.0 }
  0xfe   :  { %v258_v37 = vadd.f32 %v257_v35, %v256_v33  ;;  %v265_v38 = vrot.slane %v264_v36, 4 }
 0x100   :  { %v259_v39 = vrot.slane %v258_v37, 2  ;;  %v266_v40 = vadd.f32 %v265_v38, %v264_v36 }
 0x102   :  { %v260_v41 = vadd.f32 %v259_v39, %v258_v37  ;;  %v267_v42 = vrot.slane %v266_v40, 2 }
 0x104   :  { %v261_v43 = vrot.slane %v260_v41, 1  ;;  %v268_v44 = vadd.f32 %v267_v42, %v266_v40 }
 0x106   :  { %v269_v45 = vrot.slane %v268_v44, 1  ;;  %v262_v46 = vadd.f32 %v261_v43, %v260_v41 }
 0x108   :  { %v270_v47 = vadd.f32 %v269_v45, %v268_v44 }
 0x10a   :  { %v272_v48 = vsel %vm271_vm3, %v262_v46, %v270_v47 }
 0x10b   :  { %274 = vst.msk [vmem:[%s452_s3] sm:$0x3] %vm273_vm4, %v272_v48 }

// kernel: unet_apply.54
= control target key start
LH: loop header
LB: loop body
LE: loop exit
PB: predicated region body
PF: predicated region fallthrough
CT: control target
= control target key end

     0   :  { %s397_s12 = smov 0   ;;  %s399_s13 = smov 0   ;;  %s433_s0 = inlined_call_operand.vmem [shape: f32[2,2,2,64], index: 0, kind: input, shape index: {}]   ;;  %s434_s1 = inlined_call_operand.vmem [shape: f32[1,64], index: 1, kind: input, shape index: {}]   ;;  %s435_s2 = inlined_call_operand.vmem [shape: f32[1,64], index: 2, kind: input, shape index: {}]   ;;  %s436_s3 = inlined_call_operand.vmem [shape: bf16[2,2,2,64], index: 3, kind: output, shape index: {}]  }
   0x1   :  { %s401_s14 = smov 0  }
   0x2 LB: > { %s25_s15 = sadd.s32 1, %s371_s13  ;;  %p320_p0 = scmp.ge.s32.totalorder %s375_s14, 1  ;;  %s375_s14 = sphi %s401_s14, %s13_s14   ;;  %s371_s13 = sphi %s399_s13, %s438_s13   ;;  %s367_s12 = sphi %s397_s12, %s437_s12  }
   0x3   : > { %p27_p1 = scmp.ge.s32.totalorder %s25_s15, 2  ;;  %p158_p2 = scmp.lt.s32.totalorder %s375_s14, 3 }
   0x5   : > { %s440_s15 = smov (%p27_p1, %s25_s15), 0  ;;  %p159_p3 = pnand %p320_p0, %p158_p2 }
   0x6   : > { %p190_p4 = scmp.lt.s32.totalorder (!%p159_p3), %s367_s12, 1  ;;  %v324_v0 = vld [vmem:[%s434_s1] ss:$0 sm:$0xff] (!%p159_p3)  ;;  %vm232_vm0 = vcmask (!%p159_p3), 516096  }
   0x7   : > { %162 = sbr.rel (%p159_p3) target bundleno = 27 (0x1b), region = 32  ;;  %v325_v1 = vld [vmem:[%s435_s2] ss:$0 sm:$0xff] (!%p159_p3) }
   0xe   : > { %s442_s12 = smov (!%p190_p4, %s367_s12), 1 }
   0xf   : > { %s328_s16 = sshll.u32 %s442_s12, 2  ;;  %s323_s24 = sshll.u32 %s442_s12, 1 }
  0x10   : > { %s197_s21 = scalar_lea.vmem %s433_s0, %s328_s16  ;;  %s206_s27 = scalar_lea.vmem %s436_s3, %s323_s24 }
  0x11   : > { %v210_v2 = vld [vmem:[%s197_s21] sm:$0x3]  ;;  %v211_v3 = vld [vmem:[%s197_s21 + $0x2] sm:$0x3] }
  0x12   : > { %v218_v4 = vmul.f32 %v324_v0, %v210_v2  ;;  %v219_v5 = vmul.f32 %v324_v0, %v211_v3 }
  0x14   : > { %v226_v6 = vadd.f32 %v325_v1, %v218_v4  ;;  %v227_v7 = vadd.f32 %v325_v1, %v219_v5 }
  0x16   : > { %v228_v8 = vmax.f32 %v226_v6, 0.0  ;;  %v229_v9 = vmax.f32 %v227_v7, 0.0 }
  0x18   : > { %v230_v10 = vpack.c.bf16 %v228_v8, %v228_v8  ;;  %v231_v11 = vpack.c.bf16 %v229_v9, %v229_v9 }
  0x1a   : > { %233 = vst.msk [vmem:[%s206_s27] sm:$0x1] %vm232_vm0, %v230_v10  ;;  %234 = vst.msk [vmem:[%s206_s27 + $0x1] sm:$0x1] %vm232_vm0, %v231_v11 }
  0x1b PF: > { %s13_s14 = sadd.s32 1, %s375_s14   ;;  %s437_s12 = smov %s371_s13 }
  0x1c   : > { %p10_p5 = scmp.ge.s32.totalorder %s13_s14, 4   ;;  %s438_s13 = smov %s440_s15 }
  0x1e   :  { %12 = sbr.rel (!%p10_p5) target bundleno = 2 (0x2), region = 62 }

// kernel: unet_apply.56
= control target key start
LH: loop header
LB: loop body
LE: loop exit
PB: predicated region body
PF: predicated region fallthrough
CT: control target
= control target key end

     0   :  { %s497_s15 = smov 0   ;;  %s499_s16 = smov 0   ;;  %s539_s0 = inlined_call_operand.vmem [shape: f32[2,2,2,64], index: 0, kind: input, shape index: {}]   ;;  %s540_s1 = inlined_call_operand.vmem [shape: f32[1,64], index: 1, kind: input, shape index: {}]   ;;  %s541_s2 = inlined_call_operand.vmem [shape: f32[1,64], index: 2, kind: input, shape index: {}]   ;;  %s542_s3 = inlined_call_operand.vmem [shape: bf16[2,2,2,64], index: 3, kind: output, shape index: {0}]   ;;  %s543_s4 = inlined_call_operand.vmem [shape: bf16[2,1,1,64], index: 4, kind: output, shape index: {1}]  }
   0x1   :  { %s501_s17 = smov 0  }
   0x2 LB: > { %s27_s18 = sadd.s32 1, %s466_s16  ;;  %p415_p0 = scmp.ge.s32.totalorder %s470_s17, 1  ;;  %s470_s17 = sphi %s501_s17, %s15_s17   ;;  %s466_s16 = sphi %s499_s16, %s545_s16   ;;  %s462_s15 = sphi %s497_s15, %s544_s15  }
   0x3   : > { %p29_p1 = scmp.ge.s32.totalorder %s27_s18, 2  ;;  %p188_p2 = scmp.lt.s32.totalorder %s470_s17, 3 }
   0x5   : > { %s547_s18 = smov (%p29_p1, %s27_s18), 0  ;;  %p189_p3 = pnand %p415_p0, %p188_p2 }
   0x6   : > { %p228_p4 = scmp.lt.s32.totalorder (!%p189_p3), %s462_s15, 1  ;;  %v419_v0 = vld [vmem:[%s540_s1] ss:$0 sm:$0xff] (!%p189_p3)  ;;  %vm279_vm0 = vcmask (!%p189_p3), 517120   ;;  %vm276_vm1 = vcmask (!%p189_p3), 516096  }
   0x7   : > { %192 = sbr.rel (%p189_p3) target bundleno = 41 (0x29), region = 32  ;;  %v420_v1 = vld [vmem:[%s541_s2] ss:$0 sm:$0xff] (!%p189_p3)  ;;  %vm290_vm2 = vsmask.f32 (!%p189_p3), 256 }
   0x8   : > { %vm291_vm3 = vmand (!%p189_p3), %vm276_vm1, %vm290_vm2 }
   0xe   : > { %s549_s15 = smov (!%p228_p4, %s462_s15), 1 }
   0xf   : > { %s423_s19 = sshll.u32 %s549_s15, 2  ;;  %s418_s27 = sshll.u32 %s549_s15, 1 }
  0x10   : > { %s235_s24 = scalar_lea.vmem %s539_s0, %s423_s19  ;;  %s244_s30 = scalar_lea.vmem %s542_s3, %s418_s27 }
  0x11   : > { %v254_v2 = vld [vmem:[%s235_s24] sm:$0x3]  ;;  %v255_v3 = vld [vmem:[%s235_s24 + $0x2] sm:$0x3]  ;;  %s251_s7 = scalar_lea.vmem %s543_s4, %s549_s15 }
  0x12   : > { %v262_v4 = vmul.f32 %v419_v0, %v254_v2  ;;  %v263_v5 = vmul.f32 %v419_v0, %v255_v3  ;;  %v292_v18 = vld [vmem:[%s251_s7] sm:$0x1] }
  0x14   : > { %v270_v6 = vadd.f32 %v420_v1, %v262_v4  ;;  %v271_v7 = vadd.f32 %v420_v1, %v263_v5 }
  0x16   : > { %v272_v8 = vmax.f32 %v270_v6, 0.0  ;;  %v273_v9 = vmax.f32 %v271_v7, 0.0 }
  0x18   : > { %v280_v10 = vsel %vm279_vm0, %v272_v8, -inf  ;;  %v281_v11 = vsel %vm279_vm0, %v273_v9, -inf  ;;  %v274_v12 = vpack.c.bf16 %v272_v8, %v272_v8  ;;  %v275_v13 = vpack.c.bf16 %v273_v9, %v273_v9 }
  0x19   : > { %v282_v14 = vmax.f32 %v280_v10, %v281_v11 }
  0x1a   : > { %277 = vst.msk [vmem:[%s244_s30] sm:$0x1] %vm276_vm1, %v274_v12  ;;  %278 = vst.msk [vmem:[%s244_s30 + $0x1] sm:$0x1] %vm276_vm1, %v275_v13 }
  0x1b   : > { %283 = vst.msk [vmem:[#allocation2] sm:$0x3] %vm279_vm0, %v282_v14 }
  0x22   : > { %v284_v15 = vld [vmem:[#allocation2] ss:$2 sm:$0x1]  ;;  %v286_v16 = vld [vmem:[#allocation2 + $0x1] ss:$2 sm:$0x1] }
  0x23   : > { %v287_v17 = vmax.f32 %v284_v15, %v286_v16 }
  0x25   : > { %v288_v19 = vpack.c.bf16 %v287_v17, %v287_v17 }
  0x27   : > { %v293_v20 = vsel %vm291_vm3, %v288_v19, %v292_v18 }
  0x28   : > { %294 = vst [vmem:[%s251_s7] sm:$0x1] %v293_v20 }
  0x29 PF: > { %s15_s17 = sadd.s32 1, %s470_s17   ;;  %s544_s15 = smov %s466_s16 }
  0x2a   : > { %p12_p5 = scmp.ge.s32.totalorder %s15_s17, 4   ;;  %s545_s16 = smov %s547_s18 }
  0x2c   :  { %14 = sbr.rel (!%p12_p5) target bundleno = 2 (0x2), region = 75 }

// kernel: unet_apply.55
= control target key start
LH: loop header
LB: loop body
LE: loop exit
PB: predicated region body
PF: predicated region fallthrough
CT: control target
= control target key end

     0   :  { %v620_v36 = vmov 0.0   ;;  %vm621_vm0 = vmmov 0   ;;  %vm322_vm1 = vcmask 523264   ;;  %vm462_vm2 = vcmask 1040384   ;;  %s769_s1 = inlined_call_operand.vmem [shape: bf16[576,64], index: 1, kind: input, shape index: {}]   ;;  %s770_s0 = inlined_call_operand.vmem [shape: bf16[8,576], index: 0, kind: input, shape index: {}]   ;;  %s771_s2 = inlined_call_operand.vmem [shape: f32[8,64], index: 2, kind: output, shape index: {0}]   ;;  %s772_s3 = inlined_call_operand.vmem [shape: f32[1,2,64], index: 3, kind: output, shape index: {1}]  }
   0x1   :  { %v579_v0 = vld [vmem:[%s769_s1 + $0x40] sm:$0xff]   ;;  %v583_v4 = vld [vmem:[%s769_s1 + $0x48] sm:$0xff]   ;;  %v587_v8 = vld [vmem:[%s769_s1 + $0x50] sm:$0xff]   ;;  %vm464_vm3 = vcmask 517120  }
   0x2   :  { %v580_v1 = vld [vmem:[%s769_s1 + $0xc0] sm:$0xff]   ;;  %516 = vmatprep.subr.bf16.mxu0 %v579_v0  ;;  %v584_v5 = vld [vmem:[%s769_s1 + $0xc8] sm:$0xff]   ;;  %v588_v9 = vld [vmem:[%s769_s1 + $0xd0] sm:$0xff]  }
   0x3   :  { %v581_v2 = vld [vmem:[%s769_s1] sm:$0xff]   ;;  %538 = vmatprep.subr.bf16.mxu1 %v580_v1  ;;  %v585_v6 = vld [vmem:[%s769_s1 + $0x8] sm:$0xff]   ;;  %v589_v10 = vld [vmem:[%s769_s1 + $0x10] sm:$0xff]  }
   0x4   :  { %v582_v3 = vld [vmem:[%s769_s1 + $0x80] sm:$0xff]   ;;  %517 = vmatpush3.bf16.msra.mxu0 %v581_v2  ;;  %v586_v7 = vld [vmem:[%s769_s1 + $0x88] sm:$0xff]   ;;  %v590_v11 = vld [vmem:[%s769_s1 + $0x90] sm:$0xff]  }
   0x5   :  { %539 = vmatpush3.bf16.msra.mxu1 %v582_v3  ;;  %518 = vmatprep.subr.bf16.mxu0 %v583_v4  ;;  %v591_v12 = vld [vmem:[%s769_s1 + $0x58] sm:$0xff]   ;;  %v595_v16 = vld [vmem:[%s769_s1 + $0x60] sm:$0xff]   ;;  %v599_v20 = vld [vmem:[%s769_s1 + $0x68] sm:$0xff]  }
   0x6   :  { %540 = vmatprep.subr.bf16.mxu1 %v584_v5  ;;  %v592_v13 = vld [vmem:[%s769_s1 + $0xd8] sm:$0xff]   ;;  %v596_v17 = vld [vmem:[%s769_s1 + $0xe0] sm:$0xff]   ;;  %v600_v21 = vld [vmem:[%s769_s1 + $0xe8] sm:$0xff]  }
   0x7   :  { %v593_v14 = vld [vmem:[%s769_s1 + $0x18] sm:$0xff]   ;;  %v597_v18 = vld [vmem:[%s769_s1 + $0x20] sm:$0xff]   ;;  %v601_v22 = vld [vmem:[%s769_s1 + $0x28] sm:$0xff]  }
   0x8   :  { %519 = vmatpush3.bf16.msra.mxu0 %v585_v6  ;;  %v594_v15 = vld [vmem:[%s769_s1 + $0x98] sm:$0xff]   ;;  %v598_v19 = vld [vmem:[%s769_s1 + $0xa0] sm:$0xff]   ;;  %v602_v23 = vld [vmem:[%s769_s1 + $0xa8] sm:$0xff]  }
   0x9   :  { %541 = vmatpush3.bf16.msra.mxu1 %v586_v7  ;;  %520 = vmatprep.subr.bf16.mxu0 %v587_v8  ;;  %v603_v24 = vld [vmem:[%s769_s1 + $0x70] sm:$0xff]   ;;  %v607_v28 = vld [vmem:[%s769_s1 + $0x78] sm:$0xff]   ;;  %v14_v32 = vld [vmem:[%s770_s0] sm:$0xff] }
   0xa   :  { %542 = vmatprep.subr.bf16.mxu1 %v588_v9  ;;  %v604_v25 = vld [vmem:[%s769_s1 + $0xf0] sm:$0xff]   ;;  %v608_v29 = vld [vmem:[%s769_s1 + $0xf8] sm:$0xff]   ;;  %v474_v33 = vcombine.low %v14_v32, %v14_v32  ;;  %v475_v34 = vcombine.high %v14_v32, %v14_v32  ;;  %v15_v35 = vld [vmem:[%s770_s0 + $0x8] sm:$0xff] }
   0xb   :  { %v605_v26 = vld [vmem:[%s769_s1 + $0x30] sm:$0xff]   ;;  %v609_v30 = vld [vmem:[%s769_s1 + $0x38] sm:$0xff]   ;;  %v476_v37 = vcombine.low %v15_v35, %v15_v35  ;;  %v477_v38 = vcombine.high %v15_v35, %v15_v35  ;;  %v616_v39 = vld [vmem:[%s769_s1 + $0x100] sm:$0xff]  }
   0xc   :  { %521 = vmatpush3.bf16.msra.mxu0 %v589_v10  ;;  %v606_v27 = vld [vmem:[%s769_s1 + $0xb0] sm:$0xff]   ;;  %v610_v31 = vld [vmem:[%s769_s1 + $0xb8] sm:$0xff]   ;;  %358 = vmatprep.mubr.bf16.mxu0 %v475_v34  ;;  %v617_v40 = vld [vmem:[%s769_s1 + $0x108] sm:$0xff]  }
   0xd   :  { %543 = vmatpush3.bf16.msra.mxu1 %v590_v11  ;;  %522 = vmatprep.subr.bf16.mxu0 %v591_v12  ;;  %v618_v41 = vld [vmem:[%s769_s1 + $0x110] sm:$0xff]   ;;  %v619_v42 = vld [vmem:[%s769_s1 + $0x118] sm:$0xff]  }
   0xe   :  { %544 = vmatprep.subr.bf16.mxu1 %v592_v13  ;;  %398 = vmatprep.mubr.bf16.mxu1 %v477_v38  ;;  %v613_v43 = vld [vmem:[%s770_s0 + $0x10] ss:$0 sps:$4 sm:$0xff]  }
  0x10   :  { %523 = vmatpush3.bf16.msra.mxu0 %v593_v14 }
  0x11   :  { %545 = vmatpush3.bf16.msra.mxu1 %v594_v15  ;;  %524 = vmatprep.subr.bf16.mxu0 %v595_v16 }
  0x12   :  { %546 = vmatprep.subr.bf16.mxu1 %v596_v17 }
  0x14   :  { %525 = vmatpush3.bf16.msra.mxu0 %v597_v18 }
  0x15   :  { %547 = vmatpush3.bf16.msra.mxu1 %v598_v19  ;;  %526 = vmatprep.subr.bf16.mxu0 %v599_v20 }
  0x16   :  { %548 = vmatprep.subr.bf16.mxu1 %v600_v21 }
  0x18   :  { %527 = vmatpush3.bf16.msra.mxu0 %v601_v22 }
  0x19   :  { %549 = vmatpush3.bf16.msra.mxu1 %v602_v23  ;;  %528 = vmatprep.subr.bf16.mxu0 %v603_v24 }
  0x1a   :  { %550 = vmatprep.subr.bf16.mxu1 %v604_v25 }
  0x1c   :  { %529 = vmatpush3.bf16.msra.mxu0 %v605_v26 }
  0x1d   :  { %551 = vmatpush3.bf16.msra.mxu1 %v606_v27  ;;  %530 = vmatprep.subr.bf16.mxu0 %v607_v28 }
  0x1e   :  { %552 = vmatprep.subr.bf16.mxu1 %v608_v29 }
  0x20   :  { %531 = vmatpush3.bf16.msra.mxu0 %v609_v30 }
  0x21   :  { %553 = vmatpush3.bf16.msra.mxu1 %v610_v31  ;;  %565 = vmatprep.subr.bf16.mxu0 %v620_v36 }
  0x23   :  { %359 = vmatmul.mubr.bf16.vlgmr.msra.gmra.mrb[0].mxu0 %v474_v33 }
  0x24   :  { %399 = vmatmul.mubr.bf16.vlgmr.msra.gmra.mrb[0].mxu1 %v476_v37  ;;  %566 = vmatpush3.bf16.msra.mxu0 %v616_v39 }
  0x25   :  { %567 = vmatprep.subr.bf16.mxu0 %v620_v36  ;;  %573 = vmatprep.mubr.msk.bf16.mxu0 %vm621_vm0, %v620_v36 }
  0x28   :  { %568 = vmatpush3.bf16.msra.mxu0 %v617_v40 }
  0x29   :  { %569 = vmatprep.subr.bf16.mxu0 %v620_v36 }
  0x2c   :  { %570 = vmatpush3.bf16.msra.mxu0 %v618_v41 }
  0x2d   :  { %571 = vmatprep.subr.bf16.mxu0 %v620_v36 }
  0x30   :  { %572 = vmatpush3.bf16.msra.mxu0 %v619_v42 }
  0x33   :  { %574 = vmatmul.mubr.msk.bf16.vlgmr.msra.gmra.mrb[4].mxu0 %vm322_vm1, %v613_v43 }
  0xf6   :  { %v532_v44 = vpop.f32.mrb[0].mxu0 }
  0xf7   :  { %v554_v45 = vpop.f32.mrb[0].mxu1  ;;  %v533_v46 = vpop.f32.mrb[1].mxu0 }
  0xf8   :  { %v534_v47 = vadd.f32 %v533_v46, %v532_v44  ;;  %v555_v48 = vpop.f32.mrb[1].mxu1  ;;  %v535_v49 = vpop.f32.mrb[2].mxu0 }
  0xf9   :  { %v556_v50 = vadd.f32 %v555_v48, %v554_v45  ;;  %v536_v51 = vpop.f32.mrb[3].mxu0  ;;  %v557_v52 = vpop.f32.mrb[2].mxu1 }
  0xfa   :  { %v558_v53 = vpop.f32.mrb[3].mxu1 }
  0xfb   :  { %v401_v54 = vadd.f32 %v556_v50, %v534_v47 }
 0x106   :  { %v440_v55 = vpop.f32.mrb[4].mxu0 }
 0x107   :  { %v441_v56 = vadd.f32 %v440_v55, %v401_v54  ;;  %v575_v57 = vpop.f32.mrb[5].mxu0 }
 0x108   :  { %v443_v58 = vpop.f32.mrb[6].mxu0 }
 0x109   :  { %446 = vst.msk [vmem:[%s771_s2] sm:$0xff] %vm322_vm1, %v441_v56  ;;  %v447_v59 = vsel %vm322_vm1, %v441_v56, 0.0  ;;  %v454_v60 = vmul.f32 %v441_v56, %v441_v56  ;;  %v576_v61 = vpop.f32.mrb[7].mxu0 }
 0x10a   :  { %v448_v62 = vrot.slane %v447_v59, 4 }
 0x10b   :  { %v455_v63 = vsel %vm322_vm1, %v454_v60, 0.0 }
 0x10c   :  { %v449_v0 = vadd.f32 %v448_v62, %v447_v59  ;;  %v456_v1 = vrot.slane %v455_v63, 4 }
 0x10e   :  { %v450_v2 = vrot.slane %v449_v0, 2  ;;  %v457_v3 = vadd.f32 %v456_v1, %v455_v63 }
 0x110   :  { %v451_v4 = vadd.f32 %v450_v2, %v449_v0  ;;  %v458_v5 = vrot.slane %v457_v3, 2 }
 0x112   :  { %v452_v6 = vrot.slane %v451_v4, 1  ;;  %v459_v7 = vadd.f32 %v458_v5, %v457_v3 }
 0x114   :  { %v460_v8 = vrot.slane %v459_v7, 1  ;;  %v453_v9 = vadd.f32 %v452_v6, %v451_v4 }
 0x116   :  { %v461_v10 = vadd.f32 %v460_v8, %v459_v7 }
 0x118   :  { %v463_v11 = vsel %vm462_vm2, %v453_v9, %v461_v10 }
 0x119   :  { %465 = vst.msk [vmem:[%s772_s3] sm:$0x3] %vm464_vm3, %v463_v11 }

// kernel: unet_apply.58
= control target key start
LH: loop header
LB: loop body
LE: loop exit
PB: predicated region body
PF: predicated region fallthrough
CT: control target
= control target key end

     0   :  { %s345_s12 = smov 0   ;;  %s347_s13 = smov 0   ;;  %s377_s0 = inlined_call_operand.vmem [shape: f32[2,1,1,128], index: 0, kind: input, shape index: {}]   ;;  %s378_s1 = inlined_call_operand.vmem [shape: f32[1,128], index: 1, kind: input, shape index: {}]   ;;  %s379_s2 = inlined_call_operand.vmem [shape: f32[1,128], index: 2, kind: input, shape index: {}]   ;;  %s380_s3 = inlined_call_operand.vmem [shape: bf16[2,1,1,128], index: 3, kind: output, shape index: {}]  }
   0x1   :  { %s349_s14 = smov 0  }
   0x2 LB: > { %s25_s15 = sadd.s32 1, %s319_s13  ;;  %p274_p0 = scmp.ge.s32.totalorder %s323_s14, 1  ;;  %s323_s14 = sphi %s349_s14, %s13_s14   ;;  %s319_s13 = sphi %s347_s13, %s382_s13   ;;  %s315_s12 = sphi %s345_s12, %s381_s12  }
   0x3   : > { %p27_p1 = scmp.ge.s32.totalorder %s25_s15, 2  ;;  %p154_p2 = scmp.lt.s32.totalorder %s323_s14, 3 }
   0x5   : > { %s384_s15 = smov (%p27_p1, %s25_s15), 0  ;;  %p155_p3 = pnand %p274_p0, %p154_p2 }
   0x6   : > { %p180_p4 = scmp.lt.s32.totalorder (!%p155_p3), %s315_s12, 1  ;;  %v192_v0 = vld [vmem:[%s378_s1] sm:$0x1] (!%p155_p3)  ;;  %vm199_vm0 = vcmask (!%p155_p3), 1040384   ;;  %vm200_vm1 = vsmask.f32 (!%p155_p3), 256 }
   0x7   : > { %158 = sbr.rel (%p155_p3) target bundleno = 27 (0x1b), region = 32  ;;  %v193_v1 = vld [vmem:[%s379_s2] sm:$0x1] (!%p155_p3)  ;;  %vm201_vm2 = vmand (!%p155_p3), %vm199_vm0, %vm200_vm1 }
   0xe   : > { %s386_s12 = smov (!%p180_p4, %s315_s12), 1 }
   0xf   : > { %s185_s20 = scalar_lea.vmem %s377_s0, %s386_s12  ;;  %s191_s25 = scalar_lea.vmem %s380_s3, %s386_s12 }
  0x10   : > { %v194_v2 = vld [vmem:[%s185_s20] sm:$0x1] }
  0x11   : > { %v195_v3 = vmul.f32 %v194_v2, %v192_v0  ;;  %v202_v6 = vld [vmem:[%s191_s25] sm:$0x1] }
  0x13   : > { %v196_v4 = vadd.f32 %v195_v3, %v193_v1 }
  0x15   : > { %v197_v5 = vmax.f32 %v196_v4, 0.0 }
  0x17   : > { %v198_v7 = vpack.c.bf16 %v197_v5, %v197_v5 }
  0x19   : > { %v203_v8 = vsel %vm201_vm2, %v198_v7, %v202_v6 }
  0x1a   : > { %204 = vst [vmem:[%s191_s25] sm:$0x1] %v203_v8 }
  0x1b PF: > { %s13_s14 = sadd.s32 1, %s323_s14   ;;  %s381_s12 = smov %s319_s13 }
  0x1c   : > { %p10_p5 = scmp.ge.s32.totalorder %s13_s14, 4   ;;  %s382_s13 = smov %s384_s15 }
  0x1e   :  { %12 = sbr.rel (!%p10_p5) target bundleno = 2 (0x2), region = 62 }

// kernel: unet_apply.57
= control target key start
LH: loop header
LB: loop body
LE: loop exit
PB: predicated region body
PF: predicated region fallthrough
CT: control target
= control target key end

     0   :  { %v637_v22 = vmov 1966171168   ;;  %v92_v24 = vlaneseq  ;;  %v638_v40 = vmov 0.0   ;;  %vm639_vm0 = vmmov 0   ;;  %s777_s1 = inlined_call_operand.vmem [shape: bf16[576,128], index: 1, kind: input, shape index: {}]   ;;  %s778_s0 = inlined_call_operand.vmem [shape: bf16[2,576], index: 0, kind: input, shape index: {}]   ;;  %s779_s2 = inlined_call_operand.vmem [shape: f32[2,128], index: 2, kind: output, shape index: {0}]   ;;  %s780_s3 = inlined_call_operand.vmem [shape: f32[1,2,128], index: 3, kind: output, shape index: {1}]  }
   0x1   :  { %v600_v0 = vld [vmem:[%s777_s1 + $0x40] sm:$0xff]   ;;  %v604_v4 = vld [vmem:[%s777_s1 + $0x48] sm:$0xff]   ;;  %v608_v8 = vld [vmem:[%s777_s1 + $0x50] sm:$0xff]   ;;  %v90_v23 = vunpack.c.l.s4 %v637_v22  ;;  %vm347_vm1 = vcmask 523264   ;;  %vm472_vm2 = vcmask 1041408   ;;  %vm488_vm3 = vcmask 1040384  }
   0x2   :  { %v601_v1 = vld [vmem:[%s777_s1 + $0xc0] sm:$0xff]   ;;  %536 = vmatprep.subr.bf16.mxu0 %v600_v0  ;;  %v605_v5 = vld [vmem:[%s777_s1 + $0xc8] sm:$0xff]   ;;  %v609_v9 = vld [vmem:[%s777_s1 + $0xd0] sm:$0xff]   ;;  %v93_v30 = vshrl.u32 %v92_v24, 7 }
   0x3   :  { %v602_v2 = vld [vmem:[%s777_s1] sm:$0xff]   ;;  %558 = vmatprep.subr.bf16.mxu1 %v601_v1  ;;  %v606_v6 = vld [vmem:[%s777_s1 + $0x8] sm:$0xff]   ;;  %v610_v10 = vld [vmem:[%s777_s1 + $0x10] sm:$0xff]   ;;  %v91_v29 = vunpack.c.0.s8 %v90_v23 }
   0x4   :  { %v603_v3 = vld [vmem:[%s777_s1 + $0x80] sm:$0xff]   ;;  %537 = vmatpush3.bf16.msra.mxu0 %v602_v2  ;;  %v607_v7 = vld [vmem:[%s777_s1 + $0x88] sm:$0xff]   ;;  %v611_v11 = vld [vmem:[%s777_s1 + $0x90] sm:$0xff]  }
   0x5   :  { %559 = vmatpush3.bf16.msra.mxu1 %v603_v3  ;;  %538 = vmatprep.subr.bf16.mxu0 %v604_v4  ;;  %v612_v12 = vld [vmem:[%s777_s1 + $0x58] sm:$0xff]   ;;  %v616_v16 = vld [vmem:[%s777_s1 + $0x60] sm:$0xff]   ;;  %v620_v20 = vld [vmem:[%s777_s1 + $0x68] sm:$0xff]   ;;  %v94_v35 = vsub.s32 %v91_v29, %v93_v30 }
   0x6   :  { %560 = vmatprep.subr.bf16.mxu1 %v605_v5  ;;  %v613_v13 = vld [vmem:[%s777_s1 + $0xd8] sm:$0xff]   ;;  %v617_v17 = vld [vmem:[%s777_s1 + $0xe0] sm:$0xff]   ;;  %v621_v21 = vld [vmem:[%s777_s1 + $0xe8] sm:$0xff]  }
   0x7   :  { %v614_v14 = vld [vmem:[%s777_s1 + $0x18] sm:$0xff]   ;;  %v618_v18 = vld [vmem:[%s777_s1 + $0x20] sm:$0xff]   ;;  %v622_v25 = vld [vmem:[%s777_s1 + $0x28] sm:$0xff]  }
   0x8   :  { %539 = vmatpush3.bf16.msra.mxu0 %v606_v6  ;;  %v615_v15 = vld [vmem:[%s777_s1 + $0x98] sm:$0xff]   ;;  %v619_v19 = vld [vmem:[%s777_s1 + $0xa0] sm:$0xff]   ;;  %v623_v26 = vld [vmem:[%s777_s1 + $0xa8] sm:$0xff]  }
   0x9   :  { %561 = vmatpush3.bf16.msra.mxu1 %v607_v7  ;;  %540 = vmatprep.subr.bf16.mxu0 %v608_v8  ;;  %v624_v27 = vld [vmem:[%s777_s1 + $0x70] sm:$0xff]   ;;  %v628_v33 = vld [vmem:[%s777_s1 + $0x78] sm:$0xff]   ;;  %v14_v38 = vld [vmem:[%s778_s0] sm:$0x1f] }
   0xa   :  { %562 = vmatprep.subr.bf16.mxu1 %v609_v9  ;;  %v625_v28 = vld [vmem:[%s777_s1 + $0xf0] sm:$0xff]   ;;  %v629_v34 = vld [vmem:[%s777_s1 + $0xf8] sm:$0xff]   ;;  %v95_v39 = vrot.slane %v14_v38, %v94_v35  ;;  %v633_v44 = vld [vmem:[%s777_s1 + $0x100] sm:$0xff]   ;;  %v88_v48 = vcombine.high %v14_v38, %v14_v38 }
   0xb   :  { %v626_v31 = vld [vmem:[%s777_s1 + $0x30] sm:$0xff]   ;;  %v630_v36 = vld [vmem:[%s777_s1 + $0x38] sm:$0xff]   ;;  %v634_v47 = vld [vmem:[%s777_s1 + $0x108] sm:$0xff]  }
   0xc   :  { %541 = vmatpush3.bf16.msra.mxu0 %v610_v10  ;;  %v627_v32 = vld [vmem:[%s777_s1 + $0xb0] sm:$0xff]   ;;  %v631_v37 = vld [vmem:[%s777_s1 + $0xb8] sm:$0xff]   ;;  %v103_v41 = vcombine.high %v95_v39, %v95_v39  ;;  %v110_v42 = vrot.slane %v95_v39, %v94_v35  ;;  %v102_v50 = vrot.slane %v88_v48, %v94_v35 }
   0xd   :  { %563 = vmatpush3.bf16.msra.mxu1 %v611_v11  ;;  %542 = vmatprep.subr.bf16.mxu0 %v612_v12  ;;  %v635_v49 = vld [vmem:[%s777_s1 + $0x110] sm:$0xff]   ;;  %v636_v51 = vld [vmem:[%s777_s1 + $0x118] sm:$0xff]  }
   0xe   :  { %564 = vmatprep.subr.bf16.mxu1 %v613_v13  ;;  %v124_v43 = vrot.slane %v103_v41, %v94_v35  ;;  %v125_v45 = vcombine.high %v110_v42, %v110_v42  ;;  %v117_v52 = vrot.slane %v102_v50, %v94_v35 }
  0x10   :  { %543 = vmatpush3.bf16.msra.mxu0 %v614_v14  ;;  %383 = vmatprep.mubr.bf16.mxu0 %v124_v43  ;;  %v126_v46 = vcombine.high %v124_v43, %v124_v43 }
  0x11   :  { %565 = vmatpush3.bf16.msra.mxu1 %v615_v15  ;;  %544 = vmatprep.subr.bf16.mxu0 %v616_v16 }
  0x12   :  { %566 = vmatprep.subr.bf16.mxu1 %v617_v17  ;;  %423 = vmatprep.mubr.bf16.mxu1 %v126_v46 }
  0x14   :  { %545 = vmatpush3.bf16.msra.mxu0 %v618_v18 }
  0x15   :  { %567 = vmatpush3.bf16.msra.mxu1 %v619_v19  ;;  %546 = vmatprep.subr.bf16.mxu0 %v620_v20 }
  0x16   :  { %568 = vmatprep.subr.bf16.mxu1 %v621_v21 }
  0x18   :  { %547 = vmatpush3.bf16.msra.mxu0 %v622_v25 }
  0x19   :  { %569 = vmatpush3.bf16.msra.mxu1 %v623_v26  ;;  %548 = vmatprep.subr.bf16.mxu0 %v624_v27 }
  0x1a   :  { %570 = vmatprep.subr.bf16.mxu1 %v625_v28 }
  0x1c   :  { %549 = vmatpush3.bf16.msra.mxu0 %v626_v31 }
  0x1d   :  { %571 = vmatpush3.bf16.msra.mxu1 %v627_v32  ;;  %550 = vmatprep.subr.bf16.mxu0 %v628_v33 }
  0x1e   :  { %572 = vmatprep.subr.bf16.mxu1 %v629_v34 }
  0x20   :  { %551 = vmatpush3.bf16.msra.mxu0 %v630_v36 }
  0x21   :  { %573 = vmatpush3.bf16.msra.mxu1 %v631_v37  ;;  %585 = vmatprep.subr.bf16.mxu0 %v638_v40 }
  0x23   :  { %384 = vmatmul.mubr.bf16.vlgmr.msra.gmra.mrb[0].mxu0 %v110_v42 }
  0x24   :  { %586 = vmatpush3.bf16.msra.mxu0 %v633_v44  ;;  %424 = vmatmul.mubr.bf16.vlgmr.msra.gmra.mrb[0].mxu1 %v125_v45 }
  0x25   :  { %587 = vmatprep.subr.bf16.mxu0 %v638_v40  ;;  %593 = vmatprep.mubr.msk.bf16.mxu0 %vm639_vm0, %v638_v40 }
  0x28   :  { %588 = vmatpush3.bf16.msra.mxu0 %v634_v47 }
  0x29   :  { %589 = vmatprep.subr.bf16.mxu0 %v638_v40 }
  0x2c   :  { %590 = vmatpush3.bf16.msra.mxu0 %v635_v49 }
  0x2d   :  { %591 = vmatprep.subr.bf16.mxu0 %v638_v40 }
  0x30   :  { %592 = vmatpush3.bf16.msra.mxu0 %v636_v51 }
  0x33   :  { %594 = vmatmul.mubr.msk.bf16.vlgmr.msra.gmra.mrb[4].mxu0 %vm347_vm1, %v117_v52 }
  0xf6   :  { %v552_v53 = vpop.f32.mrb[0].mxu0 }
  0xf7   :  { %v553_v54 = vpop.f32.mrb[1].mxu0  ;;  %v574_v55 = vpop.f32.mrb[0].mxu1 }
  0xf8   :  { %v554_v56 = vadd.f32 %v553_v54, %v552_v53  ;;  %v555_v57 = vpop.f32.mrb[2].mxu0  ;;  %v575_v58 = vpop.f32.mrb[1].mxu1 }
  0xf9   :  { %v556_v59 = vpop.f32.mrb[3].mxu0  ;;  %v576_v60 = vadd.f32 %v575_v58, %v574_v55  ;;  %v577_v61 = vpop.f32.mrb[2].mxu1 }
  0xfa   :  { %v578_v62 = vpop.f32.mrb[3].mxu1 }
  0xfb   :  { %v426_v63 = vadd.f32 %v576_v60, %v554_v56 }
 0x106   :  { %v465_v0 = vpop.f32.mrb[4].mxu0 }
 0x107   :  { %v466_v1 = vadd.f32 %v465_v0, %v426_v63  ;;  %v595_v2 = vpop.f32.mrb[5].mxu0 }
 0x108   :  { %v468_v3 = vpop.f32.mrb[6].mxu0 }
 0x109   :  { %471 = vst [vmem:[%s779_s2] sm:$0x3] %v466_v1  ;;  %v473_v4 = vsel %vm472_vm2, %v466_v1, 0.0  ;;  %v480_v5 = vmul.f32 %v466_v1, %v466_v1  ;;  %v596_v6 = vpop.f32.mrb[7].mxu0 }
 0x10a   :  { %v474_v7 = vrot.slane %v473_v4, 4 }
 0x10b   :  { %v481_v8 = vsel %vm472_vm2, %v480_v5, 0.0 }
 0x10c   :  { %v475_v9 = vadd.f32 %v474_v7, %v473_v4  ;;  %v482_v10 = vrot.slane %v481_v8, 4 }
 0x10e   :  { %v476_v11 = vrot.slane %v475_v9, 2  ;;  %v483_v12 = vadd.f32 %v482_v10, %v481_v8 }
 0x110   :  { %v477_v13 = vadd.f32 %v476_v11, %v475_v9  ;;  %v484_v14 = vrot.slane %v483_v12, 2 }
 0x112   :  { %v478_v15 = vrot.slane %v477_v13, 1  ;;  %v485_v16 = vadd.f32 %v484_v14, %v483_v12 }
 0x114   :  { %v486_v17 = vrot.slane %v485_v16, 1  ;;  %v479_v18 = vadd.f32 %v478_v15, %v477_v13 }
 0x116   :  { %v487_v19 = vadd.f32 %v486_v17, %v485_v16 }
 0x118   :  { %v489_v20 = vsel %vm488_vm3, %v479_v18, %v487_v19 }
 0x119   :  { %490 = vst [vmem:[%s780_s3] sm:$0x3] %v489_v20 }

// kernel: tile.23
= control target key start
LH: loop header
LB: loop body
LE: loop exit
PB: predicated region body
PF: predicated region fallthrough
CT: control target
= control target key end

     0   :  { %s22_s0 = inlined_call_operand.vmem [shape: f32[64], index: 0, kind: input, shape index: {}]   ;;  %s23_s1 = inlined_call_operand.vmem [shape: f32[4,64], index: 1, kind: output, shape index: {}]  }
   0x1   :  { %v4_v0 = vld [vmem:[%s22_s0] ss:$0 sm:$0xff] }
   0x2   :  { %5 = vst [vmem:[%s23_s1] sm:$0xf] %v4_v0 }

// kernel: tile.24
= control target key start
LH: loop header
LB: loop body
LE: loop exit
PB: predicated region body
PF: predicated region fallthrough
CT: control target
= control target key end

     0   :  { %s6_s8 = smov 3  ;;  %vm8_vm0 = vcmask 523264   ;;  %s30_s9 = smov 64   ;;  %vm15_vm1 = vcmask 1048064   ;;  %s50_s0 = inlined_call_operand.vmem [shape: f32[4,64], index: 0, kind: input, shape index: {}]   ;;  %s51_s1 = inlined_call_operand.vmem [shape: f32[1,256], index: 1, kind: output, shape index: {}]  }
   0x1   :  { %v4_v0 = vld [vmem:[%s50_s0] sm:$0xf]  ;;  %s11_s0 = smov 3 }
   0x2   :  { %5 = vst [vmem:[#allocation1] sm:$0xf] %v4_v0 }
   0x9   :  { %v12_v1 = vld [vmem:[#allocation1 + $0x1] ss:$2 sm:%s11_s0]   ;;  %v7_v2 = vld [vmem:[#allocation1] ss:$2 sm:%s6_s8]  }
   0xa   :  { %13 = vrot.lane.b32.xlu0 %v12_v1, %s30_s9  ;;  %9 = vst.msk [vmem:[#allocation0] ss:$8 sm:$0x3] %vm8_vm0, %v7_v2  }
  0x7c   :  { %v14_v3 = vpop.permute.xlu0 %13  }
  0x7d   :  { %16 = vst.msk [vmem:[#allocation0] ss:$8 sm:$0x3] %vm15_vm1, %v14_v3  }
  0x84   :  { %v20_v4 = vld [vmem:[#allocation0] sm:$0x1]  ;;  %v24_v5 = vld [vmem:[#allocation0 + $0x8] sm:$0x1] }
  0x85   :  { %22 = vst [vmem:[%s51_s1] sm:$0x1] %v20_v4  ;;  %28 = vst [vmem:[%s51_s1 + $0x1] sm:$0x1] %v24_v5 }

// kernel: unet_apply.59
= control target key start
LH: loop header
LB: loop body
LE: loop exit
PB: predicated region body
PF: predicated region fallthrough
CT: control target
= control target key end

     0   :  { %v1160_v22 = vmov 1966171168   ;;  %v166_v24 = vlaneseq  ;;  %vm1162_vm0 = vmmov 0   ;;  %vm867_vm1 = vcmask 1041408   ;;  %s1425_s1 = inlined_call_operand.vmem [shape: bf16[1152,128], index: 1, kind: input, shape index: {}]   ;;  %s1426_s0 = inlined_call_operand.vmem [shape: bf16[2,1152], index: 0, kind: input, shape index: {}]   ;;  %s1427_s2 = inlined_call_operand.vmem [shape: f32[2,128], index: 2, kind: output, shape index: {0}]   ;;  %s1428_s3 = inlined_call_operand.vmem [shape: f32[1,2,128], index: 3, kind: output, shape index: {1}]  }
   0x1   :  { %v1087_v0 = vld [vmem:[%s1425_s1 + $0x40] sm:$0xff]   ;;  %v1091_v4 = vld [vmem:[%s1425_s1 + $0x48] sm:$0xff]   ;;  %v1095_v8 = vld [vmem:[%s1425_s1 + $0x50] sm:$0xff]   ;;  %v164_v23 = vunpack.c.l.s4 %v1160_v22  ;;  %vm883_vm2 = vcmask 1040384  }
   0x2   :  { %v1088_v1 = vld [vmem:[%s1425_s1 + $0xc0] sm:$0xff]   ;;  %967 = vmatprep.subr.bf16.mxu0 %v1087_v0  ;;  %v1092_v5 = vld [vmem:[%s1425_s1 + $0xc8] sm:$0xff]   ;;  %v1096_v9 = vld [vmem:[%s1425_s1 + $0xd0] sm:$0xff]   ;;  %v167_v30 = vshrl.u32 %v166_v24, 7 }
   0x3   :  { %v1089_v2 = vld [vmem:[%s1425_s1] sm:$0xff]   ;;  %989 = vmatprep.subr.bf16.mxu1 %v1088_v1  ;;  %v1093_v6 = vld [vmem:[%s1425_s1 + $0x8] sm:$0xff]   ;;  %v1097_v10 = vld [vmem:[%s1425_s1 + $0x10] sm:$0xff]   ;;  %v165_v29 = vunpack.c.0.s8 %v164_v23 }
   0x4   :  { %v1090_v3 = vld [vmem:[%s1425_s1 + $0x80] sm:$0xff]   ;;  %968 = vmatpush3.bf16.msra.mxu0 %v1089_v2  ;;  %v1094_v7 = vld [vmem:[%s1425_s1 + $0x88] sm:$0xff]   ;;  %v1098_v11 = vld [vmem:[%s1425_s1 + $0x90] sm:$0xff]  }
   0x5   :  { %990 = vmatpush3.bf16.msra.mxu1 %v1090_v3  ;;  %969 = vmatprep.subr.bf16.mxu0 %v1091_v4  ;;  %v1099_v12 = vld [vmem:[%s1425_s1 + $0x58] sm:$0xff]   ;;  %v1103_v16 = vld [vmem:[%s1425_s1 + $0x60] sm:$0xff]   ;;  %v1107_v20 = vld [vmem:[%s1425_s1 + $0x68] sm:$0xff]   ;;  %v1273_v35 = vsub.s32 %v165_v29, %v167_v30 }
   0x6   :  { %991 = vmatprep.subr.bf16.mxu1 %v1092_v5  ;;  %v1100_v13 = vld [vmem:[%s1425_s1 + $0xd8] sm:$0xff]   ;;  %v1104_v17 = vld [vmem:[%s1425_s1 + $0xe0] sm:$0xff]   ;;  %v1108_v21 = vld [vmem:[%s1425_s1 + $0xe8] sm:$0xff]  }
   0x7   :  { %v1101_v14 = vld [vmem:[%s1425_s1 + $0x18] sm:$0xff]   ;;  %v1105_v18 = vld [vmem:[%s1425_s1 + $0x20] sm:$0xff]   ;;  %v1109_v25 = vld [vmem:[%s1425_s1 + $0x28] sm:$0xff]  }
   0x8   :  { %970 = vmatpush3.bf16.msra.mxu0 %v1093_v6  ;;  %v1102_v15 = vld [vmem:[%s1425_s1 + $0x98] sm:$0xff]   ;;  %v1106_v19 = vld [vmem:[%s1425_s1 + $0xa0] sm:$0xff]   ;;  %v1110_v26 = vld [vmem:[%s1425_s1 + $0xa8] sm:$0xff]  }
   0x9   :  { %992 = vmatpush3.bf16.msra.mxu1 %v1094_v7  ;;  %971 = vmatprep.subr.bf16.mxu0 %v1095_v8  ;;  %v1111_v27 = vld [vmem:[%s1425_s1 + $0x70] sm:$0xff]   ;;  %v1115_v33 = vld [vmem:[%s1425_s1 + $0x78] sm:$0xff]   ;;  %v14_v38 = vld [vmem:[%s1426_s0] sm:$0xff] }
   0xa   :  { %993 = vmatprep.subr.bf16.mxu1 %v1096_v9  ;;  %v1112_v28 = vld [vmem:[%s1425_s1 + $0xf0] sm:$0xff]   ;;  %v1116_v34 = vld [vmem:[%s1425_s1 + $0xf8] sm:$0xff]   ;;  %v162_v39 = vcombine.high %v14_v38, %v14_v38  ;;  %v169_v40 = vrot.slane %v14_v38, %v1273_v35  ;;  %v1120_v41 = vld [vmem:[%s1425_s1 + $0x140] sm:$0xff]  }
   0xb   :  { %v1113_v31 = vld [vmem:[%s1425_s1 + $0x30] sm:$0xff]   ;;  %v1117_v36 = vld [vmem:[%s1425_s1 + $0x38] sm:$0xff]   ;;  %v1122_v44 = vld [vmem:[%s1425_s1 + $0x1c0] sm:$0xff]  }
   0xc   :  { %972 = vmatpush3.bf16.msra.mxu0 %v1097_v10  ;;  %v1114_v32 = vld [vmem:[%s1425_s1 + $0xb0] sm:$0xff]   ;;  %v1118_v37 = vld [vmem:[%s1425_s1 + $0xb8] sm:$0xff]   ;;  %v177_v42 = vcombine.high %v169_v40, %v169_v40  ;;  %v185_v43 = vrot.slane %v169_v40, %v1273_v35  ;;  %v1293_v45 = vrot.slane %v162_v39, %v1273_v35  ;;  %v1121_v47 = vld [vmem:[%s1425_s1 + $0x100] sm:$0xff]  }
   0xd   :  { %994 = vmatpush3.bf16.msra.mxu1 %v1098_v11  ;;  %973 = vmatprep.subr.bf16.mxu0 %v1099_v12  ;;  %v1124_v50 = vld [vmem:[%s1425_s1 + $0x148] sm:$0xff]   ;;  %v1123_v52 = vld [vmem:[%s1425_s1 + $0x180] sm:$0xff]   ;;  %v1128_v57 = vld [vmem:[%s1425_s1 + $0x150] sm:$0xff]  }
   0xe   :  { %995 = vmatprep.subr.bf16.mxu1 %v1100_v13  ;;  %v199_v46 = vrot.slane %v177_v42, %v1273_v35  ;;  %v178_v48 = vcombine.high %v1293_v45, %v1293_v45  ;;  %v207_v49 = vcombine.high %v185_v43, %v185_v43  ;;  %v1126_v54 = vld [vmem:[%s1425_s1 + $0x1c8] sm:$0xff]   ;;  %v1130_v59 = vld [vmem:[%s1425_s1 + $0x1d0] sm:$0xff]   ;;  %v1132_v61 = vld [vmem:[%s1425_s1 + $0x158] sm:$0xff]  }
   0xf   :  { %v1125_v55 = vld [vmem:[%s1425_s1 + $0x108] sm:$0xff]   ;;  %v1129_v60 = vld [vmem:[%s1425_s1 + $0x110] sm:$0xff]   ;;  %v1134_v63 = vld [vmem:[%s1425_s1 + $0x1d8] sm:$0xff]  }
  0x10   :  { %974 = vmatpush3.bf16.msra.mxu0 %v1101_v14  ;;  %698 = vmatprep.mubr.bf16.mxu0 %v199_v46  ;;  %v209_v51 = vcombine.high %v199_v46, %v199_v46  ;;  %v206_v53 = vrot.slane %v178_v48, %v1273_v35  ;;  %v1127_v58 = vld [vmem:[%s1425_s1 + $0x188] sm:$0xff]   ;;  %v1131_v62 = vld [vmem:[%s1425_s1 + $0x190] sm:$0xff]   ;;  %v1133_v0 = vld [vmem:[%s1425_s1 + $0x118] sm:$0xff]  }
  0x11   :  { %996 = vmatpush3.bf16.msra.mxu1 %v1102_v15  ;;  %975 = vmatprep.subr.bf16.mxu0 %v1103_v16  ;;  %v1136_v1 = vld [vmem:[%s1425_s1 + $0x160] sm:$0xff]   ;;  %v1135_v2 = vld [vmem:[%s1425_s1 + $0x198] sm:$0xff]   ;;  %v1140_v5 = vld [vmem:[%s1425_s1 + $0x168] sm:$0xff]  }
  0x12   :  { %997 = vmatprep.subr.bf16.mxu1 %v1104_v17  ;;  %738 = vmatprep.mubr.bf16.mxu1 %v209_v51  ;;  %v210_v56 = vcombine.high %v206_v53, %v206_v53  ;;  %v1138_v3 = vld [vmem:[%s1425_s1 + $0x1e0] sm:$0xff]   ;;  %v1142_v7 = vld [vmem:[%s1425_s1 + $0x1e8] sm:$0xff]   ;;  %v1144_v9 = vld [vmem:[%s1425_s1 + $0x170] sm:$0xff]   ;;  %v192_v17 = vrot.slane %v1293_v45, %v1273_v35 }
  0x13   :  { %v1137_v4 = vld [vmem:[%s1425_s1 + $0x120] sm:$0xff]   ;;  %v1141_v8 = vld [vmem:[%s1425_s1 + $0x128] sm:$0xff]   ;;  %v1146_v11 = vld [vmem:[%s1425_s1 + $0x1f0] sm:$0xff]  }
  0x14   :  { %976 = vmatpush3.bf16.msra.mxu0 %v1105_v18  ;;  %v1139_v6 = vld [vmem:[%s1425_s1 + $0x1a0] sm:$0xff]   ;;  %v1143_v10 = vld [vmem:[%s1425_s1 + $0x1a8] sm:$0xff]   ;;  %v1145_v12 = vld [vmem:[%s1425_s1 + $0x130] sm:$0xff]  }
  0x15   :  { %998 = vmatpush3.bf16.msra.mxu1 %v1106_v19  ;;  %977 = vmatprep.subr.bf16.mxu0 %v1107_v20  ;;  %v1148_v13 = vld [vmem:[%s1425_s1 + $0x178] sm:$0xff]   ;;  %v1147_v14 = vld [vmem:[%s1425_s1 + $0x1b0] sm:$0xff]   ;;  %v1152_v19 = vld [vmem:[%s1425_s1 + $0x200] sm:$0xff]   ;;  %v1161_v20 = vmov 0.0  }
  0x16   :  { %999 = vmatprep.subr.bf16.mxu1 %v1108_v21  ;;  %v1150_v15 = vld [vmem:[%s1425_s1 + $0x1f8] sm:$0xff]   ;;  %v208_v21 = vcombine.high %v192_v17, %v192_v17  ;;  %v894_v22 = vld.sshfl [vmem:[%s1426_s0 + $0x8] sm:$0x1 pattern:$0x75316420]  ;;  %v1158_v29 = vld [vmem:[%s1425_s1 + $0x230] sm:$0xff]  }
  0x17   :  { %v1149_v16 = vld [vmem:[%s1425_s1 + $0x138] sm:$0xff]   ;;  %v1153_v23 = vld [vmem:[%s1425_s1 + $0x208] sm:$0xff]   ;;  %v224_v24 = vrot.slane %v894_v22, %v1273_v35 }
  0x18   :  { %978 = vmatpush3.bf16.msra.mxu0 %v1109_v25  ;;  %v1151_v18 = vld [vmem:[%s1425_s1 + $0x1b8] sm:$0xff]   ;;  %v1154_v25 = vld [vmem:[%s1425_s1 + $0x210] sm:$0xff]  }
  0x19   :  { %1000 = vmatpush3.bf16.msra.mxu1 %v1110_v26  ;;  %979 = vmatprep.subr.bf16.mxu0 %v1111_v27  ;;  %v1155_v26 = vld [vmem:[%s1425_s1 + $0x218] sm:$0xff]   ;;  %v1156_v27 = vld [vmem:[%s1425_s1 + $0x220] sm:$0xff]  }
  0x1a   :  { %1001 = vmatprep.subr.bf16.mxu1 %v1112_v28  ;;  %v1157_v28 = vld [vmem:[%s1425_s1 + $0x228] sm:$0xff]   ;;  %v1159_v30 = vld [vmem:[%s1425_s1 + $0x238] sm:$0xff]  }
  0x1c   :  { %980 = vmatpush3.bf16.msra.mxu0 %v1113_v31 }
  0x1d   :  { %1002 = vmatpush3.bf16.msra.mxu1 %v1114_v32  ;;  %981 = vmatprep.subr.bf16.mxu0 %v1115_v33 }
  0x1e   :  { %1003 = vmatprep.subr.bf16.mxu1 %v1116_v34 }
  0x20   :  { %982 = vmatpush3.bf16.msra.mxu0 %v1117_v36 }
  0x21   :  { %1004 = vmatpush3.bf16.msra.mxu1 %v1118_v37  ;;  %1011 = vmatprep.subr.bf16.mxu0 %v1120_v41 }
  0x22   :  { %1033 = vmatprep.subr.bf16.mxu1 %v1122_v44 }
  0x23   :  { %699 = vmatmul.mubr.bf16.vlgmr.msra.gmra.mrb[0].mxu0 %v185_v43 }
  0x24   :  { %1012 = vmatpush3.bf16.msra.mxu0 %v1121_v47  ;;  %739 = vmatmul.mubr.bf16.vlgmr.msra.gmra.mrb[0].mxu1 %v207_v49 }
  0x25   :  { %1013 = vmatprep.subr.bf16.mxu0 %v1124_v50  ;;  %1034 = vmatpush3.bf16.msra.mxu1 %v1123_v52 }
  0x26   :  { %778 = vmatprep.mubr.bf16.mxu0 %v206_v53  ;;  %1035 = vmatprep.subr.bf16.mxu1 %v1126_v54 }
  0x27   :  { %818 = vmatprep.mubr.bf16.mxu1 %v210_v56 }
  0x28   :  { %1014 = vmatpush3.bf16.msra.mxu0 %v1125_v55 }
  0x29   :  { %1015 = vmatprep.subr.bf16.mxu0 %v1128_v57  ;;  %1036 = vmatpush3.bf16.msra.mxu1 %v1127_v58 }
  0x2a   :  { %1037 = vmatprep.subr.bf16.mxu1 %v1130_v59 }
  0x2c   :  { %1016 = vmatpush3.bf16.msra.mxu0 %v1129_v60 }
  0x2d   :  { %1017 = vmatprep.subr.bf16.mxu0 %v1132_v61  ;;  %1038 = vmatpush3.bf16.msra.mxu1 %v1131_v62 }
  0x2e   :  { %1039 = vmatprep.subr.bf16.mxu1 %v1134_v63 }
  0x30   :  { %1018 = vmatpush3.bf16.msra.mxu0 %v1133_v0 }
  0x31   :  { %1019 = vmatprep.subr.bf16.mxu0 %v1136_v1  ;;  %1040 = vmatpush3.bf16.msra.mxu1 %v1135_v2 }
  0x32   :  { %1041 = vmatprep.subr.bf16.mxu1 %v1138_v3 }
  0x34   :  { %1020 = vmatpush3.bf16.msra.mxu0 %v1137_v4 }
  0x35   :  { %1021 = vmatprep.subr.bf16.mxu0 %v1140_v5  ;;  %1042 = vmatpush3.bf16.msra.mxu1 %v1139_v6 }
  0x36   :  { %1043 = vmatprep.subr.bf16.mxu1 %v1142_v7 }
  0x38   :  { %1022 = vmatpush3.bf16.msra.mxu0 %v1141_v8 }
  0x39   :  { %1023 = vmatprep.subr.bf16.mxu0 %v1144_v9  ;;  %1044 = vmatpush3.bf16.msra.mxu1 %v1143_v10 }
  0x3a   :  { %1045 = vmatprep.subr.bf16.mxu1 %v1146_v11 }
  0x3c   :  { %1024 = vmatpush3.bf16.msra.mxu0 %v1145_v12 }
  0x3d   :  { %1025 = vmatprep.subr.bf16.mxu0 %v1148_v13  ;;  %1046 = vmatpush3.bf16.msra.mxu1 %v1147_v14 }
  0x3e   :  { %1047 = vmatprep.subr.bf16.mxu1 %v1150_v15 }
  0x40   :  { %1026 = vmatpush3.bf16.msra.mxu0 %v1149_v16 }
  0x41   :  { %1064 = vmatprep.subr.bf16.mxu0 %v1161_v20  ;;  %1048 = vmatpush3.bf16.msra.mxu1 %v1151_v18 }
  0x43   :  { %779 = vmatmul.mubr.bf16.vlgmr.msra.gmra.mrb[4].mxu0 %v192_v17 }
  0x44   :  { %1065 = vmatpush3.bf16.msra.mxu0 %v1152_v19  ;;  %1080 = vmatprep.mubr.msk.bf16.mxu0 %vm1162_vm0, %v1161_v20 }
  0x45   :  { %819 = vmatmul.mubr.bf16.vlgmr.msra.gmra.mrb[4].mxu1 %v208_v21  ;;  %1066 = vmatprep.subr.bf16.mxu0 %v1161_v20 }
  0x48   :  { %1067 = vmatpush3.bf16.msra.mxu0 %v1153_v23 }
  0x49   :  { %1068 = vmatprep.subr.bf16.mxu0 %v1161_v20 }
  0x4c   :  { %1069 = vmatpush3.bf16.msra.mxu0 %v1154_v25 }
  0x4d   :  { %1070 = vmatprep.subr.bf16.mxu0 %v1161_v20 }
  0x50   :  { %1071 = vmatpush3.bf16.msra.mxu0 %v1155_v26 }
  0x51   :  { %1072 = vmatprep.subr.bf16.mxu0 %v1161_v20 }
  0x54   :  { %1073 = vmatpush3.bf16.msra.mxu0 %v1156_v27 }
  0x55   :  { %1074 = vmatprep.subr.bf16.mxu0 %v1161_v20 }
  0x58   :  { %1075 = vmatpush3.bf16.msra.mxu0 %v1157_v28 }
  0x59   :  { %1076 = vmatprep.subr.bf16.mxu0 %v1161_v20 }
  0x5c   :  { %1077 = vmatpush3.bf16.msra.mxu0 %v1158_v29 }
  0x5d   :  { %1078 = vmatprep.subr.bf16.mxu0 %v1161_v20 }
  0x60   :  { %1079 = vmatpush3.bf16.msra.mxu0 %v1159_v30 }
  0x63   :  { %1081 = vmatmul.mubr.bf16.vlgmr.msra.gmra.mrb[8].mxu0 %v224_v24 }
  0xf6   :  { %v983_v31 = vpop.f32.mrb[0].mxu0 }
  0xf7   :  { %v984_v32 = vpop.f32.mrb[1].mxu0  ;;  %v1005_v33 = vpop.f32.mrb[0].mxu1 }
  0xf8   :  { %v985_v34 = vadd.f32 %v984_v32, %v983_v31  ;;  %v986_v35 = vpop.f32.mrb[2].mxu0  ;;  %v1006_v36 = vpop.f32.mrb[1].mxu1 }
  0xf9   :  { %v987_v37 = vpop.f32.mrb[3].mxu0  ;;  %v1007_v38 = vadd.f32 %v1006_v36, %v1005_v33  ;;  %v1008_v39 = vpop.f32.mrb[2].mxu1 }
  0xfa   :  { %v1009_v40 = vpop.f32.mrb[3].mxu1 }
  0xfb   :  { %v741_v41 = vadd.f32 %v1007_v38, %v985_v34 }
 0x116   :  { %v1027_v42 = vpop.f32.mrb[4].mxu0 }
 0x117   :  { %v1028_v43 = vpop.f32.mrb[5].mxu0 }
 0x118   :  { %v1029_v44 = vadd.f32 %v1028_v43, %v1027_v42  ;;  %v1030_v45 = vpop.f32.mrb[6].mxu0  ;;  %v1049_v46 = vpop.f32.mrb[4].mxu1 }
 0x119   :  { %v1031_v47 = vpop.f32.mrb[7].mxu0  ;;  %v1050_v48 = vpop.f32.mrb[5].mxu1 }
 0x11a   :  { %v781_v49 = vadd.f32 %v1029_v44, %v741_v41  ;;  %v1051_v50 = vadd.f32 %v1050_v48, %v1049_v46  ;;  %v1052_v51 = vpop.f32.mrb[6].mxu1 }
 0x11b   :  { %v1053_v52 = vpop.f32.mrb[7].mxu1 }
 0x11c   :  { %v821_v53 = vadd.f32 %v1051_v50, %v781_v49 }
 0x136   :  { %v860_v54 = vpop.f32.mrb[8].mxu0 }
 0x137   :  { %v861_v55 = vadd.f32 %v860_v54, %v821_v53  ;;  %v1082_v56 = vpop.f32.mrb[9].mxu0 }
 0x138   :  { %v863_v57 = vpop.f32.mrb[10].mxu0 }
 0x139   :  { %866 = vst [vmem:[%s1427_s2] sm:$0x3] %v861_v55  ;;  %v868_v58 = vsel %vm867_vm1, %v861_v55, 0.0  ;;  %v875_v59 = vmul.f32 %v861_v55, %v861_v55  ;;  %v1083_v60 = vpop.f32.mrb[11].mxu0 }
 0x13a   :  { %v869_v61 = vrot.slane %v868_v58, 4 }
 0x13b   :  { %v876_v62 = vsel %vm867_vm1, %v875_v59, 0.0 }
 0x13c   :  { %v870_v63 = vadd.f32 %v869_v61, %v868_v58  ;;  %v877_v0 = vrot.slane %v876_v62, 4 }
 0x13e   :  { %v871_v1 = vrot.slane %v870_v63, 2  ;;  %v878_v2 = vadd.f32 %v877_v0, %v876_v62 }
 0x140   :  { %v872_v3 = vadd.f32 %v871_v1, %v870_v63  ;;  %v879_v4 = vrot.slane %v878_v2, 2 }
 0x142   :  { %v873_v5 = vrot.slane %v872_v3, 1  ;;  %v880_v6 = vadd.f32 %v879_v4, %v878_v2 }
 0x144   :  { %v881_v7 = vrot.slane %v880_v6, 1  ;;  %v874_v8 = vadd.f32 %v873_v5, %v872_v3 }
 0x146   :  { %v882_v9 = vadd.f32 %v881_v7, %v880_v6 }
 0x148   :  { %v884_v10 = vsel %vm883_vm2, %v874_v8, %v882_v9 }
 0x149   :  { %885 = vst [vmem:[%s1428_s3] sm:$0x3] %v884_v10 }

// kernel: unet_apply.61
= control target key start
LH: loop header
LB: loop body
LE: loop exit
PB: predicated region body
PF: predicated region fallthrough
CT: control target
= control target key end

     0   :  { %v223_v1 = vmov 0   ;;  %v34_v18 = vlaneseq  ;;  %s301_s1 = inlined_call_operand.vmem [shape: bf16[128,256], index: 1, kind: input, shape index: {}]   ;;  %s302_s0 = inlined_call_operand.vmem [shape: bf16[2,128], index: 0, kind: input, shape index: {}]   ;;  %s303_s2 = inlined_call_operand.vmem [shape: f32[1,256], index: 2, kind: input, shape index: {}]   ;;  %s304_s3 = inlined_call_operand.vmem [shape: f32[2,256], index: 3, kind: output, shape index: {}]  }
   0x1   :  { %v199_v0 = vld [vmem:[%s301_s1 + $0x4] ss:$8 sps:$4 sm:$0xff]   ;;  %156 = vmatprep.mubr.bf16.mxu0 %v223_v1  ;;  %v201_v2 = vld [vmem:[%s301_s1] ss:$8 sps:$4 sm:$0xff]   ;;  %v202_v3 = vld [vmem:[%s301_s1 + $0x14] ss:$8 sps:$4 sm:$0xff]  }
   0x2   :  { %124 = vmatprep.subr.bf16.mxu0 %v199_v0  ;;  %v204_v4 = vld [vmem:[%s301_s1 + $0x10] ss:$8 sps:$4 sm:$0xff]   ;;  %v205_v5 = vld [vmem:[%s301_s1 + $0x24] ss:$8 sps:$4 sm:$0xff]   ;;  %v207_v6 = vld [vmem:[%s301_s1 + $0x20] ss:$8 sps:$4 sm:$0xff]  }
   0x3   :  { %125 = vmatpush1.bf16.msra.mxu0 %v201_v2  ;;  %v208_v7 = vld [vmem:[%s301_s1 + $0x34] ss:$8 sps:$4 sm:$0xff]   ;;  %v210_v8 = vld [vmem:[%s301_s1 + $0x30] ss:$8 sps:$4 sm:$0xff]   ;;  %v211_v9 = vld [vmem:[%s301_s1 + $0x44] ss:$8 sps:$4 sm:$0xff]  }
   0x4   :  { %126 = vmatprep.subr.bf16.mxu0 %v202_v3  ;;  %v213_v10 = vld [vmem:[%s301_s1 + $0x40] ss:$8 sps:$4 sm:$0xff]   ;;  %v214_v11 = vld [vmem:[%s301_s1 + $0x54] ss:$8 sps:$4 sm:$0xff]   ;;  %v216_v12 = vld [vmem:[%s301_s1 + $0x50] ss:$8 sps:$4 sm:$0xff]  }
   0x5   :  { %v217_v13 = vld [vmem:[%s301_s1 + $0x64] ss:$8 sps:$4 sm:$0xff]   ;;  %v219_v14 = vld [vmem:[%s301_s1 + $0x60] ss:$8 sps:$4 sm:$0xff]   ;;  %v220_v15 = vld [vmem:[%s301_s1 + $0x74] ss:$8 sps:$4 sm:$0xff]  }
   0x6   :  { %v222_v16 = vld [vmem:[%s301_s1 + $0x70] ss:$8 sps:$4 sm:$0xff]   ;;  %v15_v17 = vld [vmem:[%s302_s0] sm:$0x1]  ;;  %v35_v19 = vshrl.u32 %v34_v18, 7 }
   0x7   :  { %127 = vmatpush1.bf16.msra.mxu0 %v204_v4  ;;  %v32_v21 = vld [vmem:[%s303_s2] sm:$0x3] }
   0x8   :  { %128 = vmatprep.subr.bf16.mxu0 %v205_v5  ;;  %v36_v20 = vsub.s32 0, %v35_v19  ;;  %v40_v22 = vsub.s32 1, %v35_v19 }
   0xa   :  { %v37_v23 = vrot.slane %v32_v21, %v36_v20  ;;  %v41_v24 = vrot.slane %v32_v21, %v40_v22 }
   0xb   :  { %129 = vmatpush1.bf16.msra.mxu0 %v207_v6 }
   0xc   :  { %130 = vmatprep.subr.bf16.mxu0 %v208_v7 }
   0xf   :  { %131 = vmatpush1.bf16.msra.mxu0 %v210_v8 }
  0x10   :  { %132 = vmatprep.subr.bf16.mxu0 %v211_v9 }
  0x13   :  { %133 = vmatpush1.bf16.msra.mxu0 %v213_v10 }
  0x14   :  { %134 = vmatprep.subr.bf16.mxu0 %v214_v11 }
  0x17   :  { %135 = vmatpush1.bf16.msra.mxu0 %v216_v12 }
  0x18   :  { %136 = vmatprep.subr.bf16.mxu0 %v217_v13 }
  0x1b   :  { %137 = vmatpush1.bf16.msra.mxu0 %v219_v14 }
  0x1c   :  { %138 = vmatprep.subr.bf16.mxu0 %v220_v15 }
  0x1f   :  { %139 = vmatpush1.bf16.msra.mxu0 %v222_v16 }
  0x22   :  { %157 = vmatmul.mubr.bf16.vlgmr.msra.gmra.mrb[0].mxu0 %v15_v17 }
  0xf5   :  { %v158_v25 = vpop.f32.mrb[0].mxu0 }
  0xf6   :  { %v159_v26 = vadd.f32 %v158_v25, %v37_v23  ;;  %v160_v27 = vpop.f32.mrb[1].mxu0 }
  0xf7   :  { %v161_v28 = vadd.f32 %v160_v27, %v41_v24  ;;  %v162_v29 = vpop.f32.mrb[2].mxu0 }
  0xf8   :  { %v163_v30 = vpop.f32.mrb[3].mxu0 }
  0xf9   :  { %v167_v31 = vcombine.low %v159_v26, %v161_v28 }
  0xfb   :  { %197 = vst.sshfl [vmem:[%s304_s3] sm:$0x33 pattern:$0x76325410] %v167_v31 }

// kernel: tile.28
= control target key start
LH: loop header
LB: loop body
LE: loop exit
PB: predicated region body
PF: predicated region fallthrough
CT: control target
= control target key end

     0   :  { %s22_s0 = inlined_call_operand.vmem [shape: f32[32], index: 0, kind: input, shape index: {}]   ;;  %s23_s1 = inlined_call_operand.vmem [shape: f32[4,32], index: 1, kind: output, shape index: {}]  }
   0x1   :  { %v4_v0 = vld [vmem:[%s22_s0] ss:$0 sm:$0xff] }
   0x2   :  { %5 = vst [vmem:[%s23_s1] sm:$0xf] %v4_v0 }

// kernel: tile.29
= control target key start
LH: loop header
LB: loop body
LE: loop exit
PB: predicated region body
PF: predicated region fallthrough
CT: control target
= control target key end

     0   :  { %vm7_vm0 = vcmask 261120   ;;  %s37_s8 = smov 32   ;;  %s38_s9 = smov 64   ;;  %vm13_vm1 = vcmask 1048320   ;;  %vm19_vm2 = vcmask 785920   ;;  %vm25_vm3 = vcmask 523520   ;;  %s55_s0 = inlined_call_operand.vmem [shape: f32[4,32], index: 0, kind: input, shape index: {}]   ;;  %s56_s1 = inlined_call_operand.vmem [shape: f32[1,128], index: 1, kind: output, shape index: {}]  }
   0x1   :  { %v4_v0 = vld [vmem:[%s55_s0] sm:$0xf]  ;;  %s36_s0 = smov 96  }
   0x2   :  { %5 = vst [vmem:[#allocation1] sm:$0xf] %v4_v0 }
   0x9   :  { %v10_v1 = vld [vmem:[#allocation1 + $0x3] sm:$0x1]   ;;  %v22_v2 = vld [vmem:[#allocation1 + $0x1] sm:$0x1]   ;;  %v6_v3 = vld [vmem:[#allocation1] sm:$0x1]  }
   0xa   :  { %11 = vrot.lane.b32.xlu0 %v10_v1, %s36_s0  ;;  %23 = vrot.lane.b32.xlu1 %v22_v2, %s37_s8  ;;  %v16_v4 = vld [vmem:[#allocation1 + $0x2] sm:$0x1]   ;;  %8 = vst.msk [vmem:[#allocation0] sm:$0x1] %vm7_vm0, %v6_v3  }
   0xe   :  { %17 = vrot.lane.b32.xlu0 %v16_v4, %s38_s9 }
  0x7c   :  { %v12_v5 = vpop.permute.xlu0 %11   ;;  %v24_v6 = vpop.permute.xlu1 %23  }
  0x7d   :  { %14 = vst.msk [vmem:[#allocation0] sm:$0x1] %vm13_vm1, %v12_v5  }
  0x80   :  { %v18_v7 = vpop.permute.xlu0 %17  }
  0x81   :  { %20 = vst.msk [vmem:[#allocation0] sm:$0x1] %vm19_vm2, %v18_v7  }
  0x82   :  { %26 = vst.msk [vmem:[#allocation0] sm:$0x1] %vm25_vm3, %v24_v6  }
  0x89   :  { %v30_v8 = vld [vmem:[#allocation0] sm:$0x1] }
  0x8a   :  { %32 = vst [vmem:[%s56_s1] sm:$0x1] %v30_v8 }

// kernel: unet_apply.66
= control target key start
LH: loop header
LB: loop body
LE: loop exit
PB: predicated region body
PF: predicated region fallthrough
CT: control target
= control target key end

     0   :  { %v133_v0 = vmov 0.0   ;;  %vm134_vm0 = vmmov 0   ;;  %vm55_vm1 = vcmask 523264   ;;  %s176_s1 = inlined_call_operand.vmem [shape: bf16[64,128], index: 1, kind: input, shape index: {}]   ;;  %s177_s0 = inlined_call_operand.vmem [shape: bf16[8,64], index: 0, kind: input, shape index: {}]   ;;  %s178_s2 = inlined_call_operand.vmem [shape: f32[1,128], index: 2, kind: input, shape index: {}]   ;;  %s179_s3 = inlined_call_operand.vmem [shape: f32[8,128], index: 3, kind: output, shape index: {}]  }
   0x1   :  { %115 = vmatprep.subr.bf16.mxu0 %v133_v0  ;;  %v129_v1 = vld [vmem:[%s176_s1] sm:$0xff]   ;;  %123 = vmatprep.mubr.msk.bf16.mxu0 %vm134_vm0, %v133_v0  ;;  %v130_v2 = vld [vmem:[%s176_s1 + $0x8] sm:$0xff]   ;;  %v131_v3 = vld [vmem:[%s176_s1 + $0x10] sm:$0xff]  }
   0x2   :  { %116 = vmatpush3.bf16.msra.mxu0 %v129_v1  ;;  %v132_v4 = vld [vmem:[%s176_s1 + $0x18] sm:$0xff]   ;;  %v15_v5 = vld [vmem:[%s177_s0] sm:$0xf] }
   0x3   :  { %117 = vmatprep.subr.bf16.mxu0 %v133_v0  ;;  %v104_v6 = vld [vmem:[%s178_s2] ss:$0 sm:$0xff] }
   0x6   :  { %118 = vmatpush3.bf16.msra.mxu0 %v130_v2 }
   0x7   :  { %119 = vmatprep.subr.bf16.mxu0 %v133_v0 }
   0xa   :  { %120 = vmatpush3.bf16.msra.mxu0 %v131_v3 }
   0xb   :  { %121 = vmatprep.subr.bf16.mxu0 %v133_v0 }
   0xe   :  { %122 = vmatpush3.bf16.msra.mxu0 %v132_v4 }
  0x11   :  { %124 = vmatmul.mubr.msk.bf16.vlgmr.msra.gmra.mrb[0].mxu0 %vm55_vm1, %v15_v5 }
  0xe4   :  { %v93_v7 = vpop.f32.mrb[0].mxu0 }
  0xe5   :  { %v94_v8 = vadd.f32 %v104_v6, %v93_v7  ;;  %v125_v9 = vpop.f32.mrb[1].mxu0 }
  0xe6   :  { %v96_v10 = vpop.f32.mrb[2].mxu0 }
  0xe7   :  { %99 = vst [vmem:[%s179_s3] sm:$0xff] %v94_v8  ;;  %v126_v11 = vpop.f32.mrb[3].mxu0 }

// kernel: tile.33
= control target key start
LH: loop header
LB: loop body
LE: loop exit
PB: predicated region body
PF: predicated region fallthrough
CT: control target
= control target key end

     0   :  { %s22_s0 = inlined_call_operand.vmem [shape: f32[16], index: 0, kind: input, shape index: {}]   ;;  %s23_s1 = inlined_call_operand.vmem [shape: f32[4,16], index: 1, kind: output, shape index: {}]  }
   0x1   :  { %v4_v0 = vld [vmem:[%s22_s0] ss:$0 sm:$0xff] }
   0x2   :  { %5 = vst [vmem:[%s23_s1] sm:$0xf] %v4_v0 }

// kernel: tile.34
= control target key start
LH: loop header
LB: loop body
LE: loop exit
PB: predicated region body
PF: predicated region fallthrough
CT: control target
= control target key end

     0   :  { %vm7_vm0 = vcmask 130048   ;;  %s37_s8 = smov 16   ;;  %s38_s9 = smov 32   ;;  %vm13_vm1 = vcmask 523648   ;;  %vm19_vm2 = vcmask 392448   ;;  %vm25_vm3 = vcmask 261248   ;;  %s55_s0 = inlined_call_operand.vmem [shape: f32[4,16], index: 0, kind: input, shape index: {}]   ;;  %s56_s1 = inlined_call_operand.vmem [shape: f32[1,64], index: 1, kind: output, shape index: {}]  }
   0x1   :  { %v4_v0 = vld [vmem:[%s55_s0] sm:$0xf]  ;;  %s36_s0 = smov 48  }
   0x2   :  { %5 = vst [vmem:[#allocation1] sm:$0xf] %v4_v0 }
   0x9   :  { %v10_v1 = vld [vmem:[#allocation1 + $0x3] sm:$0x1]   ;;  %v22_v2 = vld [vmem:[#allocation1 + $0x1] sm:$0x1]   ;;  %v6_v3 = vld [vmem:[#allocation1] sm:$0x1]  }
   0xa   :  { %11 = vrot.lane.b32.xlu0 %v10_v1, %s36_s0  ;;  %23 = vrot.lane.b32.xlu1 %v22_v2, %s37_s8  ;;  %v16_v4 = vld [vmem:[#allocation1 + $0x2] sm:$0x1]   ;;  %8 = vst.msk [vmem:[#allocation0] sm:$0x1] %vm7_vm0, %v6_v3  }
   0xe   :  { %17 = vrot.lane.b32.xlu0 %v16_v4, %s38_s9 }
  0x7c   :  { %v12_v5 = vpop.permute.xlu0 %11   ;;  %v24_v6 = vpop.permute.xlu1 %23  }
  0x7d   :  { %14 = vst.msk [vmem:[#allocation0] sm:$0x1] %vm13_vm1, %v12_v5  }
  0x80   :  { %v18_v7 = vpop.permute.xlu0 %17  }
  0x81   :  { %20 = vst.msk [vmem:[#allocation0] sm:$0x1] %vm19_vm2, %v18_v7  }
  0x82   :  { %26 = vst.msk [vmem:[#allocation0] sm:$0x1] %vm25_vm3, %v24_v6  }
  0x89   :  { %v30_v8 = vld [vmem:[#allocation0] sm:$0x1] }
  0x8a   :  { %32 = vst [vmem:[%s56_s1] sm:$0x1] %v30_v8 }

// kernel: unet_apply.62
= control target key start
LH: loop header
LB: loop body
LE: loop exit
PB: predicated region body
PF: predicated region fallthrough
CT: control target
= control target key end

     0   :  { %v1205_v38 = vmov 0.0   ;;  %vm1206_vm0 = vmmov 0   ;;  %vm403_vm1 = vcmask 523264   ;;  %vm899_vm2 = vcmask 1040384   ;;  %s1494_s3 = inlined_call_operand.vmem [shape: bf16[576,64], index: 3, kind: input, shape index: {}]   ;;  %s1495_s1 = inlined_call_operand.vmem [shape: bf16[8,576], index: 1, kind: input, shape index: {}]   ;;  %s1496_s2 = inlined_call_operand.vmem [shape: bf16[576,64], index: 2, kind: input, shape index: {}]   ;;  %s1497_s0 = inlined_call_operand.vmem [shape: bf16[8,576], index: 0, kind: input, shape index: {}]   ;;  %s1498_s4 = inlined_call_operand.vmem [shape: f32[8,64], index: 4, kind: output, shape index: {0}]   ;;  %s1499_s5 = inlined_call_operand.vmem [shape: f32[1,2,64], index: 5, kind: output, shape index: {1}]  }
   0x1   :  { %v1123_v0 = vld [vmem:[%s1494_s3 + $0x40] sm:$0xff]   ;;  %v1127_v4 = vld [vmem:[%s1494_s3 + $0x48] sm:$0xff]   ;;  %v1131_v8 = vld [vmem:[%s1494_s3 + $0x50] sm:$0xff]   ;;  %vm901_vm3 = vcmask 517120  }
   0x2   :  { %v1124_v1 = vld [vmem:[%s1494_s3 + $0xc0] sm:$0xff]   ;;  %995 = vmatprep.subr.bf16.mxu0 %v1123_v0  ;;  %v1128_v5 = vld [vmem:[%s1494_s3 + $0xc8] sm:$0xff]   ;;  %v1132_v9 = vld [vmem:[%s1494_s3 + $0xd0] sm:$0xff]  }
   0x3   :  { %v1125_v2 = vld [vmem:[%s1494_s3] sm:$0xff]   ;;  %1017 = vmatprep.subr.bf16.mxu1 %v1124_v1  ;;  %v1129_v6 = vld [vmem:[%s1494_s3 + $0x8] sm:$0xff]   ;;  %v1133_v10 = vld [vmem:[%s1494_s3 + $0x10] sm:$0xff]  }
   0x4   :  { %v1126_v3 = vld [vmem:[%s1494_s3 + $0x80] sm:$0xff]   ;;  %996 = vmatpush3.bf16.msra.mxu0 %v1125_v2  ;;  %v1130_v7 = vld [vmem:[%s1494_s3 + $0x88] sm:$0xff]   ;;  %v1134_v11 = vld [vmem:[%s1494_s3 + $0x90] sm:$0xff]  }
   0x5   :  { %1018 = vmatpush3.bf16.msra.mxu1 %v1126_v3  ;;  %997 = vmatprep.subr.bf16.mxu0 %v1127_v4  ;;  %v1135_v12 = vld [vmem:[%s1494_s3 + $0x58] sm:$0xff]   ;;  %v1139_v16 = vld [vmem:[%s1494_s3 + $0x60] sm:$0xff]   ;;  %v1143_v20 = vld [vmem:[%s1494_s3 + $0x68] sm:$0xff]  }
   0x6   :  { %1019 = vmatprep.subr.bf16.mxu1 %v1128_v5  ;;  %v1136_v13 = vld [vmem:[%s1494_s3 + $0xd8] sm:$0xff]   ;;  %v1140_v17 = vld [vmem:[%s1494_s3 + $0xe0] sm:$0xff]   ;;  %v1144_v21 = vld [vmem:[%s1494_s3 + $0xe8] sm:$0xff]  }
   0x7   :  { %v1137_v14 = vld [vmem:[%s1494_s3 + $0x18] sm:$0xff]   ;;  %v1141_v18 = vld [vmem:[%s1494_s3 + $0x20] sm:$0xff]   ;;  %v1145_v22 = vld [vmem:[%s1494_s3 + $0x28] sm:$0xff]  }
   0x8   :  { %998 = vmatpush3.bf16.msra.mxu0 %v1129_v6  ;;  %v1138_v15 = vld [vmem:[%s1494_s3 + $0x98] sm:$0xff]   ;;  %v1142_v19 = vld [vmem:[%s1494_s3 + $0xa0] sm:$0xff]   ;;  %v1146_v23 = vld [vmem:[%s1494_s3 + $0xa8] sm:$0xff]  }
   0x9   :  { %1020 = vmatpush3.bf16.msra.mxu1 %v1130_v7  ;;  %999 = vmatprep.subr.bf16.mxu0 %v1131_v8  ;;  %v1147_v24 = vld [vmem:[%s1494_s3 + $0x70] sm:$0xff]   ;;  %v1151_v28 = vld [vmem:[%s1494_s3 + $0x78] sm:$0xff]   ;;  %v95_v32 = vld [vmem:[%s1495_s1] sm:$0xff] }
   0xa   :  { %1021 = vmatprep.subr.bf16.mxu1 %v1132_v9  ;;  %v1148_v25 = vld [vmem:[%s1494_s3 + $0xf0] sm:$0xff]   ;;  %v1152_v29 = vld [vmem:[%s1494_s3 + $0xf8] sm:$0xff]   ;;  %v911_v33 = vcombine.low %v95_v32, %v95_v32  ;;  %v912_v34 = vcombine.high %v95_v32, %v95_v32  ;;  %v96_v35 = vld [vmem:[%s1495_s1 + $0x8] sm:$0xff] }
   0xb   :  { %v1149_v26 = vld [vmem:[%s1494_s3 + $0x30] sm:$0xff]   ;;  %v1153_v30 = vld [vmem:[%s1494_s3 + $0x38] sm:$0xff]   ;;  %v913_v36 = vcombine.low %v96_v35, %v96_v35  ;;  %v914_v37 = vcombine.high %v96_v35, %v96_v35  ;;  %v1160_v39 = vld [vmem:[%s1494_s3 + $0x100] sm:$0xff]  }
   0xc   :  { %1000 = vmatpush3.bf16.msra.mxu0 %v1133_v10  ;;  %v1150_v27 = vld [vmem:[%s1494_s3 + $0xb0] sm:$0xff]   ;;  %v1154_v31 = vld [vmem:[%s1494_s3 + $0xb8] sm:$0xff]   ;;  %439 = vmatprep.mubr.bf16.mxu0 %v912_v34  ;;  %v1161_v40 = vld [vmem:[%s1496_s2 + $0xc0] sm:$0xff]  }
   0xd   :  { %1022 = vmatpush3.bf16.msra.mxu1 %v1134_v11  ;;  %1001 = vmatprep.subr.bf16.mxu0 %v1135_v12  ;;  %v1162_v41 = vld [vmem:[%s1494_s3 + $0x108] sm:$0xff]   ;;  %v1163_v42 = vld [vmem:[%s1496_s2 + $0x80] sm:$0xff]   ;;  %v1167_v45 = vld [vmem:[%s1496_s2 + $0xd0] sm:$0xff]  }
   0xe   :  { %1023 = vmatprep.subr.bf16.mxu1 %v1136_v13  ;;  %479 = vmatprep.mubr.bf16.mxu1 %v914_v37  ;;  %v1164_v43 = vld [vmem:[%s1496_s2 + $0xc8] sm:$0xff]   ;;  %v1165_v46 = vld [vmem:[%s1494_s3 + $0x110] sm:$0xff]   ;;  %v1168_v48 = vld [vmem:[%s1494_s3 + $0x118] sm:$0xff]  }
   0xf   :  { %v1166_v44 = vld [vmem:[%s1496_s2 + $0x88] sm:$0xff]   ;;  %v1169_v47 = vld [vmem:[%s1496_s2 + $0x90] sm:$0xff]   ;;  %v1171_v49 = vld [vmem:[%s1496_s2 + $0xd8] sm:$0xff]  }
  0x10   :  { %1002 = vmatpush3.bf16.msra.mxu0 %v1137_v14  ;;  %v1170_v50 = vld [vmem:[%s1496_s2 + $0x40] sm:$0xff]   ;;  %v1157_v51 = vld [vmem:[%s1495_s1 + $0x10] ss:$0 sps:$4 sm:$0xff]   ;;  %v1173_v52 = vld [vmem:[%s1496_s2 + $0x98] sm:$0xff]  }
  0x11   :  { %1024 = vmatpush3.bf16.msra.mxu1 %v1138_v15  ;;  %1003 = vmatprep.subr.bf16.mxu0 %v1139_v16  ;;  %v1172_v53 = vld [vmem:[%s1496_s2] sm:$0xff]   ;;  %v1174_v55 = vld [vmem:[%s1496_s2 + $0x48] sm:$0xff]   ;;  %v1178_v59 = vld [vmem:[%s1496_s2 + $0x50] sm:$0xff]  }
  0x12   :  { %1025 = vmatprep.subr.bf16.mxu1 %v1140_v17  ;;  %v1175_v54 = vld [vmem:[%s1496_s2 + $0xe0] sm:$0xff]   ;;  %v1176_v57 = vld [vmem:[%s1496_s2 + $0x8] sm:$0xff]   ;;  %v1180_v61 = vld [vmem:[%s1496_s2 + $0x10] sm:$0xff]  }
  0x13   :  { %v1177_v56 = vld [vmem:[%s1496_s2 + $0xa0] sm:$0xff]   ;;  %v1179_v58 = vld [vmem:[%s1496_s2 + $0xe8] sm:$0xff]   ;;  %v1183_v62 = vld [vmem:[%s1496_s2 + $0xf0] sm:$0xff]  }
  0x14   :  { %1004 = vmatpush3.bf16.msra.mxu0 %v1141_v18  ;;  %v1181_v60 = vld [vmem:[%s1496_s2 + $0xa8] sm:$0xff]   ;;  %v1182_v63 = vld [vmem:[%s1496_s2 + $0x58] sm:$0xff]   ;;  %v1185_v0 = vld [vmem:[%s1496_s2 + $0xb0] sm:$0xff]  }
  0x15   :  { %1026 = vmatpush3.bf16.msra.mxu1 %v1142_v19  ;;  %1005 = vmatprep.subr.bf16.mxu0 %v1143_v20  ;;  %v1184_v1 = vld [vmem:[%s1496_s2 + $0x18] sm:$0xff]   ;;  %v1186_v3 = vld [vmem:[%s1496_s2 + $0x60] sm:$0xff]   ;;  %v21_v5 = vld [vmem:[%s1497_s0 + $0x8] sm:$0xff] }
  0x16   :  { %1027 = vmatprep.subr.bf16.mxu1 %v1144_v21  ;;  %v1187_v2 = vld [vmem:[%s1496_s2 + $0xf8] sm:$0xff]   ;;  %v1188_v6 = vld [vmem:[%s1496_s2 + $0x20] sm:$0xff]   ;;  %v956_v7 = vcombine.high %v21_v5, %v21_v5  ;;  %v1190_v8 = vld [vmem:[%s1496_s2 + $0x68] sm:$0xff]   ;;  %v955_v9 = vcombine.low %v21_v5, %v21_v5 }
  0x17   :  { %v1189_v4 = vld [vmem:[%s1496_s2 + $0xb8] sm:$0xff]   ;;  %v1195_v10 = vld [vmem:[%s1496_s2 + $0x100] sm:$0xff]   ;;  %v1194_v11 = vld [vmem:[%s1496_s2 + $0x28] sm:$0xff]  }
  0x18   :  { %1006 = vmatpush3.bf16.msra.mxu0 %v1145_v22  ;;  %v1196_v12 = vld [vmem:[%s1496_s2 + $0x70] sm:$0xff]   ;;  %v1198_v13 = vld [vmem:[%s1496_s2 + $0x108] sm:$0xff]   ;;  %v20_v14 = vld [vmem:[%s1497_s0] sm:$0xff] }
  0x19   :  { %1028 = vmatpush3.bf16.msra.mxu1 %v1146_v23  ;;  %1007 = vmatprep.subr.bf16.mxu0 %v1147_v24  ;;  %v1197_v15 = vld [vmem:[%s1496_s2 + $0x30] sm:$0xff]   ;;  %v954_v16 = vcombine.high %v20_v14, %v20_v14  ;;  %v1199_v17 = vld [vmem:[%s1496_s2 + $0x78] sm:$0xff]   ;;  %v953_v21 = vcombine.low %v20_v14, %v20_v14 }
  0x1a   :  { %1029 = vmatprep.subr.bf16.mxu1 %v1148_v25  ;;  %v1201_v18 = vld [vmem:[%s1496_s2 + $0x110] sm:$0xff]   ;;  %v1200_v19 = vld [vmem:[%s1496_s2 + $0x38] sm:$0xff]  }
  0x1b   :  { %v1204_v20 = vld [vmem:[%s1496_s2 + $0x118] sm:$0xff]   ;;  %v1193_v22 = vld [vmem:[%s1497_s0 + $0x10] ss:$0 sps:$4 sm:$0xff]  }
  0x1c   :  { %1008 = vmatpush3.bf16.msra.mxu0 %v1149_v26 }
  0x1d   :  { %1030 = vmatpush3.bf16.msra.mxu1 %v1150_v27  ;;  %1009 = vmatprep.subr.bf16.mxu0 %v1151_v28 }
  0x1e   :  { %1031 = vmatprep.subr.bf16.mxu1 %v1152_v29 }
  0x20   :  { %1010 = vmatpush3.bf16.msra.mxu0 %v1153_v30 }
  0x21   :  { %1032 = vmatpush3.bf16.msra.mxu1 %v1154_v31  ;;  %1066 = vmatprep.subr.bf16.mxu0 %v1161_v40 }
  0x22   :  { %1093 = vmatprep.subr.bf16.mxu1 %v1205_v38 }
  0x23   :  { %440 = vmatmul.mubr.bf16.vlgmr.msra.gmra.mrb[0].mxu0 %v911_v33 }
  0x24   :  { %480 = vmatmul.mubr.bf16.vlgmr.msra.gmra.mrb[0].mxu1 %v913_v36  ;;  %1067 = vmatpush3.bf16.msra.mxu0 %v1163_v42 }
  0x25   :  { %1094 = vmatpush3.bf16.msra.mxu1 %v1160_v39  ;;  %1101 = vmatprep.mubr.msk.bf16.mxu1 %vm1206_vm0, %v1205_v38 }
  0x26   :  { %1095 = vmatprep.subr.bf16.mxu1 %v1205_v38  ;;  %1068 = vmatprep.subr.bf16.mxu0 %v1164_v43 }
  0x27   :  { %835 = vmatprep.mubr.bf16.mxu0 %v956_v7 }
  0x28   :  { %1069 = vmatpush3.bf16.msra.mxu0 %v1166_v44 }
  0x29   :  { %1096 = vmatpush3.bf16.msra.mxu1 %v1162_v41  ;;  %1070 = vmatprep.subr.bf16.mxu0 %v1167_v45 }
  0x2a   :  { %1097 = vmatprep.subr.bf16.mxu1 %v1205_v38 }
  0x2c   :  { %1071 = vmatpush3.bf16.msra.mxu0 %v1169_v47 }
  0x2d   :  { %1098 = vmatpush3.bf16.msra.mxu1 %v1165_v46  ;;  %1072 = vmatprep.subr.bf16.mxu0 %v1171_v49 }
  0x2e   :  { %1099 = vmatprep.subr.bf16.mxu1 %v1205_v38 }
  0x30   :  { %1073 = vmatpush3.bf16.msra.mxu0 %v1173_v52 }
  0x31   :  { %1100 = vmatpush3.bf16.msra.mxu1 %v1168_v48  ;;  %1074 = vmatprep.subr.bf16.mxu0 %v1175_v54 }
  0x32   :  { %1044 = vmatprep.subr.bf16.mxu1 %v1170_v50 }
  0x34   :  { %1102 = vmatmul.mubr.msk.bf16.vlgmr.msra.gmra.mrb[4].mxu1 %vm403_vm1, %v1157_v51  ;;  %1075 = vmatpush3.bf16.msra.mxu0 %v1177_v56 }
  0x35   :  { %1045 = vmatpush3.bf16.msra.mxu1 %v1172_v53  ;;  %1076 = vmatprep.subr.bf16.mxu0 %v1179_v58 }
  0x36   :  { %1046 = vmatprep.subr.bf16.mxu1 %v1174_v55  ;;  %795 = vmatprep.mubr.bf16.mxu1 %v954_v16 }
  0x38   :  { %1077 = vmatpush3.bf16.msra.mxu0 %v1181_v60 }
  0x39   :  { %1047 = vmatpush3.bf16.msra.mxu1 %v1176_v57  ;;  %1078 = vmatprep.subr.bf16.mxu0 %v1183_v62 }
  0x3a   :  { %1048 = vmatprep.subr.bf16.mxu1 %v1178_v59 }
  0x3c   :  { %1079 = vmatpush3.bf16.msra.mxu0 %v1185_v0 }
  0x3d   :  { %1049 = vmatpush3.bf16.msra.mxu1 %v1180_v61  ;;  %1080 = vmatprep.subr.bf16.mxu0 %v1187_v2 }
  0x3e   :  { %1050 = vmatprep.subr.bf16.mxu1 %v1182_v63 }
  0x40   :  { %1081 = vmatpush3.bf16.msra.mxu0 %v1189_v4 }
  0x41   :  { %1051 = vmatpush3.bf16.msra.mxu1 %v1184_v1  ;;  %1105 = vmatprep.subr.bf16.mxu0 %v1205_v38 }
  0x42   :  { %1052 = vmatprep.subr.bf16.mxu1 %v1186_v3 }
  0x43   :  { %836 = vmatmul.mubr.bf16.vlgmr.msra.gmra.mrb[4].mxu0 %v955_v9 }
  0x44   :  { %1106 = vmatpush3.bf16.msra.mxu0 %v1195_v10  ;;  %1113 = vmatprep.mubr.msk.bf16.mxu0 %vm1206_vm0, %v1205_v38 }
  0x45   :  { %1053 = vmatpush3.bf16.msra.mxu1 %v1188_v6  ;;  %1107 = vmatprep.subr.bf16.mxu0 %v1205_v38 }
  0x46   :  { %1054 = vmatprep.subr.bf16.mxu1 %v1190_v8 }
  0x48   :  { %1108 = vmatpush3.bf16.msra.mxu0 %v1198_v13 }
  0x49   :  { %1055 = vmatpush3.bf16.msra.mxu1 %v1194_v11  ;;  %1109 = vmatprep.subr.bf16.mxu0 %v1205_v38 }
  0x4a   :  { %1056 = vmatprep.subr.bf16.mxu1 %v1196_v12 }
  0x4c   :  { %1110 = vmatpush3.bf16.msra.mxu0 %v1201_v18 }
  0x4d   :  { %1057 = vmatpush3.bf16.msra.mxu1 %v1197_v15  ;;  %1111 = vmatprep.subr.bf16.mxu0 %v1205_v38 }
  0x4e   :  { %1058 = vmatprep.subr.bf16.mxu1 %v1199_v17 }
  0x50   :  { %1112 = vmatpush3.bf16.msra.mxu0 %v1204_v20 }
  0x51   :  { %1059 = vmatpush3.bf16.msra.mxu1 %v1200_v19 }
  0x53   :  { %1114 = vmatmul.mubr.msk.bf16.vlgmr.msra.gmra.mrb[8].mxu0 %vm403_vm1, %v1193_v22 }
  0x54   :  { %796 = vmatmul.mubr.bf16.vlgmr.msra.gmra.mrb[8].mxu1 %v953_v21 }
  0xf6   :  { %v1011_v23 = vpop.f32.mrb[0].mxu0 }
  0xf7   :  { %v1033_v24 = vpop.f32.mrb[0].mxu1  ;;  %v1012_v25 = vpop.f32.mrb[1].mxu0 }
  0xf8   :  { %v1013_v26 = vadd.f32 %v1012_v25, %v1011_v23  ;;  %v1034_v27 = vpop.f32.mrb[1].mxu1  ;;  %v1014_v28 = vpop.f32.mrb[2].mxu0 }
  0xf9   :  { %v1035_v29 = vadd.f32 %v1034_v27, %v1033_v24  ;;  %v1036_v30 = vpop.f32.mrb[2].mxu1  ;;  %v1015_v31 = vpop.f32.mrb[3].mxu0 }
  0xfa   :  { %v1037_v32 = vpop.f32.mrb[3].mxu1 }
  0xfb   :  { %v482_v33 = vadd.f32 %v1035_v29, %v1013_v26 }
 0x107   :  { %v521_v34 = vpop.f32.mrb[4].mxu1 }
 0x108   :  { %v522_v35 = vadd.f32 %v521_v34, %v482_v33  ;;  %v1103_v36 = vpop.f32.mrb[5].mxu1 }
 0x109   :  { %v524_v37 = vpop.f32.mrb[6].mxu1 }
 0x10a   :  { %v1104_v38 = vpop.f32.mrb[7].mxu1 }
 0x116   :  { %v1082_v39 = vpop.f32.mrb[4].mxu0 }
 0x117   :  { %v1083_v40 = vpop.f32.mrb[5].mxu0 }
 0x118   :  { %v1084_v41 = vadd.f32 %v1083_v40, %v1082_v39  ;;  %v1085_v42 = vpop.f32.mrb[6].mxu0 }
 0x119   :  { %v1086_v43 = vpop.f32.mrb[7].mxu0 }
 0x126   :  { %v877_v46 = vpop.f32.mrb[8].mxu0 }
 0x127   :  { %v1060_v44 = vpop.f32.mrb[8].mxu1  ;;  %v1115_v49 = vpop.f32.mrb[9].mxu0 }
 0x128   :  { %v1061_v45 = vpop.f32.mrb[9].mxu1  ;;  %v880_v51 = vpop.f32.mrb[10].mxu0 }
 0x129   :  { %v1062_v47 = vadd.f32 %v1061_v45, %v1060_v44  ;;  %v1063_v48 = vpop.f32.mrb[10].mxu1  ;;  %v1116_v53 = vpop.f32.mrb[11].mxu0 }
 0x12a   :  { %v1064_v50 = vpop.f32.mrb[11].mxu1 }
 0x12b   :  { %v798_v52 = vadd.f32 %v1062_v47, %v522_v35 }
 0x12d   :  { %v838_v54 = vadd.f32 %v1084_v41, %v798_v52 }
 0x12f   :  { %v878_v55 = vadd.f32 %v877_v46, %v838_v54 }
 0x131   :  { %883 = vst.msk [vmem:[%s1498_s4] sm:$0xff] %vm403_vm1, %v878_v55  ;;  %v884_v56 = vsel %vm403_vm1, %v878_v55, 0.0  ;;  %v891_v57 = vmul.f32 %v878_v55, %v878_v55 }
 0x132   :  { %v885_v58 = vrot.slane %v884_v56, 4 }
 0x133   :  { %v892_v59 = vsel %vm403_vm1, %v891_v57, 0.0 }
 0x134   :  { %v886_v60 = vadd.f32 %v885_v58, %v884_v56  ;;  %v893_v61 = vrot.slane %v892_v59, 4 }
 0x136   :  { %v887_v62 = vrot.slane %v886_v60, 2  ;;  %v894_v63 = vadd.f32 %v893_v61, %v892_v59 }
 0x138   :  { %v888_v0 = vadd.f32 %v887_v62, %v886_v60  ;;  %v895_v1 = vrot.slane %v894_v63, 2 }
 0x13a   :  { %v889_v2 = vrot.slane %v888_v0, 1  ;;  %v896_v3 = vadd.f32 %v895_v1, %v894_v63 }
 0x13c   :  { %v897_v4 = vrot.slane %v896_v3, 1  ;;  %v890_v5 = vadd.f32 %v889_v2, %v888_v0 }
 0x13e   :  { %v898_v6 = vadd.f32 %v897_v4, %v896_v3 }
 0x140   :  { %v900_v7 = vsel %vm899_vm2, %v890_v5, %v898_v6 }
 0x141   :  { %902 = vst.msk [vmem:[%s1499_s5] sm:$0x3] %vm901_vm3, %v900_v7 }

// kernel: unet_apply.67
= control target key start
LH: loop header
LB: loop body
LE: loop exit
PB: predicated region body
PF: predicated region fallthrough
CT: control target
= control target key end

     0   :  { %vm246_vm0 = vcmask 261120   ;;  %vm627_vm1 = vcmask 1040384   ;;  %vm629_vm2 = vcmask 254976   ;;  %s1040_s3 = inlined_call_operand.vmem [shape: bf16[288,32], index: 3, kind: input, shape index: {}]   ;;  %s1041_s2 = inlined_call_operand.vmem [shape: bf16[288,32], index: 2, kind: input, shape index: {}]   ;;  %s1042_s1 = inlined_call_operand.vmem [shape: bf16[32,288], index: 1, kind: input, shape index: {}]   ;;  %s1043_s0 = inlined_call_operand.vmem [shape: bf16[32,288], index: 0, kind: input, shape index: {}]   ;;  %s1044_s4 = inlined_call_operand.vmem [shape: f32[32,32], index: 4, kind: output, shape index: {0}]   ;;  %s1045_s5 = inlined_call_operand.vmem [shape: f32[1,2,32], index: 5, kind: output, shape index: {1}]  }
   0x1   :  { %v783_v0 = vld [vmem:[%s1040_s3 + $0x40] sm:$0xff]   ;;  %v787_v4 = vld [vmem:[%s1040_s3 + $0x48] sm:$0xff]   ;;  %v791_v8 = vld [vmem:[%s1040_s3 + $0x50] sm:$0xff]  }
   0x2   :  { %v784_v1 = vld [vmem:[%s1040_s3] sm:$0xff]   ;;  %691 = vmatprep.subr.bf16.mxu0 %v783_v0  ;;  %v788_v5 = vld [vmem:[%s1040_s3 + $0x8] sm:$0xff]   ;;  %v792_v9 = vld [vmem:[%s1040_s3 + $0x10] sm:$0xff]  }
   0x3   :  { %v785_v2 = vld [vmem:[%s1041_s2 + $0x40] sm:$0xff]   ;;  %692 = vmatpush3.bf16.msra.mxu0 %v784_v1  ;;  %v789_v6 = vld [vmem:[%s1041_s2 + $0x48] sm:$0xff]   ;;  %v793_v10 = vld [vmem:[%s1041_s2 + $0x50] sm:$0xff]  }
   0x4   :  { %v786_v3 = vld [vmem:[%s1041_s2] sm:$0xff]   ;;  %723 = vmatprep.subr.bf16.mxu1 %v785_v2  ;;  %693 = vmatprep.subr.bf16.mxu0 %v787_v4  ;;  %v790_v7 = vld [vmem:[%s1041_s2 + $0x8] sm:$0xff]   ;;  %v794_v11 = vld [vmem:[%s1041_s2 + $0x10] sm:$0xff]  }
   0x5   :  { %724 = vmatpush3.bf16.msra.mxu1 %v786_v3  ;;  %v795_v12 = vld [vmem:[%s1040_s3 + $0x58] sm:$0xff]   ;;  %v799_v16 = vld [vmem:[%s1040_s3 + $0x60] sm:$0xff]   ;;  %v803_v20 = vld [vmem:[%s1040_s3 + $0x68] sm:$0xff]  }
   0x6   :  { %725 = vmatprep.subr.bf16.mxu1 %v789_v6  ;;  %v796_v13 = vld [vmem:[%s1040_s3 + $0x18] sm:$0xff]   ;;  %v800_v17 = vld [vmem:[%s1040_s3 + $0x20] sm:$0xff]   ;;  %v804_v21 = vld [vmem:[%s1040_s3 + $0x28] sm:$0xff]  }
   0x7   :  { %694 = vmatpush3.bf16.msra.mxu0 %v788_v5  ;;  %v797_v14 = vld [vmem:[%s1041_s2 + $0x58] sm:$0xff]   ;;  %v801_v18 = vld [vmem:[%s1041_s2 + $0x60] sm:$0xff]   ;;  %v805_v22 = vld [vmem:[%s1041_s2 + $0x68] sm:$0xff]  }
   0x8   :  { %695 = vmatprep.subr.bf16.mxu0 %v791_v8  ;;  %v798_v15 = vld [vmem:[%s1041_s2 + $0x18] sm:$0xff]   ;;  %v802_v19 = vld [vmem:[%s1041_s2 + $0x20] sm:$0xff]   ;;  %v806_v23 = vld [vmem:[%s1041_s2 + $0x28] sm:$0xff]  }
   0x9   :  { %726 = vmatpush3.bf16.msra.mxu1 %v790_v7  ;;  %v807_v24 = vld [vmem:[%s1040_s3 + $0x70] sm:$0xff]   ;;  %v811_v28 = vld [vmem:[%s1040_s3 + $0x78] sm:$0xff]   ;;  %v814_v31 = vld [vmem:[%s1042_s1] ss:$12 sps:$4 sm:$0xff]  }
   0xa   :  { %727 = vmatprep.subr.bf16.mxu1 %v793_v10  ;;  %v808_v25 = vld [vmem:[%s1040_s3 + $0x30] sm:$0xff]   ;;  %v812_v29 = vld [vmem:[%s1040_s3 + $0x38] sm:$0xff]   ;;  %v818_v34 = vld [vmem:[%s1040_s3 + $0x80] sm:$0xff]  }
   0xb   :  { %696 = vmatpush3.bf16.msra.mxu0 %v792_v9  ;;  %v809_v26 = vld [vmem:[%s1041_s2 + $0x70] sm:$0xff]   ;;  %v813_v30 = vld [vmem:[%s1041_s2 + $0x78] sm:$0xff]   ;;  %v819_v35 = vld [vmem:[%s1043_s0] ss:$12 sps:$4 sm:$0xff]  }
   0xc   :  { %697 = vmatprep.subr.bf16.mxu0 %v795_v12  ;;  %v810_v27 = vld [vmem:[%s1041_s2 + $0x30] sm:$0xff]   ;;  %v817_v33 = vld [vmem:[%s1041_s2 + $0x38] sm:$0xff]   ;;  %v822_v37 = vld [vmem:[%s1041_s2 + $0x80] sm:$0xff]  }
   0xd   :  { %728 = vmatpush3.bf16.msra.mxu1 %v794_v11  ;;  %v816_v32 = vld [vmem:[%s1042_s1 + $0x4] ss:$12 sps:$4 sm:$0xff]   ;;  %v823_v38 = vld [vmem:[%s1042_s1 + $0x1c] ss:$12 sps:$4 sm:$0xff]   ;;  %v832_v46 = vld [vmem:[%s1042_s1 + $0x20] ss:$12 sps:$4 sm:$0xff]  }
   0xe   :  { %729 = vmatprep.subr.bf16.mxu1 %v797_v14  ;;  %285 = vmatprep.mubr.bf16.mxu0 %v816_v32  ;;  %v821_v36 = vld [vmem:[%s1043_s0 + $0x4] ss:$12 sps:$4 sm:$0xff]   ;;  %v826_v40 = vld [vmem:[%s1040_s3 + $0x88] sm:$0xff]  }
   0xf   :  { %698 = vmatpush3.bf16.msra.mxu0 %v796_v13  ;;  %527 = vmatprep.mubr.bf16.mxu1 %v821_v36  ;;  %v825_v39 = vld [vmem:[%s1042_s1 + $0x18] ss:$12 sps:$4 sm:$0xff]   ;;  %v827_v41 = vld [vmem:[%s1043_s0 + $0x1c] ss:$12 sps:$4 sm:$0xff]   ;;  %v834_v47 = vld [vmem:[%s1043_s0 + $0x20] ss:$12 sps:$4 sm:$0xff]  }
  0x10   :  { %699 = vmatprep.subr.bf16.mxu0 %v799_v16  ;;  %v829_v42 = vld [vmem:[%s1043_s0 + $0x18] ss:$12 sps:$4 sm:$0xff]   ;;  %v830_v43 = vld [vmem:[%s1041_s2 + $0x88] sm:$0xff]  }
  0x11   :  { %730 = vmatpush3.bf16.msra.mxu1 %v798_v15  ;;  %v831_v44 = vld [vmem:[%s1042_s1 + $0x8] ss:$12 sps:$4 sm:$0xff]  }
  0x12   :  { %731 = vmatprep.subr.bf16.mxu1 %v801_v18  ;;  %v833_v45 = vld [vmem:[%s1043_s0 + $0x8] ss:$12 sps:$4 sm:$0xff]  }
  0x13   :  { %700 = vmatpush3.bf16.msra.mxu0 %v800_v17 }
  0x14   :  { %701 = vmatprep.subr.bf16.mxu0 %v803_v20 }
  0x15   :  { %732 = vmatpush3.bf16.msra.mxu1 %v802_v19 }
  0x16   :  { %733 = vmatprep.subr.bf16.mxu1 %v805_v22 }
  0x17   :  { %702 = vmatpush3.bf16.msra.mxu0 %v804_v21 }
  0x18   :  { %703 = vmatprep.subr.bf16.mxu0 %v807_v24 }
  0x19   :  { %734 = vmatpush3.bf16.msra.mxu1 %v806_v23 }
  0x1a   :  { %735 = vmatprep.subr.bf16.mxu1 %v809_v26 }
  0x1b   :  { %704 = vmatpush3.bf16.msra.mxu0 %v808_v25 }
  0x1c   :  { %705 = vmatprep.subr.bf16.mxu0 %v811_v28 }
  0x1d   :  { %736 = vmatpush3.bf16.msra.mxu1 %v810_v27 }
  0x1e   :  { %737 = vmatprep.subr.bf16.mxu1 %v813_v30 }
  0x1f   :  { %706 = vmatpush3.bf16.msra.mxu0 %v812_v29 }
  0x20   :  { %755 = vmatprep.subr.bf16.mxu0 %v818_v34 }
  0x21   :  { %738 = vmatpush3.bf16.msra.mxu1 %v817_v33 }
  0x22   :  { %286 = vmatmul.mubr.bf16.vlgmr.msra.gmra.mrb[0].mxu0 %v814_v31  ;;  %763 = vmatprep.subr.bf16.mxu1 %v822_v37 }
  0x23   :  { %756 = vmatpush3.bf16.msra.mxu0 %v818_v34  ;;  %293 = vmatprep.mubr.bf16.mxu0 %v823_v38 }
  0x24   :  { %528 = vmatmul.mubr.bf16.vlgmr.msra.gmra.mrb[0].mxu1 %v819_v35  ;;  %757 = vmatprep.subr.bf16.mxu0 %v826_v40 }
  0x25   :  { %764 = vmatpush3.bf16.msra.mxu1 %v822_v37  ;;  %535 = vmatprep.mubr.bf16.mxu1 %v827_v41 }
  0x26   :  { %765 = vmatprep.subr.bf16.mxu1 %v830_v43 }
  0x27   :  { %758 = vmatpush3.bf16.msra.mxu0 %v826_v40 }
  0x29   :  { %766 = vmatpush3.bf16.msra.mxu1 %v830_v43 }
  0x2a   :  { %294 = vmatmul.mubr.bf16.gmra.mrb[4].mxu0 %v825_v39 }
  0x2b   :  { %759 = vmatprep.mubr.msk.bf16.mxu0 %vm246_vm0, %v831_v44 }
  0x2c   :  { %536 = vmatmul.mubr.bf16.gmra.mrb[4].mxu1 %v829_v42 }
  0x2d   :  { %767 = vmatprep.mubr.msk.bf16.mxu1 %vm246_vm0, %v833_v45 }
  0x32   :  { %760 = vmatmul.mubr.msk.bf16.vlgmr.msra.gmra.mrb[8].mxu0 %vm246_vm0, %v832_v46 }
  0x34   :  { %768 = vmatmul.mubr.msk.bf16.vlgmr.msra.gmra.mrb[8].mxu1 %vm246_vm0, %v834_v47 }
  0xf5   :  { %v707_v48 = vpop.f32.mrb[0].mxu0 }
  0xf6   :  { %v708_v49 = vpop.f32.mrb[1].mxu0 }
  0xf7   :  { %v709_v50 = vadd.f32 %v708_v49, %v707_v48  ;;  %v710_v51 = vpop.f32.mrb[2].mxu0  ;;  %v739_v52 = vpop.f32.mrb[0].mxu1 }
  0xf8   :  { %v711_v53 = vpop.f32.mrb[3].mxu0  ;;  %v740_v55 = vpop.f32.mrb[1].mxu1 }
  0xf9   :  { %v712_v54 = vadd.f32 %v711_v53, %v710_v51  ;;  %v741_v56 = vadd.f32 %v740_v55, %v739_v52  ;;  %v742_v57 = vpop.f32.mrb[2].mxu1 }
  0xfa   :  { %v743_v58 = vpop.f32.mrb[3].mxu1 }
  0xfb   :  { %v744_v59 = vadd.f32 %v743_v58, %v742_v57 }
  0xfd   :  { %v713_v60 = vpop.f32.mrb[4].mxu0 }
  0xfe   :  { %v714_v61 = vpop.f32.mrb[5].mxu0 }
  0xff   :  { %v715_v62 = vadd.f32 %v714_v61, %v713_v60  ;;  %v716_v63 = vpop.f32.mrb[6].mxu0  ;;  %v745_v0 = vpop.f32.mrb[4].mxu1 }
 0x100   :  { %v717_v1 = vpop.f32.mrb[7].mxu0  ;;  %v746_v3 = vpop.f32.mrb[5].mxu1 }
 0x101   :  { %v718_v2 = vadd.f32 %v717_v1, %v716_v63  ;;  %v747_v4 = vadd.f32 %v746_v3, %v745_v0  ;;  %v748_v5 = vpop.f32.mrb[6].mxu1 }
 0x102   :  { %v749_v6 = vpop.f32.mrb[7].mxu1 }
 0x103   :  { %v750_v7 = vadd.f32 %v749_v6, %v748_v5 }
 0x105   :  { %v761_v8 = vpop.f32.mrb[8].mxu0 }
 0x106   :  { %v345_v9 = vadd.f32 %v761_v8, %v715_v62  ;;  %v336_v10 = vpop.f32.mrb[9].mxu0 }
 0x107   :  { %v337_v11 = vadd.f32 %v709_v50, %v336_v10  ;;  %v762_v12 = vpop.f32.mrb[10].mxu0  ;;  %v769_v15 = vpop.f32.mrb[8].mxu1 }
 0x108   :  { %v348_v13 = vadd.f32 %v762_v12, %v718_v2  ;;  %v538_v14 = vadd.f32 %v747_v4, %v345_v9  ;;  %v339_v16 = vpop.f32.mrb[11].mxu0  ;;  %v578_v19 = vpop.f32.mrb[9].mxu1 }
 0x109   :  { %v340_v17 = vadd.f32 %v712_v54, %v339_v16  ;;  %v530_v18 = vadd.f32 %v741_v56, %v337_v11  ;;  %v770_v22 = vpop.f32.mrb[10].mxu1 }
 0x10a   :  { %v587_v20 = vadd.f32 %v769_v15, %v538_v14  ;;  %v541_v21 = vadd.f32 %v750_v7, %v348_v13  ;;  %v581_v25 = vpop.f32.mrb[11].mxu1 }
 0x10b   :  { %v579_v23 = vadd.f32 %v578_v19, %v530_v18  ;;  %v533_v24 = vadd.f32 %v744_v59, %v340_v17 }
 0x10c   :  { %595 = vst.msk [vmem:[%s1044_s4 + $0x10] sm:$0xff] %vm246_vm0, %v587_v20  ;;  %v590_v26 = vadd.f32 %v770_v22, %v541_v21  ;;  %v612_v29 = vmul.f32 %v587_v20, %v587_v20  ;;  %v600_v34 = vsel %vm246_vm0, %v587_v20, 0.0 }
 0x10d   :  { %593 = vst.msk [vmem:[%s1044_s4] sm:$0xff] %vm246_vm0, %v579_v23  ;;  %v610_v27 = vmul.f32 %v579_v23, %v579_v23  ;;  %v582_v28 = vadd.f32 %v581_v25, %v533_v24  ;;  %v597_v30 = vsel %vm246_vm0, %v579_v23, 0.0 }
 0x10e   :  { %596 = vst.msk [vmem:[%s1044_s4 + $0x18] sm:$0xff] %vm246_vm0, %v590_v26  ;;  %v613_v36 = vmul.f32 %v590_v26, %v590_v26  ;;  %v617_v40 = vsel %vm246_vm0, %v612_v29, 0.0  ;;  %v602_v41 = vsel %vm246_vm0, %v590_v26, 0.0 }
 0x10f   :  { %594 = vst.msk [vmem:[%s1044_s4 + $0x8] sm:$0xff] %vm246_vm0, %v582_v28  ;;  %v598_v31 = vsel %vm246_vm0, %v582_v28, 0.0  ;;  %v611_v32 = vmul.f32 %v582_v28, %v582_v28  ;;  %v614_v35 = vsel %vm246_vm0, %v610_v27, 0.0 }
 0x110   :  { %v599_v33 = vadd.f32 %v598_v31, %v597_v30  ;;  %v619_v44 = vsel %vm246_vm0, %v613_v36, 0.0 }
 0x111   :  { %v615_v37 = vsel %vm246_vm0, %v611_v32, 0.0 }
 0x112   :  { %v601_v38 = vadd.f32 %v600_v34, %v599_v33  ;;  %v616_v39 = vadd.f32 %v615_v37, %v614_v35 }
 0x114   :  { %v603_v42 = vadd.f32 %v602_v41, %v601_v38  ;;  %v618_v43 = vadd.f32 %v617_v40, %v616_v39 }
 0x116   :  { %v604_v45 = vrot.slane %v603_v42, 4  ;;  %v620_v46 = vadd.f32 %v619_v44, %v618_v43 }
 0x118   :  { %v605_v47 = vadd.f32 %v604_v45, %v603_v42  ;;  %v621_v48 = vrot.slane %v620_v46, 4 }
 0x11a   :  { %v606_v49 = vrot.slane %v605_v47, 2  ;;  %v622_v50 = vadd.f32 %v621_v48, %v620_v46 }
 0x11c   :  { %v607_v51 = vadd.f32 %v606_v49, %v605_v47  ;;  %v623_v52 = vrot.slane %v622_v50, 2 }
 0x11e   :  { %v608_v53 = vrot.slane %v607_v51, 1  ;;  %v624_v54 = vadd.f32 %v623_v52, %v622_v50 }
 0x120   :  { %v625_v55 = vrot.slane %v624_v54, 1  ;;  %v609_v56 = vadd.f32 %v608_v53, %v607_v51 }
 0x122   :  { %v626_v57 = vadd.f32 %v625_v55, %v624_v54 }
 0x124   :  { %v628_v58 = vsel %vm627_vm1, %v609_v56, %v626_v57 }
 0x125   :  { %630 = vst.msk [vmem:[%s1045_s5] sm:$0x3] %vm629_vm2, %v628_v58 }

// kernel: unet_apply.71
= control target key start
LH: loop header
LB: loop body
LE: loop exit
PB: predicated region body
PF: predicated region fallthrough
CT: control target
= control target key end

     0   :  { %vm52_vm0 = vcmask 261120   ;;  %vm108_vm1 = vcmask 523264   ;;  %s187_s1 = inlined_call_operand.vmem [shape: bf16[32,64], index: 1, kind: input, shape index: {}]   ;;  %s188_s0 = inlined_call_operand.vmem [shape: bf16[32,32], index: 0, kind: input, shape index: {}]   ;;  %s189_s2 = inlined_call_operand.vmem [shape: f32[1,64], index: 2, kind: input, shape index: {}]   ;;  %s190_s3 = inlined_call_operand.vmem [shape: f32[32,64], index: 3, kind: output, shape index: {}]  }
   0x1   :  { %v136_v0 = vld [vmem:[%s187_s1] sm:$0xff]   ;;  %v137_v1 = vld [vmem:[%s187_s1 + $0x8] sm:$0xff]  }
   0x2   :  { %128 = vmatprep.subr.bf16.mxu0 %v136_v0  ;;  %v138_v2 = vld [vmem:[%s188_s0] sm:$0xff]   ;;  %v139_v3 = vld [vmem:[%s188_s0 + $0x8] sm:$0xff]  }
   0x3   :  { %129 = vmatpush3.bf16.msra.mxu0 %v136_v0  ;;  %132 = vmatprep.mubr.msk.bf16.mxu0 %vm52_vm0, %v138_v2  ;;  %v117_v4 = vld [vmem:[%s189_s2] ss:$0 sm:$0xff] }
   0x4   :  { %130 = vmatprep.subr.bf16.mxu0 %v137_v1 }
   0x7   :  { %131 = vmatpush3.bf16.msra.mxu0 %v137_v1 }
   0xa   :  { %133 = vmatmul.mubr.msk.bf16.vlgmr.msra.gmra.mrb[0].mxu0 %vm52_vm0, %v139_v3 }
  0xdd   :  { %v134_v5 = vpop.f32.mrb[0].mxu0 }
  0xde   :  { %v102_v6 = vadd.f32 %v134_v5, %v117_v4  ;;  %v93_v7 = vpop.f32.mrb[1].mxu0 }
  0xdf   :  { %v94_v8 = vadd.f32 %v117_v4, %v93_v7  ;;  %v135_v9 = vpop.f32.mrb[2].mxu0 }
  0xe0   :  { %111 = vst.msk [vmem:[%s190_s3 + $0x10] sm:$0xff] %vm108_vm1, %v102_v6  ;;  %v105_v10 = vadd.f32 %v135_v9, %v117_v4  ;;  %v96_v11 = vpop.f32.mrb[3].mxu0 }
  0xe1   :  { %109 = vst.msk [vmem:[%s190_s3] sm:$0xff] %vm108_vm1, %v94_v8  ;;  %v97_v12 = vadd.f32 %v117_v4, %v96_v11 }
  0xe2   :  { %112 = vst.msk [vmem:[%s190_s3 + $0x18] sm:$0xff] %vm108_vm1, %v105_v10 }
  0xe3   :  { %110 = vst.msk [vmem:[%s190_s3 + $0x8] sm:$0xff] %vm108_vm1, %v97_v12 }

// kernel: tile.38
= control target key start
LH: loop header
LB: loop body
LE: loop exit
PB: predicated region body
PF: predicated region fallthrough
CT: control target
= control target key end

     0   :  { %s22_s0 = inlined_call_operand.vmem [shape: f32[8], index: 0, kind: input, shape index: {}]   ;;  %s23_s1 = inlined_call_operand.vmem [shape: f32[4,8], index: 1, kind: output, shape index: {}]  }
   0x1   :  { %v4_v0 = vld [vmem:[%s22_s0] ss:$0 sm:$0xff] }
   0x2   :  { %5 = vst [vmem:[%s23_s1] sm:$0xf] %v4_v0 }

// kernel: tile.39
= control target key start
LH: loop header
LB: loop body
LE: loop exit
PB: predicated region body
PF: predicated region fallthrough
CT: control target
= control target key end

     0   :  { %vm7_vm0 = vcmask 64512   ;;  %s37_s8 = smov 8   ;;  %s38_s9 = smov 16   ;;  %vm13_vm1 = vcmask 261312   ;;  %vm19_vm2 = vcmask 195712   ;;  %vm25_vm3 = vcmask 130112   ;;  %s55_s0 = inlined_call_operand.vmem [shape: f32[4,8], index: 0, kind: input, shape index: {}]   ;;  %s56_s1 = inlined_call_operand.vmem [shape: f32[1,32], index: 1, kind: output, shape index: {}]  }
   0x1   :  { %v4_v0 = vld [vmem:[%s55_s0] sm:$0xf]  ;;  %s36_s0 = smov 24  }
   0x2   :  { %5 = vst [vmem:[#allocation1] sm:$0xf] %v4_v0 }
   0x9   :  { %v10_v1 = vld [vmem:[#allocation1 + $0x3] sm:$0x1]   ;;  %v22_v2 = vld [vmem:[#allocation1 + $0x1] sm:$0x1]   ;;  %v6_v3 = vld [vmem:[#allocation1] sm:$0x1]  }
   0xa   :  { %11 = vrot.lane.b32.xlu0 %v10_v1, %s36_s0  ;;  %23 = vrot.lane.b32.xlu1 %v22_v2, %s37_s8  ;;  %v16_v4 = vld [vmem:[#allocation1 + $0x2] sm:$0x1]   ;;  %8 = vst.msk [vmem:[#allocation0] sm:$0x1] %vm7_vm0, %v6_v3  }
   0xe   :  { %17 = vrot.lane.b32.xlu0 %v16_v4, %s38_s9 }
  0x7c   :  { %v12_v5 = vpop.permute.xlu0 %11   ;;  %v24_v6 = vpop.permute.xlu1 %23  }
  0x7d   :  { %14 = vst.msk [vmem:[#allocation0] sm:$0x1] %vm13_vm1, %v12_v5  }
  0x80   :  { %v18_v7 = vpop.permute.xlu0 %17  }
  0x81   :  { %20 = vst.msk [vmem:[#allocation0] sm:$0x1] %vm19_vm2, %v18_v7  }
  0x82   :  { %26 = vst.msk [vmem:[#allocation0] sm:$0x1] %vm25_vm3, %v24_v6  }
  0x89   :  { %v30_v8 = vld [vmem:[#allocation0] sm:$0x1] }
  0x8a   :  { %32 = vst [vmem:[%s56_s1] sm:$0x1] %v30_v8 }

// kernel: unet_apply.76
= control target key start
LH: loop header
LB: loop body
LE: loop exit
PB: predicated region body
PF: predicated region fallthrough
CT: control target
= control target key end

     0   :  { %vm86_vm0 = vcmask 130048   ;;  %vm208_vm1 = vcmask 261120   ;;  %s407_s1 = inlined_call_operand.vmem [shape: bf16[16,32], index: 1, kind: input, shape index: {}]   ;;  %s408_s0 = inlined_call_operand.vmem [shape: bf16[128,16], index: 0, kind: input, shape index: {}]   ;;  %s409_s2 = inlined_call_operand.vmem [shape: f32[1,32], index: 2, kind: input, shape index: {}]   ;;  %s410_s3 = inlined_call_operand.vmem [shape: f32[128,32], index: 3, kind: output, shape index: {}]  }
   0x1   :  { %v276_v0 = vld [vmem:[%s407_s1] sm:$0xff]   ;;  %v279_v3 = vld [vmem:[%s408_s0 + $0x8] sm:$0xff]   ;;  %v281_v5 = vld [vmem:[%s408_s0 + $0x10] sm:$0xff]  }
   0x2   :  { %v277_v1 = vld [vmem:[%s408_s0] sm:$0xff]   ;;  %256 = vmatprep.subr.bf16.mxu0 %v276_v0  ;;  %274 = vmatprep.subr.bf16.mxu1 %v276_v0  ;;  %v280_v4 = vld [vmem:[%s408_s0 + $0x28] sm:$0xff]   ;;  %v282_v6 = vld [vmem:[%s408_s0 + $0x30] sm:$0xff]  }
   0x3   :  { %v278_v2 = vld [vmem:[%s408_s0 + $0x20] sm:$0xff]   ;;  %257 = vmatpush3.bf16.msra.mxu0 %v276_v0  ;;  %275 = vmatpush3.bf16.msra.mxu1 %v276_v0  ;;  %v283_v7 = vld [vmem:[%s408_s0 + $0x18] sm:$0xff]  }
   0x4   :  { %258 = vmatprep.mubr.msk.bf16.mxu0 %vm86_vm0, %v277_v1  ;;  %266 = vmatprep.mubr.msk.bf16.mxu1 %vm86_vm0, %v278_v2  ;;  %v284_v8 = vld [vmem:[%s408_s0 + $0x38] sm:$0xff]   ;;  %v229_v9 = vld [vmem:[%s409_s2] ss:$0 sm:$0xff] }
   0x6   :  { %259 = vmatmul.mubr.msk.bf16.vlgmr.msra.gmra.mrb[0].mxu0 %vm86_vm0, %v279_v3  ;;  %267 = vmatmul.mubr.msk.bf16.vlgmr.msra.gmra.mrb[0].mxu1 %vm86_vm0, %v280_v4 }
   0x7   :  { %262 = vmatprep.mubr.msk.bf16.mxu0 %vm86_vm0, %v281_v5  ;;  %270 = vmatprep.mubr.msk.bf16.mxu1 %vm86_vm0, %v282_v6 }
   0xe   :  { %263 = vmatmul.mubr.msk.bf16.gmra.mrb[4].mxu0 %vm86_vm0, %v283_v7  ;;  %271 = vmatmul.mubr.msk.bf16.gmra.mrb[4].mxu1 %vm86_vm0, %v284_v8 }
  0xd9   :  { %v260_v10 = vpop.f32.mrb[0].mxu0  ;;  %v268_v11 = vpop.f32.mrb[0].mxu1 }
  0xda   :  { %v154_v12 = vadd.f32 %v260_v10, %v229_v9  ;;  %v186_v13 = vadd.f32 %v268_v11, %v229_v9  ;;  %v145_v14 = vpop.f32.mrb[1].mxu0  ;;  %v177_v15 = vpop.f32.mrb[1].mxu1 }
  0xdb   :  { %v146_v16 = vadd.f32 %v229_v9, %v145_v14  ;;  %v178_v17 = vadd.f32 %v229_v9, %v177_v15  ;;  %v261_v18 = vpop.f32.mrb[2].mxu0  ;;  %v269_v19 = vpop.f32.mrb[2].mxu1 }
  0xdc   :  { %211 = vst.msk [vmem:[%s410_s3 + $0x10] sm:$0xff] %vm208_vm1, %v154_v12  ;;  %219 = vst.msk [vmem:[%s410_s3 + $0x50] sm:$0xff] %vm208_vm1, %v186_v13  ;;  %v157_v20 = vadd.f32 %v261_v18, %v229_v9  ;;  %v189_v21 = vadd.f32 %v269_v19, %v229_v9  ;;  %v148_v22 = vpop.f32.mrb[3].mxu0  ;;  %v180_v23 = vpop.f32.mrb[3].mxu1 }
  0xdd   :  { %209 = vst.msk [vmem:[%s410_s3] sm:$0xff] %vm208_vm1, %v146_v16  ;;  %217 = vst.msk [vmem:[%s410_s3 + $0x40] sm:$0xff] %vm208_vm1, %v178_v17  ;;  %v149_v24 = vadd.f32 %v229_v9, %v148_v22  ;;  %v181_v25 = vadd.f32 %v229_v9, %v180_v23 }
  0xde   :  { %212 = vst.msk [vmem:[%s410_s3 + $0x18] sm:$0xff] %vm208_vm1, %v157_v20  ;;  %220 = vst.msk [vmem:[%s410_s3 + $0x58] sm:$0xff] %vm208_vm1, %v189_v21 }
  0xdf   :  { %210 = vst.msk [vmem:[%s410_s3 + $0x8] sm:$0xff] %vm208_vm1, %v149_v24  ;;  %218 = vst.msk [vmem:[%s410_s3 + $0x48] sm:$0xff] %vm208_vm1, %v181_v25 }
  0xe1   :  { %v264_v26 = vpop.f32.mrb[4].mxu0  ;;  %v272_v27 = vpop.f32.mrb[4].mxu1 }
  0xe2   :  { %v170_v28 = vadd.f32 %v264_v26, %v229_v9  ;;  %v202_v29 = vadd.f32 %v272_v27, %v229_v9  ;;  %v161_v30 = vpop.f32.mrb[5].mxu0  ;;  %v193_v31 = vpop.f32.mrb[5].mxu1 }
  0xe3   :  { %v162_v32 = vadd.f32 %v229_v9, %v161_v30  ;;  %v194_v33 = vadd.f32 %v229_v9, %v193_v31  ;;  %v265_v34 = vpop.f32.mrb[6].mxu0  ;;  %v273_v35 = vpop.f32.mrb[6].mxu1 }
  0xe4   :  { %215 = vst.msk [vmem:[%s410_s3 + $0x30] sm:$0xff] %vm208_vm1, %v170_v28  ;;  %223 = vst.msk [vmem:[%s410_s3 + $0x70] sm:$0xff] %vm208_vm1, %v202_v29  ;;  %v173_v36 = vadd.f32 %v265_v34, %v229_v9  ;;  %v205_v37 = vadd.f32 %v273_v35, %v229_v9  ;;  %v164_v38 = vpop.f32.mrb[7].mxu0  ;;  %v196_v39 = vpop.f32.mrb[7].mxu1 }
  0xe5   :  { %213 = vst.msk [vmem:[%s410_s3 + $0x20] sm:$0xff] %vm208_vm1, %v162_v32  ;;  %221 = vst.msk [vmem:[%s410_s3 + $0x60] sm:$0xff] %vm208_vm1, %v194_v33  ;;  %v165_v40 = vadd.f32 %v229_v9, %v164_v38  ;;  %v197_v41 = vadd.f32 %v229_v9, %v196_v39 }
  0xe6   :  { %216 = vst.msk [vmem:[%s410_s3 + $0x38] sm:$0xff] %vm208_vm1, %v173_v36  ;;  %224 = vst.msk [vmem:[%s410_s3 + $0x78] sm:$0xff] %vm208_vm1, %v205_v37 }
  0xe7   :  { %214 = vst.msk [vmem:[%s410_s3 + $0x28] sm:$0xff] %vm208_vm1, %v165_v40  ;;  %222 = vst.msk [vmem:[%s410_s3 + $0x68] sm:$0xff] %vm208_vm1, %v197_v41 }

// kernel: unet_apply.72
= control target key start
LH: loop header
LB: loop body
LE: loop exit
PB: predicated region body
PF: predicated region fallthrough
CT: control target
= control target key end

     0   :  { %v850_v0 = vmov 0   ;;  %vm214_vm0 = vcmask 130048   ;;  %vm689_vm1 = vcmask 1040384   ;;  %vm691_vm2 = vcmask 123904   ;;  %s1146_s3 = inlined_call_operand.vmem [shape: bf16[144,16], index: 3, kind: input, shape index: {}]   ;;  %s1147_s2 = inlined_call_operand.vmem [shape: bf16[144,16], index: 2, kind: input, shape index: {}]   ;;  %s1148_s1 = inlined_call_operand.vmem [shape: bf16[128,144], index: 1, kind: input, shape index: {}]   ;;  %s1149_s0 = inlined_call_operand.vmem [shape: bf16[128,144], index: 0, kind: input, shape index: {}]   ;;  %s1150_s4 = inlined_call_operand.vmem [shape: f32[128,16], index: 4, kind: output, shape index: {0}]   ;;  %s1151_s5 = inlined_call_operand.vmem [shape: f32[1,2,16], index: 5, kind: output, shape index: {1}]  }
   0x1   :  { %239 = vmatprep.subr.bf16.mxu1 %v850_v0  ;;  %486 = vmatprep.subr.bf16.mxu0 %v850_v0  ;;  %v784_v1 = vld [vmem:[%s1146_s3] sm:$0xff]   ;;  %v786_v3 = vld [vmem:[%s1146_s3 + $0x8] sm:$0xff]   ;;  %v788_v5 = vld [vmem:[%s1146_s3 + $0x10] sm:$0xff]  }
   0x2   :  { %v785_v2 = vld [vmem:[%s1147_s2] sm:$0xff]   ;;  %240 = vmatpush1.bf16.msra.mxu1 %v784_v1  ;;  %v787_v4 = vld [vmem:[%s1147_s2 + $0x8] sm:$0xff]   ;;  %v789_v6 = vld [vmem:[%s1147_s2 + $0x10] sm:$0xff]  }
   0x3   :  { %487 = vmatpush1.bf16.msra.mxu0 %v785_v2  ;;  %241 = vmatprep.subr.bf16.mxu1 %v850_v0  ;;  %v790_v7 = vld [vmem:[%s1146_s3 + $0x18] sm:$0xff]   ;;  %v792_v9 = vld [vmem:[%s1146_s3 + $0x20] sm:$0xff]   ;;  %v794_v11 = vld [vmem:[%s1146_s3 + $0x28] sm:$0xff]  }
   0x4   :  { %488 = vmatprep.subr.bf16.mxu0 %v850_v0  ;;  %v791_v8 = vld [vmem:[%s1147_s2 + $0x18] sm:$0xff]   ;;  %v793_v10 = vld [vmem:[%s1147_s2 + $0x20] sm:$0xff]   ;;  %v795_v12 = vld [vmem:[%s1147_s2 + $0x28] sm:$0xff]  }
   0x5   :  { %v804_v13 = vld [vmem:[%s1148_s1 + $0x4] ss:$8 sps:$4 sm:$0xff]   ;;  %v796_v15 = vld [vmem:[%s1146_s3 + $0x30] sm:$0xff]   ;;  %v798_v17 = vld [vmem:[%s1146_s3 + $0x38] sm:$0xff]  }
   0x6   :  { %242 = vmatpush1.bf16.msra.mxu1 %v786_v3  ;;  %v807_v14 = vld [vmem:[%s1149_s0 + $0x4] ss:$8 sps:$4 sm:$0xff]   ;;  %726 = vmatprep.mubr.msk.bf16.mxu1 %vm214_vm0, %v804_v13  ;;  %v797_v16 = vld [vmem:[%s1147_s2 + $0x30] sm:$0xff]   ;;  %v799_v18 = vld [vmem:[%s1147_s2 + $0x38] sm:$0xff]  }
   0x7   :  { %489 = vmatpush1.bf16.msra.mxu0 %v787_v4  ;;  %243 = vmatprep.subr.bf16.mxu1 %v850_v0  ;;  %v800_v19 = vld [vmem:[%s1146_s3 + $0x40] sm:$0xff]   ;;  %v808_v23 = vld [vmem:[%s1148_s1 + $0x14] ss:$8 sps:$4 sm:$0xff]   ;;  %v812_v25 = vld [vmem:[%s1148_s1 + $0x10] ss:$8 sps:$4 sm:$0xff]  }
   0x8   :  { %490 = vmatprep.subr.bf16.mxu0 %v850_v0  ;;  %759 = vmatprep.mubr.msk.bf16.mxu0 %vm214_vm0, %v807_v14  ;;  %v801_v20 = vld [vmem:[%s1147_s2 + $0x40] sm:$0xff]   ;;  %v810_v24 = vld [vmem:[%s1149_s0 + $0x14] ss:$8 sps:$4 sm:$0xff]   ;;  %v813_v26 = vld [vmem:[%s1149_s0 + $0x10] ss:$8 sps:$4 sm:$0xff]  }
   0x9   :  { %v802_v21 = vld [vmem:[%s1148_s1] ss:$8 sps:$4 sm:$0xff]   ;;  %v814_v27 = vld [vmem:[%s1148_s1 + $0x24] ss:$8 sps:$4 sm:$0xff]   ;;  %v820_v31 = vld [vmem:[%s1148_s1 + $0x34] ss:$8 sps:$4 sm:$0xff]  }
   0xa   :  { %244 = vmatpush1.bf16.msra.mxu1 %v788_v5  ;;  %v805_v22 = vld [vmem:[%s1149_s0] ss:$8 sps:$4 sm:$0xff]   ;;  %v816_v28 = vld [vmem:[%s1149_s0 + $0x24] ss:$8 sps:$4 sm:$0xff]   ;;  %v822_v32 = vld [vmem:[%s1149_s0 + $0x34] ss:$8 sps:$4 sm:$0xff]  }
   0xb   :  { %491 = vmatpush1.bf16.msra.mxu0 %v789_v6  ;;  %245 = vmatprep.subr.bf16.mxu1 %v850_v0  ;;  %v818_v29 = vld [vmem:[%s1148_s1 + $0x20] ss:$8 sps:$4 sm:$0xff]   ;;  %v824_v33 = vld [vmem:[%s1148_s1 + $0x30] ss:$8 sps:$4 sm:$0xff]   ;;  %v826_v35 = vld [vmem:[%s1148_s1 + $0x44] ss:$8 sps:$4 sm:$0xff]  }
   0xc   :  { %492 = vmatprep.subr.bf16.mxu0 %v850_v0  ;;  %v819_v30 = vld [vmem:[%s1149_s0 + $0x20] ss:$8 sps:$4 sm:$0xff]   ;;  %v825_v34 = vld [vmem:[%s1149_s0 + $0x30] ss:$8 sps:$4 sm:$0xff]   ;;  %v828_v36 = vld [vmem:[%s1149_s0 + $0x44] ss:$8 sps:$4 sm:$0xff]  }
   0xd   :  { %v830_v37 = vld [vmem:[%s1148_s1 + $0x40] ss:$8 sps:$4 sm:$0xff]   ;;  %v832_v39 = vld [vmem:[%s1148_s1 + $0x54] ss:$8 sps:$4 sm:$0xff]   ;;  %v836_v41 = vld [vmem:[%s1148_s1 + $0x50] ss:$8 sps:$4 sm:$0xff]  }
   0xe   :  { %246 = vmatpush1.bf16.msra.mxu1 %v790_v7  ;;  %v831_v38 = vld [vmem:[%s1149_s0 + $0x40] ss:$8 sps:$4 sm:$0xff]   ;;  %v834_v40 = vld [vmem:[%s1149_s0 + $0x54] ss:$8 sps:$4 sm:$0xff]   ;;  %v837_v42 = vld [vmem:[%s1149_s0 + $0x50] ss:$8 sps:$4 sm:$0xff]  }
   0xf   :  { %493 = vmatpush1.bf16.msra.mxu0 %v791_v8  ;;  %247 = vmatprep.subr.bf16.mxu1 %v850_v0  ;;  %v838_v43 = vld [vmem:[%s1148_s1 + $0x64] ss:$8 sps:$4 sm:$0xff]   ;;  %v842_v45 = vld [vmem:[%s1148_s1 + $0x60] ss:$8 sps:$4 sm:$0xff]   ;;  %v844_v47 = vld [vmem:[%s1148_s1 + $0x74] ss:$8 sps:$4 sm:$0xff]  }
  0x10   :  { %494 = vmatprep.subr.bf16.mxu0 %v850_v0  ;;  %v840_v44 = vld [vmem:[%s1149_s0 + $0x64] ss:$8 sps:$4 sm:$0xff]   ;;  %v843_v46 = vld [vmem:[%s1149_s0 + $0x60] ss:$8 sps:$4 sm:$0xff]   ;;  %v846_v48 = vld [vmem:[%s1149_s0 + $0x74] ss:$8 sps:$4 sm:$0xff]  }
  0x11   :  { %v848_v49 = vld [vmem:[%s1148_s1 + $0x70] ss:$8 sps:$4 sm:$0xff]  }
  0x12   :  { %248 = vmatpush1.bf16.msra.mxu1 %v792_v9  ;;  %v849_v50 = vld [vmem:[%s1149_s0 + $0x70] ss:$8 sps:$4 sm:$0xff]  }
  0x13   :  { %495 = vmatpush1.bf16.msra.mxu0 %v793_v10  ;;  %249 = vmatprep.subr.bf16.mxu1 %v850_v0 }
  0x14   :  { %496 = vmatprep.subr.bf16.mxu0 %v850_v0 }
  0x16   :  { %250 = vmatpush1.bf16.msra.mxu1 %v794_v11 }
  0x17   :  { %497 = vmatpush1.bf16.msra.mxu0 %v795_v12  ;;  %251 = vmatprep.subr.bf16.mxu1 %v850_v0 }
  0x18   :  { %498 = vmatprep.subr.bf16.mxu0 %v850_v0 }
  0x1a   :  { %252 = vmatpush1.bf16.msra.mxu1 %v796_v15 }
  0x1b   :  { %499 = vmatpush1.bf16.msra.mxu0 %v797_v16  ;;  %253 = vmatprep.subr.bf16.mxu1 %v850_v0 }
  0x1c   :  { %500 = vmatprep.subr.bf16.mxu0 %v850_v0 }
  0x1e   :  { %254 = vmatpush1.bf16.msra.mxu1 %v798_v17 }
  0x1f   :  { %501 = vmatpush1.bf16.msra.mxu0 %v799_v18  ;;  %255 = vmatprep.subr.bf16.mxu1 %v850_v0 }
  0x20   :  { %502 = vmatprep.subr.bf16.mxu0 %v850_v0 }
  0x22   :  { %256 = vmatpush1.bf16.msra.mxu1 %v800_v19 }
  0x23   :  { %503 = vmatpush1.bf16.msra.mxu0 %v801_v20 }
  0x25   :  { %272 = vmatmul.mubr.bf16.vlgmr.msra.gmra.mrb[0].mxu1 %v802_v21 }
  0x26   :  { %519 = vmatmul.mubr.bf16.vlgmr.msra.gmra.mrb[0].mxu0 %v805_v22  ;;  %727 = vmatprep.mubr.msk.bf16.mxu1 %vm214_vm0, %v808_v23 }
  0x27   :  { %760 = vmatprep.mubr.msk.bf16.mxu0 %vm214_vm0, %v810_v24 }
  0x2d   :  { %280 = vmatmul.mubr.bf16.gmra.mrb[4].mxu1 %v812_v25 }
  0x2e   :  { %527 = vmatmul.mubr.bf16.gmra.mrb[4].mxu0 %v813_v26  ;;  %728 = vmatprep.mubr.msk.bf16.mxu1 %vm214_vm0, %v814_v27 }
  0x2f   :  { %761 = vmatprep.mubr.msk.bf16.mxu0 %vm214_vm0, %v816_v28 }
  0x35   :  { %288 = vmatmul.mubr.bf16.gmra.mrb[8].mxu1 %v818_v29 }
  0x36   :  { %535 = vmatmul.mubr.bf16.gmra.mrb[8].mxu0 %v819_v30  ;;  %729 = vmatprep.mubr.msk.bf16.mxu1 %vm214_vm0, %v820_v31 }
  0x37   :  { %762 = vmatprep.mubr.msk.bf16.mxu0 %vm214_vm0, %v822_v32 }
  0x3d   :  { %296 = vmatmul.mubr.bf16.gmra.mrb[12].mxu1 %v824_v33 }
  0x3e   :  { %543 = vmatmul.mubr.bf16.gmra.mrb[12].mxu0 %v825_v34  ;;  %730 = vmatprep.mubr.msk.bf16.mxu1 %vm214_vm0, %v826_v35 }
  0x3f   :  { %763 = vmatprep.mubr.msk.bf16.mxu0 %vm214_vm0, %v828_v36 }
  0x45   :  { %304 = vmatmul.mubr.bf16.gmra.mrb[16].mxu1 %v830_v37 }
  0x46   :  { %551 = vmatmul.mubr.bf16.gmra.mrb[16].mxu0 %v831_v38  ;;  %731 = vmatprep.mubr.msk.bf16.mxu1 %vm214_vm0, %v832_v39 }
  0x47   :  { %764 = vmatprep.mubr.msk.bf16.mxu0 %vm214_vm0, %v834_v40 }
  0x4d   :  { %312 = vmatmul.mubr.bf16.gmra.mrb[20].mxu1 %v836_v41 }
  0x4e   :  { %559 = vmatmul.mubr.bf16.gmra.mrb[20].mxu0 %v837_v42  ;;  %732 = vmatprep.mubr.msk.bf16.mxu1 %vm214_vm0, %v838_v43 }
  0x4f   :  { %765 = vmatprep.mubr.msk.bf16.mxu0 %vm214_vm0, %v840_v44 }
  0x55   :  { %320 = vmatmul.mubr.bf16.gmra.mrb[24].mxu1 %v842_v45 }
  0x56   :  { %567 = vmatmul.mubr.bf16.gmra.mrb[24].mxu0 %v843_v46  ;;  %733 = vmatprep.mubr.msk.bf16.mxu1 %vm214_vm0, %v844_v47 }
  0x57   :  { %766 = vmatprep.mubr.msk.bf16.mxu0 %vm214_vm0, %v846_v48 }
  0x5d   :  { %328 = vmatmul.mubr.bf16.gmra.mrb[28].mxu1 %v848_v49 }
  0x5e   :  { %575 = vmatmul.mubr.bf16.gmra.mrb[28].mxu0 %v849_v50 }
  0xf8   :  { %v273_v51 = vpop.f32.mrb[0].mxu1 }
  0xf9   :  { %v520_v52 = vpop.f32.mrb[0].mxu0  ;;  %v275_v53 = vpop.f32.mrb[1].mxu1 }
  0xfa   :  { %v521_v54 = vadd.f32 %v520_v52, %v273_v51  ;;  %v522_v55 = vpop.f32.mrb[1].mxu0  ;;  %v276_v56 = vpop.f32.mrb[2].mxu1 }
  0xfb   :  { %v523_v57 = vpop.f32.mrb[2].mxu0  ;;  %v278_v58 = vpop.f32.mrb[3].mxu1 }
  0xfc   :  { %583 = vst.msk [vmem:[%s1150_s4] sm:$0xff] %vm214_vm0, %v521_v54  ;;  %v636_v59 = vmul.f32 %v521_v54, %v521_v54  ;;  %v524_v60 = vadd.f32 %v523_v57, %v276_v56  ;;  %v525_v61 = vpop.f32.mrb[3].mxu0  ;;  %v599_v62 = vsel %vm214_vm0, %v521_v54, 0.0 }
  0xfe   :  { %584 = vst.msk [vmem:[%s1150_s4 + $0x8] sm:$0xff] %vm214_vm0, %v524_v60  ;;  %v600_v63 = vsel %vm214_vm0, %v524_v60, 0.0  ;;  %v637_v0 = vmul.f32 %v524_v60, %v524_v60  ;;  %v652_v2 = vsel %vm214_vm0, %v636_v59, 0.0 }
  0xff   :  { %v601_v1 = vadd.f32 %v600_v63, %v599_v62 }
 0x100   :  { %v653_v3 = vsel %vm214_vm0, %v637_v0, 0.0  ;;  %v281_v4 = vpop.f32.mrb[4].mxu1 }
 0x101   :  { %v654_v5 = vadd.f32 %v653_v3, %v652_v2  ;;  %v528_v6 = vpop.f32.mrb[4].mxu0  ;;  %v283_v7 = vpop.f32.mrb[5].mxu1 }
 0x102   :  { %v529_v8 = vadd.f32 %v528_v6, %v281_v4  ;;  %v530_v9 = vpop.f32.mrb[5].mxu0  ;;  %v284_v10 = vpop.f32.mrb[6].mxu1 }
 0x103   :  { %v531_v11 = vpop.f32.mrb[6].mxu0  ;;  %v286_v12 = vpop.f32.mrb[7].mxu1 }
 0x104   :  { %585 = vst.msk [vmem:[%s1150_s4 + $0x10] sm:$0xff] %vm214_vm0, %v529_v8  ;;  %v602_v13 = vsel %vm214_vm0, %v529_v8, 0.0  ;;  %v638_v14 = vmul.f32 %v529_v8, %v529_v8  ;;  %v532_v15 = vadd.f32 %v531_v11, %v284_v10  ;;  %v533_v16 = vpop.f32.mrb[7].mxu0 }
 0x105   :  { %v603_v17 = vadd.f32 %v602_v13, %v601_v1 }
 0x106   :  { %v655_v18 = vsel %vm214_vm0, %v638_v14, 0.0  ;;  %586 = vst.msk [vmem:[%s1150_s4 + $0x18] sm:$0xff] %vm214_vm0, %v532_v15  ;;  %v604_v19 = vsel %vm214_vm0, %v532_v15, 0.0  ;;  %v639_v20 = vmul.f32 %v532_v15, %v532_v15 }
 0x107   :  { %v656_v21 = vadd.f32 %v655_v18, %v654_v5  ;;  %v605_v22 = vadd.f32 %v604_v19, %v603_v17 }
 0x108   :  { %v657_v23 = vsel %vm214_vm0, %v639_v20, 0.0  ;;  %v289_v24 = vpop.f32.mrb[8].mxu1 }
 0x109   :  { %v658_v25 = vadd.f32 %v657_v23, %v656_v21  ;;  %v536_v26 = vpop.f32.mrb[8].mxu0  ;;  %v291_v27 = vpop.f32.mrb[9].mxu1 }
 0x10a   :  { %v537_v28 = vadd.f32 %v536_v26, %v289_v24  ;;  %v538_v29 = vpop.f32.mrb[9].mxu0  ;;  %v292_v30 = vpop.f32.mrb[10].mxu1 }
 0x10b   :  { %v539_v31 = vpop.f32.mrb[10].mxu0  ;;  %v294_v32 = vpop.f32.mrb[11].mxu1 }
 0x10c   :  { %587 = vst.msk [vmem:[%s1150_s4 + $0x20] sm:$0xff] %vm214_vm0, %v537_v28  ;;  %v606_v33 = vsel %vm214_vm0, %v537_v28, 0.0  ;;  %v640_v34 = vmul.f32 %v537_v28, %v537_v28  ;;  %v540_v35 = vadd.f32 %v539_v31, %v292_v30  ;;  %v541_v36 = vpop.f32.mrb[11].mxu0 }
 0x10d   :  { %v607_v37 = vadd.f32 %v606_v33, %v605_v22 }
 0x10e   :  { %v659_v38 = vsel %vm214_vm0, %v640_v34, 0.0  ;;  %588 = vst.msk [vmem:[%s1150_s4 + $0x28] sm:$0xff] %vm214_vm0, %v540_v35  ;;  %v608_v39 = vsel %vm214_vm0, %v540_v35, 0.0  ;;  %v641_v40 = vmul.f32 %v540_v35, %v540_v35 }
 0x10f   :  { %v660_v41 = vadd.f32 %v659_v38, %v658_v25  ;;  %v609_v42 = vadd.f32 %v608_v39, %v607_v37 }
 0x110   :  { %v661_v43 = vsel %vm214_vm0, %v641_v40, 0.0  ;;  %v297_v44 = vpop.f32.mrb[12].mxu1 }
 0x111   :  { %v662_v45 = vadd.f32 %v661_v43, %v660_v41  ;;  %v544_v46 = vpop.f32.mrb[12].mxu0  ;;  %v299_v47 = vpop.f32.mrb[13].mxu1 }
 0x112   :  { %v545_v48 = vadd.f32 %v544_v46, %v297_v44  ;;  %v546_v49 = vpop.f32.mrb[13].mxu0  ;;  %v300_v50 = vpop.f32.mrb[14].mxu1 }
 0x113   :  { %v547_v51 = vpop.f32.mrb[14].mxu0  ;;  %v302_v52 = vpop.f32.mrb[15].mxu1 }
 0x114   :  { %589 = vst.msk [vmem:[%s1150_s4 + $0x30] sm:$0xff] %vm214_vm0, %v545_v48  ;;  %v610_v53 = vsel %vm214_vm0, %v545_v48, 0.0  ;;  %v642_v54 = vmul.f32 %v545_v48, %v545_v48  ;;  %v548_v55 = vadd.f32 %v547_v51, %v300_v50  ;;  %v549_v56 = vpop.f32.mrb[15].mxu0 }
 0x115   :  { %v611_v57 = vadd.f32 %v610_v53, %v609_v42 }
 0x116   :  { %v663_v58 = vsel %vm214_vm0, %v642_v54, 0.0  ;;  %590 = vst.msk [vmem:[%s1150_s4 + $0x38] sm:$0xff] %vm214_vm0, %v548_v55  ;;  %v612_v59 = vsel %vm214_vm0, %v548_v55, 0.0  ;;  %v643_v60 = vmul.f32 %v548_v55, %v548_v55 }
 0x117   :  { %v664_v61 = vadd.f32 %v663_v58, %v662_v45  ;;  %v613_v62 = vadd.f32 %v612_v59, %v611_v57 }
 0x118   :  { %v665_v63 = vsel %vm214_vm0, %v643_v60, 0.0  ;;  %v305_v0 = vpop.f32.mrb[16].mxu1 }
 0x119   :  { %v666_v1 = vadd.f32 %v665_v63, %v664_v61  ;;  %v552_v2 = vpop.f32.mrb[16].mxu0  ;;  %v307_v3 = vpop.f32.mrb[17].mxu1 }
 0x11a   :  { %v553_v4 = vadd.f32 %v552_v2, %v305_v0  ;;  %v554_v5 = vpop.f32.mrb[17].mxu0  ;;  %v308_v6 = vpop.f32.mrb[18].mxu1 }
 0x11b   :  { %v555_v7 = vpop.f32.mrb[18].mxu0  ;;  %v310_v8 = vpop.f32.mrb[19].mxu1 }
 0x11c   :  { %591 = vst.msk [vmem:[%s1150_s4 + $0x40] sm:$0xff] %vm214_vm0, %v553_v4  ;;  %v614_v9 = vsel %vm214_vm0, %v553_v4, 0.0  ;;  %v644_v10 = vmul.f32 %v553_v4, %v553_v4  ;;  %v556_v11 = vadd.f32 %v555_v7, %v308_v6  ;;  %v557_v12 = vpop.f32.mrb[19].mxu0 }
 0x11d   :  { %v615_v13 = vadd.f32 %v614_v9, %v613_v62 }
 0x11e   :  { %v667_v14 = vsel %vm214_vm0, %v644_v10, 0.0  ;;  %592 = vst.msk [vmem:[%s1150_s4 + $0x48] sm:$0xff] %vm214_vm0, %v556_v11  ;;  %v616_v15 = vsel %vm214_vm0, %v556_v11, 0.0  ;;  %v645_v16 = vmul.f32 %v556_v11, %v556_v11 }
 0x11f   :  { %v668_v17 = vadd.f32 %v667_v14, %v666_v1  ;;  %v617_v18 = vadd.f32 %v616_v15, %v615_v13 }
 0x120   :  { %v669_v19 = vsel %vm214_vm0, %v645_v16, 0.0  ;;  %v313_v20 = vpop.f32.mrb[20].mxu1 }
 0x121   :  { %v670_v21 = vadd.f32 %v669_v19, %v668_v17  ;;  %v560_v22 = vpop.f32.mrb[20].mxu0  ;;  %v315_v23 = vpop.f32.mrb[21].mxu1 }
 0x122   :  { %v561_v24 = vadd.f32 %v560_v22, %v313_v20  ;;  %v562_v25 = vpop.f32.mrb[21].mxu0  ;;  %v316_v26 = vpop.f32.mrb[22].mxu1 }
 0x123   :  { %v563_v27 = vpop.f32.mrb[22].mxu0  ;;  %v318_v28 = vpop.f32.mrb[23].mxu1 }
 0x124   :  { %593 = vst.msk [vmem:[%s1150_s4 + $0x50] sm:$0xff] %vm214_vm0, %v561_v24  ;;  %v618_v29 = vsel %vm214_vm0, %v561_v24, 0.0  ;;  %v646_v30 = vmul.f32 %v561_v24, %v561_v24  ;;  %v564_v31 = vadd.f32 %v563_v27, %v316_v26  ;;  %v565_v32 = vpop.f32.mrb[23].mxu0 }
 0x125   :  { %v619_v33 = vadd.f32 %v618_v29, %v617_v18 }
 0x126   :  { %v671_v34 = vsel %vm214_vm0, %v646_v30, 0.0  ;;  %594 = vst.msk [vmem:[%s1150_s4 + $0x58] sm:$0xff] %vm214_vm0, %v564_v31  ;;  %v620_v35 = vsel %vm214_vm0, %v564_v31, 0.0  ;;  %v647_v36 = vmul.f32 %v564_v31, %v564_v31 }
 0x127   :  { %v672_v37 = vadd.f32 %v671_v34, %v670_v21  ;;  %v621_v38 = vadd.f32 %v620_v35, %v619_v33 }
 0x128   :  { %v673_v39 = vsel %vm214_vm0, %v647_v36, 0.0  ;;  %v321_v40 = vpop.f32.mrb[24].mxu1 }
 0x129   :  { %v674_v41 = vadd.f32 %v673_v39, %v672_v37  ;;  %v568_v42 = vpop.f32.mrb[24].mxu0  ;;  %v323_v43 = vpop.f32.mrb[25].mxu1 }
 0x12a   :  { %v569_v44 = vadd.f32 %v568_v42, %v321_v40  ;;  %v570_v45 = vpop.f32.mrb[25].mxu0  ;;  %v324_v46 = vpop.f32.mrb[26].mxu1 }
 0x12b   :  { %v571_v47 = vpop.f32.mrb[26].mxu0  ;;  %v326_v48 = vpop.f32.mrb[27].mxu1 }
 0x12c   :  { %595 = vst.msk [vmem:[%s1150_s4 + $0x60] sm:$0xff] %vm214_vm0, %v569_v44  ;;  %v622_v49 = vsel %vm214_vm0, %v569_v44, 0.0  ;;  %v648_v50 = vmul.f32 %v569_v44, %v569_v44  ;;  %v572_v51 = vadd.f32 %v571_v47, %v324_v46  ;;  %v573_v52 = vpop.f32.mrb[27].mxu0 }
 0x12d   :  { %v623_v53 = vadd.f32 %v622_v49, %v621_v38 }
 0x12e   :  { %v675_v54 = vsel %vm214_vm0, %v648_v50, 0.0  ;;  %596 = vst.msk [vmem:[%s1150_s4 + $0x68] sm:$0xff] %vm214_vm0, %v572_v51  ;;  %v624_v55 = vsel %vm214_vm0, %v572_v51, 0.0  ;;  %v649_v56 = vmul.f32 %v572_v51, %v572_v51 }
 0x12f   :  { %v676_v57 = vadd.f32 %v675_v54, %v674_v41  ;;  %v625_v58 = vadd.f32 %v624_v55, %v623_v53 }
 0x130   :  { %v677_v59 = vsel %vm214_vm0, %v649_v56, 0.0  ;;  %v329_v60 = vpop.f32.mrb[28].mxu1 }
 0x131   :  { %v678_v61 = vadd.f32 %v677_v59, %v676_v57  ;;  %v576_v62 = vpop.f32.mrb[28].mxu0  ;;  %v331_v63 = vpop.f32.mrb[29].mxu1 }
 0x132   :  { %v577_v0 = vadd.f32 %v576_v62, %v329_v60  ;;  %v578_v1 = vpop.f32.mrb[29].mxu0  ;;  %v332_v2 = vpop.f32.mrb[30].mxu1 }
 0x133   :  { %v579_v3 = vpop.f32.mrb[30].mxu0  ;;  %v334_v4 = vpop.f32.mrb[31].mxu1 }
 0x134   :  { %597 = vst.msk [vmem:[%s1150_s4 + $0x70] sm:$0xff] %vm214_vm0, %v577_v0  ;;  %v626_v5 = vsel %vm214_vm0, %v577_v0, 0.0  ;;  %v650_v6 = vmul.f32 %v577_v0, %v577_v0  ;;  %v580_v7 = vadd.f32 %v579_v3, %v332_v2  ;;  %v581_v8 = vpop.f32.mrb[31].mxu0 }
 0x135   :  { %v627_v9 = vadd.f32 %v626_v5, %v625_v58 }
 0x136   :  { %v679_v10 = vsel %vm214_vm0, %v650_v6, 0.0  ;;  %598 = vst.msk [vmem:[%s1150_s4 + $0x78] sm:$0xff] %vm214_vm0, %v580_v7  ;;  %v628_v11 = vsel %vm214_vm0, %v580_v7, 0.0  ;;  %v651_v12 = vmul.f32 %v580_v7, %v580_v7 }
 0x137   :  { %v680_v13 = vadd.f32 %v679_v10, %v678_v61  ;;  %v629_v14 = vadd.f32 %v628_v11, %v627_v9 }
 0x138   :  { %v681_v15 = vsel %vm214_vm0, %v651_v12, 0.0 }
 0x139   :  { %v630_v16 = vrot.slane %v629_v14, 4  ;;  %v682_v17 = vadd.f32 %v681_v15, %v680_v13 }
 0x13b   :  { %v631_v18 = vadd.f32 %v630_v16, %v629_v14  ;;  %v683_v19 = vrot.slane %v682_v17, 4 }
 0x13d   :  { %v632_v20 = vrot.slane %v631_v18, 2  ;;  %v684_v21 = vadd.f32 %v683_v19, %v682_v17 }
 0x13f   :  { %v633_v22 = vadd.f32 %v632_v20, %v631_v18  ;;  %v685_v23 = vrot.slane %v684_v21, 2 }
 0x141   :  { %v634_v24 = vrot.slane %v633_v22, 1  ;;  %v686_v25 = vadd.f32 %v685_v23, %v684_v21 }
 0x143   :  { %v687_v26 = vrot.slane %v686_v25, 1  ;;  %v635_v27 = vadd.f32 %v634_v24, %v633_v22 }
 0x145   :  { %v688_v28 = vadd.f32 %v687_v26, %v686_v25 }
 0x147   :  { %v690_v29 = vsel %vm689_vm1, %v635_v27, %v688_v28 }
 0x148   :  { %692 = vst.msk [vmem:[%s1151_s5] sm:$0x3] %vm691_vm2, %v690_v29 }

// kernel: unet_apply.81
= control target key start
LH: loop header
LB: loop body
LE: loop exit
PB: predicated region body
PF: predicated region fallthrough
CT: control target
= control target key end

     0   :  { %s1147_s14 = smov 0   ;;  %s1358_s0 = inlined_call_operand.vmem [shape: f32[512,8], index: 0, kind: input, shape index: {}]   ;;  %s1359_s1 = inlined_call_operand.vmem [shape: f32[8,1], index: 1, kind: input, shape index: {}]   ;;  %s1360_s2 = inlined_call_operand.<no memory space> [shape: f32[1,1], index: 2, kind: input, shape index: {}]   ;;  %s1361_s3 = inlined_call_operand.vmem [shape: f32[512,1], index: 3, kind: output, shape index: {}]  }
   0x1   :  { %v8_v0 = vstv %s1360_s2 }
   0x2   :  { %9 = vst [vmem:[#allocation2] sm:$0x1] %v8_v0 }
   0x3 LB: > { %s819_s15 = sadd.s32 4294967295, %s1122_s14   ;;  %p823_p0 = scmp.ge.s32.totalorder %s1122_s14, 1  ;;  %s1122_s14 = sphi %s1147_s14, %s15_s14  }
   0x4   : > { %p140_p1 = scmp.lt.s32.totalorder %s1122_s14, 3 }
   0x6   : > { %p141_p2 = pnand %p823_p0, %p140_p1 }
   0x7   : > { %v208_v1 = vld [vmem:[%s1359_s1] sm:$0xff] (!%p141_p2)  ;;  %s824_s2 = sshll.u32 (!%p141_p2), %s819_s15, 5  ;;  %vm216_vm0 = vcmask (!%p141_p2), 64512   ;;  %vm730_vm1 = vcmask (!%p141_p2), 7168  }
   0x8   : > { %144 = sbr.rel (%p141_p2) target bundleno = 318 (0x13e), region = 32  ;;  %928 = vmatprep.subr.mxu0 (!%p141_p2), %v208_v1  ;;  %978 = vmatprep.subr.mxu1 (!%p141_p2), %v208_v1  ;;  %p165_p3 = scmp.lt.s32.totalorder (!%p141_p2), %s824_s2, 63 }
   0x9   : > { %929 = vmatpush3.msra.mxu0 (!%p141_p2), %v208_v1  ;;  %979 = vmatpush3.msra.mxu1 (!%p141_p2), %v208_v1  ;;  %v1232_v34 = vld [vmem:[#allocation2] ss:$0 sm:$0xff] (!%p141_p2) }
   0xf   : > { %s1363_s2 = smov (!%p165_p3, %s824_s2), 63 }
  0x10   : > { %s825_s18 = sshll.u32 %s1363_s2, 3 }
  0x11   : > { %s1166_s21 = scalar_lea.vmem %s1358_s0, %s825_s18  ;;  %s1257_s24 = scalar_lea.vmem %s1361_s3, %s825_s18 }
  0x12   : > { %v176_v2 = vld [vmem:[%s1166_s21] sm:$0xff]  ;;  %v177_v4 = vld [vmem:[%s1166_s21 + $0x8] sm:$0xff]  ;;  %v178_v6 = vld [vmem:[%s1166_s21 + $0x10] sm:$0xff] }
  0x13   : > { %v192_v3 = vld [vmem:[%s1166_s21 + $0x80] sm:$0xff]  ;;  %930 = vmatprep.mubr.msk.f32.mxu0 %vm216_vm0, %v176_v2  ;;  %v193_v5 = vld [vmem:[%s1166_s21 + $0x88] sm:$0xff]  ;;  %v194_v7 = vld [vmem:[%s1166_s21 + $0x90] sm:$0xff] }
  0x14   : > { %954 = vmatprep.mubr.msk.f32.mxu1 %vm216_vm0, %v192_v3  ;;  %931 = vmatmul.mubr.msk.f32.vlgmr.msra.gmra.mrb[0].mxu0 %vm216_vm0, %v177_v4  ;;  %v179_v8 = vld [vmem:[%s1166_s21 + $0x18] sm:$0xff]  ;;  %v180_v10 = vld [vmem:[%s1166_s21 + $0x20] sm:$0xff]  ;;  %v181_v12 = vld [vmem:[%s1166_s21 + $0x28] sm:$0xff] }
  0x15   : > { %955 = vmatmul.mubr.msk.f32.vlgmr.msra.gmra.mrb[0].mxu1 %vm216_vm0, %v193_v5  ;;  %933 = vmatprep.mubr.msk.f32.mxu0 %vm216_vm0, %v178_v6  ;;  %v195_v9 = vld [vmem:[%s1166_s21 + $0x98] sm:$0xff]  ;;  %v196_v11 = vld [vmem:[%s1166_s21 + $0xa0] sm:$0xff]  ;;  %v197_v13 = vld [vmem:[%s1166_s21 + $0xa8] sm:$0xff] }
  0x16   : > { %957 = vmatprep.mubr.msk.f32.mxu1 %vm216_vm0, %v194_v7  ;;  %v182_v14 = vld [vmem:[%s1166_s21 + $0x30] sm:$0xff]  ;;  %v183_v16 = vld [vmem:[%s1166_s21 + $0x38] sm:$0xff]  ;;  %v184_v18 = vld [vmem:[%s1166_s21 + $0x40] sm:$0xff] }
  0x17   : > { %v198_v15 = vld [vmem:[%s1166_s21 + $0xb0] sm:$0xff]  ;;  %v199_v17 = vld [vmem:[%s1166_s21 + $0xb8] sm:$0xff]  ;;  %v200_v19 = vld [vmem:[%s1166_s21 + $0xc0] sm:$0xff] }
  0x18   : > { %934 = vmatmul.mubr.msk.f32.gmra.mrb[2].mxu0 %vm216_vm0, %v179_v8  ;;  %v185_v20 = vld [vmem:[%s1166_s21 + $0x48] sm:$0xff]  ;;  %v186_v22 = vld [vmem:[%s1166_s21 + $0x50] sm:$0xff]  ;;  %v187_v24 = vld [vmem:[%s1166_s21 + $0x58] sm:$0xff] }
  0x19   : > { %958 = vmatmul.mubr.msk.f32.gmra.mrb[2].mxu1 %vm216_vm0, %v195_v9  ;;  %936 = vmatprep.mubr.msk.f32.mxu0 %vm216_vm0, %v180_v10  ;;  %v201_v21 = vld [vmem:[%s1166_s21 + $0xc8] sm:$0xff]  ;;  %v202_v23 = vld [vmem:[%s1166_s21 + $0xd0] sm:$0xff]  ;;  %v203_v25 = vld [vmem:[%s1166_s21 + $0xd8] sm:$0xff] }
  0x1a   : > { %960 = vmatprep.mubr.msk.f32.mxu1 %vm216_vm0, %v196_v11  ;;  %v188_v26 = vld [vmem:[%s1166_s21 + $0x60] sm:$0xff]  ;;  %v189_v28 = vld [vmem:[%s1166_s21 + $0x68] sm:$0xff]  ;;  %v190_v30 = vld [vmem:[%s1166_s21 + $0x70] sm:$0xff] }
  0x1b   : > { %v204_v27 = vld [vmem:[%s1166_s21 + $0xe0] sm:$0xff]  ;;  %v205_v29 = vld [vmem:[%s1166_s21 + $0xe8] sm:$0xff]  ;;  %v206_v31 = vld [vmem:[%s1166_s21 + $0xf0] sm:$0xff] }
  0x1c   : > { %937 = vmatmul.mubr.msk.f32.gmra.mrb[4].mxu0 %vm216_vm0, %v181_v12  ;;  %v191_v32 = vld [vmem:[%s1166_s21 + $0x78] sm:$0xff] }
  0x1d   : > { %961 = vmatmul.mubr.msk.f32.gmra.mrb[4].mxu1 %vm216_vm0, %v197_v13  ;;  %939 = vmatprep.mubr.msk.f32.mxu0 %vm216_vm0, %v182_v14  ;;  %v207_v33 = vld [vmem:[%s1166_s21 + $0xf8] sm:$0xff] }
  0x1e   : > { %963 = vmatprep.mubr.msk.f32.mxu1 %vm216_vm0, %v198_v15 }
  0x20   : > { %940 = vmatmul.mubr.msk.f32.gmra.mrb[6].mxu0 %vm216_vm0, %v183_v16 }
  0x21   : > { %964 = vmatmul.mubr.msk.f32.gmra.mrb[6].mxu1 %vm216_vm0, %v199_v17  ;;  %942 = vmatprep.mubr.msk.f32.mxu0 %vm216_vm0, %v184_v18 }
  0x22   : > { %966 = vmatprep.mubr.msk.f32.mxu1 %vm216_vm0, %v200_v19 }
  0x24   : > { %943 = vmatmul.mubr.msk.f32.gmra.mrb[8].mxu0 %vm216_vm0, %v185_v20 }
  0x25   : > { %967 = vmatmul.mubr.msk.f32.gmra.mrb[8].mxu1 %vm216_vm0, %v201_v21  ;;  %945 = vmatprep.mubr.msk.f32.mxu0 %vm216_vm0, %v186_v22 }
  0x26   : > { %969 = vmatprep.mubr.msk.f32.mxu1 %vm216_vm0, %v202_v23 }
  0x28   : > { %946 = vmatmul.mubr.msk.f32.gmra.mrb[10].mxu0 %vm216_vm0, %v187_v24 }
  0x29   : > { %970 = vmatmul.mubr.msk.f32.gmra.mrb[10].mxu1 %vm216_vm0, %v203_v25  ;;  %948 = vmatprep.mubr.msk.f32.mxu0 %vm216_vm0, %v188_v26 }
  0x2a   : > { %972 = vmatprep.mubr.msk.f32.mxu1 %vm216_vm0, %v204_v27 }
  0x2c   : > { %949 = vmatmul.mubr.msk.f32.gmra.mrb[12].mxu0 %vm216_vm0, %v189_v28 }
  0x2d   : > { %973 = vmatmul.mubr.msk.f32.gmra.mrb[12].mxu1 %vm216_vm0, %v205_v29  ;;  %951 = vmatprep.mubr.msk.f32.mxu0 %vm216_vm0, %v190_v30 }
  0x2e   : > { %975 = vmatprep.mubr.msk.f32.mxu1 %vm216_vm0, %v206_v31 }
  0x30   : > { %952 = vmatmul.mubr.msk.f32.gmra.mrb[14].mxu0 %vm216_vm0, %v191_v32 }
  0x31   : > { %976 = vmatmul.mubr.msk.f32.gmra.mrb[14].mxu1 %vm216_vm0, %v207_v33 }
  0xe7   : > { %v932_v35 = vpop.f32.mrb[0].mxu0 }
  0xe8   : > { %v956_v36 = vpop.f32.mrb[0].mxu1  ;;  %v385_v37 = vadd.f32 %v932_v35, %v1232_v34  ;;  %v379_v39 = vpop.f32.mrb[1].mxu0 }
  0xe9   : > { %v465_v38 = vadd.f32 %v956_v36, %v1232_v34  ;;  %v459_v40 = vpop.f32.mrb[1].mxu1  ;;  %v380_v41 = vadd.f32 %v1232_v34, %v379_v39 }
  0xea   : > { %v460_v42 = vadd.f32 %v1232_v34, %v459_v40  ;;  %v862_v43 = vmul.f32 -1.442695, %v385_v37 }
  0xeb   : > { %v878_v44 = vmul.f32 -1.442695, %v465_v38  ;;  %v861_v45 = vmul.f32 -1.442695, %v380_v41  ;;  %v935_v47 = vpop.f32.mrb[2].mxu0 }
  0xec   : > { %v877_v46 = vmul.f32 -1.442695, %v460_v42  ;;  %v959_v48 = vpop.f32.mrb[2].mxu1  ;;  %988 = vpow2.f32 %v862_v43  ;;  %v395_v49 = vadd.f32 %v935_v47, %v1232_v34  ;;  %v389_v51 = vpop.f32.mrb[3].mxu0 }
  0xed   : > { %v475_v50 = vadd.f32 %v959_v48, %v1232_v34  ;;  %v469_v52 = vpop.f32.mrb[3].mxu1  ;;  %990 = vpow2.f32 %v878_v44  ;;  %v390_v53 = vadd.f32 %v1232_v34, %v389_v51 }
  0xee   : > { %v470_v54 = vadd.f32 %v1232_v34, %v469_v52  ;;  %992 = vpow2.f32 %v861_v45  ;;  %v864_v55 = vmul.f32 -1.442695, %v395_v49 }
  0xef   : > { %v880_v56 = vmul.f32 -1.442695, %v475_v50  ;;  %994 = vpow2.f32 %v877_v46  ;;  %v863_v57 = vmul.f32 -1.442695, %v390_v53  ;;  %v938_v59 = vpop.f32.mrb[4].mxu0 }
  0xf0   : > { %v879_v58 = vmul.f32 -1.442695, %v470_v54  ;;  %v962_v60 = vpop.f32.mrb[4].mxu1  ;;  %996 = vpow2.f32 %v864_v55  ;;  %v405_v61 = vadd.f32 %v938_v59, %v1232_v34  ;;  %v399_v63 = vpop.f32.mrb[5].mxu0 }
  0xf1   : > { %v485_v62 = vadd.f32 %v962_v60, %v1232_v34  ;;  %v479_v0 = vpop.f32.mrb[5].mxu1  ;;  %998 = vpow2.f32 %v880_v56  ;;  %v400_v1 = vadd.f32 %v1232_v34, %v399_v63 }
  0xf2   : > { %v480_v2 = vadd.f32 %v1232_v34, %v479_v0  ;;  %1000 = vpow2.f32 %v863_v57  ;;  %v866_v3 = vmul.f32 -1.442695, %v405_v61 }
  0xf3   : > { %v882_v4 = vmul.f32 -1.442695, %v485_v62  ;;  %1002 = vpow2.f32 %v879_v58  ;;  %v865_v5 = vmul.f32 -1.442695, %v400_v1  ;;  %v941_v7 = vpop.f32.mrb[6].mxu0 }
  0xf4   : > { %v881_v6 = vmul.f32 -1.442695, %v480_v2  ;;  %v965_v8 = vpop.f32.mrb[6].mxu1  ;;  %1004 = vpow2.f32 %v866_v3  ;;  %v415_v9 = vadd.f32 %v941_v7, %v1232_v34  ;;  %v409_v10 = vpop.f32.mrb[7].mxu0 }
  0xf5   : > { %v489_v11 = vpop.f32.mrb[7].mxu1  ;;  %1006 = vpow2.f32 %v882_v4  ;;  %v495_v39 = vadd.f32 %v965_v8, %v1232_v34  ;;  %v410_v42 = vadd.f32 %v1232_v34, %v409_v10 }
  0xf6   : > { %v989_v12 = vpop.eup %988  ;;  %1008 = vpow2.f32 %v865_v5  ;;  %v868_v13 = vmul.f32 -1.442695, %v415_v9  ;;  %v490_v46 = vadd.f32 %v1232_v34, %v489_v11 }
  0xf7   : > { %v991_v14 = vpop.eup %990  ;;  %v635_v15 = vadd.f32 1.0, %v989_v12  ;;  %1010 = vpow2.f32 %v881_v6  ;;  %v944_v16 = vpop.f32.mrb[8].mxu0  ;;  %v884_v55 = vmul.f32 -1.442695, %v495_v39  ;;  %v867_v59 = vmul.f32 -1.442695, %v410_v42 }
  0xf8   : > { %v993_v17 = vpop.eup %992  ;;  %v651_v18 = vadd.f32 1.0, %v991_v14  ;;  %1012 = vpow2.f32 %v868_v13  ;;  %v968_v19 = vpop.f32.mrb[8].mxu1  ;;  %v425_v51 = vadd.f32 %v944_v16, %v1232_v34  ;;  %v883_v63 = vmul.f32 -1.442695, %v490_v46 }
  0xf9   : > { %v419_v20 = vpop.f32.mrb[9].mxu0  ;;  %v995_v21 = vpop.eup %994  ;;  %1014 = vrcp.f32 %v635_v15  ;;  %v634_v22 = vadd.f32 1.0, %v993_v17  ;;  %v505_v56 = vadd.f32 %v968_v19, %v1232_v34 }
  0xfa   : > { %v499_v23 = vpop.f32.mrb[9].mxu1  ;;  %v997_v24 = vpop.eup %996  ;;  %1016 = vrcp.f32 %v651_v18  ;;  %v650_v25 = vadd.f32 1.0, %v995_v21  ;;  %v420_v60 = vadd.f32 %v1232_v34, %v419_v20  ;;  %v870_v4 = vmul.f32 -1.442695, %v425_v51 }
  0xfb   : > { %v999_v26 = vpop.eup %998  ;;  %1018 = vrcp.f32 %v634_v22  ;;  %v637_v27 = vadd.f32 1.0, %v997_v24  ;;  %v947_v28 = vpop.f32.mrb[10].mxu0  ;;  %v500_v0 = vadd.f32 %v1232_v34, %v499_v23  ;;  %v886_v8 = vmul.f32 -1.442695, %v505_v56 }
  0xfc   : > { %v1001_v29 = vpop.eup %1000  ;;  %1020 = vrcp.f32 %v650_v25  ;;  %v653_v30 = vadd.f32 1.0, %v999_v26  ;;  %v971_v31 = vpop.f32.mrb[10].mxu1  ;;  %v435_v5 = vadd.f32 %v947_v28, %v1232_v34  ;;  %v869_v11 = vmul.f32 -1.442695, %v420_v60 }
  0xfd   : > { %v429_v32 = vpop.f32.mrb[11].mxu0  ;;  %v1003_v33 = vpop.eup %1002  ;;  %1022 = vrcp.f32 %v637_v27  ;;  %v636_v35 = vadd.f32 1.0, %v1001_v29  ;;  %v515_v9 = vadd.f32 %v971_v31, %v1232_v34  ;;  %v885_v14 = vmul.f32 -1.442695, %v500_v0 }
  0xfe   : > { %v509_v36 = vpop.f32.mrb[11].mxu1  ;;  %v1005_v37 = vpop.eup %1004  ;;  %1024 = vrcp.f32 %v653_v30  ;;  %v652_v38 = vadd.f32 1.0, %v1003_v33  ;;  %v430_v12 = vadd.f32 %v1232_v34, %v429_v32  ;;  %v872_v17 = vmul.f32 -1.442695, %v435_v5 }
  0xff   : > { %v1007_v40 = vpop.eup %1006  ;;  %1026 = vrcp.f32 %v636_v35  ;;  %v639_v41 = vadd.f32 1.0, %v1005_v37  ;;  %v950_v43 = vpop.f32.mrb[12].mxu0  ;;  %v510_v15 = vadd.f32 %v1232_v34, %v509_v36  ;;  %v888_v20 = vmul.f32 -1.442695, %v515_v9 }
 0x100   : > { %v1009_v44 = vpop.eup %1008  ;;  %1028 = vrcp.f32 %v652_v38  ;;  %v655_v45 = vadd.f32 1.0, %v1007_v40  ;;  %v974_v47 = vpop.f32.mrb[12].mxu1  ;;  %v445_v18 = vadd.f32 %v950_v43, %v1232_v34  ;;  %v871_v23 = vmul.f32 -1.442695, %v430_v12 }
 0x101   : > { %v1250_v48 = vpop.f32.mrb[13].mxu0  ;;  %v1011_v49 = vpop.eup %1010  ;;  %1030 = vrcp.f32 %v639_v41  ;;  %v638_v50 = vadd.f32 1.0, %v1009_v44  ;;  %v525_v21 = vadd.f32 %v974_v47, %v1232_v34  ;;  %v887_v25 = vmul.f32 -1.442695, %v510_v15 }
 0x102   : > { %v1260_v52 = vpop.f32.mrb[13].mxu1  ;;  %v1013_v53 = vpop.eup %1012  ;;  %1032 = vrcp.f32 %v655_v45  ;;  %v654_v54 = vadd.f32 1.0, %v1011_v49  ;;  %v874_v27 = vmul.f32 -1.442695, %v445_v18 }
 0x103   : > { %v1015_v57 = vpop.eup %1014  ;;  %1034 = vrcp.f32 %v638_v50  ;;  %v641_v58 = vadd.f32 1.0, %v1013_v53  ;;  %v1264_v61 = vpop.f32.mrb[14].mxu0  ;;  %v890_v29 = vmul.f32 -1.442695, %v525_v21  ;;  %v440_v50 = vadd.f32 %v1232_v34, %v1250_v48 }
 0x104   : > { %v1017_v62 = vpop.eup %1016  ;;  %732 = vst.msk [vmem:[%s1257_s24 + $0x8] sm:$0xff] %vm730_vm1, %v1015_v57  ;;  %1036 = vrcp.f32 %v654_v54  ;;  %v1269_v1 = vpop.f32.mrb[14].mxu1  ;;  %v520_v54 = vadd.f32 %v1232_v34, %v1260_v52  ;;  %v455_v57 = vadd.f32 %v1264_v61, %v1232_v34 }
 0x105   : > { %v1271_v2 = vpop.f32.mrb[15].mxu0  ;;  %v1019_v3 = vpop.eup %1018  ;;  %748 = vst.msk [vmem:[%s1257_s24 + $0x88] sm:$0xff] %vm730_vm1, %v1017_v62  ;;  %1038 = vrcp.f32 %v641_v58  ;;  %v535_v60 = vadd.f32 %v1269_v1, %v1232_v34 }
 0x106   : > { %v1276_v6 = vpop.f32.mrb[15].mxu1  ;;  %v1021_v7 = vpop.eup %1020  ;;  %731 = vst.msk [vmem:[%s1257_s24] sm:$0xff] %vm730_vm1, %v1019_v3  ;;  %1040 = vpow2.f32 %v884_v55  ;;  %v450_v52 = vadd.f32 %v1232_v34, %v1271_v2  ;;  %v889_v61 = vmul.f32 -1.442695, %v520_v54  ;;  %v876_v1 = vmul.f32 -1.442695, %v455_v57 }
 0x107   : > { %v1023_v10 = vpop.eup %1022  ;;  %747 = vst.msk [vmem:[%s1257_s24 + $0x80] sm:$0xff] %vm730_vm1, %v1021_v7  ;;  %1042 = vpow2.f32 %v867_v59  ;;  %v892_v2 = vmul.f32 -1.442695, %v535_v60 }
 0x108   : > { %v1025_v13 = vpop.eup %1024  ;;  %734 = vst.msk [vmem:[%s1257_s24 + $0x18] sm:$0xff] %vm730_vm1, %v1023_v10  ;;  %1044 = vpow2.f32 %v883_v63  ;;  %v873_v63 = vmul.f32 -1.442695, %v440_v50  ;;  %v875_v9 = vmul.f32 -1.442695, %v450_v52 }
 0x109   : > { %v1027_v16 = vpop.eup %1026  ;;  %750 = vst.msk [vmem:[%s1257_s24 + $0x98] sm:$0xff] %vm730_vm1, %v1025_v13  ;;  %1046 = vpow2.f32 %v870_v4  ;;  %v530_v4 = vadd.f32 %v1232_v34, %v1276_v6 }
 0x10a   : > { %v1029_v19 = vpop.eup %1028  ;;  %733 = vst.msk [vmem:[%s1257_s24 + $0x10] sm:$0xff] %vm730_vm1, %v1027_v16  ;;  %1048 = vpow2.f32 %v886_v8 }
 0x10b   : > { %v1031_v22 = vpop.eup %1030  ;;  %749 = vst.msk [vmem:[%s1257_s24 + $0x90] sm:$0xff] %vm730_vm1, %v1029_v19  ;;  %1050 = vpow2.f32 %v869_v11  ;;  %v891_v6 = vmul.f32 -1.442695, %v530_v4 }
 0x10c   : > { %v1033_v24 = vpop.eup %1032  ;;  %736 = vst.msk [vmem:[%s1257_s24 + $0x28] sm:$0xff] %vm730_vm1, %v1031_v22  ;;  %1052 = vpow2.f32 %v885_v14 }
 0x10d   : > { %v1035_v26 = vpop.eup %1034  ;;  %752 = vst.msk [vmem:[%s1257_s24 + $0xa8] sm:$0xff] %vm730_vm1, %v1033_v24  ;;  %1054 = vpow2.f32 %v872_v17 }
 0x10e   : > { %v1037_v28 = vpop.eup %1036  ;;  %735 = vst.msk [vmem:[%s1257_s24 + $0x20] sm:$0xff] %vm730_vm1, %v1035_v26  ;;  %1056 = vpow2.f32 %v888_v20 }
 0x10f   : > { %v1039_v30 = vpop.eup %1038  ;;  %751 = vst.msk [vmem:[%s1257_s24 + $0xa0] sm:$0xff] %vm730_vm1, %v1037_v28  ;;  %1058 = vpow2.f32 %v871_v23 }
 0x110   : > { %v1041_v31 = vpop.eup %1040  ;;  %738 = vst.msk [vmem:[%s1257_s24 + $0x38] sm:$0xff] %vm730_vm1, %v1039_v30  ;;  %1060 = vpow2.f32 %v887_v25 }
 0x111   : > { %v1043_v32 = vpop.eup %1042  ;;  %v657_v33 = vadd.f32 1.0, %v1041_v31  ;;  %1062 = vpow2.f32 %v874_v27 }
 0x112   : > { %v1045_v35 = vpop.eup %1044  ;;  %v640_v36 = vadd.f32 1.0, %v1043_v32  ;;  %1064 = vpow2.f32 %v890_v29 }
 0x113   : > { %v1047_v37 = vpop.eup %1046  ;;  %1066 = vrcp.f32 %v657_v33  ;;  %v656_v38 = vadd.f32 1.0, %v1045_v35 }
 0x114   : > { %v1049_v39 = vpop.eup %1048  ;;  %1068 = vrcp.f32 %v640_v36  ;;  %v643_v40 = vadd.f32 1.0, %v1047_v37 }
 0x115   : > { %v1051_v41 = vpop.eup %1050  ;;  %1070 = vrcp.f32 %v656_v38  ;;  %v659_v42 = vadd.f32 1.0, %v1049_v39 }
 0x116   : > { %v1053_v43 = vpop.eup %1052  ;;  %1072 = vrcp.f32 %v643_v40  ;;  %v642_v44 = vadd.f32 1.0, %v1051_v41 }
 0x117   : > { %v1055_v45 = vpop.eup %1054  ;;  %1074 = vrcp.f32 %v659_v42  ;;  %v658_v46 = vadd.f32 1.0, %v1053_v43 }
 0x118   : > { %v1057_v47 = vpop.eup %1056  ;;  %1076 = vrcp.f32 %v642_v44  ;;  %v645_v49 = vadd.f32 1.0, %v1055_v45 }
 0x119   : > { %v1059_v51 = vpop.eup %1058  ;;  %1078 = vrcp.f32 %v658_v46  ;;  %v661_v53 = vadd.f32 1.0, %v1057_v47 }
 0x11a   : > { %v1061_v55 = vpop.eup %1060  ;;  %1080 = vrcp.f32 %v645_v49  ;;  %v644_v56 = vadd.f32 1.0, %v1059_v51 }
 0x11b   : > { %v1063_v58 = vpop.eup %1062  ;;  %1082 = vrcp.f32 %v661_v53  ;;  %v660_v59 = vadd.f32 1.0, %v1061_v55 }
 0x11c   : > { %v1065_v48 = vpop.eup %1064  ;;  %1084 = vrcp.f32 %v644_v56  ;;  %v647_v62 = vadd.f32 1.0, %v1063_v58 }
 0x11d   : > { %v1067_v0 = vpop.eup %1066  ;;  %1086 = vrcp.f32 %v660_v59  ;;  %v663_v3 = vadd.f32 1.0, %v1065_v48 }
 0x11e   : > { %v1069_v5 = vpop.eup %1068  ;;  %754 = vst.msk [vmem:[%s1257_s24 + $0xb8] sm:$0xff] %vm730_vm1, %v1067_v0  ;;  %1088 = vrcp.f32 %v647_v62 }
 0x11f   : > { %v1071_v7 = vpop.eup %1070  ;;  %737 = vst.msk [vmem:[%s1257_s24 + $0x30] sm:$0xff] %vm730_vm1, %v1069_v5  ;;  %1090 = vrcp.f32 %v663_v3 }
 0x120   : > { %v1073_v8 = vpop.eup %1072  ;;  %753 = vst.msk [vmem:[%s1257_s24 + $0xb0] sm:$0xff] %vm730_vm1, %v1071_v7  ;;  %1092 = vpow2.f32 %v873_v63 }
 0x121   : > { %v1075_v34 = vpop.eup %1074  ;;  %740 = vst.msk [vmem:[%s1257_s24 + $0x48] sm:$0xff] %vm730_vm1, %v1073_v8  ;;  %1094 = vpow2.f32 %v889_v61 }
 0x122   : > { %v1077_v10 = vpop.eup %1076  ;;  %756 = vst.msk [vmem:[%s1257_s24 + $0xc8] sm:$0xff] %vm730_vm1, %v1075_v34  ;;  %1096 = vpow2.f32 %v876_v1 }
 0x123   : > { %v1079_v11 = vpop.eup %1078  ;;  %739 = vst.msk [vmem:[%s1257_s24 + $0x40] sm:$0xff] %vm730_vm1, %v1077_v10  ;;  %1098 = vpow2.f32 %v892_v2 }
 0x124   : > { %v1081_v12 = vpop.eup %1080  ;;  %755 = vst.msk [vmem:[%s1257_s24 + $0xc0] sm:$0xff] %vm730_vm1, %v1079_v11  ;;  %1100 = vpow2.f32 %v875_v9 }
 0x125   : > { %v1083_v13 = vpop.eup %1082  ;;  %742 = vst.msk [vmem:[%s1257_s24 + $0x58] sm:$0xff] %vm730_vm1, %v1081_v12  ;;  %1102 = vpow2.f32 %v891_v6 }
 0x126   : > { %v1085_v14 = vpop.eup %1084  ;;  %758 = vst.msk [vmem:[%s1257_s24 + $0xd8] sm:$0xff] %vm730_vm1, %v1083_v13 }
 0x127   : > { %v1087_v15 = vpop.eup %1086  ;;  %741 = vst.msk [vmem:[%s1257_s24 + $0x50] sm:$0xff] %vm730_vm1, %v1085_v14 }
 0x128   : > { %v1089_v16 = vpop.eup %1088  ;;  %757 = vst.msk [vmem:[%s1257_s24 + $0xd0] sm:$0xff] %vm730_vm1, %v1087_v15 }
 0x129   : > { %v1091_v17 = vpop.eup %1090  ;;  %744 = vst.msk [vmem:[%s1257_s24 + $0x68] sm:$0xff] %vm730_vm1, %v1089_v16 }
 0x12a   : > { %v1093_v18 = vpop.eup %1092  ;;  %760 = vst.msk [vmem:[%s1257_s24 + $0xe8] sm:$0xff] %vm730_vm1, %v1091_v17 }
 0x12b   : > { %v1095_v19 = vpop.eup %1094  ;;  %v646_v20 = vadd.f32 1.0, %v1093_v18 }
 0x12c   : > { %v1097_v21 = vpop.eup %1096  ;;  %v662_v22 = vadd.f32 1.0, %v1095_v19 }
 0x12d   : > { %v1099_v23 = vpop.eup %1098  ;;  %1104 = vrcp.f32 %v646_v20  ;;  %v649_v24 = vadd.f32 1.0, %v1097_v21 }
 0x12e   : > { %v1101_v25 = vpop.eup %1100  ;;  %1106 = vrcp.f32 %v662_v22  ;;  %v665_v26 = vadd.f32 1.0, %v1099_v23 }
 0x12f   : > { %v1103_v27 = vpop.eup %1102  ;;  %1108 = vrcp.f32 %v649_v24  ;;  %v648_v28 = vadd.f32 1.0, %v1101_v25 }
 0x130   : > { %1110 = vrcp.f32 %v665_v26  ;;  %v664_v29 = vadd.f32 1.0, %v1103_v27 }
 0x131   : > { %1112 = vrcp.f32 %v648_v28 }
 0x132   : > { %1114 = vrcp.f32 %v664_v29 }
 0x137   : > { %v1105_v30 = vpop.eup %1104 }
 0x138   : > { %v1107_v31 = vpop.eup %1106  ;;  %743 = vst.msk [vmem:[%s1257_s24 + $0x60] sm:$0xff] %vm730_vm1, %v1105_v30 }
 0x139   : > { %v1109_v32 = vpop.eup %1108  ;;  %759 = vst.msk [vmem:[%s1257_s24 + $0xe0] sm:$0xff] %vm730_vm1, %v1107_v31 }
 0x13a   : > { %v1111_v33 = vpop.eup %1110  ;;  %746 = vst.msk [vmem:[%s1257_s24 + $0x78] sm:$0xff] %vm730_vm1, %v1109_v32 }
 0x13b   : > { %v1113_v35 = vpop.eup %1112  ;;  %762 = vst.msk [vmem:[%s1257_s24 + $0xf8] sm:$0xff] %vm730_vm1, %v1111_v33 }
 0x13c   : > { %v1115_v36 = vpop.eup %1114  ;;  %745 = vst.msk [vmem:[%s1257_s24 + $0x70] sm:$0xff] %vm730_vm1, %v1113_v35 }
 0x13d   : > { %761 = vst.msk [vmem:[%s1257_s24 + $0xf0] sm:$0xff] %vm730_vm1, %v1115_v36 }
 0x13e PF: > { %s15_s14 = sadd.s32 1, %s1122_s14  }
 0x13f   : > { %p12_p4 = scmp.ge.s32.totalorder %s15_s14, 4  }
 0x141   :  { %14 = sbr.rel (!%p12_p4) target bundleno = 3 (0x3), region = 62 }

// kernel: unet_apply.77
= control target key start
LH: loop header
LB: loop body
LE: loop exit
PB: predicated region body
PF: predicated region fallthrough
CT: control target
= control target key end

     0   :  { %s1626_s18 = smov 0   ;;  %s1886_s0 = inlined_call_operand.vmem [shape: bf16[512,72], index: 0, kind: input, shape index: {}]   ;;  %s1887_s1 = inlined_call_operand.vmem [shape: bf16[512,72], index: 1, kind: input, shape index: {}]   ;;  %s1888_s2 = inlined_call_operand.vmem [shape: bf16[72,8], index: 2, kind: input, shape index: {}]   ;;  %s1889_s3 = inlined_call_operand.vmem [shape: bf16[72,8], index: 3, kind: input, shape index: {}]   ;;  %s1890_s4 = inlined_call_operand.vmem [shape: f32[512,8], index: 4, kind: output, shape index: {0}]   ;;  %s1891_s5 = inlined_call_operand.vmem [shape: f32[2,2,8], index: 5, kind: output, shape index: {1}]  }
   0x1 LB: > { %s1632_s19 = sadd.s32 4294967295, %s1594_s18   ;;  %p1294_p0 = scmp.ge.s32.totalorder %s1594_s18, 1  ;;  %s1594_s18 = sphi %s1626_s18, %s16_s18  }
   0x2   : > { %p202_p1 = scmp.lt.s32.totalorder %s1594_s18, 3 }
   0x4   : > { %p203_p2 = pnand %p1294_p0, %p202_p1 }
   0x5   : > { %v1546_v0 = vld [vmem:[%s1889_s3] sm:$0xff] (!%p203_p2)   ;;  %s1295_s24 = sshll.u32 (!%p203_p2), %s1632_s19, 5  ;;  %v1548_v2 = vld [vmem:[%s1889_s3 + $0x8] sm:$0xff] (!%p203_p2)   ;;  %v1550_v4 = vld [vmem:[%s1889_s3 + $0x10] sm:$0xff] (!%p203_p2)   ;;  %vm451_vm0 = vcmask (!%p203_p2), 588800   ;;  %vm500_vm1 = vcmask (!%p203_p2), 1043456  }
   0x6   : > { %206 = sbr.rel (%p203_p2) target bundleno = 324 (0x144), region = 36  ;;  %v1547_v1 = vld [vmem:[%s1888_s2] sm:$0xff] (!%p203_p2)   ;;  %1420 = vmatprep.subr.bf16.mxu1 (!%p203_p2), %v1546_v0  ;;  %p240_p3 = scmp.lt.s32.totalorder (!%p203_p2), %s1295_s24, 63  ;;  %v1549_v3 = vld [vmem:[%s1888_s2 + $0x8] sm:$0xff] (!%p203_p2)   ;;  %v1551_v5 = vld [vmem:[%s1888_s2 + $0x10] sm:$0xff] (!%p203_p2)   ;;  %vm984_vm2 = vcmask (!%p203_p2), 64512  }
   0x7   : > { %1462 = vmatprep.subr.bf16.mxu0 (!%p203_p2), %v1547_v1  ;;  %1421 = vmatpush3.bf16.msra.mxu1 (!%p203_p2), %v1546_v0  ;;  %v1552_v6 = vld [vmem:[%s1889_s3 + $0x18] sm:$0xff] (!%p203_p2)   ;;  %v1554_v10 = vld [vmem:[%s1889_s3 + $0x20] ss:$0 sps:$4 sm:$0xff] (!%p203_p2)   ;;  %p257_p4 = scmp.lt.s32.totalorder (!%p203_p2), %s1632_s19, 1  ;;  %vm1187_vm3 = vcmask (!%p203_p2), 1040384   ;;  %vm1189_vm4 = vcmask (!%p203_p2), 58368  }
   0x8   : > { %1463 = vmatpush3.bf16.msra.mxu0 (!%p203_p2), %v1547_v1  ;;  %1422 = vmatprep.subr.bf16.mxu1 (!%p203_p2), %v1548_v2  ;;  %v1553_v7 = vld [vmem:[%s1888_s2 + $0x18] sm:$0xff] (!%p203_p2)   ;;  %v1555_v11 = vld [vmem:[%s1888_s2 + $0x20] ss:$0 sps:$4 sm:$0xff] (!%p203_p2)   ;;  %v502_v12 = vsel (!%p203_p2), %vm500_vm1, %v1554_v10, 0 }
   0x9   : > { %1464 = vmatprep.subr.bf16.mxu0 (!%p203_p2), %v1549_v3  ;;  %v821_v13 = vsel (!%p203_p2), %vm500_vm1, %v1555_v11, 0 }
   0xb   : > { %1423 = vmatpush3.bf16.msra.mxu1 (!%p203_p2), %v1548_v2 }
   0xc   : > { %1465 = vmatpush3.bf16.msra.mxu0 (!%p203_p2), %v1549_v3  ;;  %1424 = vmatprep.subr.bf16.mxu1 (!%p203_p2), %v1550_v4 }
   0xd   : > { %s1893_s24 = smov (!%p240_p3, %s1295_s24), 63  ;;  %1466 = vmatprep.subr.bf16.mxu0 %v1551_v5  ;;  %s1895_s19 = smov (!%p257_p4, %s1632_s19), 1 }
   0xe   : > { %s1296_s8 = sshll.u32 %s1893_s24, 2  ;;  %s1300_s26 = sshll.u32 %s1893_s24, 3 }
   0xf   : > { %s1661_s11 = scalar_lea.vmem %s1887_s1, %s1296_s8  ;;  %s1669_s16 = scalar_lea.vmem %s1886_s0, %s1296_s8  ;;  %1425 = vmatpush3.bf16.msra.mxu1 %v1550_v4 }
  0x10   : > { %v1556_v8 = vld [vmem:[%s1661_s11] sm:$0xff]   ;;  %1467 = vmatpush3.bf16.msra.mxu0 %v1551_v5  ;;  %1426 = vmatprep.subr.bf16.mxu1 %v1552_v6  ;;  %v1558_v14 = vld [vmem:[%s1661_s11 + $0x8] sm:$0xff]   ;;  %v1560_v16 = vld [vmem:[%s1661_s11 + $0x10] sm:$0xff]   ;;  %s1748_s29 = scalar_lea.vmem %s1890_s4, %s1300_s26  ;;  %s1301_s24 = sshll.u32 %s1895_s19, 1 }
  0x11   : > { %v1557_v9 = vld [vmem:[%s1669_s16] sm:$0xff]   ;;  %1468 = vmatprep.subr.bf16.mxu0 %v1553_v7  ;;  %1430 = vmatprep.mubr.msk.bf16.mxu1 %vm451_vm0, %v1556_v8  ;;  %v1559_v15 = vld [vmem:[%s1669_s16 + $0x8] sm:$0xff]   ;;  %v1561_v17 = vld [vmem:[%s1669_s16 + $0x10] sm:$0xff]   ;;  %s260_s7 = scalar_lea.vmem %s1891_s5, %s1301_s24 }
  0x12   : > { %1472 = vmatprep.mubr.msk.bf16.mxu0 %vm451_vm0, %v1557_v9  ;;  %v1562_v18 = vld [vmem:[%s1661_s11 + $0x18] sm:$0xff]   ;;  %v1564_v20 = vld [vmem:[%s1661_s11 + $0x20] sm:$0xff]   ;;  %v1566_v22 = vld [vmem:[%s1661_s11 + $0x28] sm:$0xff]  }
  0x13   : > { %1427 = vmatpush3.bf16.msra.mxu1 %v1552_v6  ;;  %v1563_v19 = vld [vmem:[%s1669_s16 + $0x18] sm:$0xff]   ;;  %v1565_v21 = vld [vmem:[%s1669_s16 + $0x20] sm:$0xff]   ;;  %v1567_v23 = vld [vmem:[%s1669_s16 + $0x28] sm:$0xff]  }
  0x14   : > { %1469 = vmatpush3.bf16.msra.mxu0 %v1553_v7  ;;  %1536 = vmatprep.subr.msk.bf16.mxu1 %vm500_vm1, %v1554_v10  ;;  %v1568_v24 = vld [vmem:[%s1661_s11 + $0x30] sm:$0xff]   ;;  %v1570_v26 = vld [vmem:[%s1661_s11 + $0x38] sm:$0xff]   ;;  %v1572_v28 = vld [vmem:[%s1661_s11 + $0x40] sm:$0xff]  }
  0x15   : > { %1537 = vmatprep.subr.msk.bf16.mxu0 %vm500_vm1, %v1555_v11  ;;  %v1569_v25 = vld [vmem:[%s1669_s16 + $0x30] sm:$0xff]   ;;  %v1571_v27 = vld [vmem:[%s1669_s16 + $0x38] sm:$0xff]   ;;  %v1573_v29 = vld [vmem:[%s1669_s16 + $0x40] sm:$0xff]  }
  0x16   : > { %v1574_v30 = vld [vmem:[%s1661_s11 + $0x48] sm:$0xff]   ;;  %v1576_v32 = vld [vmem:[%s1661_s11 + $0x50] sm:$0xff]   ;;  %v1578_v34 = vld [vmem:[%s1661_s11 + $0x58] sm:$0xff]  }
  0x17   : > { %1429 = vmatpush3.bf16.msra.mxu1 %v502_v12  ;;  %v1575_v31 = vld [vmem:[%s1669_s16 + $0x48] sm:$0xff]   ;;  %v1577_v33 = vld [vmem:[%s1669_s16 + $0x50] sm:$0xff]   ;;  %v1579_v35 = vld [vmem:[%s1669_s16 + $0x58] sm:$0xff]  }
  0x18   : > { %1471 = vmatpush3.bf16.msra.mxu0 %v821_v13  ;;  %v1580_v36 = vld [vmem:[%s1661_s11 + $0x60] sm:$0xff]   ;;  %v1582_v38 = vld [vmem:[%s1661_s11 + $0x68] sm:$0xff]   ;;  %v1584_v40 = vld [vmem:[%s1661_s11 + $0x70] sm:$0xff]  }
  0x19   : > { %v1581_v37 = vld [vmem:[%s1669_s16 + $0x60] sm:$0xff]   ;;  %v1583_v39 = vld [vmem:[%s1669_s16 + $0x68] sm:$0xff]   ;;  %v1585_v41 = vld [vmem:[%s1669_s16 + $0x70] sm:$0xff]  }
  0x1a   : > { %1431 = vmatmul.mubr.msk.bf16.vlgmr.msra.gmra.mrb[0].mxu1 %vm451_vm0, %v1558_v14  ;;  %v1586_v42 = vld [vmem:[%s1661_s11 + $0x78] sm:$0xff]  }
  0x1b   : > { %1473 = vmatmul.mubr.msk.bf16.vlgmr.msra.gmra.mrb[0].mxu0 %vm451_vm0, %v1559_v15  ;;  %1434 = vmatprep.mubr.msk.bf16.mxu1 %vm451_vm0, %v1560_v16  ;;  %v1587_v43 = vld [vmem:[%s1669_s16 + $0x78] sm:$0xff]  }
  0x1c   : > { %1476 = vmatprep.mubr.msk.bf16.mxu0 %vm451_vm0, %v1561_v17 }
  0x22   : > { %1435 = vmatmul.mubr.msk.bf16.gmra.mrb[4].mxu1 %vm451_vm0, %v1562_v18 }
  0x23   : > { %1477 = vmatmul.mubr.msk.bf16.gmra.mrb[4].mxu0 %vm451_vm0, %v1563_v19  ;;  %1438 = vmatprep.mubr.msk.bf16.mxu1 %vm451_vm0, %v1564_v20 }
  0x24   : > { %1480 = vmatprep.mubr.msk.bf16.mxu0 %vm451_vm0, %v1565_v21 }
  0x2a   : > { %1439 = vmatmul.mubr.msk.bf16.gmra.mrb[8].mxu1 %vm451_vm0, %v1566_v22 }
  0x2b   : > { %1481 = vmatmul.mubr.msk.bf16.gmra.mrb[8].mxu0 %vm451_vm0, %v1567_v23  ;;  %1442 = vmatprep.mubr.msk.bf16.mxu1 %vm451_vm0, %v1568_v24 }
  0x2c   : > { %1484 = vmatprep.mubr.msk.bf16.mxu0 %vm451_vm0, %v1569_v25 }
  0x32   : > { %1443 = vmatmul.mubr.msk.bf16.gmra.mrb[12].mxu1 %vm451_vm0, %v1570_v26 }
  0x33   : > { %1485 = vmatmul.mubr.msk.bf16.gmra.mrb[12].mxu0 %vm451_vm0, %v1571_v27  ;;  %1446 = vmatprep.mubr.msk.bf16.mxu1 %vm451_vm0, %v1572_v28 }
  0x34   : > { %1488 = vmatprep.mubr.msk.bf16.mxu0 %vm451_vm0, %v1573_v29 }
  0x3a   : > { %1447 = vmatmul.mubr.msk.bf16.gmra.mrb[16].mxu1 %vm451_vm0, %v1574_v30 }
  0x3b   : > { %1489 = vmatmul.mubr.msk.bf16.gmra.mrb[16].mxu0 %vm451_vm0, %v1575_v31  ;;  %1450 = vmatprep.mubr.msk.bf16.mxu1 %vm451_vm0, %v1576_v32 }
  0x3c   : > { %1492 = vmatprep.mubr.msk.bf16.mxu0 %vm451_vm0, %v1577_v33 }
  0x42   : > { %1451 = vmatmul.mubr.msk.bf16.gmra.mrb[20].mxu1 %vm451_vm0, %v1578_v34 }
  0x43   : > { %1493 = vmatmul.mubr.msk.bf16.gmra.mrb[20].mxu0 %vm451_vm0, %v1579_v35  ;;  %1454 = vmatprep.mubr.msk.bf16.mxu1 %vm451_vm0, %v1580_v36 }
  0x44   : > { %1496 = vmatprep.mubr.msk.bf16.mxu0 %vm451_vm0, %v1581_v37 }
  0x4a   : > { %1455 = vmatmul.mubr.msk.bf16.gmra.mrb[24].mxu1 %vm451_vm0, %v1582_v38 }
  0x4b   : > { %1497 = vmatmul.mubr.msk.bf16.gmra.mrb[24].mxu0 %vm451_vm0, %v1583_v39  ;;  %1458 = vmatprep.mubr.msk.bf16.mxu1 %vm451_vm0, %v1584_v40 }
  0x4c   : > { %1500 = vmatprep.mubr.msk.bf16.mxu0 %vm451_vm0, %v1585_v41 }
  0x52   : > { %1459 = vmatmul.mubr.msk.bf16.gmra.mrb[28].mxu1 %vm451_vm0, %v1586_v42 }
  0x53   : > { %1501 = vmatmul.mubr.msk.bf16.gmra.mrb[28].mxu0 %vm451_vm0, %v1587_v43 }
  0xed   : > { %v1432_v44 = vpop.f32.mrb[0].mxu1 }
  0xee   : > { %v1474_v45 = vpop.f32.mrb[0].mxu0  ;;  %v538_v46 = vpop.f32.mrb[1].mxu1 }
  0xef   : > { %v866_v47 = vadd.f32 %v1474_v45, %v1432_v44  ;;  %v857_v48 = vpop.f32.mrb[1].mxu0  ;;  %v1433_v49 = vpop.f32.mrb[2].mxu1 }
  0xf0   : > { %v858_v50 = vadd.f32 %v857_v48, %v538_v46  ;;  %v1475_v51 = vpop.f32.mrb[2].mxu0  ;;  %v541_v52 = vpop.f32.mrb[3].mxu1 }
  0xf1   : > { %987 = vst.msk [vmem:[%s1748_s29 + $0x10] sm:$0xff] %vm984_vm2, %v866_v47  ;;  %v869_v53 = vadd.f32 %v1475_v51, %v1433_v49  ;;  %v860_v54 = vpop.f32.mrb[3].mxu0  ;;  %v1088_v57 = vmul.f32 %v866_v47, %v866_v47  ;;  %v1020_v0 = vsel %vm984_vm2, %v866_v47, 0.0 }
  0xf2   : > { %985 = vst.msk [vmem:[%s1748_s29] sm:$0xff] %vm984_vm2, %v858_v50  ;;  %v1086_v55 = vmul.f32 %v858_v50, %v858_v50  ;;  %v861_v56 = vadd.f32 %v860_v54, %v541_v52  ;;  %v1017_v58 = vsel %vm984_vm2, %v858_v50, 0.0 }
  0xf3   : > { %988 = vst.msk [vmem:[%s1748_s29 + $0x18] sm:$0xff] %vm984_vm2, %v869_v53  ;;  %v1089_v61 = vmul.f32 %v869_v53, %v869_v53  ;;  %v1121_v10 = vsel %vm984_vm2, %v1088_v57, 0.0  ;;  %v1022_v11 = vsel %vm984_vm2, %v869_v53, 0.0 }
  0xf4   : > { %986 = vst.msk [vmem:[%s1748_s29 + $0x8] sm:$0xff] %vm984_vm2, %v861_v56  ;;  %v1018_v59 = vsel %vm984_vm2, %v861_v56, 0.0  ;;  %v1087_v60 = vmul.f32 %v861_v56, %v861_v56  ;;  %v1118_v1 = vsel %vm984_vm2, %v1086_v55, 0.0 }
  0xf5   : > { %v1019_v62 = vadd.f32 %v1018_v59, %v1017_v58  ;;  %v1436_v63 = vpop.f32.mrb[4].mxu1  ;;  %v1123_v15 = vsel %vm984_vm2, %v1089_v61, 0.0 }
  0xf6   : > { %v1119_v2 = vsel %vm984_vm2, %v1087_v60, 0.0  ;;  %v1478_v3 = vpop.f32.mrb[4].mxu0  ;;  %v554_v4 = vpop.f32.mrb[5].mxu1 }
  0xf7   : > { %v1021_v5 = vadd.f32 %v1020_v0, %v1019_v62  ;;  %v1120_v6 = vadd.f32 %v1119_v2, %v1118_v1  ;;  %v882_v7 = vadd.f32 %v1478_v3, %v1436_v63  ;;  %v873_v8 = vpop.f32.mrb[5].mxu0  ;;  %v1437_v9 = vpop.f32.mrb[6].mxu1 }
  0xf8   : > { %v874_v12 = vadd.f32 %v873_v8, %v554_v4  ;;  %v1479_v13 = vpop.f32.mrb[6].mxu0  ;;  %v557_v14 = vpop.f32.mrb[7].mxu1 }
  0xf9   : > { %v1122_v16 = vadd.f32 %v1121_v10, %v1120_v6  ;;  %991 = vst.msk [vmem:[%s1748_s29 + $0x30] sm:$0xff] %vm984_vm2, %v882_v7  ;;  %v1023_v17 = vadd.f32 %v1022_v11, %v1021_v5  ;;  %v876_v18 = vpop.f32.mrb[7].mxu0  ;;  %v885_v21 = vadd.f32 %v1479_v13, %v1437_v9  ;;  %v1092_v27 = vmul.f32 %v882_v7, %v882_v7 }
  0xfa   : > { %989 = vst.msk [vmem:[%s1748_s29 + $0x20] sm:$0xff] %vm984_vm2, %v874_v12  ;;  %v1024_v19 = vsel %vm984_vm2, %v874_v12, 0.0  ;;  %v1090_v20 = vmul.f32 %v874_v12, %v874_v12  ;;  %v877_v22 = vadd.f32 %v876_v18, %v557_v14  ;;  %v1028_v32 = vsel %vm984_vm2, %v882_v7, 0.0 }
  0xfb   : > { %v1025_v23 = vadd.f32 %v1024_v19, %v1023_v17  ;;  %v1124_v24 = vadd.f32 %v1123_v15, %v1122_v16  ;;  %992 = vst.msk [vmem:[%s1748_s29 + $0x38] sm:$0xff] %vm984_vm2, %v885_v21  ;;  %v1093_v35 = vmul.f32 %v885_v21, %v885_v21  ;;  %v1030_v41 = vsel %vm984_vm2, %v885_v21, 0.0 }
  0xfc   : > { %v1125_v25 = vsel %vm984_vm2, %v1090_v20, 0.0  ;;  %990 = vst.msk [vmem:[%s1748_s29 + $0x28] sm:$0xff] %vm984_vm2, %v877_v22  ;;  %v1026_v26 = vsel %vm984_vm2, %v877_v22, 0.0  ;;  %v1091_v30 = vmul.f32 %v877_v22, %v877_v22  ;;  %v1129_v46 = vsel %vm984_vm2, %v1092_v27, 0.0 }
  0xfd   : > { %v1126_v28 = vadd.f32 %v1125_v25, %v1124_v24  ;;  %v1027_v29 = vadd.f32 %v1026_v26, %v1025_v23  ;;  %v1440_v31 = vpop.f32.mrb[8].mxu1  ;;  %v1131_v54 = vsel %vm984_vm2, %v1093_v35, 0.0 }
  0xfe   : > { %v1482_v33 = vpop.f32.mrb[8].mxu0  ;;  %v570_v34 = vpop.f32.mrb[9].mxu1  ;;  %v1127_v37 = vsel %vm984_vm2, %v1091_v30, 0.0 }
  0xff   : > { %v1029_v36 = vadd.f32 %v1028_v32, %v1027_v29  ;;  %v898_v38 = vadd.f32 %v1482_v33, %v1440_v31  ;;  %v889_v39 = vpop.f32.mrb[9].mxu0  ;;  %v1441_v40 = vpop.f32.mrb[10].mxu1  ;;  %v1128_v42 = vadd.f32 %v1127_v37, %v1126_v28 }
 0x100   : > { %v890_v43 = vadd.f32 %v889_v39, %v570_v34  ;;  %v1483_v44 = vpop.f32.mrb[10].mxu0  ;;  %v573_v45 = vpop.f32.mrb[11].mxu1 }
 0x101   : > { %995 = vst.msk [vmem:[%s1748_s29 + $0x50] sm:$0xff] %vm984_vm2, %v898_v38  ;;  %v1031_v47 = vadd.f32 %v1030_v41, %v1029_v36  ;;  %v901_v48 = vadd.f32 %v1483_v44, %v1441_v40  ;;  %v892_v49 = vpop.f32.mrb[11].mxu0  ;;  %v1130_v50 = vadd.f32 %v1129_v46, %v1128_v42  ;;  %v1096_v60 = vmul.f32 %v898_v38, %v898_v38 }
 0x102   : > { %993 = vst.msk [vmem:[%s1748_s29 + $0x40] sm:$0xff] %vm984_vm2, %v890_v43  ;;  %v1032_v51 = vsel %vm984_vm2, %v890_v43, 0.0  ;;  %v1094_v52 = vmul.f32 %v890_v43, %v890_v43  ;;  %v893_v53 = vadd.f32 %v892_v49, %v573_v45  ;;  %v1036_v63 = vsel %vm984_vm2, %v898_v38, 0.0 }
 0x103   : > { %v1033_v55 = vadd.f32 %v1032_v51, %v1031_v47  ;;  %996 = vst.msk [vmem:[%s1748_s29 + $0x58] sm:$0xff] %vm984_vm2, %v901_v48  ;;  %v1132_v56 = vadd.f32 %v1131_v54, %v1130_v50  ;;  %v1097_v4 = vmul.f32 %v901_v48, %v901_v48  ;;  %v1038_v9 = vsel %vm984_vm2, %v901_v48, 0.0 }
 0x104   : > { %v1133_v57 = vsel %vm984_vm2, %v1094_v52, 0.0  ;;  %994 = vst.msk [vmem:[%s1748_s29 + $0x48] sm:$0xff] %vm984_vm2, %v893_v53  ;;  %v1034_v58 = vsel %vm984_vm2, %v893_v53, 0.0  ;;  %v1095_v59 = vmul.f32 %v893_v53, %v893_v53  ;;  %v1137_v14 = vsel %vm984_vm2, %v1096_v60, 0.0 }
 0x105   : > { %v1035_v61 = vadd.f32 %v1034_v58, %v1033_v55  ;;  %v1444_v62 = vpop.f32.mrb[12].mxu1  ;;  %v1134_v0 = vadd.f32 %v1133_v57, %v1132_v56  ;;  %v1139_v22 = vsel %vm984_vm2, %v1097_v4, 0.0 }
 0x106   : > { %v1135_v1 = vsel %vm984_vm2, %v1095_v59, 0.0  ;;  %v1486_v2 = vpop.f32.mrb[12].mxu0  ;;  %v586_v3 = vpop.f32.mrb[13].mxu1 }
 0x107   : > { %v1037_v5 = vadd.f32 %v1036_v63, %v1035_v61  ;;  %v914_v6 = vadd.f32 %v1486_v2, %v1444_v62  ;;  %v905_v7 = vpop.f32.mrb[13].mxu0  ;;  %v1445_v8 = vpop.f32.mrb[14].mxu1  ;;  %v1136_v10 = vadd.f32 %v1135_v1, %v1134_v0 }
 0x108   : > { %v906_v11 = vadd.f32 %v905_v7, %v586_v3  ;;  %v1487_v12 = vpop.f32.mrb[14].mxu0  ;;  %v589_v13 = vpop.f32.mrb[15].mxu1 }
 0x109   : > { %999 = vst.msk [vmem:[%s1748_s29 + $0x70] sm:$0xff] %vm984_vm2, %v914_v6  ;;  %v1039_v15 = vadd.f32 %v1038_v9, %v1037_v5  ;;  %v917_v16 = vadd.f32 %v1487_v12, %v1445_v8  ;;  %v908_v17 = vpop.f32.mrb[15].mxu0  ;;  %v1138_v18 = vadd.f32 %v1137_v14, %v1136_v10  ;;  %v1100_v28 = vmul.f32 %v914_v6, %v914_v6 }
 0x10a   : > { %997 = vst.msk [vmem:[%s1748_s29 + $0x60] sm:$0xff] %vm984_vm2, %v906_v11  ;;  %v1040_v19 = vsel %vm984_vm2, %v906_v11, 0.0  ;;  %v1098_v20 = vmul.f32 %v906_v11, %v906_v11  ;;  %v909_v21 = vadd.f32 %v908_v17, %v589_v13  ;;  %v1044_v31 = vsel %vm984_vm2, %v914_v6, 0.0 }
 0x10b   : > { %v1041_v23 = vadd.f32 %v1040_v19, %v1039_v15  ;;  %1000 = vst.msk [vmem:[%s1748_s29 + $0x78] sm:$0xff] %vm984_vm2, %v917_v16  ;;  %v1140_v24 = vadd.f32 %v1139_v22, %v1138_v18  ;;  %v1101_v36 = vmul.f32 %v917_v16, %v917_v16  ;;  %v1046_v41 = vsel %vm984_vm2, %v917_v16, 0.0 }
 0x10c   : > { %v1141_v25 = vsel %vm984_vm2, %v1098_v20, 0.0  ;;  %998 = vst.msk [vmem:[%s1748_s29 + $0x68] sm:$0xff] %vm984_vm2, %v909_v21  ;;  %v1042_v26 = vsel %vm984_vm2, %v909_v21, 0.0  ;;  %v1099_v27 = vmul.f32 %v909_v21, %v909_v21  ;;  %v1145_v46 = vsel %vm984_vm2, %v1100_v28, 0.0 }
 0x10d   : > { %v1043_v29 = vadd.f32 %v1042_v26, %v1041_v23  ;;  %v1448_v30 = vpop.f32.mrb[16].mxu1  ;;  %v1142_v32 = vadd.f32 %v1141_v25, %v1140_v24  ;;  %v1147_v54 = vsel %vm984_vm2, %v1101_v36, 0.0 }
 0x10e   : > { %v1143_v33 = vsel %vm984_vm2, %v1099_v27, 0.0  ;;  %v1490_v34 = vpop.f32.mrb[16].mxu0  ;;  %v602_v35 = vpop.f32.mrb[17].mxu1 }
 0x10f   : > { %v1045_v37 = vadd.f32 %v1044_v31, %v1043_v29  ;;  %v930_v38 = vadd.f32 %v1490_v34, %v1448_v30  ;;  %v921_v39 = vpop.f32.mrb[17].mxu0  ;;  %v1449_v40 = vpop.f32.mrb[18].mxu1  ;;  %v1144_v42 = vadd.f32 %v1143_v33, %v1142_v32 }
 0x110   : > { %v922_v43 = vadd.f32 %v921_v39, %v602_v35  ;;  %v1491_v44 = vpop.f32.mrb[18].mxu0  ;;  %v605_v45 = vpop.f32.mrb[19].mxu1 }
 0x111   : > { %1003 = vst.msk [vmem:[%s1748_s29 + $0x90] sm:$0xff] %vm984_vm2, %v930_v38  ;;  %v1047_v47 = vadd.f32 %v1046_v41, %v1045_v37  ;;  %v933_v48 = vadd.f32 %v1491_v44, %v1449_v40  ;;  %v924_v49 = vpop.f32.mrb[19].mxu0  ;;  %v1146_v50 = vadd.f32 %v1145_v46, %v1144_v42  ;;  %v1104_v60 = vmul.f32 %v930_v38, %v930_v38 }
 0x112   : > { %1001 = vst.msk [vmem:[%s1748_s29 + $0x80] sm:$0xff] %vm984_vm2, %v922_v43  ;;  %v1048_v51 = vsel %vm984_vm2, %v922_v43, 0.0  ;;  %v1102_v52 = vmul.f32 %v922_v43, %v922_v43  ;;  %v925_v53 = vadd.f32 %v924_v49, %v605_v45  ;;  %v1052_v63 = vsel %vm984_vm2, %v930_v38, 0.0 }
 0x113   : > { %v1049_v55 = vadd.f32 %v1048_v51, %v1047_v47  ;;  %1004 = vst.msk [vmem:[%s1748_s29 + $0x98] sm:$0xff] %vm984_vm2, %v933_v48  ;;  %v1148_v56 = vadd.f32 %v1147_v54, %v1146_v50  ;;  %v1105_v4 = vmul.f32 %v933_v48, %v933_v48  ;;  %v1054_v9 = vsel %vm984_vm2, %v933_v48, 0.0 }
 0x114   : > { %v1149_v57 = vsel %vm984_vm2, %v1102_v52, 0.0  ;;  %1002 = vst.msk [vmem:[%s1748_s29 + $0x88] sm:$0xff] %vm984_vm2, %v925_v53  ;;  %v1050_v58 = vsel %vm984_vm2, %v925_v53, 0.0  ;;  %v1103_v59 = vmul.f32 %v925_v53, %v925_v53  ;;  %v1153_v14 = vsel %vm984_vm2, %v1104_v60, 0.0 }
 0x115   : > { %v1051_v61 = vadd.f32 %v1050_v58, %v1049_v55  ;;  %v1452_v62 = vpop.f32.mrb[20].mxu1  ;;  %v1150_v0 = vadd.f32 %v1149_v57, %v1148_v56  ;;  %v1155_v22 = vsel %vm984_vm2, %v1105_v4, 0.0 }
 0x116   : > { %v1151_v1 = vsel %vm984_vm2, %v1103_v59, 0.0  ;;  %v1494_v2 = vpop.f32.mrb[20].mxu0  ;;  %v618_v3 = vpop.f32.mrb[21].mxu1 }
 0x117   : > { %v1053_v5 = vadd.f32 %v1052_v63, %v1051_v61  ;;  %v946_v6 = vadd.f32 %v1494_v2, %v1452_v62  ;;  %v937_v7 = vpop.f32.mrb[21].mxu0  ;;  %v1453_v8 = vpop.f32.mrb[22].mxu1  ;;  %v1152_v10 = vadd.f32 %v1151_v1, %v1150_v0 }
 0x118   : > { %v938_v11 = vadd.f32 %v937_v7, %v618_v3  ;;  %v1495_v12 = vpop.f32.mrb[22].mxu0  ;;  %v621_v13 = vpop.f32.mrb[23].mxu1 }
 0x119   : > { %1007 = vst.msk [vmem:[%s1748_s29 + $0xb0] sm:$0xff] %vm984_vm2, %v946_v6  ;;  %v1055_v15 = vadd.f32 %v1054_v9, %v1053_v5  ;;  %v949_v16 = vadd.f32 %v1495_v12, %v1453_v8  ;;  %v940_v17 = vpop.f32.mrb[23].mxu0  ;;  %v1154_v18 = vadd.f32 %v1153_v14, %v1152_v10  ;;  %v1108_v28 = vmul.f32 %v946_v6, %v946_v6 }
 0x11a   : > { %1005 = vst.msk [vmem:[%s1748_s29 + $0xa0] sm:$0xff] %vm984_vm2, %v938_v11  ;;  %v1056_v19 = vsel %vm984_vm2, %v938_v11, 0.0  ;;  %v1106_v20 = vmul.f32 %v938_v11, %v938_v11  ;;  %v941_v21 = vadd.f32 %v940_v17, %v621_v13  ;;  %v1060_v31 = vsel %vm984_vm2, %v946_v6, 0.0 }
 0x11b   : > { %v1057_v23 = vadd.f32 %v1056_v19, %v1055_v15  ;;  %1008 = vst.msk [vmem:[%s1748_s29 + $0xb8] sm:$0xff] %vm984_vm2, %v949_v16  ;;  %v1156_v24 = vadd.f32 %v1155_v22, %v1154_v18  ;;  %v1109_v36 = vmul.f32 %v949_v16, %v949_v16  ;;  %v1062_v41 = vsel %vm984_vm2, %v949_v16, 0.0 }
 0x11c   : > { %v1157_v25 = vsel %vm984_vm2, %v1106_v20, 0.0  ;;  %1006 = vst.msk [vmem:[%s1748_s29 + $0xa8] sm:$0xff] %vm984_vm2, %v941_v21  ;;  %v1058_v26 = vsel %vm984_vm2, %v941_v21, 0.0  ;;  %v1107_v27 = vmul.f32 %v941_v21, %v941_v21  ;;  %v1161_v46 = vsel %vm984_vm2, %v1108_v28, 0.0 }
 0x11d   : > { %v1059_v29 = vadd.f32 %v1058_v26, %v1057_v23  ;;  %v1456_v30 = vpop.f32.mrb[24].mxu1  ;;  %v1158_v32 = vadd.f32 %v1157_v25, %v1156_v24  ;;  %v1163_v54 = vsel %vm984_vm2, %v1109_v36, 0.0 }
 0x11e   : > { %v1159_v33 = vsel %vm984_vm2, %v1107_v27, 0.0  ;;  %v1498_v34 = vpop.f32.mrb[24].mxu0  ;;  %v634_v35 = vpop.f32.mrb[25].mxu1 }
 0x11f   : > { %v1061_v37 = vadd.f32 %v1060_v31, %v1059_v29  ;;  %v962_v38 = vadd.f32 %v1498_v34, %v1456_v30  ;;  %v953_v39 = vpop.f32.mrb[25].mxu0  ;;  %v1457_v40 = vpop.f32.mrb[26].mxu1  ;;  %v1160_v42 = vadd.f32 %v1159_v33, %v1158_v32 }
 0x120   : > { %v954_v43 = vadd.f32 %v953_v39, %v634_v35  ;;  %v1499_v44 = vpop.f32.mrb[26].mxu0  ;;  %v637_v45 = vpop.f32.mrb[27].mxu1 }
 0x121   : > { %1011 = vst.msk [vmem:[%s1748_s29 + $0xd0] sm:$0xff] %vm984_vm2, %v962_v38  ;;  %v1063_v47 = vadd.f32 %v1062_v41, %v1061_v37  ;;  %v965_v48 = vadd.f32 %v1499_v44, %v1457_v40  ;;  %v956_v49 = vpop.f32.mrb[27].mxu0  ;;  %v1162_v50 = vadd.f32 %v1161_v46, %v1160_v42  ;;  %v1112_v55 = vmul.f32 %v962_v38, %v962_v38 }
 0x122   : > { %1009 = vst.msk [vmem:[%s1748_s29 + $0xc0] sm:$0xff] %vm984_vm2, %v954_v43  ;;  %v1064_v51 = vsel %vm984_vm2, %v954_v43, 0.0  ;;  %v1110_v52 = vmul.f32 %v954_v43, %v954_v43  ;;  %v957_v53 = vadd.f32 %v956_v49, %v637_v45  ;;  %v1068_v0 = vsel %vm984_vm2, %v962_v38, 0.0 }
 0x123   : > { %v1065_v56 = vadd.f32 %v1064_v51, %v1063_v47  ;;  %1012 = vst.msk [vmem:[%s1748_s29 + $0xd8] sm:$0xff] %vm984_vm2, %v965_v48  ;;  %v1113_v57 = vmul.f32 %v965_v48, %v965_v48  ;;  %v1164_v58 = vadd.f32 %v1163_v54, %v1162_v50  ;;  %v1169_v5 = vsel %vm984_vm2, %v1112_v55, 0.0 }
 0x124   : > { %v1165_v59 = vsel %vm984_vm2, %v1110_v52, 0.0  ;;  %1010 = vst.msk [vmem:[%s1748_s29 + $0xc8] sm:$0xff] %vm984_vm2, %v957_v53  ;;  %v1066_v60 = vsel %vm984_vm2, %v957_v53, 0.0  ;;  %v1111_v61 = vmul.f32 %v957_v53, %v957_v53  ;;  %v1070_v10 = vsel %vm984_vm2, %v965_v48, 0.0 }
 0x125   : > { %v1067_v62 = vadd.f32 %v1066_v60, %v1065_v56  ;;  %v1460_v63 = vpop.f32.mrb[28].mxu1  ;;  %v1166_v1 = vadd.f32 %v1165_v59, %v1164_v58  ;;  %v1171_v11 = vsel %vm984_vm2, %v1113_v57, 0.0 }
 0x126   : > { %v1167_v2 = vsel %vm984_vm2, %v1111_v61, 0.0  ;;  %v1502_v3 = vpop.f32.mrb[28].mxu0  ;;  %v650_v4 = vpop.f32.mrb[29].mxu1 }
 0x127   : > { %v1069_v6 = vadd.f32 %v1068_v0, %v1067_v62  ;;  %v978_v7 = vadd.f32 %v1502_v3, %v1460_v63  ;;  %v969_v8 = vpop.f32.mrb[29].mxu0  ;;  %v1461_v9 = vpop.f32.mrb[30].mxu1  ;;  %v1168_v12 = vadd.f32 %v1167_v2, %v1166_v1 }
 0x128   : > { %v970_v13 = vadd.f32 %v969_v8, %v650_v4  ;;  %v1503_v14 = vpop.f32.mrb[30].mxu0  ;;  %v653_v15 = vpop.f32.mrb[31].mxu1 }
 0x129   : > { %1015 = vst.msk [vmem:[%s1748_s29 + $0xf0] sm:$0xff] %vm984_vm2, %v978_v7  ;;  %v1076_v16 = vsel %vm984_vm2, %v978_v7, 0.0  ;;  %v1116_v17 = vmul.f32 %v978_v7, %v978_v7  ;;  %v1071_v18 = vadd.f32 %v1070_v10, %v1069_v6  ;;  %v981_v19 = vadd.f32 %v1503_v14, %v1461_v9  ;;  %v972_v20 = vpop.f32.mrb[31].mxu0 }
 0x12a   : > { %v1170_v21 = vadd.f32 %v1169_v5, %v1168_v12  ;;  %1013 = vst.msk [vmem:[%s1748_s29 + $0xe0] sm:$0xff] %vm984_vm2, %v970_v13  ;;  %v1072_v22 = vsel %vm984_vm2, %v970_v13, 0.0  ;;  %v1114_v23 = vmul.f32 %v970_v13, %v970_v13  ;;  %v973_v24 = vadd.f32 %v972_v20, %v653_v15 }
 0x12b   : > { %v1177_v25 = vsel %vm984_vm2, %v1116_v17, 0.0  ;;  %v1073_v26 = vadd.f32 %v1072_v22, %v1071_v18  ;;  %1016 = vst.msk [vmem:[%s1748_s29 + $0xf8] sm:$0xff] %vm984_vm2, %v981_v19  ;;  %v1078_v27 = vsel %vm984_vm2, %v981_v19, 0.0  ;;  %v1117_v28 = vmul.f32 %v981_v19, %v981_v19 }
 0x12c   : > { %v1172_v29 = vadd.f32 %v1171_v11, %v1170_v21  ;;  %v1173_v30 = vsel %vm984_vm2, %v1114_v23, 0.0  ;;  %1014 = vst.msk [vmem:[%s1748_s29 + $0xe8] sm:$0xff] %vm984_vm2, %v973_v24  ;;  %v1074_v31 = vsel %vm984_vm2, %v973_v24, 0.0  ;;  %v1115_v32 = vmul.f32 %v973_v24, %v973_v24 }
 0x12d   : > { %v1179_v33 = vsel %vm984_vm2, %v1117_v28, 0.0  ;;  %v1075_v34 = vadd.f32 %v1074_v31, %v1073_v26 }
 0x12e   : > { %v1174_v35 = vadd.f32 %v1173_v30, %v1172_v29  ;;  %v1175_v36 = vsel %vm984_vm2, %v1115_v32, 0.0 }
 0x12f   : > { %v1077_v37 = vadd.f32 %v1076_v16, %v1075_v34 }
 0x130   : > { %v1176_v38 = vadd.f32 %v1175_v36, %v1174_v35 }
 0x131   : > { %v1079_v39 = vadd.f32 %v1078_v27, %v1077_v37 }
 0x132   : > { %v1178_v40 = vadd.f32 %v1177_v25, %v1176_v38 }
 0x133   : > { %v1080_v41 = vrot.slane %v1079_v39, 4 }
 0x134   : > { %v1180_v42 = vadd.f32 %v1179_v33, %v1178_v40 }
 0x135   : > { %v1081_v43 = vadd.f32 %v1080_v41, %v1079_v39 }
 0x136   : > { %v1181_v44 = vrot.slane %v1180_v42, 4 }
 0x137   : > { %v1082_v45 = vrot.slane %v1081_v43, 2 }
 0x138   : > { %v1182_v46 = vadd.f32 %v1181_v44, %v1180_v42 }
 0x139   : > { %v1083_v47 = vadd.f32 %v1082_v45, %v1081_v43 }
 0x13a   : > { %v1183_v48 = vrot.slane %v1182_v46, 2 }
 0x13b   : > { %v1084_v49 = vrot.slane %v1083_v47, 1 }
 0x13c   : > { %v1184_v50 = vadd.f32 %v1183_v48, %v1182_v46 }
 0x13d   : > { %v1085_v52 = vadd.f32 %v1084_v49, %v1083_v47 }
 0x13e   : > { %v1185_v51 = vrot.slane %v1184_v50, 1 }
 0x140   : > { %v1186_v53 = vadd.f32 %v1185_v51, %v1184_v50 }
 0x142   : > { %v1188_v54 = vsel %vm1187_vm3, %v1085_v52, %v1186_v53 }
 0x143   : > { %1190 = vst.msk [vmem:[%s260_s7] sm:$0x3] %vm1189_vm4, %v1188_v54 }
 0x144 PF: > { %s16_s18 = sadd.s32 1, %s1594_s18  }
 0x145   : > { %p13_p5 = scmp.ge.s32.totalorder %s16_s18, 4  }
 0x147   :  { %15 = sbr.rel (!%p13_p5) target bundleno = 1 (0x1), region = 81 }

</bundles_post_ra>
